<compile_context>
chip_gen: v5e
topology: v5e:2x2
jax: 0.10.0
libtpu: 0.0.40
codegen_flags: <defaults>
</compile_context>

<pallas_src>
import functools

import jax
import jax.numpy as jnp
from jax import lax
from jax.experimental import pallas as pl
from jax.experimental.pallas import tpu as pltpu

EPS = 1e-5
LANE = 128


def _round_up(a, b):
    return (a + b - 1) // b * b


def _vmem_limit_bytes():
    # ~3/4 of per-core VMEM: ~48 MiB on v7x (64 MiB/TC), ~96 MiB on v5e/v6e (128 MiB).
    try:
        cap = int(getattr(pltpu.get_tpu_info(), "vmem_capacity_bytes", 0) or 0)
    except Exception:
        cap = 0
    if cap <= 0:
        cap = 64 * 1024 * 1024
    return min(cap * 3 // 4, 100 * 1024 * 1024)


_VMEM_LIMIT = _vmem_limit_bytes()


# ------------------ conv kernels: VMEM W-im2col (3 copies) + 3 K=3*C MXU matmuls ------------------

def _build_w_im2col(x_ref, col_ref, Hrows, Wo, C, stride):
    """col[h, ow, kj*C:(kj+1)*C] = x[h, stride*ow + kj, :]  (3 lane-aligned VMEM copies)."""
    for kj in range(3):
        if stride == 1:
            xs = x_ref[0, 0:Hrows, kj:kj + Wo, :]
        else:
            xs = x_ref[0, 0:Hrows, pl.ds(kj, Wo, stride), :]
        col_ref[:, :, kj * C:(kj + 1) * C] = xs


def _row_matmuls(col_ref, w_ref, Ho, Wo, C, stride):
    """acc[oh*Wo + ow, :] = sum_ki col[stride*oh + ki, ow, :] @ w[ki]   (f32 accumulation)."""
    acc = None
    for ki in range(3):
        if stride == 1:
            lhs = col_ref[ki:ki + Ho, :, :]
        else:
            lhs = col_ref[pl.ds(ki, Ho, stride), :, :]
        d = jnp.dot(lhs.reshape(Ho * Wo, 3 * C), w_ref[ki],
                    preferred_element_type=jnp.float32)
        acc = d if acc is None else acc + d
    return acc


def _write_stats(st_ref, acc):
    # Per-image partial BN statistics (sum, sum of squares) per channel, in f32.
    st_ref[0, 0:1, :] = jnp.sum(acc, axis=0, keepdims=True)
    st_ref[0, 1:2, :] = jnp.sum(acc * acc, axis=0, keepdims=True)


def _conv1_kernel(x_ref, w_ref, y_ref, st_ref, col_ref, *, Ho, Wo, Cip, stride, Hrows):
    _build_w_im2col(x_ref, col_ref, Hrows, Wo, Cip, stride)
    acc = _row_matmuls(col_ref, w_ref, Ho, Wo, Cip, stride)
    _write_stats(st_ref, acc)
    y_ref[0] = acc.reshape(Ho, Wo, -1).astype(y_ref.dtype)


def _conv1_proj_kernel(x_ref, w_ref, ws_ref, y_ref, ysc_ref, st_ref, sts_ref, col_ref,
                       *, Ho, Wo, Cip, stride, Hrows):
    _build_w_im2col(x_ref, col_ref, Hrows, Wo, Cip, stride)
    acc = _row_matmuls(col_ref, w_ref, Ho, Wo, Cip, stride)
    _write_stats(st_ref, acc)
    y_ref[0] = acc.reshape(Ho, Wo, -1).astype(y_ref.dtype)
    # Fused 1x1/stride projection shortcut: its input is exactly the kj == 1 channel
    # block of the already-built im2col scratch (x is streamed from HBM only once).
    if stride == 1:
        xs = col_ref[1:1 + Ho, :, Cip:2 * Cip]
    else:
        xs = col_ref[pl.ds(1, Ho, stride), :, Cip:2 * Cip]
    accs = jnp.dot(xs.reshape(Ho * Wo, Cip), ws_ref[...],
                   preferred_element_type=jnp.float32)
    _write_stats(sts_ref, accs)
    ysc_ref[0] = accs.astype(ysc_ref.dtype)


def _conv2_fused_kernel(y1_ref, sc_ref, sh_ref, w_ref, y_ref, st_ref, apad_ref, col_ref,
                        *, Ho, Wo, Cop):
    # BN1 + ReLU applied to the VMEM-resident conv1 tile and zero-haloed in a VMEM
    # scratch: no HBM round trip for the intermediate activation or its spatial pad.
    apad_ref[...] = jnp.zeros_like(apad_ref)
    a = jnp.maximum(y1_ref[0].astype(jnp.float32) * sc_ref[...] + sh_ref[...], 0.0)
    apad_ref[1:Ho + 1, 1:Wo + 1, :] = a.astype(apad_ref.dtype)
    for kj in range(3):
        col_ref[:, :, kj * Cop:(kj + 1) * Cop] = apad_ref[:, kj:kj + Wo, :]
    acc = _row_matmuls(col_ref, w_ref, Ho, Wo, Cop, 1)
    _write_stats(st_ref, acc)
    y_ref[0] = acc.astype(y_ref.dtype)


def conv1_bn_stats(xpad, w, Ho, Wo, stride):
    N, Hp, Wp, Cip = xpad.shape
    Cop = w.shape[-1]
    Hrows = (Ho - 1) * stride + 3
    kernel = functools.partial(_conv1_kernel, Ho=Ho, Wo=Wo, Cip=Cip,
                               stride=stride, Hrows=Hrows)
    y, st = pl.pallas_call(
        kernel,
        grid=(N,),
        in_specs=[
            pl.BlockSpec((1, Hp, Wp, Cip), lambda n: (n, 0, 0, 0)),
            pl.BlockSpec((3, 3 * Cip, Cop), lambda n: (0, 0, 0)),
        ],
        out_specs=[
            pl.BlockSpec((1, Ho, Wo, Cop), lambda n: (n, 0, 0, 0)),
            pl.BlockSpec((1, 2, Cop), lambda n: (n, 0, 0)),
        ],
        out_shape=[
            jax.ShapeDtypeStruct((N, Ho, Wo, Cop), jnp.bfloat16),
            jax.ShapeDtypeStruct((N, 2, Cop), jnp.float32),
        ],
        scratch_shapes=[pltpu.VMEM((Hrows, Wo, 3 * Cip), jnp.bfloat16)],
        compiler_params=pltpu.CompilerParams(
            dimension_semantics=("parallel",), vmem_limit_bytes=_VMEM_LIMIT),
    )(xpad, w)
    return y, jnp.sum(st, axis=0)


def conv1_proj_bn_stats(xpad, w, ws, Ho, Wo, stride):
    N, Hp, Wp, Cip = xpad.shape
    Cop = w.shape[-1]
    Hrows = (Ho - 1) * stride + 3
    kernel = functools.partial(_conv1_proj_kernel, Ho=Ho, Wo=Wo, Cip=Cip,
                               stride=stride, Hrows=Hrows)
    y, ysc, st, sts = pl.pallas_call(
        kernel,
        grid=(N,),
        in_specs=[
            pl.BlockSpec((1, Hp, Wp, Cip), lambda n: (n, 0, 0, 0)),
            pl.BlockSpec((3, 3 * Cip, Cop), lambda n: (0, 0, 0)),
            pl.BlockSpec((Cip, Cop), lambda n: (0, 0)),
        ],
        out_specs=[
            pl.BlockSpec((1, Ho, Wo, Cop), lambda n: (n, 0, 0, 0)),
            pl.BlockSpec((1, Ho * Wo, Cop), lambda n: (n, 0, 0)),
            pl.BlockSpec((1, 2, Cop), lambda n: (n, 0, 0)),
            pl.BlockSpec((1, 2, Cop), lambda n: (n, 0, 0)),
        ],
        out_shape=[
            jax.ShapeDtypeStruct((N, Ho, Wo, Cop), jnp.bfloat16),
            jax.ShapeDtypeStruct((N, Ho * Wo, Cop), jnp.bfloat16),
            jax.ShapeDtypeStruct((N, 2, Cop), jnp.float32),
            jax.ShapeDtypeStruct((N, 2, Cop), jnp.float32),
        ],
        scratch_shapes=[pltpu.VMEM((Hrows, Wo, 3 * Cip), jnp.bfloat16)],
        compiler_params=pltpu.CompilerParams(
            dimension_semantics=("parallel",), vmem_limit_bytes=_VMEM_LIMIT),
    )(xpad, w, ws)
    return y, ysc, jnp.sum(st, axis=0), jnp.sum(sts, axis=0)


def conv2_fused_bn_stats(y1, sc1, sh1, w, Ho, Wo):
    N = y1.shape[0]
    Cop = w.shape[-1]
    kernel = functools.partial(_conv2_fused_kernel, Ho=Ho, Wo=Wo, Cop=Cop)
    y, st = pl.pallas_call(
        kernel,
        grid=(N,),
        in_specs=[
            pl.BlockSpec((1, Ho, Wo, Cop), lambda n: (n, 0, 0, 0)),
            pl.BlockSpec((1, Cop), lambda n: (0, 0)),
            pl.BlockSpec((1, Cop), lambda n: (0, 0)),
            pl.BlockSpec((3, 3 * Cop, Cop), lambda n: (0, 0, 0)),
        ],
        out_specs=[
            pl.BlockSpec((1, Ho * Wo, Cop), lambda n: (n, 0, 0)),
            pl.BlockSpec((1, 2, Cop), lambda n: (n, 0, 0)),
        ],
        out_shape=[
            jax.ShapeDtypeStruct((N, Ho * Wo, Cop), jnp.bfloat16),
            jax.ShapeDtypeStruct((N, 2, Cop), jnp.float32),
        ],
        scratch_shapes=[
            pltpu.VMEM((Ho + 2, Wo + 2, Cop), jnp.bfloat16),   # zero-haloed BN1+ReLU tile
            pltpu.VMEM((Ho + 2, Wo, 3 * Cop), jnp.bfloat16),   # W-im2col scratch
        ],
        compiler_params=pltpu.CompilerParams(
            dimension_semantics=("parallel",), vmem_limit_bytes=_VMEM_LIMIT),
    )(y1, sc1, sh1, w)
    return y, jnp.sum(st, axis=0)


# ------------------ final BN(+BN / +identity) + add + ReLU (row-tiled, HBM-bound) ------------------

def _bn2_bn_add_relu_kernel(y_ref, sc_ref, sh_ref, ys_ref, scs_ref, shs_ref, o_ref):
    left = y_ref[...].astype(jnp.float32) * sc_ref[...] + sh_ref[...]
    right = ys_ref[...].astype(jnp.float32) * scs_ref[...] + shs_ref[...]
    o_ref[...] = jnp.maximum(left + right, 0.0)


def _bn2_add_relu_kernel(y_ref, sc_ref, sh_ref, x_ref, o_ref):
    left = y_ref[...].astype(jnp.float32) * sc_ref[...] + sh_ref[...]
    o_ref[...] = jnp.maximum(left + x_ref[...], 0.0)


def _row_tile(M):
    # Pure HBM-bandwidth pass: 1024-row x 128-lane tiles (~85% of HBM roofline on the
    # measured elementwise sweep); a single tile for smaller extents.
    if M > 1024:
        return 1024, _round_up(M, 1024)
    t = _round_up(max(M, 8), 8)
    return t, t


def _rowwise_call(kernel_fn, args, out_dtype):
    """Row-tiled elementwise pass. args: list of (array, tiled); tiled arrays are
    [M, C] activations, untiled ones are small per-channel [1, C] tensors."""
    M, C = next(a.shape for a, tiled in args if tiled)
    tm, Mp = _row_tile(M)
    inputs, specs = [], []
    for a, tiled in args:
        if tiled:
            inputs.append(a if M == Mp else jnp.pad(a, ((0, Mp - M), (0, 0))))
            specs.append(pl.BlockSpec((tm, C), lambda i: (i, 0)))
        else:
            inputs.append(a)
            specs.append(pl.BlockSpec(a.shape, lambda i, nd=a.ndim: (0,) * nd))
    out = pl.pallas_call(
        kernel_fn,
        grid=(Mp // tm,),
        in_specs=specs,
        out_specs=pl.BlockSpec((tm, C), lambda i: (i, 0)),
        out_shape=jax.ShapeDtypeStruct((Mp, C), out_dtype),
        compiler_params=pltpu.CompilerParams(
            dimension_semantics=("parallel",), vmem_limit_bytes=_VMEM_LIMIT),
    )(*inputs)
    return out[:M]


def _bn_scale_shift(st, g, b, m):
    # PyTorch training-mode BN: biased batch variance, eps=1e-5.  Tiny [2, C] math.
    # TODO(synk): compensated/centered second pass if E[y^2]-E[y]^2 cancellation shows
    #             up at production-scale M.
    mean = st[0:1] * (1.0 / m)
    var = jnp.maximum(st[1:2] * (1.0 / m) - mean * mean, 0.0)
    scale = g * lax.rsqrt(var + EPS)
    shift = b - mean * scale
    return scale, shift


# ----------------------------------- forward (glue in plain JAX) -----------------------------------

@functools.partial(jax.jit, static_argnames=("stride",))
def residual_block_forward(x_nchw, params, stride=1):
    N, Cin, H, W = x_nchw.shape
    Cout = params["w1"].shape[0]
    Cip, Cop = _round_up(Cin, LANE), _round_up(Cout, LANE)
    Ho = (H + 2 - 3) // stride + 1
    Wo = (W + 2 - 3) // stride + 1
    M = N * Ho * Wo
    projection = (stride != 1) or (Cin != Cout)

    # NHWC, channels lane-padded + spatial halo of 1, bf16 MXU operand (single fused pad).
    x_nhwc = jnp.transpose(x_nchw, (0, 2, 3, 1))
    xpad = jnp.pad(x_nhwc, ((0, 0), (1, 1), (1, 1), (0, Cip - Cin))).astype(jnp.bfloat16)

    def prep_w3(w, ci_pad):  # [Co, Ci, 3, 3] -> [3(ki), 3*ci_pad (kj,ci), Cop] bf16
        ci = w.shape[1]
        wt = jnp.transpose(w, (2, 3, 1, 0))                    # [3, 3, Ci, Co]
        wt = jnp.pad(wt, ((0, 0), (0, 0), (0, ci_pad - ci), (0, Cop - w.shape[0])))
        return wt.reshape(3, 3 * ci_pad, Cop).astype(jnp.bfloat16)

    def prep_gb(v):          # [Cout] -> [1, Cop] f32
        return jnp.pad(v.astype(jnp.float32).reshape(1, -1), ((0, 0), (0, Cop - Cout)))

    w1, w2 = prep_w3(params["w1"], Cip), prep_w3(params["w2"], Cop)
    g1, b1 = prep_gb(params["g1"]), prep_gb(params["b1"])
    g2, b2 = prep_gb(params["g2"]), prep_gb(params["b2"])

    # conv1 (3x3, stride) [+ fused 1x1 projection] + f32 per-channel BN statistics.
    if projection:
        ws = jnp.pad(jnp.transpose(params["ws"][:, :, 0, 0], (1, 0)),
                     ((0, Cip - Cin), (0, Cop - Cout))).astype(jnp.bfloat16)
        y1, ysc, st1, sts = conv1_proj_bn_stats(xpad, w1, ws, Ho, Wo, stride)
    else:
        y1, st1 = conv1_bn_stats(xpad, w1, Ho, Wo, stride)

    # BN1 scale/shift (tiny [2, Cop] math in plain JAX, f32).
    sc1, sh1 = _bn_scale_shift(st1, g1, b1, M)

    # conv2 (3x3, stride 1) with fused BN1 + ReLU prologue and in-VMEM zero halo.
    y2, st2 = conv2_fused_bn_stats(y1, sc1, sh1, w2, Ho, Wo)
    sc2, sh2 = _bn_scale_shift(st2, g2, b2, M)

    # BN2 (+ BN_shortcut / + identity) + residual add + ReLU, row-tiled mem-bound pass.
    if projection:
        gs, bs = prep_gb(params["gs"]), prep_gb(params["bs"])
        scs, shs = _bn_scale_shift(sts, gs, bs, M)
        out = _rowwise_call(
            _bn2_bn_add_relu_kernel,
            [(y2.reshape(M, Cop), True), (sc2, False), (sh2, False),
             (ysc.reshape(M, Cop), True), (scs, False), (shs, False)],
            jnp.float32)
    else:
        x_flat = jnp.pad(x_nhwc, ((0, 0), (0, 0), (0, 0), (0, Cop - Cin))).reshape(M, Cop)
        out = _rowwise_call(
            _bn2_add_relu_kernel,
            [(y2.reshape(M, Cop), True), (sc2, False), (sh2, False),
             (x_flat.astype(jnp.float32), True)],
            jnp.float32)

    out = out.reshape(N, Ho, Wo, Cop)[..., :Cout]
    return jnp.transpose(out, (0, 3, 1, 2))   # back to NCHW


# --------------------------------------- pure-JAX reference ---------------------------------------

def reference_forward(x_nchw, params, stride):
    def conv(x, w, s, pad):
        return lax.conv_general_dilated(
            x, w, (s, s), [(pad, pad), (pad, pad)],
            dimension_numbers=("NCHW", "OIHW", "NCHW"))

    def bn(x, g, b):
        mean = jnp.mean(x, axis=(0, 2, 3), keepdims=True)
        var = jnp.mean(jnp.square(x - mean), axis=(0, 2, 3), keepdims=True)
        return (x - mean) * lax.rsqrt(var + EPS) * g.reshape(1, -1, 1, 1) + b.reshape(1, -1, 1, 1)

    left = conv(x_nchw, params["w1"], stride, 1)
    left = jnp.maximum(bn(left, params["g1"], params["b1"]), 0.0)
    left = conv(left, params["w2"], 1, 1)
    left = bn(left, params["g2"], params["b2"])
    Cin, Cout = x_nchw.shape[1], params["w1"].shape[0]
    if stride != 1 or Cin != Cout:
        sc = bn(conv(x_nchw, params["ws"], stride, 0), params["gs"], params["bs"])
    else:
        sc = x_nchw
    return jnp.maximum(left + sc, 0.0)


# --------------------------------------------- main ---------------------------------------------

if __name__ == "__main__":
    key = jax.random.PRNGKey(0)
    N, Cin, H, W = 2, 4, 16, 16
    Cout, stride = 8, 1   # Cin != Cout -> projection-shortcut path is exercised

    ks = jax.random.split(key, 10)
    params = {
        "w1": jax.random.normal(ks[0], (Cout, Cin, 3, 3), jnp.float32) * 0.1,
        "g1": 1.0 + 0.1 * jax.random.normal(ks[1], (Cout,), jnp.float32),
        "b1": 0.1 * jax.random.normal(ks[2], (Cout,), jnp.float32),
        "w2": jax.random.normal(ks[3], (Cout, Cout, 3, 3), jnp.float32) * 0.1,
        "g2": 1.0 + 0.1 * jax.random.normal(ks[4], (Cout,), jnp.float32),
        "b2": 0.1 * jax.random.normal(ks[5], (Cout,), jnp.float32),
        "ws": jax.random.normal(ks[6], (Cout, Cin, 1, 1), jnp.float32) * 0.1,
        "gs": 1.0 + 0.1 * jax.random.normal(ks[7], (Cout,), jnp.float32),
        "bs": 0.1 * jax.random.normal(ks[8], (Cout,), jnp.float32),
    }
    x = jax.random.normal(ks[9], (N, Cin, H, W), jnp.float32)

    out = jax.block_until_ready(residual_block_forward(x, params, stride=stride))
    ref = reference_forward(x, params, stride)

    assert out.shape == ref.shape == (N, Cout, H // stride, W // stride)
    max_err = float(jnp.max(jnp.abs(out - ref)))
    # bf16 MXU operands and bf16-stored conv intermediates (f32 accumulation / f32 BN
    # statistics) vs. the all-f32 reference.
    assert jnp.allclose(out, ref, atol=1e-1, rtol=5e-2), max_err

    print("KERNEL_OK")
</pallas_src>

<mosaic_0001>
module attributes {stable_mosaic.version = 11 : i64} {
  func.func @_conv1_proj_kernel(%arg0: i32, %arg1: memref<1x18x18x128xbf16, #tpu.memory_space<vmem>>, %arg2: memref<3x384x128xbf16, #tpu.memory_space<vmem>>, %arg3: memref<128x128xbf16, #tpu.memory_space<vmem>>, %arg4: memref<1x16x16x128xbf16, #tpu.memory_space<vmem>>, %arg5: memref<1x256x128xbf16, #tpu.memory_space<vmem>>, %arg6: memref<1x2x128xf32, #tpu.memory_space<vmem>>, %arg7: memref<1x2x128xf32, #tpu.memory_space<vmem>>, %arg8: memref<18x16x384xbf16, #tpu.memory_space<vmem>>) attributes {dimension_semantics = [#tpu.dimension_semantics<parallel>], iteration_bounds = array<i64: 2>, scalar_prefetch = 0 : i64, scratch_operands = 1 : i64, tpu.core_type = #tpu.core_type<tc>, window_params = [{transform_indices = @transform_0, window_bounds = array<i64: 1, 18, 18, 128>}, {pipeline_mode = #tpu.pipeline_mode<synchronous>, transform_indices = @transform_1, window_bounds = array<i64: 3, 384, 128>}, {pipeline_mode = #tpu.pipeline_mode<synchronous>, transform_indices = @transform_2, window_bounds = array<i64: 128, 128>}, {transform_indices = @transform_3, window_bounds = array<i64: 1, 16, 16, 128>}, {transform_indices = @transform_4, window_bounds = array<i64: 1, 256, 128>}, {transform_indices = @transform_5, window_bounds = array<i64: 1, 2, 128>}, {transform_indices = @transform_6, window_bounds = array<i64: 1, 2, 128>}]} {
    %c0 = arith.constant 0 : index
    %c0_0 = arith.constant 0 : index
    %c0_1 = arith.constant 0 : index
    %c0_2 = arith.constant 0 : index
    %0 = vector.load %arg1[%c0, %c0_0, %c0_1, %c0_2] : memref<1x18x18x128xbf16, #tpu.memory_space<vmem>>, vector<1x18x16x128xbf16>
    %1 = vector.shape_cast %0 : vector<1x18x16x128xbf16> to vector<18x16x128xbf16>
    %c0_3 = arith.constant 0 : index
    %c0_4 = arith.constant 0 : index
    %c0_5 = arith.constant 0 : index
    %2 = vector.load %arg8[%c0_3, %c0_4, %c0_5] : memref<18x16x384xbf16, #tpu.memory_space<vmem>>, vector<18x16x128xbf16>
    tpu.vector_store %arg8[%c0_3, %c0_4, %c0_5], %1 {strides = array<i32>} : memref<18x16x384xbf16, #tpu.memory_space<vmem>>, vector<18x16x128xbf16>,
    %c0_6 = arith.constant 0 : index
    %c0_7 = arith.constant 0 : index
    %c1 = arith.constant 1 : index
    %c0_8 = arith.constant 0 : index
    %3 = vector.load %arg1[%c0_6, %c0_7, %c1, %c0_8] : memref<1x18x18x128xbf16, #tpu.memory_space<vmem>>, vector<1x18x16x128xbf16>
    %4 = vector.shape_cast %3 : vector<1x18x16x128xbf16> to vector<18x16x128xbf16>
    %c0_9 = arith.constant 0 : index
    %c0_10 = arith.constant 0 : index
    %c128 = arith.constant 128 : index
    %5 = vector.load %arg8[%c0_9, %c0_10, %c128] : memref<18x16x384xbf16, #tpu.memory_space<vmem>>, vector<18x16x128xbf16>
    tpu.vector_store %arg8[%c0_9, %c0_10, %c128], %4 {strides = array<i32>} : memref<18x16x384xbf16, #tpu.memory_space<vmem>>, vector<18x16x128xbf16>,
    %c0_11 = arith.constant 0 : index
    %c0_12 = arith.constant 0 : index
    %c2 = arith.constant 2 : index
    %c0_13 = arith.constant 0 : index
    %6 = vector.load %arg1[%c0_11, %c0_12, %c2, %c0_13] : memref<1x18x18x128xbf16, #tpu.memory_space<vmem>>, vector<1x18x16x128xbf16>
    %7 = vector.shape_cast %6 : vector<1x18x16x128xbf16> to vector<18x16x128xbf16>
    %c0_14 = arith.constant 0 : index
    %c0_15 = arith.constant 0 : index
    %c256 = arith.constant 256 : index
    %8 = vector.load %arg8[%c0_14, %c0_15, %c256] : memref<18x16x384xbf16, #tpu.memory_space<vmem>>, vector<18x16x128xbf16>
    tpu.vector_store %arg8[%c0_14, %c0_15, %c256], %7 {strides = array<i32>} : memref<18x16x384xbf16, #tpu.memory_space<vmem>>, vector<18x16x128xbf16>,
    %c0_16 = arith.constant 0 : index
    %c0_17 = arith.constant 0 : index
    %c0_18 = arith.constant 0 : index
    %9 = vector.load %arg8[%c0_16, %c0_17, %c0_18] : memref<18x16x384xbf16, #tpu.memory_space<vmem>>, vector<16x16x384xbf16>
    %10 = vector.shape_cast %9 : vector<16x16x384xbf16> to vector<256x384xbf16>
    %c0_19 = arith.constant 0 : index
    %c0_20 = arith.constant 0 : index
    %c0_21 = arith.constant 0 : index
    %11 = vector.load %arg2[%c0_19, %c0_20, %c0_21] : memref<3x384x128xbf16, #tpu.memory_space<vmem>>, vector<1x384x128xbf16>
    %12 = vector.shape_cast %11 : vector<1x384x128xbf16> to vector<384x128xbf16>
    %cst = arith.constant dense<0.000000e+00> : vector<256x128xf32>
    %13 = tpu.matmul %10, %12, %cst {dimension_numbers = #tpu.dot_dimension_numbers<[1], [0], [0], [1], [0, 0, 1, 1], [], []>} : vector<256x384xbf16>, vector<384x128xbf16>, vector<256x128xf32> -> vector<256x128xf32>
    %c1_22 = arith.constant 1 : index
    %c0_23 = arith.constant 0 : index
    %c0_24 = arith.constant 0 : index
    %14 = vector.load %arg8[%c1_22, %c0_23, %c0_24] : memref<18x16x384xbf16, #tpu.memory_space<vmem>>, vector<16x16x384xbf16>
    %15 = vector.shape_cast %14 : vector<16x16x384xbf16> to vector<256x384xbf16>
    %c1_25 = arith.constant 1 : index
    %c0_26 = arith.constant 0 : index
    %c0_27 = arith.constant 0 : index
    %16 = vector.load %arg2[%c1_25, %c0_26, %c0_27] : memref<3x384x128xbf16, #tpu.memory_space<vmem>>, vector<1x384x128xbf16>
    %17 = vector.shape_cast %16 : vector<1x384x128xbf16> to vector<384x128xbf16>
    %cst_28 = arith.constant dense<0.000000e+00> : vector<256x128xf32>
    %18 = tpu.matmul %15, %17, %cst_28 {dimension_numbers = #tpu.dot_dimension_numbers<[1], [0], [0], [1], [0, 0, 1, 1], [], []>} : vector<256x384xbf16>, vector<384x128xbf16>, vector<256x128xf32> -> vector<256x128xf32>
    %19 = arith.addf %13, %18 : vector<256x128xf32>
    %c2_29 = arith.constant 2 : index
    %c0_30 = arith.constant 0 : index
    %c0_31 = arith.constant 0 : index
    %20 = vector.load %arg8[%c2_29, %c0_30, %c0_31] : memref<18x16x384xbf16, #tpu.memory_space<vmem>>, vector<16x16x384xbf16>
    %21 = vector.shape_cast %20 : vector<16x16x384xbf16> to vector<256x384xbf16>
    %c2_32 = arith.constant 2 : index
    %c0_33 = arith.constant 0 : index
    %c0_34 = arith.constant 0 : index
    %22 = vector.load %arg2[%c2_32, %c0_33, %c0_34] : memref<3x384x128xbf16, #tpu.memory_space<vmem>>, vector<1x384x128xbf16>
    %23 = vector.shape_cast %22 : vector<1x384x128xbf16> to vector<384x128xbf16>
    %cst_35 = arith.constant dense<0.000000e+00> : vector<256x128xf32>
    %24 = tpu.matmul %21, %23, %cst_35 {dimension_numbers = #tpu.dot_dimension_numbers<[1], [0], [0], [1], [0, 0, 1, 1], [], []>} : vector<256x384xbf16>, vector<384x128xbf16>, vector<256x128xf32> -> vector<256x128xf32>
    %25 = arith.addf %19, %24 : vector<256x128xf32>
    %cst_36 = arith.constant dense<0.000000e+00> : vector<128xf32>
    %26 = vector.multi_reduction <add>, %25, %cst_36 [0] : vector<256x128xf32> to vector<128xf32>
    %27 = vector.shape_cast %26 : vector<128xf32> to vector<1x128xf32>
    %c0_37 = arith.constant 0 : index
    %c0_38 = arith.constant 0 : index
    %c0_39 = arith.constant 0 : index
    %28 = vector.load %arg6[%c0_37, %c0_38, %c0_39] : memref<1x2x128xf32, #tpu.memory_space<vmem>>, vector<1x1x128xf32>
    %29 = vector.shape_cast %28 : vector<1x1x128xf32> to vector<1x128xf32>
    %30 = vector.shape_cast %27 : vector<1x128xf32> to vector<1x1x128xf32>
    tpu.vector_store %arg6[%c0_37, %c0_38, %c0_39], %30 {strides = array<i32>} : memref<1x2x128xf32, #tpu.memory_space<vmem>>, vector<1x1x128xf32>,
    %31 = arith.mulf %25, %25 : vector<256x128xf32>
    %cst_40 = arith.constant dense<0.000000e+00> : vector<128xf32>
    %32 = vector.multi_reduction <add>, %31, %cst_40 [0] : vector<256x128xf32> to vector<128xf32>
    %33 = vector.shape_cast %32 : vector<128xf32> to vector<1x128xf32>
    %c0_41 = arith.constant 0 : index
    %c1_42 = arith.constant 1 : index
    %c0_43 = arith.constant 0 : index
    %34 = vector.load %arg6[%c0_41, %c1_42, %c0_43] : memref<1x2x128xf32, #tpu.memory_space<vmem>>, vector<1x1x128xf32>
    %35 = vector.shape_cast %34 : vector<1x1x128xf32> to vector<1x128xf32>
    %36 = vector.shape_cast %33 : vector<1x128xf32> to vector<1x1x128xf32>
    tpu.vector_store %arg6[%c0_41, %c1_42, %c0_43], %36 {strides = array<i32>} : memref<1x2x128xf32, #tpu.memory_space<vmem>>, vector<1x1x128xf32>,
    %37 = vector.shape_cast %25 : vector<256x128xf32> to vector<16x16x128xf32>
    %38 = arith.truncf %37 : vector<16x16x128xf32> to vector<16x16x128xbf16>
    %c0_44 = arith.constant 0 : index
    %c0_45 = arith.constant 0 : index
    %c0_46 = arith.constant 0 : index
    %c0_47 = arith.constant 0 : index
    %39 = vector.load %arg4[%c0_44, %c0_45, %c0_46, %c0_47] : memref<1x16x16x128xbf16, #tpu.memory_space<vmem>>, vector<1x16x16x128xbf16>
    %40 = vector.shape_cast %39 : vector<1x16x16x128xbf16> to vector<16x16x128xbf16>
    %41 = vector.shape_cast %38 : vector<16x16x128xbf16> to vector<1x16x16x128xbf16>
    tpu.vector_store %arg4[%c0_44, %c0_45, %c0_46, %c0_47], %41 {strides = array<i32>} : memref<1x16x16x128xbf16, #tpu.memory_space<vmem>>, vector<1x16x16x128xbf16>,
    %c1_48 = arith.constant 1 : index
    %c0_49 = arith.constant 0 : index
    %c128_50 = arith.constant 128 : index
    %42 = vector.load %arg8[%c1_48, %c0_49, %c128_50] : memref<18x16x384xbf16, #tpu.memory_space<vmem>>, vector<16x16x128xbf16>
    %43 = vector.shape_cast %42 : vector<16x16x128xbf16> to vector<256x128xbf16>
    %c0_51 = arith.constant 0 : index
    %c0_52 = arith.constant 0 : index
    %44 = vector.load %arg3[%c0_51, %c0_52] : memref<128x128xbf16, #tpu.memory_space<vmem>>, vector<128x128xbf16>
    %cst_53 = arith.constant dense<0.000000e+00> : vector<256x128xf32>
    %45 = tpu.matmul %43, %44, %cst_53 {dimension_numbers = #tpu.dot_dimension_numbers<[1], [0], [0], [1], [0, 0, 1, 1], [], []>} : vector<256x128xbf16>, vector<128x128xbf16>, vector<256x128xf32> -> vector<256x128xf32>
    %cst_54 = arith.constant dense<0.000000e+00> : vector<128xf32>
    %46 = vector.multi_reduction <add>, %45, %cst_54 [0] : vector<256x128xf32> to vector<128xf32>
    %47 = vector.shape_cast %46 : vector<128xf32> to vector<1x128xf32>
    %c0_55 = arith.constant 0 : index
    %c0_56 = arith.constant 0 : index
    %c0_57 = arith.constant 0 : index
    %48 = vector.load %arg7[%c0_55, %c0_56, %c0_57] : memref<1x2x128xf32, #tpu.memory_space<vmem>>, vector<1x1x128xf32>
    %49 = vector.shape_cast %48 : vector<1x1x128xf32> to vector<1x128xf32>
    %50 = vector.shape_cast %47 : vector<1x128xf32> to vector<1x1x128xf32>
    tpu.vector_store %arg7[%c0_55, %c0_56, %c0_57], %50 {strides = array<i32>} : memref<1x2x128xf32, #tpu.memory_space<vmem>>, vector<1x1x128xf32>,
    %51 = arith.mulf %45, %45 : vector<256x128xf32>
    %cst_58 = arith.constant dense<0.000000e+00> : vector<128xf32>
    %52 = vector.multi_reduction <add>, %51, %cst_58 [0] : vector<256x128xf32> to vector<128xf32>
    %53 = vector.shape_cast %52 : vector<128xf32> to vector<1x128xf32>
    %c0_59 = arith.constant 0 : index
    %c1_60 = arith.constant 1 : index
    %c0_61 = arith.constant 0 : index
    %54 = vector.load %arg7[%c0_59, %c1_60, %c0_61] : memref<1x2x128xf32, #tpu.memory_space<vmem>>, vector<1x1x128xf32>
    %55 = vector.shape_cast %54 : vector<1x1x128xf32> to vector<1x128xf32>
    %56 = vector.shape_cast %53 : vector<1x128xf32> to vector<1x1x128xf32>
    tpu.vector_store %arg7[%c0_59, %c1_60, %c0_61], %56 {strides = array<i32>} : memref<1x2x128xf32, #tpu.memory_space<vmem>>, vector<1x1x128xf32>,
    %57 = arith.truncf %45 : vector<256x128xf32> to vector<256x128xbf16>
    %c0_62 = arith.constant 0 : index
    %c0_63 = arith.constant 0 : index
    %c0_64 = arith.constant 0 : index
    %58 = vector.load %arg5[%c0_62, %c0_63, %c0_64] : memref<1x256x128xbf16, #tpu.memory_space<vmem>>, vector<1x256x128xbf16>
    %59 = vector.shape_cast %58 : vector<1x256x128xbf16> to vector<256x128xbf16>
    %60 = vector.shape_cast %57 : vector<256x128xbf16> to vector<1x256x128xbf16>
    tpu.vector_store %arg5[%c0_62, %c0_63, %c0_64], %60 {strides = array<i32>} : memref<1x256x128xbf16, #tpu.memory_space<vmem>>, vector<1x256x128xbf16>,
    return
  }
  func.func @transform_0(%arg0: i32) -> (i32, i32, i32, i32) {
    %c0_i32 = arith.constant 0 : i32
    %c0_i32_0 = arith.constant 0 : i32
    %c0_i32_1 = arith.constant 0 : i32
    %c0_i32_2 = arith.constant 0 : i32
    return %arg0, %c0_i32, %c0_i32_0, %c0_i32_1 : i32, i32, i32, i32
  }
  func.func @transform_1(%arg0: i32) -> (i32, i32, i32) {
    %c0_i32 = arith.constant 0 : i32
    %c0_i32_0 = arith.constant 0 : i32
    %c0_i32_1 = arith.constant 0 : i32
    %c0_i32_2 = arith.constant 0 : i32
    return %c0_i32, %c0_i32_0, %c0_i32_1 : i32, i32, i32
  }
  func.func @transform_2(%arg0: i32) -> (i32, i32) {
    %c0_i32 = arith.constant 0 : i32
    %c0_i32_0 = arith.constant 0 : i32
    %c0_i32_1 = arith.constant 0 : i32
    return %c0_i32, %c0_i32_0 : i32, i32
  }
  func.func @transform_3(%arg0: i32) -> (i32, i32, i32, i32) {
    %c0_i32 = arith.constant 0 : i32
    %c0_i32_0 = arith.constant 0 : i32
    %c0_i32_1 = arith.constant 0 : i32
    %c0_i32_2 = arith.constant 0 : i32
    return %arg0, %c0_i32, %c0_i32_0, %c0_i32_1 : i32, i32, i32, i32
  }
  func.func @transform_4(%arg0: i32) -> (i32, i32, i32) {
    %c0_i32 = arith.constant 0 : i32
    %c0_i32_0 = arith.constant 0 : i32
    %c0_i32_1 = arith.constant 0 : i32
    return %arg0, %c0_i32, %c0_i32_0 : i32, i32, i32
  }
  func.func @transform_5(%arg0: i32) -> (i32, i32, i32) {
    %c0_i32 = arith.constant 0 : i32
    %c0_i32_0 = arith.constant 0 : i32
    %c0_i32_1 = arith.constant 0 : i32
    return %arg0, %c0_i32, %c0_i32_0 : i32, i32, i32
  }
  func.func @transform_6(%arg0: i32) -> (i32, i32, i32) {
    %c0_i32 = arith.constant 0 : i32
    %c0_i32_0 = arith.constant 0 : i32
    %c0_i32_1 = arith.constant 0 : i32
    return %arg0, %c0_i32, %c0_i32_0 : i32, i32, i32
  }
}

module attributes {stable_mosaic.version = 11 : i64} {
  func.func @_conv2_fused_kernel(%arg0: i32, %arg1: memref<1x16x16x128xbf16, #tpu.memory_space<vmem>>, %arg2: memref<1x128xf32, #tpu.memory_space<vmem>>, %arg3: memref<1x128xf32, #tpu.memory_space<vmem>>, %arg4: memref<3x384x128xbf16, #tpu.memory_space<vmem>>, %arg5: memref<1x256x128xbf16, #tpu.memory_space<vmem>>, %arg6: memref<1x2x128xf32, #tpu.memory_space<vmem>>, %arg7: memref<18x18x128xbf16, #tpu.memory_space<vmem>>, %arg8: memref<18x16x384xbf16, #tpu.memory_space<vmem>>) attributes {dimension_semantics = [#tpu.dimension_semantics<parallel>], iteration_bounds = array<i64: 2>, scalar_prefetch = 0 : i64, scratch_operands = 2 : i64, tpu.core_type = #tpu.core_type<tc>, window_params = [{transform_indices = @transform_0, window_bounds = array<i64: 1, 16, 16, 128>}, {pipeline_mode = #tpu.pipeline_mode<synchronous>, transform_indices = @transform_1, window_bounds = array<i64: 1, 128>}, {pipeline_mode = #tpu.pipeline_mode<synchronous>, transform_indices = @transform_2, window_bounds = array<i64: 1, 128>}, {pipeline_mode = #tpu.pipeline_mode<synchronous>, transform_indices = @transform_3, window_bounds = array<i64: 3, 384, 128>}, {transform_indices = @transform_4, window_bounds = array<i64: 1, 256, 128>}, {transform_indices = @transform_5, window_bounds = array<i64: 1, 2, 128>}]} {
    %cst = arith.constant 0.000000e+00 : bf16
    %0 = vector.broadcast %cst : bf16 to vector<18x18x128xbf16>
    %c0 = arith.constant 0 : index
    %c0_0 = arith.constant 0 : index
    %c0_1 = arith.constant 0 : index
    %1 = vector.load %arg7[%c0, %c0_0, %c0_1] : memref<18x18x128xbf16, #tpu.memory_space<vmem>>, vector<18x18x128xbf16>
    tpu.vector_store %arg7[%c0, %c0_0, %c0_1], %0 {strides = array<i32>} : memref<18x18x128xbf16, #tpu.memory_space<vmem>>, vector<18x18x128xbf16>,
    %c0_2 = arith.constant 0 : index
    %c0_3 = arith.constant 0 : index
    %c0_4 = arith.constant 0 : index
    %c0_5 = arith.constant 0 : index
    %2 = vector.load %arg1[%c0_2, %c0_3, %c0_4, %c0_5] : memref<1x16x16x128xbf16, #tpu.memory_space<vmem>>, vector<1x16x16x128xbf16>
    %3 = vector.shape_cast %2 : vector<1x16x16x128xbf16> to vector<16x16x128xbf16>
    %4 = arith.extf %3 : vector<16x16x128xbf16> to vector<16x16x128xf32>
    %c0_6 = arith.constant 0 : index
    %c0_7 = arith.constant 0 : index
    %5 = vector.load %arg2[%c0_6, %c0_7] : memref<1x128xf32, #tpu.memory_space<vmem>>, vector<1x128xf32>
    %6 = vector.shape_cast %5 : vector<1x128xf32> to vector<1x1x128xf32>
    %7 = vector.broadcast %6 : vector<1x1x128xf32> to vector<16x16x128xf32>
    %8 = arith.mulf %4, %7 : vector<16x16x128xf32>
    %c0_8 = arith.constant 0 : index
    %c0_9 = arith.constant 0 : index
    %9 = vector.load %arg3[%c0_8, %c0_9] : memref<1x128xf32, #tpu.memory_space<vmem>>, vector<1x128xf32>
    %10 = vector.shape_cast %9 : vector<1x128xf32> to vector<1x1x128xf32>
    %11 = vector.broadcast %10 : vector<1x1x128xf32> to vector<16x16x128xf32>
    %12 = arith.addf %8, %11 : vector<16x16x128xf32>
    %cst_10 = arith.constant 0.000000e+00 : f32
    %13 = vector.broadcast %cst_10 : f32 to vector<16x16x128xf32>
    %14 = arith.maximumf %12, %13 : vector<16x16x128xf32>
    %15 = arith.truncf %14 : vector<16x16x128xf32> to vector<16x16x128xbf16>
    %c1 = arith.constant 1 : index
    %c1_11 = arith.constant 1 : index
    %c0_12 = arith.constant 0 : index
    %16 = vector.load %arg7[%c1, %c1_11, %c0_12] : memref<18x18x128xbf16, #tpu.memory_space<vmem>>, vector<16x16x128xbf16>
    tpu.vector_store %arg7[%c1, %c1_11, %c0_12], %15 {strides = array<i32>} : memref<18x18x128xbf16, #tpu.memory_space<vmem>>, vector<16x16x128xbf16>,
    %c0_13 = arith.constant 0 : index
    %c0_14 = arith.constant 0 : index
    %c0_15 = arith.constant 0 : index
    %17 = vector.load %arg7[%c0_13, %c0_14, %c0_15] : memref<18x18x128xbf16, #tpu.memory_space<vmem>>, vector<18x16x128xbf16>
    %c0_16 = arith.constant 0 : index
    %c0_17 = arith.constant 0 : index
    %c0_18 = arith.constant 0 : index
    %18 = vector.load %arg8[%c0_16, %c0_17, %c0_18] : memref<18x16x384xbf16, #tpu.memory_space<vmem>>, vector<18x16x128xbf16>
    tpu.vector_store %arg8[%c0_16, %c0_17, %c0_18], %17 {strides = array<i32>} : memref<18x16x384xbf16, #tpu.memory_space<vmem>>, vector<18x16x128xbf16>,
    %c0_19 = arith.constant 0 : index
    %c1_20 = arith.constant 1 : index
    %c0_21 = arith.constant 0 : index
    %19 = vector.load %arg7[%c0_19, %c1_20, %c0_21] : memref<18x18x128xbf16, #tpu.memory_space<vmem>>, vector<18x16x128xbf16>
    %c0_22 = arith.constant 0 : index
    %c0_23 = arith.constant 0 : index
    %c128 = arith.constant 128 : index
    %20 = vector.load %arg8[%c0_22, %c0_23, %c128] : memref<18x16x384xbf16, #tpu.memory_space<vmem>>, vector<18x16x128xbf16>
    tpu.vector_store %arg8[%c0_22, %c0_23, %c128], %19 {strides = array<i32>} : memref<18x16x384xbf16, #tpu.memory_space<vmem>>, vector<18x16x128xbf16>,
    %c0_24 = arith.constant 0 : index
    %c2 = arith.constant 2 : index
    %c0_25 = arith.constant 0 : index
    %21 = vector.load %arg7[%c0_24, %c2, %c0_25] : memref<18x18x128xbf16, #tpu.memory_space<vmem>>, vector<18x16x128xbf16>
    %c0_26 = arith.constant 0 : index
    %c0_27 = arith.constant 0 : index
    %c256 = arith.constant 256 : index
    %22 = vector.load %arg8[%c0_26, %c0_27, %c256] : memref<18x16x384xbf16, #tpu.memory_space<vmem>>, vector<18x16x128xbf16>
    tpu.vector_store %arg8[%c0_26, %c0_27, %c256], %21 {strides = array<i32>} : memref<18x16x384xbf16, #tpu.memory_space<vmem>>, vector<18x16x128xbf16>,
    %c0_28 = arith.constant 0 : index
    %c0_29 = arith.constant 0 : index
    %c0_30 = arith.constant 0 : index
    %23 = vector.load %arg8[%c0_28, %c0_29, %c0_30] : memref<18x16x384xbf16, #tpu.memory_space<vmem>>, vector<16x16x384xbf16>
    %24 = vector.shape_cast %23 : vector<16x16x384xbf16> to vector<256x384xbf16>
    %c0_31 = arith.constant 0 : index
    %c0_32 = arith.constant 0 : index
    %c0_33 = arith.constant 0 : index
    %25 = vector.load %arg4[%c0_31, %c0_32, %c0_33] : memref<3x384x128xbf16, #tpu.memory_space<vmem>>, vector<1x384x128xbf16>
    %26 = vector.shape_cast %25 : vector<1x384x128xbf16> to vector<384x128xbf16>
    %cst_34 = arith.constant dense<0.000000e+00> : vector<256x128xf32>
    %27 = tpu.matmul %24, %26, %cst_34 {dimension_numbers = #tpu.dot_dimension_numbers<[1], [0], [0], [1], [0, 0, 1, 1], [], []>} : vector<256x384xbf16>, vector<384x128xbf16>, vector<256x128xf32> -> vector<256x128xf32>
    %c1_35 = arith.constant 1 : index
    %c0_36 = arith.constant 0 : index
    %c0_37 = arith.constant 0 : index
    %28 = vector.load %arg8[%c1_35, %c0_36, %c0_37] : memref<18x16x384xbf16, #tpu.memory_space<vmem>>, vector<16x16x384xbf16>
    %29 = vector.shape_cast %28 : vector<16x16x384xbf16> to vector<256x384xbf16>
    %c1_38 = arith.constant 1 : index
    %c0_39 = arith.constant 0 : index
    %c0_40 = arith.constant 0 : index
    %30 = vector.load %arg4[%c1_38, %c0_39, %c0_40] : memref<3x384x128xbf16, #tpu.memory_space<vmem>>, vector<1x384x128xbf16>
    %31 = vector.shape_cast %30 : vector<1x384x128xbf16> to vector<384x128xbf16>
    %cst_41 = arith.constant dense<0.000000e+00> : vector<256x128xf32>
    %32 = tpu.matmul %29, %31, %cst_41 {dimension_numbers = #tpu.dot_dimension_numbers<[1], [0], [0], [1], [0, 0, 1, 1], [], []>} : vector<256x384xbf16>, vector<384x128xbf16>, vector<256x128xf32> -> vector<256x128xf32>
    %33 = arith.addf %27, %32 : vector<256x128xf32>
    %c2_42 = arith.constant 2 : index
    %c0_43 = arith.constant 0 : index
    %c0_44 = arith.constant 0 : index
    %34 = vector.load %arg8[%c2_42, %c0_43, %c0_44] : memref<18x16x384xbf16, #tpu.memory_space<vmem>>, vector<16x16x384xbf16>
    %35 = vector.shape_cast %34 : vector<16x16x384xbf16> to vector<256x384xbf16>
    %c2_45 = arith.constant 2 : index
    %c0_46 = arith.constant 0 : index
    %c0_47 = arith.constant 0 : index
    %36 = vector.load %arg4[%c2_45, %c0_46, %c0_47] : memref<3x384x128xbf16, #tpu.memory_space<vmem>>, vector<1x384x128xbf16>
    %37 = vector.shape_cast %36 : vector<1x384x128xbf16> to vector<384x128xbf16>
    %cst_48 = arith.constant dense<0.000000e+00> : vector<256x128xf32>
    %38 = tpu.matmul %35, %37, %cst_48 {dimension_numbers = #tpu.dot_dimension_numbers<[1], [0], [0], [1], [0, 0, 1, 1], [], []>} : vector<256x384xbf16>, vector<384x128xbf16>, vector<256x128xf32> -> vector<256x128xf32>
    %39 = arith.addf %33, %38 : vector<256x128xf32>
    %cst_49 = arith.constant dense<0.000000e+00> : vector<128xf32>
    %40 = vector.multi_reduction <add>, %39, %cst_49 [0] : vector<256x128xf32> to vector<128xf32>
    %41 = vector.shape_cast %40 : vector<128xf32> to vector<1x128xf32>
    %c0_50 = arith.constant 0 : index
    %c0_51 = arith.constant 0 : index
    %c0_52 = arith.constant 0 : index
    %42 = vector.load %arg6[%c0_50, %c0_51, %c0_52] : memref<1x2x128xf32, #tpu.memory_space<vmem>>, vector<1x1x128xf32>
    %43 = vector.shape_cast %42 : vector<1x1x128xf32> to vector<1x128xf32>
    %44 = vector.shape_cast %41 : vector<1x128xf32> to vector<1x1x128xf32>
    tpu.vector_store %arg6[%c0_50, %c0_51, %c0_52], %44 {strides = array<i32>} : memref<1x2x128xf32, #tpu.memory_space<vmem>>, vector<1x1x128xf32>,
    %45 = arith.mulf %39, %39 : vector<256x128xf32>
    %cst_53 = arith.constant dense<0.000000e+00> : vector<128xf32>
    %46 = vector.multi_reduction <add>, %45, %cst_53 [0] : vector<256x128xf32> to vector<128xf32>
    %47 = vector.shape_cast %46 : vector<128xf32> to vector<1x128xf32>
    %c0_54 = arith.constant 0 : index
    %c1_55 = arith.constant 1 : index
    %c0_56 = arith.constant 0 : index
    %48 = vector.load %arg6[%c0_54, %c1_55, %c0_56] : memref<1x2x128xf32, #tpu.memory_space<vmem>>, vector<1x1x128xf32>
    %49 = vector.shape_cast %48 : vector<1x1x128xf32> to vector<1x128xf32>
    %50 = vector.shape_cast %47 : vector<1x128xf32> to vector<1x1x128xf32>
    tpu.vector_store %arg6[%c0_54, %c1_55, %c0_56], %50 {strides = array<i32>} : memref<1x2x128xf32, #tpu.memory_space<vmem>>, vector<1x1x128xf32>,
    %51 = arith.truncf %39 : vector<256x128xf32> to vector<256x128xbf16>
    %c0_57 = arith.constant 0 : index
    %c0_58 = arith.constant 0 : index
    %c0_59 = arith.constant 0 : index
    %52 = vector.load %arg5[%c0_57, %c0_58, %c0_59] : memref<1x256x128xbf16, #tpu.memory_space<vmem>>, vector<1x256x128xbf16>
    %53 = vector.shape_cast %52 : vector<1x256x128xbf16> to vector<256x128xbf16>
    %54 = vector.shape_cast %51 : vector<256x128xbf16> to vector<1x256x128xbf16>
    tpu.vector_store %arg5[%c0_57, %c0_58, %c0_59], %54 {strides = array<i32>} : memref<1x256x128xbf16, #tpu.memory_space<vmem>>, vector<1x256x128xbf16>,
    return
  }
  func.func @transform_0(%arg0: i32) -> (i32, i32, i32, i32) {
    %c0_i32 = arith.constant 0 : i32
    %c0_i32_0 = arith.constant 0 : i32
    %c0_i32_1 = arith.constant 0 : i32
    %c0_i32_2 = arith.constant 0 : i32
    return %arg0, %c0_i32, %c0_i32_0, %c0_i32_1 : i32, i32, i32, i32
  }
  func.func @transform_1(%arg0: i32) -> (i32, i32) {
    %c0_i32 = arith.constant 0 : i32
    %c0_i32_0 = arith.constant 0 : i32
    %c0_i32_1 = arith.constant 0 : i32
    return %c0_i32, %c0_i32_0 : i32, i32
  }
  func.func @transform_2(%arg0: i32) -> (i32, i32) {
    %c0_i32 = arith.constant 0 : i32
    %c0_i32_0 = arith.constant 0 : i32
    %c0_i32_1 = arith.constant 0 : i32
    return %c0_i32, %c0_i32_0 : i32, i32
  }
  func.func @transform_3(%arg0: i32) -> (i32, i32, i32) {
    %c0_i32 = arith.constant 0 : i32
    %c0_i32_0 = arith.constant 0 : i32
    %c0_i32_1 = arith.constant 0 : i32
    %c0_i32_2 = arith.constant 0 : i32
    return %c0_i32, %c0_i32_0, %c0_i32_1 : i32, i32, i32
  }
  func.func @transform_4(%arg0: i32) -> (i32, i32, i32) {
    %c0_i32 = arith.constant 0 : i32
    %c0_i32_0 = arith.constant 0 : i32
    %c0_i32_1 = arith.constant 0 : i32
    return %arg0, %c0_i32, %c0_i32_0 : i32, i32, i32
  }
  func.func @transform_5(%arg0: i32) -> (i32, i32, i32) {
    %c0_i32 = arith.constant 0 : i32
    %c0_i32_0 = arith.constant 0 : i32
    %c0_i32_1 = arith.constant 0 : i32
    return %arg0, %c0_i32, %c0_i32_0 : i32, i32, i32
  }
}

module attributes {stable_mosaic.version = 11 : i64} {
  func.func @_bn2_bn_add_relu_kernel(%arg0: i32, %arg1: memref<512x128xbf16, #tpu.memory_space<vmem>>, %arg2: memref<1x128xf32, #tpu.memory_space<vmem>>, %arg3: memref<1x128xf32, #tpu.memory_space<vmem>>, %arg4: memref<512x128xbf16, #tpu.memory_space<vmem>>, %arg5: memref<1x128xf32, #tpu.memory_space<vmem>>, %arg6: memref<1x128xf32, #tpu.memory_space<vmem>>, %arg7: memref<512x128xf32, #tpu.memory_space<vmem>>) attributes {dimension_semantics = [#tpu.dimension_semantics<parallel>], iteration_bounds = array<i64: 1>, scalar_prefetch = 0 : i64, scratch_operands = 0 : i64, tpu.core_type = #tpu.core_type<tc>, window_params = [{transform_indices = @transform_0, window_bounds = array<i64: 512, 128>}, {pipeline_mode = #tpu.pipeline_mode<synchronous>, transform_indices = @transform_1, window_bounds = array<i64: 1, 128>}, {pipeline_mode = #tpu.pipeline_mode<synchronous>, transform_indices = @transform_2, window_bounds = array<i64: 1, 128>}, {transform_indices = @transform_3, window_bounds = array<i64: 512, 128>}, {pipeline_mode = #tpu.pipeline_mode<synchronous>, transform_indices = @transform_4, window_bounds = array<i64: 1, 128>}, {pipeline_mode = #tpu.pipeline_mode<synchronous>, transform_indices = @transform_5, window_bounds = array<i64: 1, 128>}, {transform_indices = @transform_6, window_bounds = array<i64: 512, 128>}]} {
    %c0 = arith.constant 0 : index
    %c0_0 = arith.constant 0 : index
    %0 = vector.load %arg1[%c0, %c0_0] : memref<512x128xbf16, #tpu.memory_space<vmem>>, vector<512x128xbf16>
    %1 = arith.extf %0 : vector<512x128xbf16> to vector<512x128xf32>
    %c0_1 = arith.constant 0 : index
    %c0_2 = arith.constant 0 : index
    %2 = vector.load %arg2[%c0_1, %c0_2] : memref<1x128xf32, #tpu.memory_space<vmem>>, vector<1x128xf32>
    %3 = vector.broadcast %2 : vector<1x128xf32> to vector<512x128xf32>
    %4 = arith.mulf %1, %3 : vector<512x128xf32>
    %c0_3 = arith.constant 0 : index
    %c0_4 = arith.constant 0 : index
    %5 = vector.load %arg3[%c0_3, %c0_4] : memref<1x128xf32, #tpu.memory_space<vmem>>, vector<1x128xf32>
    %6 = vector.broadcast %5 : vector<1x128xf32> to vector<512x128xf32>
    %7 = arith.addf %4, %6 : vector<512x128xf32>
    %c0_5 = arith.constant 0 : index
    %c0_6 = arith.constant 0 : index
    %8 = vector.load %arg4[%c0_5, %c0_6] : memref<512x128xbf16, #tpu.memory_space<vmem>>, vector<512x128xbf16>
    %9 = arith.extf %8 : vector<512x128xbf16> to vector<512x128xf32>
    %c0_7 = arith.constant 0 : index
    %c0_8 = arith.constant 0 : index
    %10 = vector.load %arg5[%c0_7, %c0_8] : memref<1x128xf32, #tpu.memory_space<vmem>>, vector<1x128xf32>
    %11 = vector.broadcast %10 : vector<1x128xf32> to vector<512x128xf32>
    %12 = arith.mulf %9, %11 : vector<512x128xf32>
    %c0_9 = arith.constant 0 : index
    %c0_10 = arith.constant 0 : index
    %13 = vector.load %arg6[%c0_9, %c0_10] : memref<1x128xf32, #tpu.memory_space<vmem>>, vector<1x128xf32>
    %14 = vector.broadcast %13 : vector<1x128xf32> to vector<512x128xf32>
    %15 = arith.addf %12, %14 : vector<512x128xf32>
    %16 = arith.addf %7, %15 : vector<512x128xf32>
    %cst = arith.constant 0.000000e+00 : f32
    %17 = vector.broadcast %cst : f32 to vector<512x128xf32>
    %18 = arith.maximumf %16, %17 : vector<512x128xf32>
    %c0_11 = arith.constant 0 : index
    %c0_12 = arith.constant 0 : index
    %19 = vector.load %arg7[%c0_11, %c0_12] : memref<512x128xf32, #tpu.memory_space<vmem>>, vector<512x128xf32>
    tpu.vector_store %arg7[%c0_11, %c0_12], %18 {strides = array<i32>} : memref<512x128xf32, #tpu.memory_space<vmem>>, vector<512x128xf32>,
    return
  }
  func.func @transform_0(%arg0: i32) -> (i32, i32) {
    %c0_i32 = arith.constant 0 : i32
    %c0_i32_0 = arith.constant 0 : i32
    return %arg0, %c0_i32 : i32, i32
  }
  func.func @transform_1(%arg0: i32) -> (i32, i32) {
    %c0_i32 = arith.constant 0 : i32
    %c0_i32_0 = arith.constant 0 : i32
    %c0_i32_1 = arith.constant 0 : i32
    return %c0_i32, %c0_i32_0 : i32, i32
  }
  func.func @transform_2(%arg0: i32) -> (i32, i32) {
    %c0_i32 = arith.constant 0 : i32
    %c0_i32_0 = arith.constant 0 : i32
    %c0_i32_1 = arith.constant 0 : i32
    return %c0_i32, %c0_i32_0 : i32, i32
  }
  func.func @transform_3(%arg0: i32) -> (i32, i32) {
    %c0_i32 = arith.constant 0 : i32
    %c0_i32_0 = arith.constant 0 : i32
    return %arg0, %c0_i32 : i32, i32
  }
  func.func @transform_4(%arg0: i32) -> (i32, i32) {
    %c0_i32 = arith.constant 0 : i32
    %c0_i32_0 = arith.constant 0 : i32
    %c0_i32_1 = arith.constant 0 : i32
    return %c0_i32, %c0_i32_0 : i32, i32
  }
  func.func @transform_5(%arg0: i32) -> (i32, i32) {
    %c0_i32 = arith.constant 0 : i32
    %c0_i32_0 = arith.constant 0 : i32
    %c0_i32_1 = arith.constant 0 : i32
    return %c0_i32, %c0_i32_0 : i32, i32
  }
  func.func @transform_6(%arg0: i32) -> (i32, i32) {
    %c0_i32 = arith.constant 0 : i32
    %c0_i32_0 = arith.constant 0 : i32
    return %arg0, %c0_i32 : i32, i32
  }
}

</mosaic_0001>

<bundles_post_ra>
// kernel: residual_block_forward.5
= control target key start
LH: loop header
LB: loop body
LE: loop exit
PB: predicated region body
PF: predicated region fallthrough
CT: control target
= control target key end

     0   :  { %s1788_s0 = inlined_call_operand.vmem [shape: bf16[512,128], index: 0, kind: input, shape index: {}]   ;;  %s1789_s1 = inlined_call_operand.vmem [shape: f32[1,128], index: 1, kind: input, shape index: {}]   ;;  %s1790_s2 = inlined_call_operand.vmem [shape: f32[1,128], index: 2, kind: input, shape index: {}]   ;;  %s1791_s3 = inlined_call_operand.vmem [shape: bf16[512,128], index: 3, kind: input, shape index: {}]   ;;  %s1792_s4 = inlined_call_operand.vmem [shape: f32[1,128], index: 4, kind: input, shape index: {}]   ;;  %s1793_s5 = inlined_call_operand.vmem [shape: f32[1,128], index: 5, kind: input, shape index: {}]   ;;  %s1794_s6 = inlined_call_operand.vmem [shape: f32[512,128], index: 6, kind: output, shape index: {}]  }
   0x1   :  { %v748_v0 = vld [vmem:[%s1788_s0] sm:$0xff]   ;;  %v1003_v12 = vld [vmem:[%s1788_s0 + $0x8] sm:$0xff]   ;;  %v1004_v18 = vld [vmem:[%s1788_s0 + $0x10] sm:$0xff]  }
   0x2   :  { %v1114_v1 = vld [vmem:[%s1789_s1] ss:$0 sm:$0xff]  ;;  %v749_v2 = vunpack.c.l.bf16 %v748_v0  ;;  %v750_v5 = vunpack.c.h.bf16 %v748_v0  ;;  %v1034_v13 = vld [vmem:[%s1791_s3 + $0x8] sm:$0xff]   ;;  %v753_v16 = vunpack.c.l.bf16 %v1003_v12  ;;  %v1035_v19 = vld [vmem:[%s1791_s3 + $0x10] sm:$0xff]   ;;  %v754_v22 = vunpack.c.h.bf16 %v1003_v12 }
   0x3   :  { %v1119_v3 = vld [vmem:[%s1790_s2] ss:$0 sm:$0xff]  ;;  %v881_v17 = vunpack.c.l.bf16 %v1034_v13  ;;  %v882_v23 = vunpack.c.h.bf16 %v1034_v13  ;;  %v757_v30 = vunpack.c.l.bf16 %v1004_v18  ;;  %v885_v31 = vunpack.c.l.bf16 %v1035_v19  ;;  %v1005_v40 = vld [vmem:[%s1788_s0 + $0x18] sm:$0xff]   ;;  %v1007_v12 = vld [vmem:[%s1788_s0 + $0x28] sm:$0xff]  }
   0x4   :  { %v876_v4 = vld [vmem:[%s1791_s3] sm:$0xff]   ;;  %v155_v9 = vmul.f32 %v1114_v1, %v749_v2  ;;  %v156_v11 = vmul.f32 %v1114_v1, %v750_v5  ;;  %v157_v26 = vmul.f32 %v1114_v1, %v753_v16  ;;  %v158_v28 = vmul.f32 %v1114_v1, %v754_v22  ;;  %v1036_v41 = vld [vmem:[%s1791_s3 + $0x18] sm:$0xff]  }
   0x5   :  { %v877_v6 = vunpack.c.l.bf16 %v876_v4  ;;  %v1127_v7 = vld [vmem:[%s1792_s4] ss:$0 sm:$0xff]  ;;  %v878_v8 = vunpack.c.h.bf16 %v876_v4  ;;  %v159_v38 = vmul.f32 %v1114_v1, %v757_v30  ;;  %v758_v45 = vunpack.c.h.bf16 %v1004_v18  ;;  %v1008_v30 = vld [vmem:[%s1788_s0 + $0x30] sm:$0xff]  }
   0x6   :  { %v1133_v10 = vld [vmem:[%s1793_s5] ss:$0 sm:$0xff]  ;;  %v223_v20 = vadd.f32 %v1119_v3, %v155_v9  ;;  %v224_v21 = vadd.f32 %v1119_v3, %v156_v11  ;;  %v421_v27 = vmul.f32 %v1127_v7, %v881_v17  ;;  %v422_v29 = vmul.f32 %v1127_v7, %v882_v23 }
   0x7   :  { %v419_v14 = vmul.f32 %v1127_v7, %v877_v6  ;;  %v420_v15 = vmul.f32 %v1127_v7, %v878_v8  ;;  %v225_v34 = vadd.f32 %v1119_v3, %v157_v26  ;;  %v226_v36 = vadd.f32 %v1119_v3, %v158_v28  ;;  %v1006_v54 = vld [vmem:[%s1788_s0 + $0x20] sm:$0xff]  }
   0x8   :  { %v489_v35 = vadd.f32 %v1133_v10, %v421_v27  ;;  %v490_v37 = vadd.f32 %v1133_v10, %v422_v29  ;;  %v423_v39 = vmul.f32 %v1127_v7, %v885_v31  ;;  %v227_v47 = vadd.f32 %v1119_v3, %v159_v38  ;;  %v1037_v59 = vld [vmem:[%s1791_s3 + $0x20] sm:$0xff]  }
   0x9   :  { %v487_v24 = vadd.f32 %v1133_v10, %v419_v14  ;;  %v488_v25 = vadd.f32 %v1133_v10, %v420_v15  ;;  %v886_v49 = vunpack.c.h.bf16 %v1035_v19  ;;  %v160_v51 = vmul.f32 %v1114_v1, %v758_v45 }
   0xa   :  { %v553_v44 = vadd.f32 %v489_v35, %v225_v34  ;;  %v554_v46 = vadd.f32 %v490_v37, %v226_v36  ;;  %v491_v48 = vadd.f32 %v1133_v10, %v423_v39  ;;  %v761_v52 = vunpack.c.l.bf16 %v1005_v40  ;;  %v1039_v35 = vld [vmem:[%s1791_s3 + $0x30] sm:$0xff]  }
   0xb   :  { %v551_v32 = vadd.f32 %v487_v24, %v223_v20  ;;  %v552_v33 = vadd.f32 %v488_v25, %v224_v21  ;;  %v889_v53 = vunpack.c.l.bf16 %v1036_v41  ;;  %v424_v57 = vmul.f32 %v1127_v7, %v886_v49  ;;  %v1038_v21 = vld [vmem:[%s1791_s3 + $0x28] sm:$0xff]  }
   0xc   :  { %v617_v50 = vmax.f32 %v553_v44, 0.0  ;;  %v618_v55 = vmax.f32 %v554_v46, 0.0  ;;  %v555_v56 = vadd.f32 %v491_v48, %v227_v47  ;;  %v762_v58 = vunpack.c.h.bf16 %v1005_v40  ;;  %v1009_v48 = vld [vmem:[%s1788_s0 + $0x38] sm:$0xff]  }
   0xd   :  { %v615_v42 = vmax.f32 %v551_v32, 0.0  ;;  %v616_v43 = vmax.f32 %v552_v33, 0.0  ;;  %v228_v60 = vadd.f32 %v1119_v3, %v160_v51  ;;  %v161_v61 = vmul.f32 %v1114_v1, %v761_v52 }
   0xe   :  { %681 = vst [vmem:[%s1794_s6 + $0x10] sm:$0xff] %v617_v50  ;;  %v425_v62 = vmul.f32 %v1127_v7, %v889_v53  ;;  %v890_v63 = vunpack.c.h.bf16 %v1036_v41  ;;  %v619_v0 = vmax.f32 %v555_v56, 0.0  ;;  %v492_v2 = vadd.f32 %v1133_v10, %v424_v57  ;;  %v1040_v53 = vld [vmem:[%s1791_s3 + $0x38] sm:$0xff]  }
   0xf   :  { %679 = vst [vmem:[%s1794_s6] sm:$0xff] %v615_v42  ;;  %v162_v4 = vmul.f32 %v1114_v1, %v762_v58  ;;  %v765_v5 = vunpack.c.l.bf16 %v1006_v54  ;;  %v229_v6 = vadd.f32 %v1119_v3, %v161_v61  ;;  %v893_v11 = vunpack.c.l.bf16 %v1037_v59 }
  0x10   :  { %680 = vst [vmem:[%s1794_s6 + $0x8] sm:$0xff] %v616_v43  ;;  %v493_v8 = vadd.f32 %v1133_v10, %v425_v62  ;;  %v426_v9 = vmul.f32 %v1127_v7, %v890_v63  ;;  %v556_v13 = vadd.f32 %v492_v2, %v228_v60  ;;  %v766_v16 = vunpack.c.h.bf16 %v1006_v54 }
  0x11   :  { %682 = vst [vmem:[%s1794_s6 + $0x18] sm:$0xff] %v618_v55  ;;  %v230_v14 = vadd.f32 %v1119_v3, %v162_v4  ;;  %v163_v15 = vmul.f32 %v1114_v1, %v765_v5  ;;  %v427_v19 = vmul.f32 %v1127_v7, %v893_v11  ;;  %v894_v20 = vunpack.c.h.bf16 %v1037_v59  ;;  %v1010_v4 = vld [vmem:[%s1788_s0 + $0x40] sm:$0xff]  }
  0x12   :  { %683 = vst [vmem:[%s1794_s6 + $0x20] sm:$0xff] %v619_v0  ;;  %v557_v17 = vadd.f32 %v493_v8, %v229_v6  ;;  %v494_v18 = vadd.f32 %v1133_v10, %v426_v9  ;;  %v620_v22 = vmax.f32 %v556_v13, 0.0  ;;  %v164_v24 = vmul.f32 %v1114_v1, %v766_v16  ;;  %v1041_v11 = vld [vmem:[%s1791_s3 + $0x40] sm:$0xff]  }
  0x13   :  { %v231_v23 = vadd.f32 %v1119_v3, %v163_v15  ;;  %v769_v25 = vunpack.c.l.bf16 %v1007_v12  ;;  %v495_v28 = vadd.f32 %v1133_v10, %v427_v19  ;;  %v428_v29 = vmul.f32 %v1127_v7, %v894_v20 }
  0x14   :  { %v621_v26 = vmax.f32 %v557_v17, 0.0  ;;  %v558_v27 = vadd.f32 %v494_v18, %v230_v14  ;;  %684 = vst [vmem:[%s1794_s6 + $0x28] sm:$0xff] %v620_v22  ;;  %v232_v31 = vadd.f32 %v1119_v3, %v164_v24  ;;  %v897_v33 = vunpack.c.l.bf16 %v1038_v21  ;;  %v1011_v24 = vld [vmem:[%s1788_s0 + $0x48] sm:$0xff]  }
  0x15   :  { %v165_v32 = vmul.f32 %v1114_v1, %v769_v25  ;;  %v770_v34 = vunpack.c.h.bf16 %v1007_v12  ;;  %v559_v37 = vadd.f32 %v495_v28, %v231_v23  ;;  %v496_v38 = vadd.f32 %v1133_v10, %v428_v29  ;;  %v1042_v29 = vld [vmem:[%s1791_s3 + $0x48] sm:$0xff]  }
  0x16   :  { %685 = vst [vmem:[%s1794_s6 + $0x30] sm:$0xff] %v621_v26  ;;  %v622_v36 = vmax.f32 %v558_v27, 0.0  ;;  %v898_v39 = vunpack.c.h.bf16 %v1038_v21  ;;  %v429_v41 = vmul.f32 %v1127_v7, %v897_v33  ;;  %v773_v43 = vunpack.c.l.bf16 %v1008_v30 }
  0x17   :  { %v233_v40 = vadd.f32 %v1119_v3, %v165_v32  ;;  %v166_v42 = vmul.f32 %v1114_v1, %v770_v34  ;;  %v623_v44 = vmax.f32 %v559_v37, 0.0  ;;  %v560_v45 = vadd.f32 %v496_v38, %v232_v31 }
  0x18   :  { %686 = vst [vmem:[%s1794_s6 + $0x38] sm:$0xff] %v622_v36  ;;  %v430_v46 = vmul.f32 %v1127_v7, %v898_v39  ;;  %v901_v47 = vunpack.c.l.bf16 %v1039_v35  ;;  %v497_v49 = vadd.f32 %v1133_v10, %v429_v41  ;;  %v167_v51 = vmul.f32 %v1114_v1, %v773_v43 }
  0x19   :  { %v234_v50 = vadd.f32 %v1119_v3, %v166_v42  ;;  %v774_v52 = vunpack.c.h.bf16 %v1008_v30  ;;  %687 = vst [vmem:[%s1794_s6 + $0x40] sm:$0xff] %v623_v44  ;;  %v624_v54 = vmax.f32 %v560_v45, 0.0  ;;  %v902_v57 = vunpack.c.h.bf16 %v1039_v35  ;;  %v1012_v42 = vld [vmem:[%s1788_s0 + $0x50] sm:$0xff]  }
  0x1a   :  { %v498_v55 = vadd.f32 %v1133_v10, %v430_v46  ;;  %v431_v56 = vmul.f32 %v1127_v7, %v901_v47  ;;  %v561_v58 = vadd.f32 %v497_v49, %v233_v40  ;;  %v235_v59 = vadd.f32 %v1119_v3, %v167_v51  ;;  %v1043_v51 = vld [vmem:[%s1791_s3 + $0x50] sm:$0xff]  }
  0x1b   :  { %v168_v60 = vmul.f32 %v1114_v1, %v774_v52  ;;  %v777_v61 = vunpack.c.l.bf16 %v1009_v48  ;;  %688 = vst [vmem:[%s1794_s6 + $0x48] sm:$0xff] %v624_v54  ;;  %v432_v0 = vmul.f32 %v1127_v7, %v902_v57  ;;  %v905_v2 = vunpack.c.l.bf16 %v1040_v53 }
  0x1c   :  { %v562_v62 = vadd.f32 %v498_v55, %v234_v50  ;;  %v499_v63 = vadd.f32 %v1133_v10, %v431_v56  ;;  %v625_v5 = vmax.f32 %v561_v58, 0.0  ;;  %v778_v9 = vunpack.c.h.bf16 %v1009_v48 }
  0x1d   :  { %v236_v6 = vadd.f32 %v1119_v3, %v168_v60  ;;  %v169_v8 = vmul.f32 %v1114_v1, %v777_v61  ;;  %v500_v14 = vadd.f32 %v1133_v10, %v432_v0  ;;  %v433_v15 = vmul.f32 %v1127_v7, %v905_v2  ;;  %v1013_v60 = vld [vmem:[%s1788_s0 + $0x58] sm:$0xff]  }
  0x1e   :  { %v626_v12 = vmax.f32 %v562_v62, 0.0  ;;  %v563_v13 = vadd.f32 %v499_v63, %v235_v59  ;;  %689 = vst [vmem:[%s1794_s6 + $0x50] sm:$0xff] %v625_v5  ;;  %v170_v17 = vmul.f32 %v1114_v1, %v778_v9  ;;  %v906_v18 = vunpack.c.h.bf16 %v1040_v53  ;;  %v1044_v2 = vld [vmem:[%s1791_s3 + $0x58] sm:$0xff]  }
  0x1f   :  { %v237_v16 = vadd.f32 %v1119_v3, %v169_v8  ;;  %v781_v19 = vunpack.c.l.bf16 %v1010_v4  ;;  %v564_v21 = vadd.f32 %v500_v14, %v236_v6  ;;  %v501_v22 = vadd.f32 %v1133_v10, %v433_v15 }
  0x20   :  { %690 = vst [vmem:[%s1794_s6 + $0x58] sm:$0xff] %v626_v12  ;;  %v627_v20 = vmax.f32 %v563_v13, 0.0  ;;  %v909_v23 = vunpack.c.l.bf16 %v1041_v11  ;;  %v238_v25 = vadd.f32 %v1119_v3, %v170_v17  ;;  %v434_v26 = vmul.f32 %v1127_v7, %v906_v18  ;;  %v1014_v18 = vld [vmem:[%s1788_s0 + $0x60] sm:$0xff]  }
  0x21   :  { %v171_v27 = vmul.f32 %v1114_v1, %v781_v19  ;;  %v782_v28 = vunpack.c.h.bf16 %v1010_v4  ;;  %v628_v30 = vmax.f32 %v564_v21, 0.0  ;;  %v565_v31 = vadd.f32 %v501_v22, %v237_v16 }
  0x22   :  { %691 = vst [vmem:[%s1794_s6 + $0x60] sm:$0xff] %v627_v20  ;;  %v435_v32 = vmul.f32 %v1127_v7, %v909_v23  ;;  %v910_v33 = vunpack.c.h.bf16 %v1041_v11  ;;  %v502_v34 = vadd.f32 %v1133_v10, %v434_v26  ;;  %v785_v37 = vunpack.c.l.bf16 %v1011_v24  ;;  %v1045_v23 = vld [vmem:[%s1791_s3 + $0x60] sm:$0xff]  }
  0x23   :  { %v239_v35 = vadd.f32 %v1119_v3, %v171_v27  ;;  %v172_v36 = vmul.f32 %v1114_v1, %v782_v28  ;;  %692 = vst [vmem:[%s1794_s6 + $0x68] sm:$0xff] %v628_v30  ;;  %v629_v38 = vmax.f32 %v565_v31, 0.0  ;;  %v913_v41 = vunpack.c.l.bf16 %v1042_v29 }
  0x24   :  { %v503_v39 = vadd.f32 %v1133_v10, %v435_v32  ;;  %v436_v40 = vmul.f32 %v1127_v7, %v910_v33  ;;  %v566_v43 = vadd.f32 %v502_v34, %v238_v25  ;;  %v173_v45 = vmul.f32 %v1114_v1, %v785_v37 }
  0x25   :  { %v240_v44 = vadd.f32 %v1119_v3, %v172_v36  ;;  %v786_v46 = vunpack.c.h.bf16 %v1011_v24  ;;  %693 = vst [vmem:[%s1794_s6 + $0x70] sm:$0xff] %v629_v38  ;;  %v437_v49 = vmul.f32 %v1127_v7, %v913_v41  ;;  %v914_v50 = vunpack.c.h.bf16 %v1042_v29  ;;  %v1015_v36 = vld [vmem:[%s1788_s0 + $0x68] sm:$0xff]  }
  0x26   :  { %v567_v47 = vadd.f32 %v503_v39, %v239_v35  ;;  %v504_v48 = vadd.f32 %v1133_v10, %v436_v40  ;;  %v630_v52 = vmax.f32 %v566_v43, 0.0  ;;  %v241_v53 = vadd.f32 %v1119_v3, %v173_v45  ;;  %v1046_v41 = vld [vmem:[%s1791_s3 + $0x68] sm:$0xff]  }
  0x27   :  { %v174_v54 = vmul.f32 %v1114_v1, %v786_v46  ;;  %v789_v55 = vunpack.c.l.bf16 %v1012_v42  ;;  %v505_v58 = vadd.f32 %v1133_v10, %v437_v49  ;;  %v438_v59 = vmul.f32 %v1127_v7, %v914_v50 }
  0x28   :  { %v631_v56 = vmax.f32 %v567_v47, 0.0  ;;  %v568_v57 = vadd.f32 %v504_v48, %v240_v44  ;;  %694 = vst [vmem:[%s1794_s6 + $0x78] sm:$0xff] %v630_v52  ;;  %v917_v63 = vunpack.c.l.bf16 %v1043_v51  ;;  %v790_v0 = vunpack.c.h.bf16 %v1012_v42 }
  0x29   :  { %v242_v61 = vadd.f32 %v1119_v3, %v174_v54  ;;  %v175_v62 = vmul.f32 %v1114_v1, %v789_v55  ;;  %v569_v5 = vadd.f32 %v505_v58, %v241_v53  ;;  %v506_v6 = vadd.f32 %v1133_v10, %v438_v59  ;;  %v1016_v54 = vld [vmem:[%s1788_s0 + $0x70] sm:$0xff]  }
  0x2a   :  { %695 = vst [vmem:[%s1794_s6 + $0x80] sm:$0xff] %v631_v56  ;;  %v632_v4 = vmax.f32 %v568_v57, 0.0  ;;  %v918_v8 = vunpack.c.h.bf16 %v1043_v51  ;;  %v439_v11 = vmul.f32 %v1127_v7, %v917_v63  ;;  %v176_v12 = vmul.f32 %v1114_v1, %v790_v0  ;;  %v1047_v59 = vld [vmem:[%s1791_s3 + $0x70] sm:$0xff]  }
  0x2b   :  { %v243_v9 = vadd.f32 %v1119_v3, %v175_v62  ;;  %v793_v13 = vunpack.c.l.bf16 %v1013_v60  ;;  %v633_v14 = vmax.f32 %v569_v5, 0.0  ;;  %v570_v15 = vadd.f32 %v506_v6, %v242_v61 }
  0x2c   :  { %696 = vst [vmem:[%s1794_s6 + $0x88] sm:$0xff] %v632_v4  ;;  %v440_v16 = vmul.f32 %v1127_v7, %v918_v8  ;;  %v921_v17 = vunpack.c.l.bf16 %v1044_v2  ;;  %v507_v19 = vadd.f32 %v1133_v10, %v439_v11  ;;  %v244_v20 = vadd.f32 %v1119_v3, %v176_v12  ;;  %v1017_v12 = vld [vmem:[%s1788_s0 + $0x78] sm:$0xff]  }
  0x2d   :  { %v177_v21 = vmul.f32 %v1114_v1, %v793_v13  ;;  %v794_v22 = vunpack.c.h.bf16 %v1013_v60  ;;  %697 = vst [vmem:[%s1794_s6 + $0x90] sm:$0xff] %v633_v14  ;;  %v634_v24 = vmax.f32 %v570_v15, 0.0  ;;  %v922_v27 = vunpack.c.h.bf16 %v1044_v2 }
  0x2e   :  { %v508_v25 = vadd.f32 %v1133_v10, %v440_v16  ;;  %v441_v26 = vmul.f32 %v1127_v7, %v921_v17  ;;  %v571_v28 = vadd.f32 %v507_v19, %v243_v9  ;;  %v797_v31 = vunpack.c.l.bf16 %v1014_v18 }
  0x2f   :  { %v245_v29 = vadd.f32 %v1119_v3, %v177_v21  ;;  %v178_v30 = vmul.f32 %v1114_v1, %v794_v22  ;;  %698 = vst [vmem:[%s1794_s6 + $0x98] sm:$0xff] %v634_v24  ;;  %v442_v34 = vmul.f32 %v1127_v7, %v922_v27  ;;  %v925_v35 = vunpack.c.l.bf16 %v1045_v23  ;;  %v1048_v21 = vld [vmem:[%s1791_s3 + $0x78] sm:$0xff]  }
  0x30   :  { %v572_v32 = vadd.f32 %v508_v25, %v244_v20  ;;  %v509_v33 = vadd.f32 %v1133_v10, %v441_v26  ;;  %v635_v37 = vmax.f32 %v571_v28, 0.0  ;;  %v179_v39 = vmul.f32 %v1114_v1, %v797_v31 }
  0x31   :  { %v246_v38 = vadd.f32 %v1119_v3, %v178_v30  ;;  %v798_v40 = vunpack.c.h.bf16 %v1014_v18  ;;  %v510_v44 = vadd.f32 %v1133_v10, %v442_v34  ;;  %v443_v45 = vmul.f32 %v1127_v7, %v925_v35  ;;  %v1018_v30 = vld [vmem:[%s1788_s0 + $0x80] sm:$0xff]  }
  0x32   :  { %v636_v42 = vmax.f32 %v572_v32, 0.0  ;;  %v573_v43 = vadd.f32 %v509_v33, %v245_v29  ;;  %699 = vst [vmem:[%s1794_s6 + $0xa0] sm:$0xff] %v635_v37  ;;  %v247_v46 = vadd.f32 %v1119_v3, %v179_v39  ;;  %v926_v48 = vunpack.c.h.bf16 %v1045_v23  ;;  %v1049_v35 = vld [vmem:[%s1791_s3 + $0x80] sm:$0xff]  }
  0x33   :  { %v180_v47 = vmul.f32 %v1114_v1, %v798_v40  ;;  %v801_v49 = vunpack.c.l.bf16 %v1015_v36  ;;  %v574_v51 = vadd.f32 %v510_v44, %v246_v38  ;;  %v511_v52 = vadd.f32 %v1133_v10, %v443_v45 }
  0x34   :  { %700 = vst [vmem:[%s1794_s6 + $0xa8] sm:$0xff] %v636_v42  ;;  %v637_v50 = vmax.f32 %v573_v43, 0.0  ;;  %v929_v53 = vunpack.c.l.bf16 %v1046_v41  ;;  %v444_v56 = vmul.f32 %v1127_v7, %v926_v48  ;;  %v802_v58 = vunpack.c.h.bf16 %v1015_v36  ;;  %v1019_v48 = vld [vmem:[%s1788_s0 + $0x88] sm:$0xff]  }
  0x35   :  { %v248_v55 = vadd.f32 %v1119_v3, %v180_v47  ;;  %v181_v57 = vmul.f32 %v1114_v1, %v801_v49  ;;  %v638_v60 = vmax.f32 %v574_v51, 0.0  ;;  %v575_v61 = vadd.f32 %v511_v52, %v247_v46 }
  0x36   :  { %701 = vst [vmem:[%s1794_s6 + $0xb0] sm:$0xff] %v637_v50  ;;  %v445_v62 = vmul.f32 %v1127_v7, %v929_v53  ;;  %v930_v63 = vunpack.c.h.bf16 %v1046_v41  ;;  %v512_v0 = vadd.f32 %v1133_v10, %v444_v56  ;;  %v182_v4 = vmul.f32 %v1114_v1, %v802_v58  ;;  %v1050_v53 = vld [vmem:[%s1791_s3 + $0x88] sm:$0xff]  }
  0x37   :  { %v249_v2 = vadd.f32 %v1119_v3, %v181_v57  ;;  %v805_v5 = vunpack.c.l.bf16 %v1016_v54  ;;  %702 = vst [vmem:[%s1794_s6 + $0xb8] sm:$0xff] %v638_v60  ;;  %v639_v6 = vmax.f32 %v575_v61, 0.0  ;;  %v933_v11 = vunpack.c.l.bf16 %v1047_v59 }
  0x38   :  { %v513_v8 = vadd.f32 %v1133_v10, %v445_v62  ;;  %v446_v9 = vmul.f32 %v1127_v7, %v930_v63  ;;  %v576_v13 = vadd.f32 %v512_v0, %v248_v55  ;;  %v250_v14 = vadd.f32 %v1119_v3, %v182_v4  ;;  %v1020_v4 = vld [vmem:[%s1788_s0 + $0x90] sm:$0xff]  }
  0x39   :  { %v183_v15 = vmul.f32 %v1114_v1, %v805_v5  ;;  %v806_v16 = vunpack.c.h.bf16 %v1016_v54  ;;  %703 = vst [vmem:[%s1794_s6 + $0xc0] sm:$0xff] %v639_v6  ;;  %v447_v19 = vmul.f32 %v1127_v7, %v933_v11  ;;  %v934_v20 = vunpack.c.h.bf16 %v1047_v59  ;;  %v1051_v11 = vld [vmem:[%s1791_s3 + $0x90] sm:$0xff]  }
  0x3a   :  { %v577_v17 = vadd.f32 %v513_v8, %v249_v2  ;;  %v514_v18 = vadd.f32 %v1133_v10, %v446_v9  ;;  %v640_v22 = vmax.f32 %v576_v13, 0.0  ;;  %v809_v25 = vunpack.c.l.bf16 %v1017_v12 }
  0x3b   :  { %v251_v23 = vadd.f32 %v1119_v3, %v183_v15  ;;  %v184_v24 = vmul.f32 %v1114_v1, %v806_v16  ;;  %v515_v28 = vadd.f32 %v1133_v10, %v447_v19  ;;  %v448_v29 = vmul.f32 %v1127_v7, %v934_v20 }
  0x3c   :  { %v641_v26 = vmax.f32 %v577_v17, 0.0  ;;  %v578_v27 = vadd.f32 %v514_v18, %v250_v14  ;;  %704 = vst [vmem:[%s1794_s6 + $0xc8] sm:$0xff] %v640_v22  ;;  %v185_v32 = vmul.f32 %v1114_v1, %v809_v25  ;;  %v937_v33 = vunpack.c.l.bf16 %v1048_v21 }
  0x3d   :  { %v252_v31 = vadd.f32 %v1119_v3, %v184_v24  ;;  %v810_v34 = vunpack.c.h.bf16 %v1017_v12  ;;  %v579_v37 = vadd.f32 %v515_v28, %v251_v23  ;;  %v516_v38 = vadd.f32 %v1133_v10, %v448_v29  ;;  %v1021_v24 = vld [vmem:[%s1788_s0 + $0x98] sm:$0xff]  }
  0x3e   :  { %705 = vst [vmem:[%s1794_s6 + $0xd0] sm:$0xff] %v641_v26  ;;  %v642_v36 = vmax.f32 %v578_v27, 0.0  ;;  %v938_v39 = vunpack.c.h.bf16 %v1048_v21  ;;  %v253_v40 = vadd.f32 %v1119_v3, %v185_v32  ;;  %v449_v41 = vmul.f32 %v1127_v7, %v937_v33  ;;  %v1052_v29 = vld [vmem:[%s1791_s3 + $0x98] sm:$0xff]  }
  0x3f   :  { %v186_v42 = vmul.f32 %v1114_v1, %v810_v34  ;;  %v813_v43 = vunpack.c.l.bf16 %v1018_v30  ;;  %v643_v44 = vmax.f32 %v579_v37, 0.0  ;;  %v580_v45 = vadd.f32 %v516_v38, %v252_v31 }
  0x40   :  { %706 = vst [vmem:[%s1794_s6 + $0xd8] sm:$0xff] %v642_v36  ;;  %v450_v46 = vmul.f32 %v1127_v7, %v938_v39  ;;  %v941_v47 = vunpack.c.l.bf16 %v1049_v35  ;;  %v517_v49 = vadd.f32 %v1133_v10, %v449_v41  ;;  %v814_v52 = vunpack.c.h.bf16 %v1018_v30 }
  0x41   :  { %v254_v50 = vadd.f32 %v1119_v3, %v186_v42  ;;  %v187_v51 = vmul.f32 %v1114_v1, %v813_v43  ;;  %707 = vst [vmem:[%s1794_s6 + $0xe0] sm:$0xff] %v643_v44  ;;  %v644_v54 = vmax.f32 %v580_v45, 0.0  ;;  %v942_v57 = vunpack.c.h.bf16 %v1049_v35  ;;  %v1022_v42 = vld [vmem:[%s1788_s0 + $0xa0] sm:$0xff]  }
  0x42   :  { %v518_v55 = vadd.f32 %v1133_v10, %v450_v46  ;;  %v451_v56 = vmul.f32 %v1127_v7, %v941_v47  ;;  %v581_v58 = vadd.f32 %v517_v49, %v253_v40  ;;  %v188_v60 = vmul.f32 %v1114_v1, %v814_v52 }
  0x43   :  { %v255_v59 = vadd.f32 %v1119_v3, %v187_v51  ;;  %v817_v61 = vunpack.c.l.bf16 %v1019_v48  ;;  %708 = vst [vmem:[%s1794_s6 + $0xe8] sm:$0xff] %v644_v54  ;;  %v452_v0 = vmul.f32 %v1127_v7, %v942_v57  ;;  %v945_v2 = vunpack.c.l.bf16 %v1050_v53  ;;  %v1053_v51 = vld [vmem:[%s1791_s3 + $0xa0] sm:$0xff]  }
  0x44   :  { %v582_v62 = vadd.f32 %v518_v55, %v254_v50  ;;  %v519_v63 = vadd.f32 %v1133_v10, %v451_v56  ;;  %v645_v5 = vmax.f32 %v581_v58, 0.0  ;;  %v256_v6 = vadd.f32 %v1119_v3, %v188_v60  ;;  %v1023_v60 = vld [vmem:[%s1788_s0 + $0xa8] sm:$0xff]  }
  0x45   :  { %v189_v8 = vmul.f32 %v1114_v1, %v817_v61  ;;  %v818_v9 = vunpack.c.h.bf16 %v1019_v48  ;;  %v520_v14 = vadd.f32 %v1133_v10, %v452_v0  ;;  %v453_v15 = vmul.f32 %v1127_v7, %v945_v2  ;;  %v1054_v2 = vld [vmem:[%s1791_s3 + $0xa8] sm:$0xff]  }
  0x46   :  { %v646_v12 = vmax.f32 %v582_v62, 0.0  ;;  %v583_v13 = vadd.f32 %v519_v63, %v255_v59  ;;  %709 = vst [vmem:[%s1794_s6 + $0xf0] sm:$0xff] %v645_v5  ;;  %v946_v18 = vunpack.c.h.bf16 %v1050_v53  ;;  %v821_v19 = vunpack.c.l.bf16 %v1020_v4 }
  0x47   :  { %v257_v16 = vadd.f32 %v1119_v3, %v189_v8  ;;  %v190_v17 = vmul.f32 %v1114_v1, %v818_v9  ;;  %v584_v21 = vadd.f32 %v520_v14, %v256_v6  ;;  %v521_v22 = vadd.f32 %v1133_v10, %v453_v15 }
  0x48   :  { %710 = vst [vmem:[%s1794_s6 + $0xf8] sm:$0xff] %v646_v12  ;;  %v647_v20 = vmax.f32 %v583_v13, 0.0  ;;  %v949_v23 = vunpack.c.l.bf16 %v1051_v11  ;;  %v454_v26 = vmul.f32 %v1127_v7, %v946_v18  ;;  %v191_v27 = vmul.f32 %v1114_v1, %v821_v19  ;;  %v1024_v18 = vld [vmem:[%s1788_s0 + $0xb0] sm:$0xff]  }
  0x49   :  { %v258_v25 = vadd.f32 %v1119_v3, %v190_v17  ;;  %v822_v28 = vunpack.c.h.bf16 %v1020_v4  ;;  %v648_v30 = vmax.f32 %v584_v21, 0.0  ;;  %v585_v31 = vadd.f32 %v521_v22, %v257_v16 }
  0x4a   :  { %711 = vst [vmem:[%s1794_s6 + $0x100] sm:$0xff] %v647_v20  ;;  %v455_v32 = vmul.f32 %v1127_v7, %v949_v23  ;;  %v950_v33 = vunpack.c.h.bf16 %v1051_v11  ;;  %v522_v34 = vadd.f32 %v1133_v10, %v454_v26  ;;  %v259_v35 = vadd.f32 %v1119_v3, %v191_v27  ;;  %v1055_v23 = vld [vmem:[%s1791_s3 + $0xb0] sm:$0xff]  }
  0x4b   :  { %v192_v36 = vmul.f32 %v1114_v1, %v822_v28  ;;  %v825_v37 = vunpack.c.l.bf16 %v1021_v24  ;;  %712 = vst [vmem:[%s1794_s6 + $0x108] sm:$0xff] %v648_v30  ;;  %v649_v38 = vmax.f32 %v585_v31, 0.0  ;;  %v953_v41 = vunpack.c.l.bf16 %v1052_v29 }
  0x4c   :  { %v523_v39 = vadd.f32 %v1133_v10, %v455_v32  ;;  %v456_v40 = vmul.f32 %v1127_v7, %v950_v33  ;;  %v586_v43 = vadd.f32 %v522_v34, %v258_v25  ;;  %v826_v46 = vunpack.c.h.bf16 %v1021_v24 }
  0x4d   :  { %v260_v44 = vadd.f32 %v1119_v3, %v192_v36  ;;  %v193_v45 = vmul.f32 %v1114_v1, %v825_v37  ;;  %713 = vst [vmem:[%s1794_s6 + $0x110] sm:$0xff] %v649_v38  ;;  %v457_v49 = vmul.f32 %v1127_v7, %v953_v41  ;;  %v954_v50 = vunpack.c.h.bf16 %v1052_v29  ;;  %v1025_v36 = vld [vmem:[%s1788_s0 + $0xb8] sm:$0xff]  }
  0x4e   :  { %v587_v47 = vadd.f32 %v523_v39, %v259_v35  ;;  %v524_v48 = vadd.f32 %v1133_v10, %v456_v40  ;;  %v650_v52 = vmax.f32 %v586_v43, 0.0  ;;  %v194_v54 = vmul.f32 %v1114_v1, %v826_v46  ;;  %v1056_v41 = vld [vmem:[%s1791_s3 + $0xb8] sm:$0xff]  }
  0x4f   :  { %v261_v53 = vadd.f32 %v1119_v3, %v193_v45  ;;  %v829_v55 = vunpack.c.l.bf16 %v1022_v42  ;;  %v525_v58 = vadd.f32 %v1133_v10, %v457_v49  ;;  %v458_v59 = vmul.f32 %v1127_v7, %v954_v50 }
  0x50   :  { %v651_v56 = vmax.f32 %v587_v47, 0.0  ;;  %v588_v57 = vadd.f32 %v524_v48, %v260_v44  ;;  %714 = vst [vmem:[%s1794_s6 + $0x118] sm:$0xff] %v650_v52  ;;  %v262_v61 = vadd.f32 %v1119_v3, %v194_v54  ;;  %v957_v63 = vunpack.c.l.bf16 %v1053_v51  ;;  %v1026_v54 = vld [vmem:[%s1788_s0 + $0xc0] sm:$0xff]  }
  0x51   :  { %v195_v62 = vmul.f32 %v1114_v1, %v829_v55  ;;  %v830_v0 = vunpack.c.h.bf16 %v1022_v42  ;;  %v589_v5 = vadd.f32 %v525_v58, %v261_v53  ;;  %v526_v6 = vadd.f32 %v1133_v10, %v458_v59  ;;  %v1057_v59 = vld [vmem:[%s1791_s3 + $0xc0] sm:$0xff]  }
  0x52   :  { %715 = vst [vmem:[%s1794_s6 + $0x120] sm:$0xff] %v651_v56  ;;  %v652_v4 = vmax.f32 %v588_v57, 0.0  ;;  %v958_v8 = vunpack.c.h.bf16 %v1053_v51  ;;  %v459_v11 = vmul.f32 %v1127_v7, %v957_v63  ;;  %v833_v13 = vunpack.c.l.bf16 %v1023_v60 }
  0x53   :  { %v263_v9 = vadd.f32 %v1119_v3, %v195_v62  ;;  %v196_v12 = vmul.f32 %v1114_v1, %v830_v0  ;;  %v653_v14 = vmax.f32 %v589_v5, 0.0  ;;  %v590_v15 = vadd.f32 %v526_v6, %v262_v61 }
  0x54   :  { %716 = vst [vmem:[%s1794_s6 + $0x128] sm:$0xff] %v652_v4  ;;  %v460_v16 = vmul.f32 %v1127_v7, %v958_v8  ;;  %v961_v17 = vunpack.c.l.bf16 %v1054_v2  ;;  %v527_v19 = vadd.f32 %v1133_v10, %v459_v11  ;;  %v197_v21 = vmul.f32 %v1114_v1, %v833_v13 }
  0x55   :  { %v264_v20 = vadd.f32 %v1119_v3, %v196_v12  ;;  %v834_v22 = vunpack.c.h.bf16 %v1023_v60  ;;  %717 = vst [vmem:[%s1794_s6 + $0x130] sm:$0xff] %v653_v14  ;;  %v654_v24 = vmax.f32 %v590_v15, 0.0  ;;  %v962_v27 = vunpack.c.h.bf16 %v1054_v2  ;;  %v1027_v12 = vld [vmem:[%s1788_s0 + $0xc8] sm:$0xff]  }
  0x56   :  { %v528_v25 = vadd.f32 %v1133_v10, %v460_v16  ;;  %v461_v26 = vmul.f32 %v1127_v7, %v961_v17  ;;  %v591_v28 = vadd.f32 %v527_v19, %v263_v9  ;;  %v265_v29 = vadd.f32 %v1119_v3, %v197_v21  ;;  %v1058_v21 = vld [vmem:[%s1791_s3 + $0xc8] sm:$0xff]  }
  0x57   :  { %v198_v30 = vmul.f32 %v1114_v1, %v834_v22  ;;  %v837_v31 = vunpack.c.l.bf16 %v1024_v18  ;;  %718 = vst [vmem:[%s1794_s6 + $0x138] sm:$0xff] %v654_v24  ;;  %v462_v34 = vmul.f32 %v1127_v7, %v962_v27  ;;  %v965_v35 = vunpack.c.l.bf16 %v1055_v23 }
  0x58   :  { %v592_v32 = vadd.f32 %v528_v25, %v264_v20  ;;  %v529_v33 = vadd.f32 %v1133_v10, %v461_v26  ;;  %v655_v37 = vmax.f32 %v591_v28, 0.0  ;;  %v838_v40 = vunpack.c.h.bf16 %v1024_v18 }
  0x59   :  { %v266_v38 = vadd.f32 %v1119_v3, %v198_v30  ;;  %v199_v39 = vmul.f32 %v1114_v1, %v837_v31  ;;  %v530_v44 = vadd.f32 %v1133_v10, %v462_v34  ;;  %v463_v45 = vmul.f32 %v1127_v7, %v965_v35  ;;  %v1028_v30 = vld [vmem:[%s1788_s0 + $0xd0] sm:$0xff]  }
  0x5a   :  { %v656_v42 = vmax.f32 %v592_v32, 0.0  ;;  %v593_v43 = vadd.f32 %v529_v33, %v265_v29  ;;  %719 = vst [vmem:[%s1794_s6 + $0x140] sm:$0xff] %v655_v37  ;;  %v200_v47 = vmul.f32 %v1114_v1, %v838_v40  ;;  %v966_v48 = vunpack.c.h.bf16 %v1055_v23  ;;  %v1059_v35 = vld [vmem:[%s1791_s3 + $0xd0] sm:$0xff]  }
  0x5b   :  { %v267_v46 = vadd.f32 %v1119_v3, %v199_v39  ;;  %v841_v49 = vunpack.c.l.bf16 %v1025_v36  ;;  %v594_v51 = vadd.f32 %v530_v44, %v266_v38  ;;  %v531_v52 = vadd.f32 %v1133_v10, %v463_v45 }
  0x5c   :  { %720 = vst [vmem:[%s1794_s6 + $0x148] sm:$0xff] %v656_v42  ;;  %v657_v50 = vmax.f32 %v593_v43, 0.0  ;;  %v969_v53 = vunpack.c.l.bf16 %v1056_v41  ;;  %v268_v55 = vadd.f32 %v1119_v3, %v200_v47  ;;  %v464_v56 = vmul.f32 %v1127_v7, %v966_v48 }
  0x5d   :  { %v201_v57 = vmul.f32 %v1114_v1, %v841_v49  ;;  %v842_v58 = vunpack.c.h.bf16 %v1025_v36  ;;  %v658_v60 = vmax.f32 %v594_v51, 0.0  ;;  %v595_v61 = vadd.f32 %v531_v52, %v267_v46  ;;  %v1651_v49 = vld [vmem:[%s1790_s2] ss:$0 sm:$0xff] }
  0x5e   :  { %721 = vst [vmem:[%s1794_s6 + $0x150] sm:$0xff] %v657_v50  ;;  %v465_v62 = vmul.f32 %v1127_v7, %v969_v53  ;;  %v970_v63 = vunpack.c.h.bf16 %v1056_v41  ;;  %v532_v0 = vadd.f32 %v1133_v10, %v464_v56  ;;  %v845_v5 = vunpack.c.l.bf16 %v1026_v54 }
  0x5f   :  { %v269_v2 = vadd.f32 %v1119_v3, %v201_v57  ;;  %v202_v4 = vmul.f32 %v1114_v1, %v842_v58  ;;  %722 = vst [vmem:[%s1794_s6 + $0x158] sm:$0xff] %v658_v60  ;;  %v659_v6 = vmax.f32 %v595_v61, 0.0  ;;  %v973_v11 = vunpack.c.l.bf16 %v1057_v59 }
  0x60   :  { %v533_v8 = vadd.f32 %v1133_v10, %v465_v62  ;;  %v466_v9 = vmul.f32 %v1127_v7, %v970_v63  ;;  %v596_v13 = vadd.f32 %v532_v0, %v268_v55  ;;  %v203_v15 = vmul.f32 %v1114_v1, %v845_v5  ;;  %v1670_v55 = vld [vmem:[%s1792_s4] ss:$0 sm:$0xff] }
  0x61   :  { %v270_v14 = vadd.f32 %v1119_v3, %v202_v4  ;;  %v846_v16 = vunpack.c.h.bf16 %v1026_v54  ;;  %723 = vst [vmem:[%s1794_s6 + $0x160] sm:$0xff] %v659_v6  ;;  %v467_v19 = vmul.f32 %v1127_v7, %v973_v11  ;;  %v974_v20 = vunpack.c.h.bf16 %v1057_v59  ;;  %v1030_v4 = vld [vmem:[%s1788_s0 + $0xe0] sm:$0xff]  }
  0x62   :  { %v597_v17 = vadd.f32 %v533_v8, %v269_v2  ;;  %v534_v18 = vadd.f32 %v1133_v10, %v466_v9  ;;  %v660_v22 = vmax.f32 %v596_v13, 0.0  ;;  %v271_v23 = vadd.f32 %v1119_v3, %v203_v15  ;;  %v1061_v11 = vld [vmem:[%s1791_s3 + $0xe0] sm:$0xff]  }
  0x63   :  { %v204_v24 = vmul.f32 %v1114_v1, %v846_v16  ;;  %v849_v25 = vunpack.c.l.bf16 %v1027_v12  ;;  %v535_v28 = vadd.f32 %v1133_v10, %v467_v19  ;;  %v468_v29 = vmul.f32 %v1127_v7, %v974_v20 }
  0x64   :  { %v661_v26 = vmax.f32 %v597_v17, 0.0  ;;  %v598_v27 = vadd.f32 %v534_v18, %v270_v14  ;;  %724 = vst [vmem:[%s1794_s6 + $0x168] sm:$0xff] %v660_v22  ;;  %v977_v33 = vunpack.c.l.bf16 %v1058_v21  ;;  %v850_v34 = vunpack.c.h.bf16 %v1027_v12 }
  0x65   :  { %v272_v31 = vadd.f32 %v1119_v3, %v204_v24  ;;  %v205_v32 = vmul.f32 %v1114_v1, %v849_v25  ;;  %v599_v37 = vadd.f32 %v535_v28, %v271_v23  ;;  %v536_v38 = vadd.f32 %v1133_v10, %v468_v29  ;;  %v1637_v1 = vld [vmem:[%s1789_s1] ss:$0 sm:$0xff]  ;;  %v1031_v24 = vld [vmem:[%s1788_s0 + $0xe8] sm:$0xff]  }
  0x66   :  { %725 = vst [vmem:[%s1794_s6 + $0x170] sm:$0xff] %v661_v26  ;;  %v662_v36 = vmax.f32 %v598_v27, 0.0  ;;  %v978_v39 = vunpack.c.h.bf16 %v1058_v21  ;;  %v469_v41 = vmul.f32 %v1127_v7, %v977_v33  ;;  %v206_v42 = vmul.f32 %v1637_v1, %v850_v34  ;;  %v1062_v29 = vld [vmem:[%s1791_s3 + $0xe8] sm:$0xff]  }
  0x67   :  { %v273_v40 = vadd.f32 %v1119_v3, %v205_v32  ;;  %v853_v43 = vunpack.c.l.bf16 %v1028_v30  ;;  %v663_v44 = vmax.f32 %v599_v37, 0.0  ;;  %v600_v45 = vadd.f32 %v536_v38, %v272_v31  ;;  %v1029_v3 = vld [vmem:[%s1788_s0 + $0xd8] sm:$0xff]  }
  0x68   :  { %726 = vst [vmem:[%s1794_s6 + $0x178] sm:$0xff] %v662_v36  ;;  %v470_v46 = vmul.f32 %v1127_v7, %v978_v39  ;;  %v981_v47 = vunpack.c.l.bf16 %v1059_v35  ;;  %v537_v48 = vadd.f32 %v1133_v10, %v469_v41  ;;  %v274_v50 = vadd.f32 %v1651_v49, %v206_v42  ;;  %v1060_v7 = vld [vmem:[%s1791_s3 + $0xd8] sm:$0xff]   ;;  %v1664_v10 = vld [vmem:[%s1793_s5] ss:$0 sm:$0xff]  ;;  %v1032_v42 = vld [vmem:[%s1788_s0 + $0xf0] sm:$0xff]  }
  0x69   :  { %v207_v51 = vmul.f32 %v1637_v1, %v853_v43  ;;  %v854_v52 = vunpack.c.h.bf16 %v1028_v30  ;;  %727 = vst [vmem:[%s1794_s6 + $0x180] sm:$0xff] %v663_v44  ;;  %v664_v53 = vmax.f32 %v600_v45, 0.0  ;;  %v982_v57 = vunpack.c.h.bf16 %v1059_v35 }
  0x6a   :  { %v538_v54 = vadd.f32 %v1664_v10, %v470_v46  ;;  %v471_v56 = vmul.f32 %v1670_v55, %v981_v47  ;;  %v601_v58 = vadd.f32 %v537_v48, %v273_v40  ;;  %v857_v61 = vunpack.c.l.bf16 %v1029_v3 }
  0x6b   :  { %v275_v59 = vadd.f32 %v1651_v49, %v207_v51  ;;  %v208_v60 = vmul.f32 %v1637_v1, %v854_v52  ;;  %728 = vst [vmem:[%s1794_s6 + $0x188] sm:$0xff] %v664_v53  ;;  %v472_v0 = vmul.f32 %v1670_v55, %v982_v57  ;;  %v985_v2 = vunpack.c.l.bf16 %v1060_v7  ;;  %v1063_v51 = vld [vmem:[%s1791_s3 + $0xf0] sm:$0xff]  }
  0x6c   :  { %v602_v62 = vadd.f32 %v538_v54, %v274_v50  ;;  %v539_v63 = vadd.f32 %v1664_v10, %v471_v56  ;;  %v665_v5 = vmax.f32 %v601_v58, 0.0  ;;  %v209_v8 = vmul.f32 %v1637_v1, %v857_v61 }
  0x6d   :  { %v276_v6 = vadd.f32 %v1651_v49, %v208_v60  ;;  %v858_v9 = vunpack.c.h.bf16 %v1029_v3  ;;  %v540_v14 = vadd.f32 %v1664_v10, %v472_v0  ;;  %v473_v15 = vmul.f32 %v1670_v55, %v985_v2  ;;  %v1033_v60 = vld [vmem:[%s1788_s0 + $0xf8] sm:$0xff]  }
  0x6e   :  { %v666_v12 = vmax.f32 %v602_v62, 0.0  ;;  %v603_v13 = vadd.f32 %v539_v63, %v275_v59  ;;  %729 = vst [vmem:[%s1794_s6 + $0x190] sm:$0xff] %v665_v5  ;;  %v277_v16 = vadd.f32 %v1651_v49, %v209_v8  ;;  %v986_v18 = vunpack.c.h.bf16 %v1060_v7  ;;  %v1064_v2 = vld [vmem:[%s1791_s3 + $0xf8] sm:$0xff]  }
  0x6f   :  { %v210_v17 = vmul.f32 %v1637_v1, %v858_v9  ;;  %v861_v19 = vunpack.c.l.bf16 %v1030_v4  ;;  %v604_v21 = vadd.f32 %v540_v14, %v276_v6  ;;  %v541_v22 = vadd.f32 %v1664_v10, %v473_v15 }
  0x70   :  { %730 = vst [vmem:[%s1794_s6 + $0x198] sm:$0xff] %v666_v12  ;;  %v667_v20 = vmax.f32 %v603_v13, 0.0  ;;  %v989_v23 = vunpack.c.l.bf16 %v1061_v11  ;;  %v474_v26 = vmul.f32 %v1670_v55, %v986_v18  ;;  %v862_v28 = vunpack.c.h.bf16 %v1030_v4 }
  0x71   :  { %v278_v25 = vadd.f32 %v1651_v49, %v210_v17  ;;  %v211_v27 = vmul.f32 %v1637_v1, %v861_v19  ;;  %v668_v30 = vmax.f32 %v604_v21, 0.0  ;;  %v605_v31 = vadd.f32 %v541_v22, %v277_v16 }
  0x72   :  { %731 = vst [vmem:[%s1794_s6 + $0x1a0] sm:$0xff] %v667_v20  ;;  %v475_v32 = vmul.f32 %v1670_v55, %v989_v23  ;;  %v990_v33 = vunpack.c.h.bf16 %v1061_v11  ;;  %v542_v34 = vadd.f32 %v1664_v10, %v474_v26  ;;  %v212_v36 = vmul.f32 %v1637_v1, %v862_v28 }
  0x73   :  { %v279_v35 = vadd.f32 %v1651_v49, %v211_v27  ;;  %v865_v37 = vunpack.c.l.bf16 %v1031_v24  ;;  %732 = vst [vmem:[%s1794_s6 + $0x1a8] sm:$0xff] %v668_v30  ;;  %v669_v38 = vmax.f32 %v605_v31, 0.0  ;;  %v993_v41 = vunpack.c.l.bf16 %v1062_v29 }
  0x74   :  { %v543_v39 = vadd.f32 %v1664_v10, %v475_v32  ;;  %v476_v40 = vmul.f32 %v1670_v55, %v990_v33  ;;  %v606_v43 = vadd.f32 %v542_v34, %v278_v25  ;;  %v280_v44 = vadd.f32 %v1651_v49, %v212_v36 }
  0x75   :  { %v213_v45 = vmul.f32 %v1637_v1, %v865_v37  ;;  %v866_v46 = vunpack.c.h.bf16 %v1031_v24  ;;  %733 = vst [vmem:[%s1794_s6 + $0x1b0] sm:$0xff] %v669_v38  ;;  %v477_v48 = vmul.f32 %v1670_v55, %v993_v41  ;;  %v994_v50 = vunpack.c.h.bf16 %v1062_v29 }
  0x76   :  { %v607_v47 = vadd.f32 %v543_v39, %v279_v35  ;;  %v544_v3 = vadd.f32 %v1664_v10, %v476_v40  ;;  %v670_v52 = vmax.f32 %v606_v43, 0.0  ;;  %v869_v54 = vunpack.c.l.bf16 %v1032_v42 }
  0x77   :  { %v281_v7 = vadd.f32 %v1651_v49, %v213_v45  ;;  %v214_v53 = vmul.f32 %v1637_v1, %v866_v46  ;;  %v545_v58 = vadd.f32 %v1664_v10, %v477_v48  ;;  %v478_v59 = vmul.f32 %v1670_v55, %v994_v50 }
  0x78   :  { %v671_v56 = vmax.f32 %v607_v47, 0.0  ;;  %v608_v57 = vadd.f32 %v544_v3, %v280_v44  ;;  %734 = vst [vmem:[%s1794_s6 + $0x1b8] sm:$0xff] %v670_v52  ;;  %v215_v62 = vmul.f32 %v1637_v1, %v869_v54  ;;  %v997_v63 = vunpack.c.l.bf16 %v1063_v51 }
  0x79   :  { %v282_v61 = vadd.f32 %v1651_v49, %v214_v53  ;;  %v870_v0 = vunpack.c.h.bf16 %v1032_v42  ;;  %v609_v5 = vadd.f32 %v545_v58, %v281_v7  ;;  %v546_v6 = vadd.f32 %v1664_v10, %v478_v59 }
  0x7a   :  { %735 = vst [vmem:[%s1794_s6 + $0x1c0] sm:$0xff] %v671_v56  ;;  %v672_v4 = vmax.f32 %v608_v57, 0.0  ;;  %v998_v8 = vunpack.c.h.bf16 %v1063_v51  ;;  %v283_v9 = vadd.f32 %v1651_v49, %v215_v62  ;;  %v479_v11 = vmul.f32 %v1670_v55, %v997_v63 }
  0x7b   :  { %v216_v12 = vmul.f32 %v1637_v1, %v870_v0  ;;  %v873_v13 = vunpack.c.l.bf16 %v1033_v60  ;;  %v673_v14 = vmax.f32 %v609_v5, 0.0  ;;  %v610_v15 = vadd.f32 %v546_v6, %v282_v61 }
  0x7c   :  { %736 = vst [vmem:[%s1794_s6 + $0x1c8] sm:$0xff] %v672_v4  ;;  %v480_v16 = vmul.f32 %v1670_v55, %v998_v8  ;;  %v1001_v17 = vunpack.c.l.bf16 %v1064_v2  ;;  %v547_v18 = vadd.f32 %v1664_v10, %v479_v11  ;;  %v874_v21 = vunpack.c.h.bf16 %v1033_v60 }
  0x7d   :  { %v284_v19 = vadd.f32 %v1651_v49, %v216_v12  ;;  %v217_v20 = vmul.f32 %v1637_v1, %v873_v13  ;;  %737 = vst [vmem:[%s1794_s6 + $0x1d0] sm:$0xff] %v673_v14  ;;  %v674_v22 = vmax.f32 %v610_v15, 0.0  ;;  %v1002_v25 = vunpack.c.h.bf16 %v1064_v2 }
  0x7e   :  { %v548_v23 = vadd.f32 %v1664_v10, %v480_v16  ;;  %v481_v24 = vmul.f32 %v1670_v55, %v1001_v17  ;;  %v611_v26 = vadd.f32 %v547_v18, %v283_v9  ;;  %v218_v28 = vmul.f32 %v1637_v1, %v874_v21 }
  0x7f   :  { %v285_v27 = vadd.f32 %v1651_v49, %v217_v20  ;;  %738 = vst [vmem:[%s1794_s6 + $0x1d8] sm:$0xff] %v674_v22  ;;  %v482_v31 = vmul.f32 %v1670_v55, %v1002_v25 }
  0x80   :  { %v612_v29 = vadd.f32 %v548_v23, %v284_v19  ;;  %v549_v30 = vadd.f32 %v1664_v10, %v481_v24  ;;  %v675_v32 = vmax.f32 %v611_v26, 0.0  ;;  %v286_v33 = vadd.f32 %v1651_v49, %v218_v28 }
  0x81   :  { %v550_v36 = vadd.f32 %v1664_v10, %v482_v31 }
  0x82   :  { %v676_v34 = vmax.f32 %v612_v29, 0.0  ;;  %v613_v35 = vadd.f32 %v549_v30, %v285_v27  ;;  %739 = vst [vmem:[%s1794_s6 + $0x1e0] sm:$0xff] %v675_v32 }
  0x83   :  { %v614_v37 = vadd.f32 %v550_v36, %v286_v33 }
  0x84   :  { %740 = vst [vmem:[%s1794_s6 + $0x1e8] sm:$0xff] %v676_v34  ;;  %v677_v1 = vmax.f32 %v613_v35, 0.0 }
  0x85   :  { %v678_v55 = vmax.f32 %v614_v37, 0.0 }
  0x86   :  { %741 = vst [vmem:[%s1794_s6 + $0x1f0] sm:$0xff] %v677_v1 }
  0x87   :  { %742 = vst [vmem:[%s1794_s6 + $0x1f8] sm:$0xff] %v678_v55 }

// kernel: residual_block_forward.4
= control target key start
LH: loop header
LB: loop body
LE: loop exit
PB: predicated region body
PF: predicated region fallthrough
CT: control target
= control target key end

     0   :  { %s5963_s18 = smov 0   ;;  %s7092_s0 = inlined_call_operand.vmem [shape: bf16[2,16,16,128], index: 0, kind: input, shape index: {}]   ;;  %s7093_s1 = inlined_call_operand.vmem [shape: f32[1,128], index: 1, kind: input, shape index: {}]   ;;  %s7094_s2 = inlined_call_operand.vmem [shape: f32[1,128], index: 2, kind: input, shape index: {}]   ;;  %s7095_s3 = inlined_call_operand.vmem [shape: bf16[3,384,128], index: 3, kind: input, shape index: {}]   ;;  %s7096_s4 = inlined_call_operand.vmem [shape: bf16[2,256,128], index: 4, kind: output, shape index: {0}]   ;;  %s7097_s5 = inlined_call_operand.vmem [shape: f32[2,2,128], index: 5, kind: output, shape index: {1}]  }
   0x1 LB: > { %s4505_s19 = sadd.s32 4294967295, %s5930_s18   ;;  %p4509_p0 = scmp.ge.s32.totalorder %s5930_s18, 1  ;;  %s5930_s18 = sphi %s5963_s18, %s16_s18  }
   0x2   : > { %p190_p1 = scmp.lt.s32.totalorder %s5930_s18, 3 }
   0x4   : > { %p191_p2 = pnand %p4509_p0, %p190_p1 }
   0x6   : > { %194 = sbr.rel (%p191_p2) target bundleno = 822 (0x336), region = 36 }
   0xb   : > { %v5624_v0 = vld [vmem:[%s7095_s3 + $0xf8] sm:$0xff]  ;;  %p222_p3 = scmp.lt.s32.totalorder %s4505_s19, 1  ;;  %v5932_v1 = vmov 0   ;;  %v5623_v2 = vld [vmem:[%s7095_s3 + $0xf0] sm:$0xff]  ;;  %v5992_v3 = vld [vmem:[%s7093_s1] ss:$0 sm:$0xff] }
   0xc   : > { %240 = vst [vmem:[#allocation2 + $0xc] sm:$0xf] %v5932_v1  ;;  %2500 = vmatpush.bf16.msra.mxu0 %v5624_v0  ;;  %5887 = vmatpush.bf16.msra.mxu1 %v5624_v0  ;;  %v5622_v4 = vld [vmem:[%s7095_s3 + $0xe8] sm:$0xff]  ;;  %v6003_v8 = vld [vmem:[%s7094_s2] ss:$0 sm:$0xff]  ;;  %v5620_v20 = vld [vmem:[%s7095_s3 + $0xd8] sm:$0xff] }
   0xd   : > { %s7121_s19 = smov (!%p222_p3, %s4505_s19), 1  ;;  %241 = vst [vmem:[#allocation2 + $0x10] sm:$0xf] %v5932_v1  ;;  %5888 = vmatpush.bf16.msra.mxu2 %v5624_v0  ;;  %5889 = vmatpush.bf16.msra.mxu3 %v5624_v0  ;;  %v5621_v12 = vld [vmem:[%s7095_s3 + $0xe0] sm:$0xff]  ;;  %vm815_vm0 = vcmask 1043456   ;;  %v5619_v31 = vld [vmem:[%s7095_s3 + $0xd0] sm:$0xff] }
   0xe   : > { %s5495_s24 = sshll.u32 %s7121_s19, 7  ;;  %237 = vst [vmem:[#allocation2] sm:$0xf] %v5932_v1  ;;  %vm491_vm1 = vsmask.f32 256  ;;  %v5618_v46 = vld [vmem:[%s7095_s3 + $0xc8] sm:$0xff] }
   0xf   : > { %s5987_s27 = scalar_lea.vmem %s7092_s0, %s5495_s24  ;;  %238 = vst [vmem:[#allocation2 + $0x4] sm:$0xf] %v5932_v1  ;;  %vm492_vm2 = vsmask.f32 4368  ;;  %vm816_vm3 = vsmask.f32 7938 }
  0x10   : > { %2501 = vmatpush.bf16.msra.mxu0 %v5623_v2  ;;  %5890 = vmatpush.bf16.msra.mxu1 %v5623_v2  ;;  %v5714_v5 = vld [vmem:[%s5987_s27] sm:$0xff]   ;;  %239 = vst [vmem:[#allocation2 + $0x8] sm:$0x1] %v5932_v1  ;;  %vm6039_vm4 = vmor %vm491_vm1, %vm492_vm2  ;;  %vm822_vm6 = vcmask 1040384   ;;  %vm1673_vm7 = vcmask 1042432   ;;  %vm1674_vm9 = vcmask 1046532  }
  0x11   : > { %5891 = vmatpush.bf16.msra.mxu2 %v5623_v2  ;;  %5892 = vmatpush.bf16.msra.mxu3 %v5623_v2  ;;  %v5715_v6 = vunpack.c.l.bf16 %v5714_v5  ;;  %v5716_v7 = vunpack.c.h.bf16 %v5714_v5  ;;  %v5860_v9 = vld [vmem:[%s5987_s27 + $0x20] sm:$0xff]   ;;  %242 = vst [vmem:[#allocation2 + $0x14] sm:$0x1] %v5932_v1  ;;  %vm6049_vm5 = vmand %vm815_vm0, %vm816_vm3  ;;  %vm1058_vm10 = vsmask.f32 3328 }
  0x12   : > { %243 = vst [vmem:[#allocation2 + $0x18] sm:$0xf] %v5932_v1  ;;  %v5731_v13 = vunpack.c.l.bf16 %v5860_v9  ;;  %v5732_v16 = vunpack.c.h.bf16 %v5860_v9  ;;  %v5864_v17 = vld [vmem:[%s5987_s27 + $0x40] sm:$0xff]   ;;  %vm6551_vm8 = vmand %vm822_vm6, %vm491_vm1  ;;  %vm1059_vm11 = vsmask.f32 7440 }
  0x13   : > { %v359_v10 = vmul.f32 %v5992_v3, %v5715_v6  ;;  %v360_v11 = vmul.f32 %v5992_v3, %v5716_v7  ;;  %244 = vst [vmem:[#allocation2 + $0x1c] sm:$0xf] %v5932_v1  ;;  %v5747_v22 = vunpack.c.l.bf16 %v5864_v17  ;;  %v5748_v25 = vunpack.c.h.bf16 %v5864_v17  ;;  %v5868_v34 = vld [vmem:[%s5987_s27 + $0x60] sm:$0xff]   ;;  %v818_v40 = vld [vmem:[#allocation2 + $0xc] sm:$0xf]  ;;  %vm6566_vm12 = vmor %vm1673_vm7, %vm1674_vm9 }
  0x14   : > { %2502 = vmatpush.bf16.msra.mxu0 %v5622_v4  ;;  %5893 = vmatpush.bf16.msra.mxu1 %v5622_v4  ;;  %245 = vst [vmem:[#allocation2 + $0x20] sm:$0x1] %v5932_v1  ;;  %v367_v21 = vmul.f32 %v5992_v3, %v5731_v13  ;;  %v368_v26 = vmul.f32 %v5992_v3, %v5732_v16  ;;  %v5763_v45 = vunpack.c.l.bf16 %v5868_v34  ;;  %v5764_v49 = vunpack.c.h.bf16 %v5868_v34  ;;  %v5617_v55 = vld [vmem:[%s7095_s3 + $0xc0] sm:$0xff]  ;;  %vm6572_vm13 = vmor %vm1058_vm10, %vm1059_vm11 }
  0x15   : > { %5894 = vmatpush.bf16.msra.mxu2 %v5622_v4  ;;  %5895 = vmatpush.bf16.msra.mxu3 %v5622_v4  ;;  %v395_v14 = vadd.f32 %v6003_v8, %v359_v10  ;;  %v396_v15 = vadd.f32 %v6003_v8, %v360_v11  ;;  %246 = vst [vmem:[#allocation2 + $0x24] sm:$0xf] %v5932_v1  ;;  %v5857_v10 = vld [vmem:[%s5987_s27 + $0x8] sm:$0xff]  }
  0x16   : > { %247 = vst [vmem:[#allocation2 + $0x28] sm:$0xf] %v5932_v1  ;;  %v403_v32 = vadd.f32 %v6003_v8, %v367_v21  ;;  %v375_v33 = vmul.f32 %v5992_v3, %v5747_v22  ;;  %v376_v38 = vmul.f32 %v5992_v3, %v5748_v25  ;;  %v404_v41 = vadd.f32 %v6003_v8, %v368_v26  ;;  %v5861_v11 = vld [vmem:[%s5987_s27 + $0x28] sm:$0xff]  }
  0x17   : > { %v427_v18 = vmax.f32 %v395_v14, 0.0  ;;  %v428_v19 = vmax.f32 %v396_v15, 0.0  ;;  %248 = vst [vmem:[#allocation2 + $0x2c] sm:$0x1] %v5932_v1  ;;  %v383_v54 = vmul.f32 %v5992_v3, %v5763_v45  ;;  %v384_v56 = vmul.f32 %v5992_v3, %v5764_v49 }
  0x18   : > { %2503 = vmatpush.bf16.msra.mxu0 %v5621_v12  ;;  %5896 = vmatpush.bf16.msra.mxu1 %v5621_v12  ;;  %249 = vst [vmem:[#allocation2 + $0x30] sm:$0xf] %v5932_v1  ;;  %v435_v47 = vmax.f32 %v403_v32, 0.0  ;;  %v411_v48 = vadd.f32 %v6003_v8, %v375_v33  ;;  %v412_v52 = vadd.f32 %v6003_v8, %v376_v38  ;;  %v436_v53 = vmax.f32 %v404_v41, 0.0 }
  0x19   : > { %5897 = vmatpush.bf16.msra.mxu2 %v5621_v12  ;;  %5898 = vmatpush.bf16.msra.mxu3 %v5621_v12  ;;  %v459_v23 = vpack.c.bf16 %v427_v18, %v427_v18  ;;  %v460_v24 = vpack.c.bf16 %v428_v19, %v428_v19  ;;  %250 = vst [vmem:[#allocation2 + $0x34] sm:$0xf] %v5932_v1  ;;  %v5865_v12 = vld [vmem:[%s5987_s27 + $0x48] sm:$0xff]   ;;  %v5719_v14 = vunpack.c.l.bf16 %v5857_v10  ;;  %v5720_v15 = vunpack.c.h.bf16 %v5857_v10 }
  0x1a   : > { %251 = vst [vmem:[#allocation2 + $0x38] sm:$0x1] %v5932_v1  ;;  %v6075_v57 = vpack.c.bf16 %v435_v47, %v435_v47  ;;  %v443_v58 = vmax.f32 %v411_v48, 0.0  ;;  %v444_v59 = vmax.f32 %v412_v52, 0.0  ;;  %v6078_v60 = vpack.c.bf16 %v436_v53, %v436_v53 }
  0x1b   : > { %v495_v27 = vshrl.u32 %v459_v23, 16  ;;  %v498_v28 = vshll.u32 %v459_v23, 16  ;;  %v503_v29 = vshrl.u32 %v460_v24, 16  ;;  %v506_v30 = vshll.u32 %v460_v24, 16  ;;  %252 = vst [vmem:[#allocation2 + $0x3c] sm:$0xf] %v5932_v1 }
  0x1c   : > { %2504 = vmatpush.bf16.msra.mxu0 %v5620_v20  ;;  %5899 = vmatpush.bf16.msra.mxu1 %v5620_v20  ;;  %253 = vst [vmem:[#allocation2 + $0x40] sm:$0xf] %v5932_v1  ;;  %v419_v61 = vadd.f32 %v6003_v8, %v383_v54  ;;  %v420_v62 = vadd.f32 %v6003_v8, %v384_v56  ;;  %v563_v0 = vshrl.u32 %v6075_v57, 16  ;;  %v566_v6 = vshll.u32 %v6075_v57, 16 }
  0x1d   : > { %5900 = vmatpush.bf16.msra.mxu2 %v5620_v20  ;;  %5901 = vmatpush.bf16.msra.mxu3 %v5620_v20  ;;  %v497_v36 = vrot.slane %v495_v27, 7  ;;  %v6043_v37 = vrot.slane %v503_v29, 7  ;;  %254 = vst [vmem:[#allocation2 + $0x44] sm:$0x1] %v5932_v1  ;;  %v6086_v2 = vpack.c.bf16 %v443_v58, %v443_v58  ;;  %v6088_v4 = vpack.c.bf16 %v444_v59, %v444_v59 }
  0x1e   : > { %255 = vst [vmem:[#allocation2 + $0x48] sm:$0xf] %v5932_v1  ;;  %v571_v7 = vshrl.u32 %v6078_v60, 16  ;;  %v451_v9 = vmax.f32 %v419_v61, 0.0  ;;  %v452_v13 = vmax.f32 %v420_v62, 0.0  ;;  %v5735_v16 = vunpack.c.l.bf16 %v5861_v11 }
  0x1f   : > { %v500_v42 = vor.u32 %v498_v28, %v497_v36  ;;  %v501_v43 = vrot.slane %v497_v36, 4  ;;  %v508_v44 = vor.u32 %v506_v30, %v6043_v37  ;;  %256 = vst [vmem:[#allocation2 + $0x4c] sm:$0xf] %v5932_v1  ;;  %v574_v17 = vshll.u32 %v6078_v60, 16 }
  0x20   : > { %2505 = vmatpush.bf16.msra.mxu0 %v5619_v31  ;;  %5902 = vmatpush.bf16.msra.mxu1 %v5619_v31  ;;  %257 = vst [vmem:[#allocation2 + $0x50] sm:$0x1] %v5932_v1  ;;  %v631_v18 = vshrl.u32 %v6086_v2, 16  ;;  %v639_v19 = vshrl.u32 %v6088_v4, 16  ;;  %v5736_v20 = vunpack.c.h.bf16 %v5861_v11  ;;  %v361_v21 = vmul.f32 %v5992_v3, %v5719_v14 }
  0x21   : > { %5903 = vmatpush.bf16.msra.mxu2 %v5619_v31  ;;  %5904 = vmatpush.bf16.msra.mxu3 %v5619_v31  ;;  %v509_v50 = vsel %vm6039_vm4, %v501_v43, %v508_v44  ;;  %v819_v51 = vsel %vm6049_vm5, %v500_v42, %v818_v40  ;;  %258 = vst [vmem:[#allocation2 + $0x54] sm:$0xf] %v5932_v1  ;;  %v5751_v24 = vunpack.c.l.bf16 %v5865_v12  ;;  %v565_v25 = vrot.slane %v563_v0, 7  ;;  %v5869_v43 = vld [vmem:[%s5987_s27 + $0x68] sm:$0xff]  }
  0x22   : > { %820 = vst [vmem:[#allocation2 + $0xc] sm:$0xf] %v819_v51  ;;  %v362_v22 = vmul.f32 %v5992_v3, %v5720_v15  ;;  %v369_v23 = vmul.f32 %v5992_v3, %v5735_v16  ;;  %v6105_v26 = vrot.slane %v571_v7, 7  ;;  %v6107_v27 = vpack.c.bf16 %v451_v9, %v451_v9  ;;  %v6137_v60 = vld [vmem:[#allocation2 + $0x3c] sm:$0xf] }
  0x23   : > { %821 = vst [vmem:[#allocation2 + $0x10] sm:$0xf] %v509_v50  ;;  %v370_v28 = vmul.f32 %v5992_v3, %v5736_v20  ;;  %v6111_v29 = vpack.c.bf16 %v452_v13, %v452_v13  ;;  %v397_v30 = vadd.f32 %v6003_v8, %v361_v21  ;;  %v5752_v32 = vunpack.c.h.bf16 %v5865_v12 }
  0x24   : > { %2506 = vmatpush.bf16.msra.mxu0 %v5618_v46  ;;  %5905 = vmatpush.bf16.msra.mxu1 %v5618_v46  ;;  %259 = vst [vmem:[#allocation2 + $0x58] sm:$0xf] %v5932_v1  ;;  %v398_v31 = vadd.f32 %v6003_v8, %v362_v22  ;;  %v633_v34 = vrot.slane %v631_v18, 7  ;;  %v642_v36 = vshll.u32 %v6088_v4, 16  ;;  %v405_v38 = vadd.f32 %v6003_v8, %v369_v23 }
  0x25   : > { %5906 = vmatpush.bf16.msra.mxu2 %v5618_v46  ;;  %5907 = vmatpush.bf16.msra.mxu3 %v5618_v46  ;;  %260 = vst [vmem:[#allocation2 + $0x5c] sm:$0x1] %v5932_v1  ;;  %v6119_v41 = vrot.slane %v639_v19, 7  ;;  %v377_v42 = vmul.f32 %v5992_v3, %v5751_v24  ;;  %v429_v45 = vmax.f32 %v397_v30, 0.0  ;;  %v406_v47 = vadd.f32 %v6003_v8, %v370_v28  ;;  %v5862_v30 = vld [vmem:[%s5987_s27 + $0x30] sm:$0xff]  }
  0x26   : > { %261 = vst [vmem:[#allocation2 + $0x60] sm:$0xf] %v5932_v1  ;;  %v430_v46 = vmax.f32 %v398_v31, 0.0  ;;  %v569_v48 = vrot.slane %v565_v25, 4  ;;  %v699_v49 = vshrl.u32 %v6107_v27, 16  ;;  %v707_v50 = vshrl.u32 %v6111_v29, 16 }
  0x27   : > { %262 = vst [vmem:[#allocation2 + $0x64] sm:$0xf] %v5932_v1  ;;  %v378_v51 = vmul.f32 %v5992_v3, %v5752_v32  ;;  %v576_v52 = vor.u32 %v574_v17, %v6105_v26  ;;  %v437_v53 = vmax.f32 %v405_v38, 0.0  ;;  %v5767_v54 = vunpack.c.l.bf16 %v5869_v43  ;;  %v5640_v31 = vld [vmem:[%s7095_s3 + $0x178] sm:$0xff] }
  0x28   : > { %2507 = vmatpush.bf16.msra.mxu0 %v5617_v55  ;;  %5908 = vmatpush.bf16.msra.mxu1 %v5617_v55  ;;  %263 = vst [vmem:[#allocation2 + $0x68] sm:$0x1] %v5932_v1  ;;  %v6132_v56 = vor.u32 %v566_v6, %v565_v25  ;;  %v634_v57 = vshll.u32 %v6086_v2, 16  ;;  %v637_v58 = vrot.slane %v633_v34, 4  ;;  %v413_v59 = vadd.f32 %v6003_v8, %v377_v42  ;;  %v5552_v32 = vld [vmem:[%s7095_s3 + $0x38] sm:$0xff] }
  0x29   : > { %5909 = vmatpush.bf16.msra.mxu2 %v5617_v55  ;;  %5910 = vmatpush.bf16.msra.mxu3 %v5617_v55  ;;  %v934_v63 = vld [vmem:[#allocation2 + $0xc] sm:$0xf]  ;;  %264 = vst [vmem:[#allocation2 + $0x6c] sm:$0xf] %v5932_v1  ;;  %v5768_v55 = vunpack.c.h.bf16 %v5869_v43  ;;  %v644_v61 = vor.u32 %v642_v36, %v6119_v41  ;;  %v6140_v62 = vpack.c.bf16 %v429_v45, %v429_v45  ;;  %v438_v0 = vmax.f32 %v406_v47, 0.0 }
  0x2a   : > { %v935_v5 = vld [vmem:[#allocation2 + $0x10] sm:$0xf]  ;;  %970 = vst [vmem:[#allocation3 + $0x18] sm:$0xf] %v934_v63  ;;  %v6142_v63 = vpack.c.bf16 %v430_v46, %v430_v46  ;;  %v701_v4 = vrot.slane %v699_v49, 7  ;;  %v710_v2 = vshll.u32 %v6111_v29, 16  ;;  %v414_v6 = vadd.f32 %v6003_v8, %v378_v51 }
  0x2b   : > { %971 = vst [vmem:[#allocation3 + $0x24] sm:$0xf] %v935_v5  ;;  %v6145_v5 = vrot.slane %v707_v50, 7  ;;  %v6152_v7 = vsel %vm6039_vm4, %v569_v48, %v576_v52  ;;  %v6154_v9 = vpack.c.bf16 %v437_v53, %v437_v53  ;;  %v385_v10 = vmul.f32 %v5992_v3, %v5767_v54  ;;  %v5858_v29 = vld [vmem:[%s5987_s27 + $0x10] sm:$0xff]   ;;  %v5560_v50 = vld [vmem:[%s7095_s3 + $0x78] sm:$0xff] }
  0x2c   : > { %265 = vst [vmem:[#allocation2 + $0x70] sm:$0xf] %v5932_v1  ;;  %v386_v11 = vmul.f32 %v5992_v3, %v5768_v55  ;;  %v849_v12 = vsel %vm6049_vm5, %v6132_v56, %v6137_v60  ;;  %v6163_v13 = vor.u32 %v634_v57, %v633_v34  ;;  %v702_v14 = vshll.u32 %v6107_v27, 16  ;;  %v5639_v48 = vld [vmem:[%s7095_s3 + $0x170] sm:$0xff]  ;;  %3256 = vmatpush.bf16.msrb.mxu0 %v5560_v50 }
  0x2d   : > { %266 = vst [vmem:[#allocation2 + $0x74] sm:$0x1] %v5932_v1  ;;  %v445_v15 = vmax.f32 %v413_v59, 0.0  ;;  %v6169_v16 = vsel %vm6039_vm4, %v637_v58, %v644_v61  ;;  %v512_v17 = vshrl.u32 %v6140_v62, 16  ;;  %v520_v18 = vshrl.u32 %v6142_v63, 16  ;;  %2678 = vmatpush.bf16.msrb.mxu2 %v5640_v31  ;;  %3167 = vmatpush.bf16.msrb.mxu3 %v5552_v32  ;;  %v5551_v49 = vld [vmem:[%s7095_s3 + $0x30] sm:$0xff] }
  0x2e   : > { %267 = vst [vmem:[#allocation2 + $0x78] sm:$0xf] %v5932_v1  ;;  %v6173_v19 = vpack.c.bf16 %v438_v0, %v438_v0  ;;  %v705_v20 = vrot.slane %v701_v4, 4  ;;  %v712_v21 = vor.u32 %v710_v2, %v6145_v5  ;;  %v515_v22 = vshll.u32 %v6140_v62, 16 }
  0x2f   : > { %268 = vst [vmem:[#allocation2 + $0x7c] sm:$0xf] %v5932_v1  ;;  %v446_v23 = vmax.f32 %v414_v6, 0.0  ;;  %v523_v24 = vshll.u32 %v6142_v63, 16  ;;  %v580_v25 = vshrl.u32 %v6154_v9, 16  ;;  %v421_v27 = vadd.f32 %v6003_v8, %v385_v10 }
  0x30   : > { %269 = vst [vmem:[#allocation2 + $0x80] sm:$0x1] %v5932_v1  ;;  %v422_v28 = vadd.f32 %v6003_v8, %v386_v11  ;;  %v583_v34 = vshll.u32 %v6154_v9, 16  ;;  %v6196_v36 = vpack.c.bf16 %v445_v15, %v445_v15  ;;  %v5723_v38 = vunpack.c.l.bf16 %v5858_v29  ;;  %v876_v57 = vld [vmem:[#allocation2 + $0x6c] sm:$0xf] }
  0x31   : > { %v4583_v33 = vld [vmem:[#allocation3 + $0x18] sm:$0xf]  ;;  %270 = vst [vmem:[#allocation2 + $0x84] sm:$0xf] %v5932_v1  ;;  %v6199_v42 = vrot.slane %v512_v17, 7  ;;  %v6201_v43 = vrot.slane %v520_v18, 7  ;;  %v5739_v45 = vunpack.c.l.bf16 %v5862_v30  ;;  %v6205_v46 = vor.u32 %v702_v14, %v701_v4  ;;  %2679 = vmatpush.bf16.msrb.mxu2 %v5639_v48  ;;  %3168 = vmatpush.bf16.msrb.mxu3 %v5551_v49 }
  0x32   : > { %v5570_v40 = vld [vmem:[#allocation3 + $0x20] sm:$0xf0]  ;;  %271 = vst [vmem:[#allocation2 + $0x88] sm:$0xf] %v5932_v1  ;;  %v6209_v47 = vsel %vm6039_vm4, %v705_v20, %v712_v21  ;;  %v591_v51 = vshll.u32 %v6173_v19, 16  ;;  %v453_v52 = vmax.f32 %v421_v27, 0.0  ;;  %v363_v54 = vmul.f32 %v5992_v3, %v5723_v38 }
  0x33   : > { %v4584_v44 = vor.u32 %v5570_v40, %v4583_v33  ;;  %272 = vst [vmem:[#allocation2 + $0x8c] sm:$0x1] %v5932_v1  ;;  %v5632_v33 = vld [vmem:[%s7095_s3 + $0x138] sm:$0xff]  ;;  %v5724_v40 = vunpack.c.h.bf16 %v5858_v29  ;;  %v454_v53 = vmax.f32 %v422_v28, 0.0  ;;  %v5740_v55 = vunpack.c.h.bf16 %v5862_v30  ;;  %v5866_v28 = vld [vmem:[%s5987_s27 + $0x50] sm:$0xff]  }
  0x34   : > { %273 = vst [vmem:[#allocation2 + $0x90] sm:$0xf] %v5932_v1  ;;  %2589 = vmatpush.bf16.msrb.mxu1 %v5632_v33  ;;  %v6224_v58 = vrot.slane %v580_v25, 7  ;;  %v6226_v59 = vpack.c.bf16 %v446_v23, %v446_v23  ;;  %v648_v61 = vshrl.u32 %v6196_v36, 16  ;;  %v518_v63 = vrot.slane %v6199_v42, 4  ;;  %v5870_v49 = vld [vmem:[%s5987_s27 + $0x70] sm:$0xff]  }
  0x35   : > { %2508 = vmatmul.bf16.vlgmr.msra.gmra.mxu0 %v4584_v44  ;;  %274 = vst [vmem:[#allocation2 + $0x94] sm:$0xf] %v5932_v1  ;;  %v588_v44 = vshrl.u32 %v6173_v19, 16  ;;  %v364_v62 = vmul.f32 %v5992_v3, %v5724_v40  ;;  %v651_v0 = vshll.u32 %v6196_v36, 16  ;;  %v399_v4 = vadd.f32 %v6003_v8, %v363_v54  ;;  %v827_v18 = vld [vmem:[#allocation2 + $0x18] sm:$0xf] }
  0x36   : > { %275 = vst [vmem:[#allocation2 + $0x98] sm:$0x1] %v5932_v1  ;;  %v371_v2 = vmul.f32 %v5992_v3, %v5739_v45  ;;  %v6236_v6 = vpack.c.bf16 %v453_v52, %v453_v52  ;;  %v6238_v9 = vpack.c.bf16 %v454_v53, %v454_v53  ;;  %v877_v11 = vsel %vm6049_vm5, %v6163_v13, %v876_v57  ;;  %v6300_v54 = vld [vmem:[%s5987_s27 + $0x18] sm:$0xff]  }
  0x37   : > { %276 = vst [vmem:[#allocation2 + $0x9c] sm:$0xf] %v5932_v1  ;;  %v400_v10 = vadd.f32 %v6003_v8, %v364_v62  ;;  %v517_v15 = vor.u32 %v515_v22, %v6199_v42  ;;  %v525_v17 = vor.u32 %v523_v24, %v6201_v43  ;;  %v372_v20 = vmul.f32 %v5992_v3, %v5740_v55  ;;  %v6306_v19 = vld [vmem:[#allocation2 + $0x78] sm:$0xf] }
  0x38   : > { %277 = vst [vmem:[#allocation2 + $0xa0] sm:$0xf] %v5932_v1  ;;  %v6250_v21 = vor.u32 %v583_v34, %v6224_v58  ;;  %v6252_v23 = vrot.slane %v648_v61, 7  ;;  %v431_v25 = vmax.f32 %v399_v4, 0.0  ;;  %v586_v13 = vrot.slane %v6224_v58, 4  ;;  %v5638_v61 = vld [vmem:[%s7095_s3 + $0x168] sm:$0xff] }
  0x39   : > { %278 = vst [vmem:[#allocation2 + $0xa4] sm:$0x1] %v5932_v1  ;;  %v432_v27 = vmax.f32 %v400_v10, 0.0  ;;  %v6260_v22 = vrot.slane %v588_v44, 7  ;;  %v656_v24 = vshrl.u32 %v6226_v59, 16  ;;  %v716_v30 = vshrl.u32 %v6236_v6, 16  ;;  %2680 = vmatpush.bf16.msrb.mxu2 %v5638_v61 }
  0x3a   : > { %279 = vst [vmem:[#allocation2 + $0xa8] sm:$0xf] %v5932_v1  ;;  %v724_v56 = vshrl.u32 %v6238_v9, 16  ;;  %v6271_v60 = vpack.c.bf16 %v431_v25, %v431_v25  ;;  %v659_v31 = vshll.u32 %v6226_v59, 16  ;;  %v654_v33 = vrot.slane %v6252_v23, 4  ;;  %v5559_v10 = vld [vmem:[%s7095_s3 + $0x70] sm:$0xff] }
  0x3b   : > { %280 = vst [vmem:[#allocation2 + $0xac] sm:$0xf] %v5932_v1  ;;  %v6276_v32 = vpack.c.bf16 %v432_v27, %v432_v27  ;;  %v5755_v38 = vunpack.c.l.bf16 %v5866_v28  ;;  %v5756_v40 = vunpack.c.h.bf16 %v5866_v28  ;;  %v526_v42 = vsel %vm6039_vm4, %v518_v63, %v525_v17  ;;  %v6284_v44 = vld [vmem:[#allocation2 + $0x48] sm:$0xf]  ;;  %3257 = vmatpush.bf16.msrb.mxu0 %v5559_v10 }
  0x3c   : > { %281 = vst [vmem:[#allocation2 + $0xb0] sm:$0x1] %v5932_v1  ;;  %v529_v34 = vshrl.u32 %v6271_v60, 16  ;;  %v6286_v45 = vrot.slane %v656_v24, 7  ;;  %v6294_v50 = vrot.slane %v716_v30, 7  ;;  %v6296_v52 = vrot.slane %v724_v56, 7 }
  0x3d   : > { %282 = vst [vmem:[#allocation2 + $0xb4] sm:$0xf] %v5932_v1  ;;  %v727_v53 = vshll.u32 %v6238_v9, 16  ;;  %v532_v57 = vshll.u32 %v6271_v60, 16  ;;  %v537_v58 = vshrl.u32 %v6276_v32, 16  ;;  %v379_v62 = vmul.f32 %v5992_v3, %v5755_v38  ;;  %v5550_v9 = vld [vmem:[%s7095_s3 + $0x28] sm:$0xff] }
  0x3e   : > { %283 = vst [vmem:[#allocation2 + $0xb8] sm:$0xf] %v5932_v1  ;;  %v904_v14 = vld [vmem:[#allocation2 + $0x9c] sm:$0xf]  ;;  %v6302_v55 = vrot.slane %v529_v34, 7  ;;  %v380_v63 = vmul.f32 %v5992_v3, %v5756_v40  ;;  %v5771_v4 = vunpack.c.l.bf16 %v5870_v49  ;;  %3169 = vmatpush.bf16.msrb.mxu3 %v5550_v9 }
  0x3f   : > { %284 = vst [vmem:[#allocation2 + $0xbc] sm:$0x1] %v5932_v1  ;;  %v905_v29 = vsel %vm6049_vm5, %v6205_v46, %v904_v14  ;;  %v719_v46 = vshll.u32 %v6236_v6, 16  ;;  %v6319_v6 = vor.u32 %v651_v0, %v6252_v23  ;;  %v5772_v14 = vunpack.c.h.bf16 %v5870_v49  ;;  %v834_v49 = vld [vmem:[#allocation2 + $0x24] sm:$0xf] }
  0x40   : > { %285 = vst [vmem:[#allocation2 + $0xc0] sm:$0xf] %v5932_v1  ;;  %v856_v0 = vsel %vm6049_vm5, %v6250_v21, %v6284_v44  ;;  %v387_v25 = vmul.f32 %v5992_v3, %v5771_v4  ;;  %v5549_v21 = vld [vmem:[%s7095_s3 + $0x20] sm:$0xff]  ;;  %v6363_v40 = vrot.slane %v537_v58, 7  ;;  %v534_v58 = vor.u32 %v532_v57, %v6302_v55 }
  0x41   : > { %286 = vst [vmem:[#allocation2 + $0xc4] sm:$0xf] %v5932_v1  ;;  %v6344_v24 = vld [vmem:[#allocation2 + $0xa8] sm:$0xf]  ;;  %v721_v56 = vor.u32 %v719_v46, %v6294_v50  ;;  %v884_v38 = vsel %vm6049_vm5, %v6319_v6, %v6306_v19  ;;  %v535_v4 = vrot.slane %v6302_v55, 4 }
  0x42   : > { %287 = vst [vmem:[#allocation2 + $0xc8] sm:$0x1] %v5932_v1  ;;  %3170 = vmatpush.bf16.msrb.mxu3 %v5549_v21 }
  0x43   : > { %288 = vst [vmem:[#allocation2 + $0xcc] sm:$0xf] %v5932_v1 }
  0x44   : > { %289 = vst [vmem:[#allocation2 + $0xd0] sm:$0xf] %v5932_v1 }
  0x45   : > { %290 = vst [vmem:[#allocation2 + $0xd4] sm:$0x1] %v5932_v1  ;;  %v407_v1 = vadd.f32 %v6003_v8, %v371_v2 }
  0x46   : > { %850 = vst [vmem:[#allocation2 + $0x3c] sm:$0xf] %v849_v12  ;;  %v828_v12 = vsel %vm6049_vm5, %v517_v15, %v827_v18  ;;  %v5727_v15 = vunpack.c.l.bf16 %v6300_v54  ;;  %v5630_v18 = vld [vmem:[%s7095_s3 + $0x128] sm:$0xff] }
  0x47   : > { %851 = vst [vmem:[#allocation2 + $0x40] sm:$0xf] %v6152_v7  ;;  %v408_v7 = vadd.f32 %v6003_v8, %v372_v20  ;;  %v439_v48 = vmax.f32 %v407_v1, 0.0  ;;  %v5637_v20 = vld [vmem:[%s7095_s3 + $0x160] sm:$0xff]  ;;  %v5558_v1 = vld [vmem:[%s7095_s3 + $0x68] sm:$0xff] }
  0x48   : > { %878 = vst [vmem:[#allocation2 + $0x6c] sm:$0xf] %v877_v11  ;;  %v365_v44 = vmul.f32 %v5992_v3, %v5727_v15  ;;  %2681 = vmatpush.bf16.msrb.mxu2 %v5637_v20  ;;  %3258 = vmatpush.bf16.msrb.mxu0 %v5558_v1  ;;  %v5728_v20 = vunpack.c.h.bf16 %v6300_v54 }
  0x49   : > { %879 = vst [vmem:[#allocation2 + $0x70] sm:$0xf] %v6169_v16  ;;  %v593_v16 = vor.u32 %v591_v51, %v6260_v22  ;;  %v5631_v51 = vld [vmem:[%s7095_s3 + $0x130] sm:$0xff]  ;;  %v6327_v11 = vpack.c.bf16 %v439_v48, %v439_v48  ;;  %v729_v48 = vor.u32 %v727_v53, %v6296_v52 }
  0x4a   : > { %906 = vst [vmem:[#allocation2 + $0x9c] sm:$0xf] %v905_v29  ;;  %2590 = vmatpush.bf16.msrb.mxu1 %v5631_v51  ;;  %v388_v29 = vmul.f32 %v5992_v3, %v5772_v14  ;;  %v6389_v23 = vadd.f32 %v6003_v8, %v365_v44 }
  0x4b   : > { %907 = vst [vmem:[#allocation2 + $0xa0] sm:$0xf] %v6209_v47  ;;  %v440_v47 = vmax.f32 %v408_v7, 0.0  ;;  %v594_v36 = vsel %vm6039_vm4, %v586_v13, %v593_v16  ;;  %v661_v13 = vor.u32 %v659_v31, %v6286_v45  ;;  %v415_v31 = vadd.f32 %v6003_v8, %v379_v62 }
  0x4c   : > { %829 = vst [vmem:[#allocation2 + $0x18] sm:$0xf] %v828_v12  ;;  %v540_v12 = vshll.u32 %v6276_v32, 16  ;;  %v416_v7 = vadd.f32 %v6003_v8, %v380_v63  ;;  %v722_v32 = vrot.slane %v6294_v50, 4  ;;  %v600_v16 = vshll.u32 %v6327_v11, 16 }
  0x4d   : > { %v942_v59 = vld [vmem:[#allocation2 + $0x3c] sm:$0xf]  ;;  %830 = vst [vmem:[#allocation2 + $0x1c] sm:$0xf] %v526_v42  ;;  %v6352_v28 = vpack.c.bf16 %v440_v47, %v440_v47  ;;  %v597_v42 = vshrl.u32 %v6327_v11, 16  ;;  %v423_v47 = vadd.f32 %v6003_v8, %v387_v25  ;;  %v424_v53 = vadd.f32 %v6003_v8, %v388_v29  ;;  %v5629_v11 = vld [vmem:[%s7095_s3 + $0x120] sm:$0xff] }
  0x4e   : > { %v943_v2 = vld [vmem:[#allocation2 + $0x40] sm:$0xf]  ;;  %978 = vst [vmem:[#allocation3 + $0x78] sm:$0xf] %v942_v59  ;;  %2591 = vmatpush.bf16.msrb.mxu1 %v5630_v18  ;;  %v662_v61 = vsel %vm6039_vm4, %v654_v33, %v661_v13  ;;  %v912_v62 = vsel %vm6049_vm5, %v721_v56, %v6344_v24  ;;  %v447_v63 = vmax.f32 %v415_v31, 0.0  ;;  %v448_v60 = vmax.f32 %v416_v7, 0.0 }
  0x4f   : > { %979 = vst [vmem:[#allocation3 + $0x84] sm:$0xf] %v943_v2  ;;  %v950_v17 = vld [vmem:[#allocation2 + $0x6c] sm:$0xf]  ;;  %v605_v19 = vshrl.u32 %v6352_v28, 16  ;;  %v608_v50 = vshll.u32 %v6352_v28, 16  ;;  %v542_v2 = vor.u32 %v540_v12, %v6363_v40  ;;  %v730_v55 = vsel %vm6039_vm4, %v722_v32, %v729_v48 }
  0x50   : > { %v951_v27 = vld [vmem:[#allocation2 + $0x70] sm:$0xf]  ;;  %986 = vst [vmem:[#allocation3 + $0xd8] sm:$0xf] %v950_v17  ;;  %v6386_v6 = vrot.slane %v597_v42, 7  ;;  %v6391_v10 = vpack.c.bf16 %v447_v63, %v447_v63  ;;  %v6393_v14 = vpack.c.bf16 %v448_v60, %v448_v60  ;;  %v455_v15 = vmax.f32 %v423_v47, 0.0 }
  0x51   : > { %987 = vst [vmem:[#allocation3 + $0xe4] sm:$0xf] %v951_v27  ;;  %v958_v30 = vld [vmem:[#allocation2 + $0x9c] sm:$0xf]  ;;  %v456_v18 = vmax.f32 %v424_v53, 0.0  ;;  %v6401_v13 = vrot.slane %v605_v19, 7  ;;  %v543_v29 = vsel %vm6039_vm4, %v535_v4, %v542_v2  ;;  %v366_v19 = vmul.f32 %v5992_v3, %v5728_v20 }
  0x52   : > { %v959_v34 = vld [vmem:[#allocation2 + $0xa0] sm:$0xf]  ;;  %994 = vst [vmem:[#allocation3 + $0x138] sm:$0xf] %v958_v30  ;;  %v5863_v25 = vld [vmem:[%s5987_s27 + $0x38] sm:$0xff]   ;;  %v665_v24 = vshrl.u32 %v6391_v10, 16  ;;  %v6404_v21 = vpack.c.bf16 %v455_v15, %v455_v15  ;;  %v602_v60 = vor.u32 %v600_v16, %v6386_v6  ;;  %2592 = vmatpush.bf16.msrb.mxu1 %v5629_v11 }
  0x53   : > { %995 = vst [vmem:[#allocation3 + $0x144] sm:$0xf] %v959_v34  ;;  %v936_v46 = vld [vmem:[#allocation2 + $0x18] sm:$0xf]  ;;  %v603_v30 = vrot.slane %v6386_v6, 4  ;;  %v673_v54 = vshrl.u32 %v6393_v14, 16  ;;  %v6410_v56 = vpack.c.bf16 %v456_v18, %v456_v18  ;;  %v5744_v32 = vunpack.c.h.bf16 %v5863_v25 }
  0x54   : > { %v937_v59 = vld [vmem:[#allocation2 + $0x1c] sm:$0xf]  ;;  %972 = vst [vmem:[#allocation3 + $0x30] sm:$0xf] %v936_v46  ;;  %v733_v7 = vshrl.u32 %v6404_v21, 16  ;;  %v433_v34 = vmax.f32 %v6389_v23, 0.0 }
  0x55   : > { %v4631_v51 = vld [vmem:[#allocation3 + $0x78] sm:$0xf]  ;;  %973 = vst [vmem:[#allocation3 + $0x3c] sm:$0xf] %v937_v59  ;;  %v668_v44 = vshll.u32 %v6391_v10, 16  ;;  %v676_v46 = vshll.u32 %v6393_v14, 16  ;;  %v374_v16 = vmul.f32 %v5992_v3, %v5744_v32 }
  0x56   : > { %v5582_v57 = vld [vmem:[#allocation3 + $0x80] sm:$0xf0]  ;;  %857 = vst [vmem:[#allocation2 + $0x48] sm:$0xf] %v856_v0  ;;  %v835_v0 = vsel %vm6049_vm5, %v534_v58, %v834_v49  ;;  %v6419_v59 = vrot.slane %v665_v24, 7  ;;  %v6421_v58 = vrot.slane %v673_v54, 7 }
  0x57   : > { %v4632_v9 = vor.u32 %v5582_v57, %v4631_v51  ;;  %v4679_v33 = vld [vmem:[#allocation3 + $0xd8] sm:$0xf]  ;;  %858 = vst [vmem:[#allocation2 + $0x4c] sm:$0xf] %v594_v36  ;;  %v6417_v48 = vld [vmem:[%s5987_s27 + $0x58] sm:$0xff]   ;;  %v736_v57 = vshll.u32 %v6404_v21, 16 }
  0x58   : > { %v5594_v17 = vld [vmem:[#allocation3 + $0xe0] sm:$0xf0]  ;;  %885 = vst [vmem:[#allocation2 + $0x78] sm:$0xf] %v884_v38  ;;  %v5743_v38 = vunpack.c.l.bf16 %v5863_v25  ;;  %v862_v51 = vld [vmem:[#allocation2 + $0x54] sm:$0xf]  ;;  %v670_v15 = vor.u32 %v668_v44, %v6419_v59  ;;  %v5759_v28 = vunpack.c.l.bf16 %v6417_v48 }
  0x59   : > { %2528 = vmatmul.bf16.vlgmr.msra.gmra.mxu1 %v4632_v9  ;;  %v4680_v27 = vor.u32 %v5594_v17, %v4679_v33  ;;  %v4727_v36 = vld [vmem:[#allocation3 + $0x138] sm:$0xf]  ;;  %886 = vst [vmem:[#allocation2 + $0x7c] sm:$0xf] %v662_v61  ;;  %v6424_v61 = vrot.slane %v733_v7, 7  ;;  %v744_v4 = vshll.u32 %v6410_v56, 16  ;;  %v610_v9 = vor.u32 %v608_v50, %v6401_v13 }
  0x5a   : > { %v5606_v1 = vld [vmem:[#allocation3 + $0x140] sm:$0xf0]  ;;  %913 = vst [vmem:[#allocation2 + $0xa8] sm:$0xf] %v912_v62  ;;  %v741_v62 = vshrl.u32 %v6410_v56, 16  ;;  %v373_v2 = vmul.f32 %v5992_v3, %v5743_v38  ;;  %v671_v17 = vrot.slane %v6419_v59, 4  ;;  %v863_v21 = vsel %vm6049_vm5, %v602_v60, %v862_v51 }
  0x5b   : > { %2548 = vmatmul.bf16.vlgmr.msra.gmra.mxu2 %v4680_v27  ;;  %v4728_v12 = vor.u32 %v5606_v1, %v4727_v36  ;;  %v4595_v31 = vld [vmem:[#allocation3 + $0x30] sm:$0xf]  ;;  %914 = vst [vmem:[#allocation2 + $0xac] sm:$0xf] %v730_v55  ;;  %v890_v33 = vld [vmem:[#allocation2 + $0x84] sm:$0xf]  ;;  %v402_v55 = vadd.f32 %v6003_v8, %v366_v19  ;;  %v465_v27 = vpack.c.bf16 %v433_v34, %v433_v34  ;;  %v5760_v36 = vunpack.c.h.bf16 %v6417_v48 }
  0x5c   : > { %v5573_v42 = vld [vmem:[#allocation3 + $0x38] sm:$0xf0]  ;;  %836 = vst [vmem:[#allocation2 + $0x24] sm:$0xf] %v835_v0  ;;  %v6436_v10 = vrot.slane %v741_v62, 7  ;;  %v678_v0 = vor.u32 %v676_v46, %v6421_v58  ;;  %v739_v18 = vrot.slane %v6424_v61, 4  ;;  %v738_v1 = vor.u32 %v736_v57, %v6424_v61 }
  0x5d   : > { %2568 = vmatmul.bf16.vlgmr.msra.gmra.mxu3 %v4728_v12  ;;  %v4596_v49 = vor.u32 %v5573_v42, %v4595_v31  ;;  %v944_v47 = vld [vmem:[#allocation2 + $0x48] sm:$0xf]  ;;  %837 = vst [vmem:[#allocation2 + $0x28] sm:$0xf] %v543_v29  ;;  %v918_v20 = vld [vmem:[#allocation2 + $0xb4] sm:$0xf]  ;;  %v409_v56 = vadd.f32 %v6003_v8, %v373_v2  ;;  %v611_v31 = vsel %vm6039_vm4, %v603_v30, %v610_v9 }
  0x5e   : > { %v945_v53 = vld [vmem:[#allocation2 + $0x4c] sm:$0xf]  ;;  %980 = vst [vmem:[#allocation3 + $0x90] sm:$0xf] %v944_v47  ;;  %v5636_v25 = vld [vmem:[%s7095_s3 + $0x158] sm:$0xff]  ;;  %v5557_v54 = vld [vmem:[%s7095_s3 + $0x60] sm:$0xff]  ;;  %v746_v7 = vor.u32 %v744_v4, %v6436_v10  ;;  %v410_v42 = vadd.f32 %v6003_v8, %v374_v16  ;;  %v891_v6 = vsel %vm6049_vm5, %v670_v15, %v890_v33  ;;  %v381_v32 = vmul.f32 %v5992_v3, %v5759_v28 }
  0x5f   : > { %2513 = vmatmul.bf16.gmra.mxu0 %v4596_v49  ;;  %981 = vst [vmem:[#allocation3 + $0x9c] sm:$0xf] %v945_v53  ;;  %v952_v63 = vld [vmem:[#allocation2 + $0x78] sm:$0xf]  ;;  %2682 = vmatpush.bf16.msrb.mxu2 %v5636_v25  ;;  %v5635_v38 = vld [vmem:[%s7095_s3 + $0x150] sm:$0xff]  ;;  %v679_v8 = vsel %vm6039_vm4, %v671_v17, %v678_v0  ;;  %v434_v49 = vmax.f32 %v402_v55, 0.0  ;;  %v382_v59 = vmul.f32 %v5992_v3, %v5760_v36 }
  0x60   : > { %v953_v23 = vld [vmem:[#allocation2 + $0x7c] sm:$0xf]  ;;  %988 = vst [vmem:[#allocation3 + $0xf0] sm:$0xf] %v952_v63  ;;  %3259 = vmatpush.bf16.msrb.mxu0 %v5557_v54  ;;  %v5547_v30 = vld [vmem:[%s7095_s3 + $0x10] sm:$0xff]  ;;  %v546_v47 = vshrl.u32 %v465_v27, 16  ;;  %v919_v51 = vsel %vm6049_vm5, %v738_v1, %v918_v20  ;;  %v747_v60 = vsel %vm6039_vm4, %v739_v18, %v746_v7 }
  0x61   : > { %989 = vst [vmem:[#allocation3 + $0xfc] sm:$0xf] %v953_v23  ;;  %v960_v14 = vld [vmem:[#allocation2 + $0xa8] sm:$0xf]  ;;  %v5548_v29 = vld [vmem:[%s7095_s3 + $0x18] sm:$0xff]  ;;  %v549_v61 = vshll.u32 %v465_v27, 16  ;;  %v466_v57 = vpack.c.bf16 %v434_v49, %v434_v49 }
  0x62   : > { %v961_v50 = vld [vmem:[#allocation2 + $0xac] sm:$0xf]  ;;  %996 = vst [vmem:[#allocation3 + $0x150] sm:$0xf] %v960_v14  ;;  %v5628_v34 = vld [vmem:[%s7095_s3 + $0x118] sm:$0xff]  ;;  %3171 = vmatpush.bf16.msrb.mxu3 %v5548_v29  ;;  %v441_v62 = vmax.f32 %v409_v56, 0.0 }
  0x63   : > { %997 = vst [vmem:[#allocation3 + $0x15c] sm:$0xf] %v961_v50  ;;  %v938_v24 = vld [vmem:[#allocation2 + $0x24] sm:$0xf]  ;;  %v5556_v46 = vld [vmem:[%s7095_s3 + $0x58] sm:$0xff]  ;;  %2593 = vmatpush.bf16.msrb.mxu1 %v5628_v34  ;;  %2683 = vmatpush.bf16.msrb.mxu2 %v5635_v38  ;;  %v548_v4 = vrot.slane %v546_v47, 7 }
  0x64   : > { %v939_v12 = vld [vmem:[#allocation2 + $0x28] sm:$0xf]  ;;  %974 = vst [vmem:[#allocation3 + $0x48] sm:$0xf] %v938_v24  ;;  %v442_v2 = vmax.f32 %v410_v42, 0.0  ;;  %v473_v33 = vpack.c.bf16 %v441_v62, %v441_v62  ;;  %3260 = vmatpush.bf16.msrb.mxu0 %v5556_v46  ;;  %v554_v55 = vshrl.u32 %v466_v57, 16 }
  0x65   : > { %v4643_v44 = vld [vmem:[#allocation3 + $0x90] sm:$0xf]  ;;  %975 = vst [vmem:[#allocation3 + $0x54] sm:$0xf] %v939_v12  ;;  %v841_v9 = vld [vmem:[#allocation2 + $0x30] sm:$0xf]  ;;  %v551_v15 = vor.u32 %v549_v61, %v548_v4 }
  0x66   : > { %v5585_v48 = vld [vmem:[#allocation3 + $0x98] sm:$0xf0]  ;;  %864 = vst [vmem:[#allocation2 + $0x54] sm:$0xf] %v863_v21  ;;  %3172 = vmatpush.bf16.msrb.mxu3 %v5547_v30  ;;  %v5922_v11 = vld [vmem:[%s7094_s2] ss:$0 sm:$0xff]  ;;  %v474_v28 = vpack.c.bf16 %v442_v2, %v442_v2 }
  0x67   : > { %v4644_v19 = vor.u32 %v5585_v48, %v4643_v44  ;;  %v4691_v53 = vld [vmem:[#allocation3 + $0xf0] sm:$0xf]  ;;  %865 = vst [vmem:[#allocation2 + $0x58] sm:$0xf] %v611_v31  ;;  %v417_v16 = vadd.f32 %v5922_v11, %v381_v32  ;;  %v552_v17 = vrot.slane %v548_v4, 4  ;;  %v557_v18 = vshll.u32 %v466_v57, 16 }
  0x68   : > { %v5597_v63 = vld [vmem:[#allocation3 + $0xf8] sm:$0xf0]  ;;  %892 = vst [vmem:[#allocation2 + $0x84] sm:$0xf] %v891_v6  ;;  %v614_v20 = vshrl.u32 %v473_v33, 16  ;;  %v418_v25 = vadd.f32 %v5922_v11, %v382_v59  ;;  %v6493_v36 = vrot.slane %v554_v55, 7  ;;  %v842_v24 = vsel %vm6049_vm5, %v551_v15, %v841_v9 }
  0x69   : > { %2533 = vmatmul.bf16.gmra.mxu1 %v4644_v19  ;;  %v4692_v23 = vor.u32 %v5597_v63, %v4691_v53  ;;  %v4739_v3 = vld [vmem:[#allocation3 + $0x150] sm:$0xf]  ;;  %893 = vst [vmem:[#allocation2 + $0x88] sm:$0xf] %v679_v8  ;;  %v617_v21 = vshll.u32 %v473_v33, 16  ;;  %v622_v1 = vshrl.u32 %v474_v28, 16 }
  0x6a   : > { %v5609_v14 = vld [vmem:[#allocation3 + $0x158] sm:$0xf0]  ;;  %920 = vst [vmem:[#allocation2 + $0xb4] sm:$0xf] %v919_v51  ;;  %v5871_v29 = vld [vmem:[%s5987_s27 + $0x78] sm:$0xff]   ;;  %v616_v12 = vrot.slane %v614_v20, 7  ;;  %v559_v38 = vor.u32 %v557_v18, %v6493_v36  ;;  %s7023_s27 = scalar_lea.vmem %s7096_s4, %s5495_s24 }
  0x6b   : > { %2553 = vmatmul.bf16.gmra.mxu2 %v4692_v23  ;;  %v4740_v50 = vor.u32 %v5609_v14, %v4739_v3  ;;  %v4607_v0 = vld [vmem:[#allocation3 + $0x48] sm:$0xf]  ;;  %921 = vst [vmem:[#allocation2 + $0xb8] sm:$0xf] %v747_v60  ;;  %v625_v31 = vshll.u32 %v474_v28, 16  ;;  %v5775_v7 = vunpack.c.l.bf16 %v5871_v29  ;;  %v6499_v42 = vrot.slane %v622_v1, 7 }
  0x6c   : > { %v5576_v27 = vld [vmem:[#allocation3 + $0x50] sm:$0xf0]  ;;  %843 = vst [vmem:[#allocation2 + $0x30] sm:$0xf] %v842_v24  ;;  %v5776_v44 = vunpack.c.h.bf16 %v5871_v29  ;;  %v619_v30 = vor.u32 %v617_v21, %v616_v12  ;;  %v449_v46 = vmax.f32 %v417_v16, 0.0  ;;  %v620_v49 = vrot.slane %v616_v12, 4 }
  0x6d   : > { %2573 = vmatmul.bf16.gmra.mxu3 %v4740_v50  ;;  %v4608_v54 = vor.u32 %v5576_v27, %v4607_v0  ;;  %v946_v56 = vld [vmem:[#allocation2 + $0x54] sm:$0xf]  ;;  %v5923_v32 = vld [vmem:[%s7093_s1] ss:$0 sm:$0xff]  ;;  %v627_v47 = vor.u32 %v625_v31, %v6499_v42  ;;  %v450_v59 = vmax.f32 %v418_v25, 0.0  ;;  %v560_v53 = vsel %vm6039_vm4, %v552_v17, %v559_v38  ;;  %v5634_v25 = vld [vmem:[%s7095_s3 + $0x148] sm:$0xff] }
  0x6e   : > { %v947_v34 = vld [vmem:[#allocation2 + $0x58] sm:$0xf]  ;;  %982 = vst [vmem:[#allocation3 + $0xa8] sm:$0xf] %v946_v56  ;;  %v389_v48 = vmul.f32 %v5923_v32, %v5775_v7  ;;  %v869_v51 = vld [vmem:[#allocation2 + $0x60] sm:$0xf]  ;;  %v481_v61 = vpack.c.bf16 %v449_v46, %v449_v46  ;;  %v390_v62 = vmul.f32 %v5923_v32, %v5776_v44  ;;  %2684 = vmatpush.bf16.msrb.mxu2 %v5634_v25 }
  0x6f   : > { %2518 = vmatmul.bf16.gmra.mxu0 %v4608_v54  ;;  %983 = vst [vmem:[#allocation3 + $0xb4] sm:$0xf] %v947_v34  ;;  %v954_v6 = vld [vmem:[#allocation2 + $0x84] sm:$0xf]  ;;  %v870_v57 = vsel %vm6049_vm5, %v619_v30, %v869_v51  ;;  %v482_v4 = vpack.c.bf16 %v450_v59, %v450_v59  ;;  %v5627_v33 = vld [vmem:[%s7095_s3 + $0x110] sm:$0xff]  ;;  %v628_v14 = vsel %vm6039_vm4, %v620_v49, %v627_v47  ;;  %v5546_v54 = vld [vmem:[%s7095_s3 + $0x8] sm:$0xff] }
  0x70   : > { %v955_v8 = vld [vmem:[#allocation2 + $0x88] sm:$0xf]  ;;  %990 = vst [vmem:[#allocation3 + $0x108] sm:$0xf] %v954_v6  ;;  %v425_v63 = vadd.f32 %v5922_v11, %v389_v48  ;;  %v682_v2 = vshrl.u32 %v481_v61, 16  ;;  %v685_v23 = vshll.u32 %v481_v61, 16  ;;  %v426_v3 = vadd.f32 %v5922_v11, %v390_v62  ;;  %2594 = vmatpush.bf16.msrb.mxu1 %v5627_v33  ;;  %3173 = vmatpush.bf16.msrb.mxu3 %v5546_v54 }
  0x71   : > { %991 = vst [vmem:[#allocation3 + $0x114] sm:$0xf] %v955_v8  ;;  %v962_v19 = vld [vmem:[#allocation2 + $0xb4] sm:$0xf]  ;;  %v690_v15 = vshrl.u32 %v482_v4, 16  ;;  %v693_v17 = vshll.u32 %v482_v4, 16 }
  0x72   : > { %v963_v60 = vld [vmem:[#allocation2 + $0xb8] sm:$0xf]  ;;  %998 = vst [vmem:[#allocation3 + $0x168] sm:$0xf] %v962_v19  ;;  %v457_v9 = vmax.f32 %v425_v63, 0.0  ;;  %v684_v50 = vrot.slane %v682_v2, 7 }
  0x73   : > { %999 = vst [vmem:[#allocation3 + $0x174] sm:$0xf] %v963_v60  ;;  %v940_v16 = vld [vmem:[#allocation2 + $0x30] sm:$0xf]  ;;  %v458_v0 = vmax.f32 %v426_v3, 0.0  ;;  %v6514_v20 = vrot.slane %v690_v15, 7 }
  0x74   : > { %844 = vst [vmem:[#allocation2 + $0x34] sm:$0xf] %v560_v53  ;;  %v897_v55 = vld [vmem:[#allocation2 + $0x90] sm:$0xf]  ;;  %v489_v18 = vpack.c.bf16 %v457_v9, %v457_v9  ;;  %v687_v21 = vor.u32 %v685_v23, %v684_v50  ;;  %v688_v1 = vrot.slane %v684_v50, 4  ;;  %v5626_v47 = vld [vmem:[%s7095_s3 + $0x108] sm:$0xff] }
  0x75   : > { %v4655_v28 = vld [vmem:[#allocation3 + $0xa8] sm:$0xf]  ;;  %976 = vst [vmem:[#allocation3 + $0x60] sm:$0xf] %v940_v16  ;;  %v490_v29 = vpack.c.bf16 %v458_v0, %v458_v0  ;;  %v695_v12 = vor.u32 %v693_v17, %v6514_v20  ;;  %v5555_v34 = vld [vmem:[%s7095_s3 + $0x50] sm:$0xff]  ;;  %2595 = vmatpush.bf16.msrb.mxu1 %v5626_v47  ;;  %v510_v60 = vrot.slane %v6043_v37, 4 }
  0x76   : > { %v5588_v11 = vld [vmem:[#allocation3 + $0xb0] sm:$0xf0]  ;;  %871 = vst [vmem:[#allocation2 + $0x60] sm:$0xf] %v870_v57  ;;  %v750_v31 = vshrl.u32 %v489_v18, 16  ;;  %v753_v7 = vshll.u32 %v489_v18, 16  ;;  %v898_v6 = vsel %vm6049_vm5, %v687_v21, %v897_v55  ;;  %3261 = vmatpush.bf16.msrb.mxu0 %v5555_v34 }
  0x77   : > { %v4656_v27 = vor.u32 %v5588_v11, %v4655_v28  ;;  %v4703_v24 = vld [vmem:[#allocation3 + $0x108] sm:$0xf]  ;;  %872 = vst [vmem:[#allocation2 + $0x64] sm:$0xf] %v628_v14  ;;  %v758_v30 = vshrl.u32 %v490_v29, 16  ;;  %v761_v46 = vshll.u32 %v490_v29, 16  ;;  %v696_v8 = vsel %vm6039_vm4, %v688_v1, %v695_v12 }
  0x78   : > { %v5600_v56 = vld [vmem:[#allocation3 + $0x110] sm:$0xf0]  ;;  %v925_v32 = vld [vmem:[#allocation2 + $0xc0] sm:$0xf]  ;;  %899 = vst [vmem:[#allocation2 + $0x90] sm:$0xf] %v898_v6 }
  0x79   : > { %2538 = vmatmul.bf16.gmra.mxu1 %v4656_v27  ;;  %v4704_v38 = vor.u32 %v5600_v56, %v4703_v24  ;;  %v4751_v44 = vld [vmem:[#allocation3 + $0x168] sm:$0xf]  ;;  %v752_v49 = vrot.slane %v750_v31, 7  ;;  %900 = vst [vmem:[#allocation2 + $0x94] sm:$0xf] %v696_v8  ;;  %v6533_v53 = vrot.slane %v758_v30, 7 }
  0x7a   : > { %v5612_v48 = vld [vmem:[#allocation3 + $0x170] sm:$0xf0]  ;;  %v5633_v51 = vld [vmem:[%s7095_s3 + $0x140] sm:$0xff]  ;;  %v824_v15 = vld [vmem:[#allocation2 + $0x14] sm:$0x1]  ;;  %s4514_s24 = sshll.u32 %s7121_s19, 1 }
  0x7b   : > { %2558 = vmatmul.bf16.gmra.mxu2 %v4704_v38  ;;  %v4752_v59 = vor.u32 %v5612_v48, %v4751_v44  ;;  %v941_v19 = vld [vmem:[#allocation2 + $0x34] sm:$0xf]  ;;  %v755_v61 = vor.u32 %v753_v7, %v752_v49  ;;  %v756_v62 = vrot.slane %v752_v49, 4  ;;  %v5545_v63 = vld [vmem:[%s7095_s3] sm:$0xff]  ;;  %v763_v4 = vor.u32 %v761_v46, %v6533_v53  ;;  %v5554_v2 = vld [vmem:[%s7095_s3 + $0x48] sm:$0xff]  ;;  %s235_s29 = scalar_lea.vmem %s7097_s5, %s4514_s24 }
  0x7c   : > { %977 = vst [vmem:[#allocation3 + $0x6c] sm:$0xf] %v941_v19  ;;  %2685 = vmatpush.bf16.msrb.mxu2 %v5633_v51  ;;  %v5625_v23 = vld [vmem:[%s7095_s3 + $0x100] sm:$0xff]  ;;  %3174 = vmatpush.bf16.msrb.mxu3 %v5545_v63  ;;  %v4619_v16 = vld [vmem:[#allocation3 + $0x60] sm:$0xf]  ;;  %v825_v28 = vsel %vm6551_vm8, %v510_v60, %v824_v15 }
  0x7d   : > { %2578 = vmatmul.bf16.gmra.mxu3 %v4752_v59  ;;  %v948_v57 = vld [vmem:[#allocation2 + $0x60] sm:$0xf]  ;;  %v926_v9 = vsel %vm6049_vm5, %v755_v61, %v925_v32  ;;  %v764_v14 = vsel %vm6039_vm4, %v756_v62, %v763_v4  ;;  %3262 = vmatpush.bf16.msrb.mxu0 %v5554_v2  ;;  %v1007_v17 = vld [vmem:[#allocation2 + $0xc] sm:$0xf]  ;;  %v1008_v55 = vld [vmem:[#allocation2 + $0x10] sm:$0xf] }
  0x7e   : > { %v949_v37 = vld [vmem:[#allocation2 + $0x64] sm:$0xf]  ;;  %984 = vst [vmem:[#allocation3 + $0xc0] sm:$0xf] %v948_v57  ;;  %2596 = vmatpush.bf16.msrb.mxu1 %v5625_v23  ;;  %v1086_v0 = vshrl.u32 %v1007_v17, 16  ;;  %v1089_v18 = vshll.u32 %v1007_v17, 16 }
  0x7f   : > { %v5553_v33 = vld [vmem:[%s7095_s3 + $0x40] sm:$0xff]  ;;  %985 = vst [vmem:[#allocation3 + $0xcc] sm:$0xf] %v949_v37  ;;  %v956_v39 = vld [vmem:[#allocation2 + $0x90] sm:$0xf]  ;;  %v1095_v35 = vshll.u32 %v1008_v55, 16 }
  0x80   : > { %927 = vst [vmem:[#allocation2 + $0xc0] sm:$0xf] %v926_v9  ;;  %v957_v50 = vld [vmem:[#allocation2 + $0x94] sm:$0xf]  ;;  %v1099_v25 = vshrl.u32 %v1008_v55, 16  ;;  %v1088_v24 = vrot.slane %v1086_v0, 4 }
  0x81   : > { %928 = vst [vmem:[#allocation2 + $0xc4] sm:$0xf] %v764_v14  ;;  %3263 = vmatpush.bf16.msrb.mxu0 %v5553_v33  ;;  %v1091_v21 = vrot.slane %v1089_v18, 5  ;;  %v1568_v1 = vld [vmem:[#allocation2 + $0xc] sm:$0xe]  ;;  %v1097_v54 = vrot.slane %v1095_v35, 5 }
  0x82   : > { %992 = vst [vmem:[#allocation3 + $0x120] sm:$0xf] %v956_v39  ;;  %v1101_v56 = vrot.slane %v1099_v25, 4  ;;  %v1569_v12 = vld [vmem:[#allocation2 + $0x10] sm:$0xf]  ;;  %v4516_v38 = vrot.slane %v1568_v1, 9 }
  0x83   : > { %v5579_v11 = vld [vmem:[#allocation3 + $0x68] sm:$0xf0]  ;;  %993 = vst [vmem:[#allocation3 + $0x12c] sm:$0xf] %v957_v50  ;;  %v1092_v34 = vor.u32 %v1091_v21, %v1088_v24  ;;  %v1685_v44 = vrot.slane %v1569_v12, 5  ;;  %v5696_v62 = vld [vmem:[%s7095_s3 + $0x1b8] sm:$0xff] }
  0x84   : > { %v4620_v27 = vor.u32 %v5579_v11, %v4619_v16  ;;  %826 = vst [vmem:[#allocation2 + $0x14] sm:$0x1] %v825_v28  ;;  %v932_v6 = vld [vmem:[#allocation2] sm:$0xf]  ;;  %v1102_v48 = vor.u32 %v1101_v56, %v1097_v54  ;;  %v933_v8 = vld [vmem:[#allocation2 + $0x4] sm:$0xf]  ;;  %3948 = vmatpush.bf16.msra.mxu2 %v5696_v62 }
  0x85   : > { %v4667_v29 = vld [vmem:[#allocation3 + $0xc0] sm:$0xf]  ;;  %968 = vst [vmem:[#allocation3] sm:$0xf] %v932_v6  ;;  %v1093_v47 = vrot.slane %v1092_v34, 4  ;;  %v1686_v59 = vsel %vm6566_vm12, %v4516_v38, %v1685_v44  ;;  %v1687_v19 = vrot.slane %v1685_v44, 4 }
  0x86   : > { %2523 = vmatmul.bf16.gmra.mxu0 %v4620_v27  ;;  %v5591_v7 = vld [vmem:[#allocation3 + $0xc8] sm:$0xf0]  ;;  %v1103_v61 = vrot.slane %v1102_v48, 4  ;;  %1840 = vst [vmem:[#allocation3 + $0x20] sm:$0xf] %v1686_v59  ;;  %v527_v39 = vrot.slane %v6201_v43, 4 }
  0x87   : > { %v4668_v30 = vor.u32 %v5591_v7, %v4667_v29  ;;  %v964_v46 = vld [vmem:[#allocation2 + $0xc0] sm:$0xf]  ;;  %v1098_v60 = vsel %vm6572_vm13, %v1093_v47, %v1097_v54  ;;  %969 = vst [vmem:[#allocation3 + $0xc] sm:$0xf] %v933_v8  ;;  %v1005_v33 = vld [vmem:[#allocation2 + $0x4] sm:$0xf] }
  0x88   : > { %v965_v49 = vld [vmem:[#allocation2 + $0xc4] sm:$0xf]  ;;  %1000 = vst [vmem:[#allocation3 + $0x180] sm:$0xf] %v964_v46  ;;  %v1004_v57 = vld [vmem:[#allocation2] sm:$0xf] }
  0x89   : > { %2543 = vmatmul.bf16.gmra.mxu1 %v4668_v30  ;;  %v4715_v51 = vld [vmem:[#allocation3 + $0x120] sm:$0xf]  ;;  %1001 = vst [vmem:[#allocation3 + $0x18c] sm:$0xf] %v965_v49  ;;  %v1006_v16 = vld [vmem:[#allocation2 + $0x8] sm:$0x1] }
  0x8a   : > { %v5603_v63 = vld [vmem:[#allocation3 + $0x128] sm:$0xf0]  ;;  %1531 = vst [vmem:[#allocation3 + $0x1c] sm:$0xf] %v1098_v60  ;;  %v1062_v14 = vshrl.u32 %v1004_v57, 16  ;;  %v1065_v15 = vshll.u32 %v1004_v57, 16 }
  0x8b   : > { %v4716_v4 = vor.u32 %v5603_v63, %v4715_v51  ;;  %v1009_v2 = vld [vmem:[#allocation2 + $0x14] sm:$0x1]  ;;  %v1071_v17 = vshll.u32 %v1005_v33, 16  ;;  %v1075_v55 = vshrl.u32 %v1005_v33, 16  ;;  %v1081_v0 = vshll.u32 %v1006_v16, 16  ;;  %v5704_v18 = vld [vmem:[%s7095_s3 + $0x1f8] sm:$0xff] }
  0x8c   : > { %v1570_v23 = vld [vmem:[#allocation2 + $0x14] sm:$0x1]  ;;  %v1105_v37 = vshll.u32 %v1009_v2, 16  ;;  %v5568_v11 = vld [vmem:[%s7095_s3 + $0xb8] sm:$0xff]  ;;  %v1064_v25 = vrot.slane %v1062_v14, 4  ;;  %v1067_v27 = vrot.slane %v1065_v15, 5  ;;  %4037 = vmatpush.bf16.msra.mxu3 %v5704_v18 }
  0x8d   : > { %v1688_v9 = vrot.slane %v1570_v23, 5  ;;  %2563 = vmatmul.bf16.gmra.mxu2 %v4716_v4  ;;  %v1073_v21 = vrot.slane %v1071_v17, 5  ;;  %v1077_v1 = vrot.slane %v1075_v55, 4  ;;  %3345 = vmatpush.bf16.msra.mxu1 %v5568_v11  ;;  %v5712_v29 = vld [vmem:[%s7095_s3 + $0x238] sm:$0xff]  ;;  %v831_v12 = vld [vmem:[#allocation2 + $0x20] sm:$0x1] }
  0x8e   : > { %v1107_v28 = vrot.slane %v1105_v37, 5  ;;  %v1068_v56 = vor.u32 %v1067_v27, %v1064_v25  ;;  %v1083_v34 = vrot.slane %v1081_v0, 5  ;;  %4126 = vmatpush.bf16.msra.mxu0 %v5712_v29  ;;  %v832_v38 = vsel %vm6551_vm8, %v527_v39, %v831_v12  ;;  %v1010_v44 = vld [vmem:[#allocation2 + $0x18] sm:$0xf]  ;;  %v1011_v6 = vld [vmem:[#allocation2 + $0x1c] sm:$0xf] }
  0x8f   : > { %v1689_v50 = vsel %vm6566_vm12, %v1687_v19, %v1688_v9  ;;  %v4763_v35 = vld [vmem:[#allocation3 + $0x180] sm:$0xf]  ;;  %v1078_v7 = vor.u32 %v1077_v1, %v1073_v21  ;;  %833 = vst [vmem:[#allocation2 + $0x20] sm:$0x1] %v832_v38  ;;  %v1110_v48 = vshrl.u32 %v1010_v44, 16  ;;  %v544_v8 = vrot.slane %v6363_v40, 4 }
  0x90   : > { %1841 = vst [vmem:[#allocation3 + $0x2c] sm:$0xf] %v1689_v50  ;;  %v5615_v24 = vld [vmem:[#allocation3 + $0x188] sm:$0xf0]  ;;  %v1108_v43 = vsel %vm6572_vm13, %v1103_v61, %v1107_v28  ;;  %v4591_v30 = vld [vmem:[#allocation3 + $0x20] sm:$0xf] }
  0x91   : > { %v4764_v54 = vor.u32 %v5615_v24, %v4763_v35  ;;  %1532 = vst [vmem:[#allocation3 + $0x28] sm:$0xf] %v1108_v43  ;;  %v1069_v46 = vrot.slane %v1068_v56, 4  ;;  %v5569_v49 = vld [vmem:[#allocation3 + $0x1c] sm:$0xf]  ;;  %v1079_v47 = vrot.slane %v1078_v7, 4 }
  0x92   : > { %v1113_v59 = vshll.u32 %v1010_v44, 16  ;;  %v1119_v19 = vshll.u32 %v1011_v6, 16  ;;  %v1571_v51 = vld [vmem:[#allocation2 + $0x18] sm:$0xe]  ;;  %v1112_v62 = vrot.slane %v1110_v48, 4  ;;  %v1123_v63 = vshrl.u32 %v1011_v6, 16 }
  0x93   : > { %2583 = vmatmul.bf16.gmra.mxu3 %v4764_v54  ;;  %v1074_v61 = vsel %vm6572_vm13, %v1069_v46, %v1073_v21  ;;  %v1572_v60 = vld [vmem:[#allocation2 + $0x1c] sm:$0xf]  ;;  %v4517_v57 = vrot.slane %v1571_v51, 9  ;;  %v1084_v2 = vsel %vm6572_vm13, %v1079_v47, %v1083_v34  ;;  %v4871_v17 = vld [vmem:[#allocation3] sm:$0xf]  ;;  %v561_v27 = vrot.slane %v6493_v36, 4 }
  0x94   : > { %1529 = vst [vmem:[#allocation3 + $0x4] sm:$0xf] %v1074_v61  ;;  %v1115_v23 = vrot.slane %v1113_v59, 5  ;;  %v1121_v37 = vrot.slane %v1119_v19, 5  ;;  %v1125_v40 = vrot.slane %v1123_v63, 4  ;;  %v1692_v9 = vrot.slane %v1572_v60, 5 }
  0x95   : > { %1530 = vst [vmem:[#allocation3 + $0x10] sm:$0xf] %v1084_v2  ;;  %v5498_v55 = vld [vmem:[#allocation3 + $0x8] sm:$0xf0]  ;;  %v838_v0 = vld [vmem:[#allocation2 + $0x2c] sm:$0x1] }
  0x96   : > { %v1116_v14 = vor.u32 %v1115_v23, %v1112_v62  ;;  %v1126_v39 = vor.u32 %v1125_v40, %v1121_v37  ;;  %v1693_v28 = vsel %vm6566_vm12, %v4517_v57, %v1692_v9  ;;  %v1694_v50 = vrot.slane %v1692_v9, 4  ;;  %v1012_v18 = vld [vmem:[#allocation2 + $0x20] sm:$0x1]  ;;  %v1013_v29 = vld [vmem:[#allocation2 + $0x24] sm:$0xf] }
  0x97   : > { %v5571_v4 = vld [vmem:[#allocation3 + $0x28] sm:$0xf0]  ;;  %v1573_v35 = vld [vmem:[#allocation2 + $0x20] sm:$0x1]  ;;  %v839_v25 = vsel %vm6551_vm8, %v544_v8, %v838_v0  ;;  %v1129_v43 = vshll.u32 %v1012_v18, 16  ;;  %v1134_v34 = vshrl.u32 %v1013_v29, 16  ;;  %v4872_v36 = vor.u32 %v5498_v55, %v4871_v17 }
  0x98   : > { %v4585_v33 = vld [vmem:[#allocation3 + $0x24] sm:$0xf0]  ;;  %v4592_v16 = vor.u32 %v5571_v4, %v4591_v30  ;;  %v1117_v11 = vrot.slane %v1116_v14, 4  ;;  %v1127_v24 = vrot.slane %v1126_v39, 4  ;;  %v1695_v21 = vrot.slane %v1573_v35, 5  ;;  %v5711_v35 = vld [vmem:[%s7095_s3 + $0x230] sm:$0xff] }
  0x99   : > { %v4588_v15 = vor.u32 %v5569_v49, %v4585_v33  ;;  %1842 = vst [vmem:[#allocation3 + $0x38] sm:$0xf] %v1693_v28  ;;  %v1014_v54 = vld [vmem:[#allocation2 + $0x28] sm:$0xf]  ;;  %v1131_v12 = vrot.slane %v1129_v43, 5  ;;  %v1137_v44 = vshll.u32 %v1013_v29, 16  ;;  %4127 = vmatpush.bf16.msra.mxu0 %v5711_v35 }
  0x9a   : > { %v1122_v1 = vsel %vm6572_vm13, %v1117_v11, %v1121_v37  ;;  %840 = vst [vmem:[#allocation2 + $0x2c] sm:$0x1] %v839_v25  ;;  %v1696_v7 = vsel %vm6566_vm12, %v1694_v50, %v1695_v21  ;;  %v1143_v6 = vshll.u32 %v1014_v54, 16  ;;  %v1136_v48 = vrot.slane %v1134_v34, 4  ;;  %v1574_v49 = vld [vmem:[#allocation2 + $0x24] sm:$0xe] }
  0x9b   : > { %2597 = vmatmul.bf16.vlgmr.msrb.gmra.mxu1 %v4588_v15  ;;  %v5497_v56 = vld [vmem:[#allocation3 + $0x4] sm:$0xf]  ;;  %1533 = vst [vmem:[#allocation3 + $0x34] sm:$0xf] %v1122_v1  ;;  %v1132_v46 = vsel %vm6572_vm13, %v1127_v24, %v1131_v12  ;;  %v1147_v8 = vshrl.u32 %v1014_v54, 16  ;;  %v1139_v59 = vrot.slane %v1137_v44, 5 }
  0x9c   : > { %v4873_v38 = vld [vmem:[#allocation3 + $0xc] sm:$0xf0]  ;;  %1843 = vst [vmem:[#allocation3 + $0x44] sm:$0xf] %v1696_v7  ;;  %v1145_v19 = vrot.slane %v1143_v6, 5  ;;  %v4518_v51 = vrot.slane %v1574_v49, 9 }
  0x9d   : > { %2686 = vmatmul.bf16.vlgmr.msrb.gmra.mxu2 %v4592_v16  ;;  %v4876_v30 = vor.u32 %v5497_v56, %v4873_v38  ;;  %v1575_v47 = vld [vmem:[#allocation2 + $0x28] sm:$0xf]  ;;  %1534 = vst [vmem:[#allocation3 + $0x40] sm:$0xf] %v1132_v46  ;;  %v1149_v62 = vrot.slane %v1147_v8, 4  ;;  %v1140_v63 = vor.u32 %v1139_v59, %v1136_v48  ;;  %v5695_v15 = vld [vmem:[%s7095_s3 + $0x1b0] sm:$0xff] }
  0x9e   : > { %v1699_v61 = vrot.slane %v1575_v47, 5  ;;  %v845_v4 = vld [vmem:[#allocation2 + $0x38] sm:$0x1]  ;;  %v5703_v28 = vld [vmem:[%s7095_s3 + $0x1f0] sm:$0xff]  ;;  %3949 = vmatpush.bf16.msra.mxu2 %v5695_v15  ;;  %v4885_v34 = vld [vmem:[#allocation3 + $0x24] sm:$0xf0] }
  0x9f   : > { %3264 = vmatmul.bf16.vlgmr.msrb.gmra.mxu0 %v4876_v30  ;;  %v1150_v23 = vor.u32 %v1149_v62, %v1145_v19  ;;  %v846_v40 = vsel %vm6551_vm8, %v561_v27, %v845_v4  ;;  %v1141_v33 = vrot.slane %v1140_v63, 4  ;;  %v5567_v11 = vld [vmem:[%s7095_s3 + $0xb0] sm:$0xff]  ;;  %4038 = vmatpush.bf16.msra.mxu3 %v5703_v28  ;;  %v5501_v8 = vld [vmem:[#allocation3 + $0x20] sm:$0xf0]  ;;  %v578_v59 = vrot.slane %v6105_v26, 4 }
  0xa0   : > { %v1700_v60 = vsel %vm6566_vm12, %v4518_v51, %v1699_v61  ;;  %v1701_v57 = vrot.slane %v1699_v61, 4  ;;  %v4603_v9 = vld [vmem:[#allocation3 + $0x38] sm:$0xf]  ;;  %847 = vst [vmem:[#allocation2 + $0x38] sm:$0x1] %v846_v40  ;;  %3346 = vmatpush.bf16.msra.mxu1 %v5567_v11 }
  0xa1   : > { %v1015_v2 = vld [vmem:[#allocation2 + $0x2c] sm:$0x1]  ;;  %1844 = vst [vmem:[#allocation3 + $0x50] sm:$0xf] %v1700_v60  ;;  %v1151_v39 = vrot.slane %v1150_v23, 4  ;;  %v1146_v50 = vsel %vm6572_vm13, %v1141_v33, %v1145_v19 }
  0xa2   : > { %v1576_v37 = vld [vmem:[#allocation2 + $0x2c] sm:$0x1]  ;;  %v1153_v16 = vshll.u32 %v1015_v2, 16  ;;  %1535 = vst [vmem:[#allocation3 + $0x4c] sm:$0xf] %v1146_v50 }
  0xa3   : > { %3175 = vmatmul.bf16.vlgmr.msrb.gmra.mxu3 %v4872_v36  ;;  %v1702_v14 = vrot.slane %v1576_v37, 5  ;;  %v5572_v17 = vld [vmem:[#allocation3 + $0x34] sm:$0xf]  ;;  %v5574_v55 = vld [vmem:[#allocation3 + $0x40] sm:$0xf0] }
  0xa4   : > { %v1155_v0 = vrot.slane %v1153_v16, 5  ;;  %v4597_v25 = vld [vmem:[#allocation3 + $0x3c] sm:$0xf0]  ;;  %v4604_v24 = vor.u32 %v5574_v55, %v4603_v9  ;;  %v5500_v43 = vld [vmem:[#allocation3 + $0x1c] sm:$0xf] }
  0xa5   : > { %v1703_v18 = vsel %vm6566_vm12, %v1701_v57, %v1702_v14  ;;  %v4600_v27 = vor.u32 %v5572_v17, %v4597_v25  ;;  %v1016_v1 = vld [vmem:[#allocation2 + $0x30] sm:$0xf]  ;;  %v1017_v29 = vld [vmem:[#allocation2 + $0x34] sm:$0xf]  ;;  %v4888_v19 = vor.u32 %v5500_v43, %v4885_v34  ;;  %v852_v23 = vld [vmem:[#allocation2 + $0x44] sm:$0x1] }
  0xa6   : > { %v1156_v21 = vsel %vm6572_vm13, %v1151_v39, %v1155_v0  ;;  %1845 = vst [vmem:[#allocation3 + $0x5c] sm:$0xf] %v1703_v18  ;;  %v1158_v54 = vshrl.u32 %v1016_v1, 16  ;;  %v1161_v56 = vshll.u32 %v1016_v1, 16  ;;  %v1167_v12 = vshll.u32 %v1017_v29, 16 }
  0xa7   : > { %1536 = vst [vmem:[#allocation3 + $0x58] sm:$0xf] %v1156_v21  ;;  %v1171_v7 = vshrl.u32 %v1017_v29, 16  ;;  %v1577_v36 = vld [vmem:[#allocation2 + $0x30] sm:$0xe]  ;;  %v853_v14 = vsel %vm6551_vm8, %v578_v59, %v852_v23 }
  0xa8   : > { %v1578_v38 = vld [vmem:[#allocation2 + $0x34] sm:$0xf]  ;;  %v1160_v44 = vrot.slane %v1158_v54, 4  ;;  %v1163_v6 = vrot.slane %v1161_v56, 5  ;;  %v1169_v30 = vrot.slane %v1167_v12, 5  ;;  %v4519_v49 = vrot.slane %v1577_v36, 9 }
  0xa9   : > { %v1173_v46 = vrot.slane %v1171_v7, 4  ;;  %v4883_v48 = vld [vmem:[#allocation3 + $0x18] sm:$0xf]  ;;  %v1706_v47 = vrot.slane %v1578_v38, 5  ;;  %v1018_v51 = vld [vmem:[#allocation2 + $0x38] sm:$0x1] }
  0xaa   : > { %v1164_v61 = vor.u32 %v1163_v6, %v1160_v44  ;;  %v1579_v63 = vld [vmem:[#allocation2 + $0x38] sm:$0x1]  ;;  %v1177_v60 = vshll.u32 %v1018_v51, 16  ;;  %v4884_v37 = vor.u32 %v5501_v8, %v4883_v48  ;;  %v5575_v15 = vld [vmem:[#allocation3 + $0x4c] sm:$0xf]  ;;  %v595_v12 = vrot.slane %v6260_v22, 4 }
  0xab   : > { %2602 = vmatmul.bf16.gmra.mxu1 %v4600_v27  ;;  %v1174_v62 = vor.u32 %v1173_v46, %v1169_v30  ;;  %v1707_v57 = vsel %vm6566_vm12, %v4519_v49, %v1706_v47  ;;  %v1708_v4 = vrot.slane %v1706_v47, 4  ;;  %v1709_v2 = vrot.slane %v1579_v63, 5  ;;  %v1019_v55 = vld [vmem:[#allocation2 + $0x3c] sm:$0xf]  ;;  %v1020_v39 = vld [vmem:[#allocation2 + $0x40] sm:$0xf] }
  0xac   : > { %v1165_v40 = vrot.slane %v1164_v61, 4  ;;  %1846 = vst [vmem:[#allocation3 + $0x68] sm:$0xf] %v1707_v57  ;;  %v1179_v33 = vrot.slane %v1177_v60, 5  ;;  %v1182_v28 = vshrl.u32 %v1019_v55, 16  ;;  %v1185_v50 = vshll.u32 %v1019_v55, 16 }
  0xad   : > { %2691 = vmatmul.bf16.gmra.mxu2 %v4604_v24  ;;  %v1175_v9 = vrot.slane %v1174_v62, 4  ;;  %v1710_v26 = vsel %vm6566_vm12, %v1708_v4, %v1709_v2  ;;  %v1191_v0 = vshll.u32 %v1020_v39, 16  ;;  %v1195_v18 = vshrl.u32 %v1020_v39, 16  ;;  %854 = vst [vmem:[#allocation2 + $0x44] sm:$0x1] %v853_v14  ;;  %v5702_v55 = vld [vmem:[%s7095_s3 + $0x1e8] sm:$0xff] }
  0xae   : > { %v1170_v16 = vsel %vm6572_vm13, %v1165_v40, %v1169_v30  ;;  %1847 = vst [vmem:[#allocation3 + $0x74] sm:$0xf] %v1710_v26  ;;  %v4609_v11 = vld [vmem:[#allocation3 + $0x54] sm:$0xf0]  ;;  %v1581_v35 = vld [vmem:[#allocation2 + $0x40] sm:$0xf]  ;;  %4039 = vmatpush.bf16.msra.mxu3 %v5702_v55 }
  0xaf   : > { %3269 = vmatmul.bf16.gmra.mxu0 %v4888_v19  ;;  %v1180_v17 = vsel %vm6572_vm13, %v1175_v9, %v1179_v33  ;;  %1537 = vst [vmem:[#allocation3 + $0x64] sm:$0xf] %v1170_v16  ;;  %v1184_v25 = vrot.slane %v1182_v28, 4  ;;  %v1187_v27 = vrot.slane %v1185_v50, 5  ;;  %v1193_v24 = vrot.slane %v1191_v0, 5  ;;  %v5566_v0 = vld [vmem:[%s7095_s3 + $0xa8] sm:$0xff] }
  0xb0   : > { %1538 = vst [vmem:[#allocation3 + $0x70] sm:$0xf] %v1180_v17  ;;  %v1197_v43 = vrot.slane %v1195_v18, 4  ;;  %v1580_v21 = vld [vmem:[#allocation2 + $0x3c] sm:$0xe]  ;;  %v1713_v56 = vrot.slane %v1581_v35, 5  ;;  %v4612_v7 = vor.u32 %v5575_v15, %v4609_v11  ;;  %3347 = vmatpush.bf16.msra.mxu1 %v5566_v0 }
  0xb1   : > { %v4615_v1 = vld [vmem:[#allocation3 + $0x50] sm:$0xf]  ;;  %v5577_v29 = vld [vmem:[#allocation3 + $0x58] sm:$0xf0]  ;;  %v4520_v54 = vrot.slane %v1580_v21, 9  ;;  %v1188_v34 = vor.u32 %v1187_v27, %v1184_v25  ;;  %v612_v27 = vrot.slane %v6401_v13, 4 }
  0xb2   : > { %v1198_v36 = vor.u32 %v1197_v43, %v1193_v24  ;;  %v4616_v44 = vor.u32 %v5577_v29, %v4615_v1  ;;  %v5503_v6 = vld [vmem:[#allocation3 + $0x34] sm:$0xf]  ;;  %v4895_v46 = vld [vmem:[#allocation3 + $0x30] sm:$0xf]  ;;  %v4897_v48 = vld [vmem:[#allocation3 + $0x3c] sm:$0xf0] }
  0xb3   : > { %3180 = vmatmul.bf16.gmra.mxu3 %v4884_v37  ;;  %v1714_v38 = vsel %vm6566_vm12, %v4520_v54, %v1713_v56  ;;  %v1189_v30 = vrot.slane %v1188_v34, 4  ;;  %v1715_v8 = vrot.slane %v1713_v56, 4  ;;  %v859_v49 = vld [vmem:[#allocation2 + $0x50] sm:$0x1]  ;;  %v5504_v47 = vld [vmem:[#allocation3 + $0x38] sm:$0xf0]  ;;  %v4900_v60 = vor.u32 %v5503_v6, %v4897_v48 }
  0xb4   : > { %1848 = vst [vmem:[#allocation3 + $0x80] sm:$0xf] %v1714_v38  ;;  %v1021_v59 = vld [vmem:[#allocation2 + $0x44] sm:$0x1]  ;;  %v860_v51 = vsel %vm6551_vm8, %v595_v12, %v859_v49  ;;  %v1199_v61 = vrot.slane %v1198_v36, 4  ;;  %v4896_v2 = vor.u32 %v5504_v47, %v4895_v46  ;;  %v5694_v17 = vld [vmem:[%s7095_s3 + $0x1a8] sm:$0xff] }
  0xb5   : > { %v1194_v22 = vsel %vm6572_vm13, %v1189_v30, %v1193_v24  ;;  %v1582_v19 = vld [vmem:[#allocation2 + $0x44] sm:$0x1]  ;;  %v1201_v62 = vshll.u32 %v1021_v59, 16  ;;  %861 = vst [vmem:[#allocation2 + $0x50] sm:$0x1] %v860_v51  ;;  %v5710_v18 = vld [vmem:[%s7095_s3 + $0x228] sm:$0xff]  ;;  %3950 = vmatpush.bf16.msra.mxu2 %v5694_v17 }
  0xb6   : > { %1539 = vst [vmem:[#allocation3 + $0x7c] sm:$0xf] %v1194_v22  ;;  %v1716_v63 = vrot.slane %v1582_v19, 5  ;;  %v1022_v23 = vld [vmem:[#allocation2 + $0x48] sm:$0xf]  ;;  %4128 = vmatpush.bf16.msra.mxu0 %v5710_v18 }
  0xb7   : > { %v1203_v57 = vrot.slane %v1201_v62, 5  ;;  %v1023_v37 = vld [vmem:[#allocation2 + $0x4c] sm:$0xf]  ;;  %v1206_v9 = vshrl.u32 %v1022_v23, 16  ;;  %v1209_v33 = vshll.u32 %v1022_v23, 16 }
  0xb8   : > { %v1717_v4 = vsel %vm6566_vm12, %v1715_v8, %v1716_v63  ;;  %v1215_v26 = vshll.u32 %v1023_v37, 16  ;;  %v5578_v16 = vld [vmem:[#allocation3 + $0x64] sm:$0xf]  ;;  %v1219_v14 = vshrl.u32 %v1023_v37, 16  ;;  %v4621_v15 = vld [vmem:[#allocation3 + $0x6c] sm:$0xf0]  ;;  %v6682_v63 = vpop.f32.mrf.mxu0 }
  0xb9   : > { %1849 = vst [vmem:[#allocation3 + $0x8c] sm:$0xf] %v1717_v4  ;;  %v1204_v40 = vsel %vm6572_vm13, %v1199_v61, %v1203_v57  ;;  %v1208_v39 = vrot.slane %v1206_v9, 4  ;;  %v1211_v28 = vrot.slane %v1209_v33, 5  ;;  %v4627_v50 = vld [vmem:[#allocation3 + $0x68] sm:$0xf]  ;;  %v4624_v34 = vor.u32 %v5578_v16, %v4621_v15 }
  0xba   : > { %1540 = vst [vmem:[#allocation3 + $0x88] sm:$0xf] %v1204_v40  ;;  %v1217_v35 = vrot.slane %v1215_v26, 5  ;;  %v1221_v25 = vrot.slane %v1219_v14, 4  ;;  %v1583_v21 = vld [vmem:[#allocation2 + $0x48] sm:$0xe] }
  0xbb   : > { %2607 = vmatmul.bf16.gmra.mxu1 %v4612_v7  ;;  %v1212_v24 = vor.u32 %v1211_v28, %v1208_v39  ;;  %v1584_v1 = vld [vmem:[#allocation2 + $0x4c] sm:$0xf]  ;;  %v4521_v12 = vrot.slane %v1583_v21, 9  ;;  %v5506_v48 = vld [vmem:[#allocation3 + $0x4c] sm:$0xf]  ;;  %v629_v15 = vrot.slane %v6499_v42, 4 }
  0xbc   : > { %v1024_v11 = vld [vmem:[#allocation2 + $0x50] sm:$0x1]  ;;  %v5580_v29 = vld [vmem:[#allocation3 + $0x70] sm:$0xf0]  ;;  %v1222_v54 = vor.u32 %v1221_v25, %v1217_v35  ;;  %v1720_v7 = vrot.slane %v1584_v1, 5 }
  0xbd   : > { %2696 = vmatmul.bf16.gmra.mxu2 %v4616_v44  ;;  %v1225_v43 = vshll.u32 %v1024_v11, 16  ;;  %v1585_v56 = vld [vmem:[#allocation2 + $0x50] sm:$0x1]  ;;  %v1213_v36 = vrot.slane %v1212_v24, 4  ;;  %v4628_v46 = vor.u32 %v5580_v29, %v4627_v50  ;;  %v866_v22 = vld [vmem:[#allocation2 + $0x5c] sm:$0x1] }
  0xbe   : > { %v1723_v44 = vrot.slane %v1585_v56, 5  ;;  %v1223_v6 = vrot.slane %v1222_v54, 4  ;;  %v1721_v13 = vsel %vm6566_vm12, %v4521_v12, %v1720_v7  ;;  %v1722_v30 = vrot.slane %v1720_v7, 4  ;;  %v4909_v49 = vld [vmem:[#allocation3 + $0x54] sm:$0xf0] }
  0xbf   : > { %3274 = vmatmul.bf16.gmra.mxu0 %v4900_v60  ;;  %v1227_v38 = vrot.slane %v1225_v43, 5  ;;  %v1218_v8 = vsel %vm6572_vm13, %v1213_v36, %v1217_v35  ;;  %1850 = vst [vmem:[#allocation3 + $0x98] sm:$0xf] %v1721_v13  ;;  %v867_v19 = vsel %vm6551_vm8, %v612_v27, %v866_v22  ;;  %v4907_v51 = vld [vmem:[#allocation3 + $0x48] sm:$0xf]  ;;  %v4912_v62 = vor.u32 %v5506_v48, %v4909_v49 }
  0xc0   : > { %1541 = vst [vmem:[#allocation3 + $0x94] sm:$0xf] %v1218_v8  ;;  %v1724_v59 = vsel %vm6566_vm12, %v1722_v30, %v1723_v44  ;;  %v5507_v61 = vld [vmem:[#allocation3 + $0x50] sm:$0xf0]  ;;  %v1025_v57 = vld [vmem:[#allocation2 + $0x54] sm:$0xf]  ;;  %v6687_v29 = vpop.f32.mrf.mxu0 }
  0xc1   : > { %v1228_v47 = vsel %vm6572_vm13, %v1223_v6, %v1227_v38  ;;  %1851 = vst [vmem:[#allocation3 + $0xa4] sm:$0xf] %v1724_v59  ;;  %v4908_v60 = vor.u32 %v5507_v61, %v4907_v51  ;;  %v1026_v4 = vld [vmem:[#allocation2 + $0x58] sm:$0xf]  ;;  %v1233_v23 = vshll.u32 %v1025_v57, 16 }
  0xc2   : > { %1542 = vst [vmem:[#allocation3 + $0xa0] sm:$0xf] %v1228_v47  ;;  %v1239_v37 = vshll.u32 %v1026_v4, 16  ;;  %v5581_v40 = vld [vmem:[#allocation3 + $0x7c] sm:$0xf]  ;;  %v1243_v9 = vshrl.u32 %v1026_v4, 16 }
  0xc3   : > { %3185 = vmatmul.bf16.gmra.mxu3 %v4896_v2  ;;  %868 = vst [vmem:[#allocation2 + $0x5c] sm:$0x1] %v867_v19  ;;  %v1230_v2 = vshrl.u32 %v1025_v57, 16  ;;  %v4633_v33 = vld [vmem:[#allocation3 + $0x84] sm:$0xf0]  ;;  %v1235_v16 = vrot.slane %v1233_v23, 5 }
  0xc4   : > { %v1241_v14 = vrot.slane %v1239_v37, 5  ;;  %v1245_v55 = vrot.slane %v1243_v9, 4  ;;  %v1587_v39 = vld [vmem:[#allocation2 + $0x58] sm:$0xf]  ;;  %v1586_v0 = vld [vmem:[#allocation2 + $0x54] sm:$0xe]  ;;  %v4636_v1 = vor.u32 %v5581_v40, %v4633_v33 }
  0xc5   : > { %v1232_v26 = vrot.slane %v1230_v2, 4  ;;  %v1727_v11 = vrot.slane %v1587_v39, 5  ;;  %v4639_v25 = vld [vmem:[#allocation3 + $0x80] sm:$0xf]  ;;  %v5583_v27 = vld [vmem:[#allocation3 + $0x88] sm:$0xf0] }
  0xc6   : > { %v1246_v24 = vor.u32 %v1245_v55, %v1241_v14  ;;  %v4522_v43 = vrot.slane %v1586_v0, 9  ;;  %v5509_v36 = vld [vmem:[#allocation3 + $0x64] sm:$0xf]  ;;  %v4921_v6 = vld [vmem:[#allocation3 + $0x6c] sm:$0xf0]  ;;  %v5693_v40 = vld [vmem:[%s7095_s3 + $0x1a0] sm:$0xff] }
  0xc7   : > { %v1236_v28 = vor.u32 %v1235_v16, %v1232_v26  ;;  %v1729_v56 = vrot.slane %v1727_v11, 4  ;;  %v873_v30 = vld [vmem:[#allocation2 + $0x68] sm:$0x1]  ;;  %v4919_v48 = vld [vmem:[#allocation3 + $0x60] sm:$0xf]  ;;  %v4924_v49 = vor.u32 %v5509_v36, %v4921_v6  ;;  %v5701_v9 = vld [vmem:[%s7095_s3 + $0x1e0] sm:$0xff]  ;;  %3951 = vmatpush.bf16.msra.mxu2 %v5693_v40 }
  0xc8   : > { %v1247_v12 = vrot.slane %v1246_v24, 4  ;;  %v1728_v7 = vsel %vm6566_vm12, %v4522_v43, %v1727_v11  ;;  %v5510_v8 = vld [vmem:[#allocation3 + $0x68] sm:$0xf0]  ;;  %v1028_v19 = vld [vmem:[#allocation2 + $0x60] sm:$0xf]  ;;  %4040 = vmatpush.bf16.msra.mxu3 %v5701_v9 }
  0xc9   : > { %v1237_v54 = vrot.slane %v1236_v28, 4  ;;  %1852 = vst [vmem:[#allocation3 + $0xb0] sm:$0xf] %v1728_v7  ;;  %v4920_v22 = vor.u32 %v5510_v8, %v4919_v48  ;;  %v1029_v51 = vld [vmem:[#allocation2 + $0x64] sm:$0xf]  ;;  %v1257_v57 = vshll.u32 %v1028_v19, 16 }
  0xca   : > { %v1027_v17 = vld [vmem:[#allocation2 + $0x5c] sm:$0x1]  ;;  %v1263_v4 = vshll.u32 %v1029_v51, 16  ;;  %v5584_v2 = vld [vmem:[#allocation3 + $0x94] sm:$0xf]  ;;  %v1267_v23 = vshrl.u32 %v1029_v51, 16 }
  0xcb   : > { %2612 = vmatmul.bf16.gmra.mxu1 %v4624_v34  ;;  %v1249_v50 = vshll.u32 %v1027_v17, 16  ;;  %v1588_v18 = vld [vmem:[#allocation2 + $0x5c] sm:$0x1]  ;;  %v4640_v34 = vor.u32 %v5583_v27, %v4639_v25  ;;  %v1242_v38 = vsel %vm6572_vm13, %v1237_v54, %v1241_v14  ;;  %v4645_v37 = vld [vmem:[#allocation3 + $0x9c] sm:$0xf0]  ;;  %v1259_v26 = vrot.slane %v1257_v57, 5 }
  0xcc   : > { %v1730_v21 = vrot.slane %v1588_v18, 5  ;;  %1543 = vst [vmem:[#allocation3 + $0xac] sm:$0xf] %v1242_v38  ;;  %v4651_v16 = vld [vmem:[#allocation3 + $0x98] sm:$0xf]  ;;  %v5565_v14 = vld [vmem:[%s7095_s3 + $0xa0] sm:$0xff] }
  0xcd   : > { %2701 = vmatmul.bf16.gmra.mxu2 %v4628_v46  ;;  %v1251_v42 = vrot.slane %v1249_v50, 5  ;;  %v874_v46 = vsel %vm6551_vm8, %v629_v15, %v873_v30  ;;  %v5709_v15 = vld [vmem:[%s7095_s3 + $0x220] sm:$0xff]  ;;  %v1265_v55 = vrot.slane %v1263_v4, 5  ;;  %v1269_v39 = vrot.slane %v1267_v23, 4  ;;  %v5586_v24 = vld [vmem:[#allocation3 + $0xa0] sm:$0xf0]  ;;  %3348 = vmatpush.bf16.msra.mxu1 %v5565_v14 }
  0xce   : > { %v1731_v44 = vsel %vm6566_vm12, %v1729_v56, %v1730_v21  ;;  %875 = vst [vmem:[#allocation2 + $0x68] sm:$0x1] %v874_v46  ;;  %v646_v28 = vrot.slane %v6119_v41, 4  ;;  %v1589_v18 = vld [vmem:[#allocation2 + $0x60] sm:$0xe]  ;;  %4129 = vmatpush.bf16.msra.mxu0 %v5709_v15 }
  0xcf   : > { %3279 = vmatmul.bf16.gmra.mxu0 %v4912_v62  ;;  %v1252_v13 = vsel %vm6572_vm13, %v1247_v12, %v1251_v42  ;;  %1853 = vst [vmem:[#allocation3 + $0xbc] sm:$0xf] %v1731_v44  ;;  %v1590_v11 = vld [vmem:[#allocation2 + $0x64] sm:$0xf]  ;;  %v1270_v43 = vor.u32 %v1269_v39, %v1265_v55  ;;  %v4648_v42 = vor.u32 %v5584_v2, %v4645_v37  ;;  %v5512_v6 = vld [vmem:[#allocation3 + $0x7c] sm:$0xf] }
  0xd0   : > { %1544 = vst [vmem:[#allocation3 + $0xb8] sm:$0xf] %v1252_v13  ;;  %v1734_v54 = vrot.slane %v1590_v11, 5  ;;  %v4652_v44 = vor.u32 %v5586_v24, %v4651_v16  ;;  %v4933_v30 = vld [vmem:[#allocation3 + $0x84] sm:$0xf0] }
  0xd1   : > { %v880_v8 = vld [vmem:[#allocation2 + $0x74] sm:$0x1]  ;;  %v5513_v51 = vld [vmem:[#allocation3 + $0x80] sm:$0xf0]  ;;  %v1031_v23 = vld [vmem:[#allocation2 + $0x6c] sm:$0xf] }
  0xd2   : > { %v1736_v38 = vrot.slane %v1734_v54, 4  ;;  %v1032_v37 = vld [vmem:[#allocation2 + $0x70] sm:$0xf]  ;;  %v1278_v9 = vshrl.u32 %v1031_v23, 16 }
  0xd3   : > { %3190 = vmatmul.bf16.gmra.mxu3 %v4908_v60  ;;  %v1254_v60 = vshrl.u32 %v1028_v19, 16  ;;  %v4931_v19 = vld [vmem:[#allocation3 + $0x78] sm:$0xf]  ;;  %v5587_v16 = vld [vmem:[#allocation3 + $0xac] sm:$0xf]  ;;  %v1291_v14 = vshrl.u32 %v1032_v37, 16 }
  0xd4   : > { %v4932_v2 = vor.u32 %v5513_v51, %v4931_v19 }
  0xd5   : > { %v1256_v33 = vrot.slane %v1254_v60, 4  ;;  %v1030_v17 = vld [vmem:[#allocation2 + $0x68] sm:$0x1]  ;;  %v4936_v60 = vor.u32 %v5512_v6, %v4933_v30 }
  0xd6   : > { %v6685_v35 = vpop.f32.mrf.mxu1  ;;  %v1273_v0 = vshll.u32 %v1030_v17, 16  ;;  %v1591_v21 = vld [vmem:[#allocation2 + $0x68] sm:$0x1]  ;;  %v1280_v17 = vrot.slane %v1278_v9, 4 }
  0xd7   : > { %v1260_v50 = vor.u32 %v1259_v26, %v1256_v33  ;;  %v1737_v12 = vrot.slane %v1591_v21, 5  ;;  %v1281_v33 = vshll.u32 %v1031_v23, 16  ;;  %v1287_v26 = vshll.u32 %v1032_v37, 16  ;;  %v4657_v15 = vld [vmem:[#allocation3 + $0xb4] sm:$0xf0] }
  0xd8   : > { %v1275_v41 = vrot.slane %v1273_v0, 5  ;;  %v1293_v0 = vrot.slane %v1291_v14, 4  ;;  %v1592_v21 = vld [vmem:[#allocation2 + $0x6c] sm:$0xe]  ;;  %v887_v23 = vld [vmem:[#allocation2 + $0x80] sm:$0x1] }
  0xd9   : > { %v1261_v56 = vrot.slane %v1260_v50, 4  ;;  %v1738_v48 = vsel %vm6566_vm12, %v1736_v38, %v1737_v12  ;;  %v1289_v39 = vrot.slane %v1287_v26, 5  ;;  %v5589_v12 = vld [vmem:[#allocation3 + $0xb8] sm:$0xf0]  ;;  %v4943_v9 = vld [vmem:[#allocation3 + $0x90] sm:$0xf] }
  0xda   : > { %1855 = vst [vmem:[#allocation3 + $0xd4] sm:$0xf] %v1738_v48 }
  0xdb   : > { %2617 = vmatmul.bf16.gmra.mxu1 %v4636_v1  ;;  %v4523_v1 = vrot.slane %v1589_v18, 9  ;;  %v1266_v13 = vsel %vm6572_vm13, %v1261_v56, %v1265_v55  ;;  %v1283_v55 = vrot.slane %v1281_v33, 5  ;;  %v1593_v18 = vld [vmem:[#allocation2 + $0x70] sm:$0xf]  ;;  %v5516_v33 = vld [vmem:[#allocation3 + $0x98] sm:$0xf0] }
  0xdc   : > { %v6705_v62 = vpop.f32.mrf.mxu0  ;;  %1545 = vst [vmem:[#allocation3 + $0xc4] sm:$0xf] %v1266_v13 }
  0xdd   : > { %2706 = vmatmul.bf16.gmra.mxu2 %v4640_v34  ;;  %v1271_v34 = vrot.slane %v1270_v43, 4  ;;  %v1735_v36 = vsel %vm6566_vm12, %v4523_v1, %v1734_v54  ;;  %v1284_v24 = vor.u32 %v1283_v55, %v1280_v17  ;;  %v1741_v54 = vrot.slane %v1593_v18, 5  ;;  %v1034_v17 = vld [vmem:[#allocation2 + $0x78] sm:$0xf]  ;;  %v1035_v55 = vld [vmem:[#allocation2 + $0x7c] sm:$0xf] }
  0xde   : > { %v6699_v47 = vpop.f32.mrf.mxu2  ;;  %v6701_v59 = vpop.f32.mrf.mxu1  ;;  %1854 = vst [vmem:[#allocation3 + $0xc8] sm:$0xf] %v1735_v36  ;;  %v4524_v36 = vrot.slane %v1592_v21, 9  ;;  %v1311_v18 = vshll.u32 %v1035_v55, 16  ;;  %v1315_v21 = vshrl.u32 %v1035_v55, 16 }
  0xdf   : > { %3284 = vmatmul.bf16.gmra.mxu0 %v4924_v49  ;;  %v1276_v46 = vsel %vm6572_vm13, %v1271_v34, %v1275_v41  ;;  %v4663_v41 = vld [vmem:[#allocation3 + $0xb0] sm:$0xf]  ;;  %v1294_v34 = vor.u32 %v1293_v0, %v1289_v39  ;;  %v1743_v13 = vrot.slane %v1741_v54, 4  ;;  %v1305_v0 = vshll.u32 %v1034_v17, 16 }
  0xe0   : > { %v6703_v61 = vpop.f32.mrf.mxu3  ;;  %1546 = vst [vmem:[#allocation3 + $0xd0] sm:$0xf] %v1276_v46  ;;  %v1742_v48 = vsel %vm6566_vm12, %v4524_v36, %v1741_v54  ;;  %v5692_v54 = vld [vmem:[%s7095_s3 + $0x198] sm:$0xff] }
  0xe1   : > { %v1295_v46 = vrot.slane %v1294_v34, 4  ;;  %1856 = vst [vmem:[#allocation3 + $0xe0] sm:$0xf] %v1742_v48  ;;  %v1307_v34 = vrot.slane %v1305_v0, 5  ;;  %3952 = vmatpush.bf16.msra.mxu2 %v5692_v54  ;;  %v4957_v54 = vld [vmem:[#allocation3 + $0xb4] sm:$0xf0] }
  0xe3   : > { %3195 = vmatmul.bf16.gmra.mxu3 %v4920_v22  ;;  %v881_v22 = vsel %vm6551_vm8, %v646_v28, %v880_v8  ;;  %v663_v28 = vrot.slane %v6286_v45, 4  ;;  %v4660_v45 = vor.u32 %v5587_v16, %v4657_v15  ;;  %v4664_v8 = vor.u32 %v5589_v12, %v4663_v41  ;;  %v5700_v41 = vld [vmem:[%s7095_s3 + $0x1d8] sm:$0xff] }
  0xe4   : > { %v6734_v49 = vpop.f32.mrf.mxu0  ;;  %882 = vst [vmem:[#allocation2 + $0x74] sm:$0x1] %v881_v22  ;;  %v5515_v22 = vld [vmem:[#allocation3 + $0x94] sm:$0xf]  ;;  %v4944_v15 = vor.u32 %v5516_v33, %v4943_v9  ;;  %4041 = vmatpush.bf16.msra.mxu3 %v5700_v41  ;;  %v5564_v9 = vld [vmem:[%s7095_s3 + $0x98] sm:$0xff] }
  0xe5   : > { %v888_v37 = vsel %vm6551_vm8, %v663_v28, %v887_v23  ;;  %v680_v28 = vrot.slane %v6421_v58, 4  ;;  %v1596_v58 = vld [vmem:[#allocation2 + $0x7c] sm:$0xf]  ;;  %3349 = vmatpush.bf16.msra.mxu1 %v5564_v9 }
  0xe6   : > { %v6720_v25 = vpop.f32.mrf.mxu2  ;;  %v6722_v27 = vpop.f32.mrf.mxu1  ;;  %889 = vst [vmem:[#allocation2 + $0x80] sm:$0x1] %v888_v37  ;;  %v1748_v48 = vrot.slane %v1596_v58, 5  ;;  %v5708_v33 = vld [vmem:[%s7095_s3 + $0x218] sm:$0xff] }
  0xe7   : > { %4130 = vmatpush.bf16.msra.mxu0 %v5708_v33  ;;  %v1599_v33 = vld [vmem:[#allocation2 + $0x88] sm:$0xf] }
  0xe8   : > { %v6724_v7 = vpop.f32.mrf.mxu3 }
  0xeb   : > { %2622 = vmatmul.bf16.gmra.mxu1 %v4648_v42  ;;  %v1033_v50 = vld [vmem:[#allocation2 + $0x74] sm:$0x1] }
  0xec   : > { %v6745_v11 = vpop.f32.mrf.mxu0  ;;  %v1297_v43 = vshll.u32 %v1033_v50, 16  ;;  %v1594_v1 = vld [vmem:[#allocation2 + $0x74] sm:$0x1]  ;;  %v1302_v50 = vshrl.u32 %v1034_v17, 16  ;;  %v1750_v17 = vrot.slane %v1748_v48, 4 }
  0xed   : > { %2711 = vmatmul.bf16.gmra.mxu2 %v4652_v44  ;;  %v1744_v38 = vrot.slane %v1594_v1, 5  ;;  %v1285_v44 = vrot.slane %v1284_v24, 4  ;;  %v4669_v1 = vld [vmem:[#allocation3 + $0xcc] sm:$0xf0]  ;;  %v1036_v36 = vld [vmem:[#allocation2 + $0x80] sm:$0x1] }
  0xee   : > { %v6738_v57 = vpop.f32.mrf.mxu2  ;;  %v6740_v4 = vpop.f32.mrf.mxu1  ;;  %v1299_v6 = vrot.slane %v1297_v43, 5  ;;  %v5590_v43 = vld [vmem:[#allocation3 + $0xc4] sm:$0xf]  ;;  %v1304_v12 = vrot.slane %v1302_v50, 4 }
  0xef   : > { %3289 = vmatmul.bf16.gmra.mxu0 %v4936_v60  ;;  %v1290_v19 = vsel %vm6572_vm13, %v1285_v44, %v1289_v39  ;;  %v1745_v51 = vsel %vm6566_vm12, %v1743_v13, %v1744_v38  ;;  %v4945_v60 = vld [vmem:[#allocation3 + $0x9c] sm:$0xf0]  ;;  %v1313_v38 = vrot.slane %v1311_v18, 5  ;;  %v4672_v37 = vor.u32 %v5590_v43, %v4669_v1  ;;  %v5518_v18 = vld [vmem:[#allocation3 + $0xac] sm:$0xf] }
  0xf0   : > { %v6742_v40 = vpop.f32.mrf.mxu3  ;;  %1547 = vst [vmem:[#allocation3 + $0xdc] sm:$0xf] %v1290_v19  ;;  %v4948_v26 = vor.u32 %v5515_v22, %v4945_v60  ;;  %v1308_v44 = vor.u32 %v1307_v34, %v1304_v12  ;;  %v1595_v13 = vld [vmem:[#allocation2 + $0x78] sm:$0xe]  ;;  %v4675_v19 = vld [vmem:[#allocation3 + $0xc8] sm:$0xf]  ;;  %v4960_v58 = vor.u32 %v5518_v18, %v4957_v54 }
  0xf1   : > { %1857 = vst [vmem:[#allocation3 + $0xec] sm:$0xf] %v1745_v51  ;;  %v5592_v51 = vld [vmem:[#allocation3 + $0xd0] sm:$0xf0] }
  0xf2   : > { %v4676_v0 = vor.u32 %v5592_v51, %v4675_v19  ;;  %v894_v12 = vld [vmem:[#allocation2 + $0x8c] sm:$0x1] }
  0xf3   : > { %3200 = vmatmul.bf16.gmra.mxu3 %v4932_v2  ;;  %v1300_v2 = vsel %vm6572_vm13, %v1295_v46, %v1299_v6  ;;  %v1321_v6 = vshll.u32 %v1036_v36, 16  ;;  %v1597_v46 = vld [vmem:[#allocation2 + $0x80] sm:$0x1]  ;;  %v895_v34 = vsel %vm6551_vm8, %v680_v28, %v894_v12 }
  0xf4   : > { %1548 = vst [vmem:[#allocation3 + $0xe8] sm:$0xf] %v1300_v2  ;;  %v6767_v39 = vpop.f32.mrf.mxu0  ;;  %v4525_v2 = vrot.slane %v1595_v13, 9  ;;  %v1751_v23 = vrot.slane %v1597_v46, 5  ;;  %v1037_v13 = vld [vmem:[#allocation2 + $0x84] sm:$0xf] }
  0xf5   : > { %896 = vst [vmem:[#allocation2 + $0x8c] sm:$0x1] %v895_v34  ;;  %v1326_v19 = vshrl.u32 %v1037_v13, 16  ;;  %v1329_v51 = vshll.u32 %v1037_v13, 16 }
  0xf6   : > { %v6747_v42 = vpop.f32.mrf.mxu2  ;;  %v6749_v56 = vpop.f32.mrf.mxu1  ;;  %v1749_v50 = vsel %vm6566_vm12, %v4525_v2, %v1748_v48  ;;  %v1038_v48 = vld [vmem:[#allocation2 + $0x88] sm:$0xf] }
  0xf7   : > { %1858 = vst [vmem:[#allocation3 + $0xf8] sm:$0xf] %v1749_v50  ;;  %v1335_v28 = vshll.u32 %v1038_v48, 16  ;;  %v1339_v2 = vshrl.u32 %v1038_v48, 16  ;;  %v1331_v9 = vrot.slane %v1329_v51, 5 }
  0xf8   : > { %v6751_v30 = vpop.f32.mrf.mxu3  ;;  %v5595_v12 = vld [vmem:[#allocation3 + $0xe8] sm:$0xf0] }
  0xf9   : > { %v1341_v50 = vrot.slane %v1339_v2, 4 }
  0xfb   : > { %2627 = vmatmul.bf16.gmra.mxu1 %v4660_v45  ;;  %v1317_v45 = vrot.slane %v1315_v21, 4  ;;  %v1752_v21 = vsel %vm6566_vm12, %v1750_v17, %v1751_v23  ;;  %v4681_v23 = vld [vmem:[#allocation3 + $0xe4] sm:$0xf0] }
  0xfc   : > { %1859 = vst [vmem:[#allocation3 + $0x104] sm:$0xf] %v1752_v21  ;;  %v1039_v17 = vld [vmem:[#allocation2 + $0x8c] sm:$0x1]  ;;  %v1598_v21 = vld [vmem:[#allocation2 + $0x84] sm:$0xe] }
  0xfd   : > { %2716 = vmatmul.bf16.gmra.mxu2 %v4664_v8  ;;  %v1318_v60 = vor.u32 %v1317_v45, %v1313_v38  ;;  %v5519_v45 = vld [vmem:[#allocation3 + $0xb0] sm:$0xf0] }
  0xfe   : > { %v6763_v16 = vpop.f32.mrf.mxu2  ;;  %v6765_v14 = vpop.f32.mrf.mxu1  ;;  %v1600_v54 = vld [vmem:[#allocation2 + $0x8c] sm:$0x1] }
  0xff   : > { %3294 = vmatmul.bf16.gmra.mxu0 %v4948_v26  ;;  %v1309_v26 = vrot.slane %v1308_v44, 4  ;;  %v1319_v55 = vrot.slane %v1318_v60, 4  ;;  %v5593_v60 = vld [vmem:[#allocation3 + $0xdc] sm:$0xf] }
 0x100   : > { %v6770_v24 = vpop.f32.mrf.mxu3  ;;  %v4684_v13 = vor.u32 %v5593_v60, %v4681_v23  ;;  %v901_v23 = vld [vmem:[#allocation2 + $0x98] sm:$0x1] }
 0x101   : > { %7108 = vst [vmem:[#allocation4_spill] sm:$0xff] %v6770_v24  ;;  %v1314_v43 = vsel %vm6572_vm13, %v1309_v26, %v1313_v38  ;;  %v4955_v38 = vld [vmem:[#allocation3 + $0xa8] sm:$0xf] }
 0x102   : > { %1549 = vst [vmem:[#allocation3 + $0xf4] sm:$0xf] %v1314_v43  ;;  %v1345_v43 = vshll.u32 %v1039_v17, 16 }
 0x103   : > { %3205 = vmatmul.bf16.gmra.mxu3 %v4944_v15  ;;  %v1323_v15 = vrot.slane %v1321_v6, 5  ;;  %v6794_v1 = vpop.f32.mrf.mxu0  ;;  %v4956_v6 = vor.u32 %v5519_v45, %v4955_v38  ;;  %v4526_v38 = vrot.slane %v1598_v21, 9 }
 0x105   : > { %v1324_v41 = vsel %vm6572_vm13, %v1319_v55, %v1323_v15  ;;  %v4687_v15 = vld [vmem:[#allocation3 + $0xe0] sm:$0xf]  ;;  %v1337_v55 = vrot.slane %v1335_v28, 5 }
 0x106   : > { %v6778_v8 = vpop.f32.mrf.mxu2  ;;  %v6780_v22 = vpop.f32.mrf.mxu1  ;;  %1550 = vst [vmem:[#allocation3 + $0x100] sm:$0xf] %v1324_v41 }
 0x107   : > { %v1342_v34 = vor.u32 %v1341_v50, %v1337_v55 }
 0x108   : > { %v6800_v36 = vpop.f32.mrf.mxu3 }
 0x109   : > { %7109 = vst [vmem:[#allocation5_spill] sm:$0xff] %v6800_v36  ;;  %v1343_v2 = vrot.slane %v1342_v34, 4  ;;  %v1040_v34 = vld [vmem:[#allocation2 + $0x90] sm:$0xf] }
 0x10b   : > { %2632 = vmatmul.bf16.gmra.mxu1 %v4672_v37  ;;  %v1328_v37 = vrot.slane %v1326_v19, 4  ;;  %v6806_v26 = vpop.f32.mrf.mxu0  ;;  %v1347_v19 = vrot.slane %v1345_v43, 5 }
 0x10d   : > { %2721 = vmatmul.bf16.gmra.mxu2 %v4676_v0  ;;  %v1755_v0 = vrot.slane %v1599_v33, 5  ;;  %v1332_v18 = vor.u32 %v1331_v9, %v1328_v37  ;;  %v4688_v9 = vor.u32 %v5595_v12, %v4687_v15  ;;  %v5521_v33 = vld [vmem:[#allocation3 + $0xc4] sm:$0xf]  ;;  %v1348_v60 = vsel %vm6572_vm13, %v1343_v2, %v1347_v19  ;;  %v4967_v15 = vld [vmem:[#allocation3 + $0xc0] sm:$0xf] }
 0x10e   : > { %v6802_v44 = vpop.f32.mrf.mxu1  ;;  %1552 = vst [vmem:[#allocation3 + $0x118] sm:$0xf] %v1348_v60  ;;  %v4693_v19 = vld [vmem:[#allocation3 + $0xfc] sm:$0xf0]  ;;  %v1353_v2 = vshll.u32 %v1040_v34, 16 }
 0x10f   : > { %3299 = vmatmul.bf16.gmra.mxu0 %v4960_v58  ;;  %v1757_v45 = vrot.slane %v1755_v0, 4  ;;  %v1758_v58 = vrot.slane %v1600_v54, 5  ;;  %v1333_v48 = vrot.slane %v1332_v18, 4  ;;  %v1756_v37 = vsel %vm6566_vm12, %v4526_v38, %v1755_v0  ;;  %v5522_v18 = vld [vmem:[#allocation3 + $0xc8] sm:$0xf0] }
 0x110   : > { %v6804_v46 = vpop.f32.mrf.mxu2  ;;  %1860 = vst [vmem:[#allocation3 + $0x110] sm:$0xf] %v1756_v37  ;;  %v4968_v12 = vor.u32 %v5522_v18, %v4967_v15 }
 0x111   : > { %v1338_v17 = vsel %vm6572_vm13, %v1333_v48, %v1337_v55  ;;  %v1759_v50 = vsel %vm6566_vm12, %v1757_v45, %v1758_v58  ;;  %v1041_v48 = vld [vmem:[#allocation2 + $0x94] sm:$0xf] }
 0x112   : > { %1551 = vst [vmem:[#allocation3 + $0x10c] sm:$0xf] %v1338_v17  ;;  %v1359_v37 = vshll.u32 %v1041_v48, 16  ;;  %v4699_v17 = vld [vmem:[#allocation3 + $0xf8] sm:$0xf] }
 0x113   : > { %3210 = vmatmul.bf16.gmra.mxu3 %v4956_v6  ;;  %v697_v6 = vrot.slane %v6514_v20, 4  ;;  %v4969_v20 = vld [vmem:[#allocation3 + $0xcc] sm:$0xf0]  ;;  %1861 = vst [vmem:[#allocation3 + $0x11c] sm:$0xf] %v1759_v50 }
 0x114   : > { %v4972_v55 = vor.u32 %v5521_v33, %v4969_v20  ;;  %v5691_v33 = vld [vmem:[%s7095_s3 + $0x190] sm:$0xff]  ;;  %v1355_v20 = vrot.slane %v1353_v2, 5  ;;  %v1361_v60 = vrot.slane %v1359_v37, 5 }
 0x115   : > { %v902_v0 = vsel %vm6551_vm8, %v697_v6, %v901_v23  ;;  %v1350_v6 = vshrl.u32 %v1040_v34, 16  ;;  %3953 = vmatpush.bf16.msra.mxu2 %v5691_v33 }
 0x116   : > { %v6808_v41 = vpop.f32.mrf.mxu3  ;;  %903 = vst [vmem:[#allocation2 + $0x98] sm:$0x1] %v902_v0  ;;  %v714_v0 = vrot.slane %v6145_v5, 4  ;;  %v5563_v5 = vld [vmem:[%s7095_s3 + $0x90] sm:$0xff] }
 0x117   : > { %7110 = vst [vmem:[#allocation6_spill] sm:$0xff] %v6808_v41  ;;  %3350 = vmatpush.bf16.msra.mxu1 %v5563_v5 }
 0x118   : > { %v6811_v51 = vpop.f32.mrf.mxu2  ;;  %v2598_v28 = vpop.f32.mrf.mxu1 }
 0x119   : > { %v2599_v54 = vadd.f32 %v2598_v28, %v6682_v63  ;;  %v5699_v63 = vld [vmem:[%s7095_s3 + $0x1d0] sm:$0xff]  ;;  %v1352_v28 = vrot.slane %v1350_v6, 4 }
 0x11a   : > { %4042 = vmatpush.bf16.msra.mxu3 %v5699_v63 }
 0x11b   : > { %2637 = vmatmul.bf16.gmra.mxu1 %v4684_v13  ;;  %v5596_v13 = vld [vmem:[#allocation3 + $0xf4] sm:$0xf] }
 0x11c   : > { %v3265_v21 = vpop.f32.mrf.mxu0  ;;  %v4696_v15 = vor.u32 %v5596_v13, %v4693_v19  ;;  %v5707_v13 = vld [vmem:[%s7095_s3 + $0x210] sm:$0xff] }
 0x11d   : > { %2726 = vmatmul.bf16.gmra.mxu2 %v4688_v9  ;;  %v1363_v9 = vshrl.u32 %v1041_v48, 16  ;;  %v1042_v50 = vld [vmem:[#allocation2 + $0x98] sm:$0x1]  ;;  %v1356_v48 = vor.u32 %v1355_v20, %v1352_v28  ;;  %4131 = vmatpush.bf16.msra.mxu0 %v5707_v13 }
 0x11e   : > { %v6823_v43 = vpop.f32.mrf.mxu3  ;;  %v1369_v18 = vshll.u32 %v1042_v50, 16  ;;  %v1603_v41 = vld [vmem:[#allocation2 + $0x98] sm:$0x1] }
 0x11f   : > { %7111 = vst [vmem:[#allocation7_spill] sm:$0xff] %v6823_v43  ;;  %3304 = vmatmul.bf16.gmra.mxu0 %v4972_v55  ;;  %v1365_v23 = vrot.slane %v1363_v9, 4  ;;  %v1601_v55 = vld [vmem:[#allocation2 + $0x90] sm:$0xe]  ;;  %v1765_v37 = vrot.slane %v1603_v41, 5  ;;  %v1357_v63 = vrot.slane %v1356_v48, 4 }
 0x120   : > { %v2687_v38 = vpop.f32.mrf.mxu2  ;;  %v2600_v45 = vpop.f32.mrf.mxu1  ;;  %v4527_v6 = vrot.slane %v1601_v55, 9  ;;  %v1371_v19 = vrot.slane %v1369_v18, 5  ;;  %v4981_v55 = vld [vmem:[#allocation3 + $0xe4] sm:$0xf0] }
 0x121   : > { %v2688_v58 = vadd.f32 %v2687_v38, %v2599_v54  ;;  %v1602_v54 = vld [vmem:[#allocation2 + $0x94] sm:$0xf]  ;;  %v5598_v38 = vld [vmem:[#allocation3 + $0x100] sm:$0xf0]  ;;  %v1366_v43 = vor.u32 %v1365_v23, %v1361_v60  ;;  %v2601_v2 = vadd.f32 %v2600_v45, %v6687_v29  ;;  %v1362_v41 = vsel %vm6572_vm13, %v1357_v63, %v1361_v60 }
 0x122   : > { %v1762_v36 = vrot.slane %v1602_v54, 5  ;;  %v4700_v29 = vor.u32 %v5598_v38, %v4699_v17  ;;  %v5524_v23 = vld [vmem:[#allocation3 + $0xdc] sm:$0xf]  ;;  %v908_v54 = vld [vmem:[#allocation2 + $0xa4] sm:$0x1] }
 0x123   : > { %3215 = vmatmul.bf16.gmra.mxu3 %v4968_v12  ;;  %v1367_v28 = vrot.slane %v1366_v43, 4  ;;  %1553 = vst [vmem:[#allocation3 + $0x124] sm:$0xf] %v1362_v41  ;;  %v4979_v17 = vld [vmem:[#allocation3 + $0xd8] sm:$0xf] }
 0x124   : > { %v3267_v34 = vpop.f32.mrf.mxu0  ;;  %v1763_v50 = vsel %vm6566_vm12, %v4527_v6, %v1762_v36 }
 0x125   : > { %1862 = vst [vmem:[#allocation3 + $0x128] sm:$0xf] %v1763_v50  ;;  %v1372_v18 = vsel %vm6572_vm13, %v1367_v28, %v1371_v19  ;;  %v5599_v19 = vld [vmem:[#allocation3 + $0x10c] sm:$0xf] }
 0x126   : > { %v3176_v12 = vpop.f32.mrf.mxu3  ;;  %1554 = vst [vmem:[#allocation3 + $0x130] sm:$0xf] %v1372_v18 }
 0x127   : > { %v3177_v24 = vadd.f32 %v3176_v12, %v2688_v58  ;;  %v1764_v58 = vrot.slane %v1762_v36, 4  ;;  %v909_v36 = vsel %vm6551_vm8, %v714_v0, %v908_v54  ;;  %v1044_v0 = vld [vmem:[#allocation2 + $0xa0] sm:$0xf] }
 0x128   : > { %v2689_v9 = vpop.f32.mrf.mxu2  ;;  %v2603_v33 = vpop.f32.mrf.mxu1  ;;  %910 = vst [vmem:[#allocation2 + $0xa4] sm:$0x1] %v909_v36  ;;  %v1383_v28 = vshll.u32 %v1044_v0, 16  ;;  %v1387_v50 = vshrl.u32 %v1044_v0, 16 }
 0x129   : > { %v2690_v20 = vadd.f32 %v2689_v9, %v2601_v2  ;;  %v6842_v45 = vadd.f32 %v3265_v21, %v3177_v24  ;;  %v1766_v43 = vsel %vm6566_vm12, %v1764_v58, %v1765_v37  ;;  %v5525_v24 = vld [vmem:[#allocation3 + $0xe0] sm:$0xf0]  ;;  %v4984_v21 = vor.u32 %v5524_v23, %v4981_v55  ;;  %v4705_v9 = vld [vmem:[#allocation3 + $0x114] sm:$0xf0]  ;;  %v1605_v55 = vld [vmem:[#allocation2 + $0xa0] sm:$0xf] }
 0x12a   : > { %1863 = vst [vmem:[#allocation3 + $0x134] sm:$0xf] %v1766_v43  ;;  %v2604_v48 = vadd.f32 %v2603_v33, %v6705_v62  ;;  %v4980_v6 = vor.u32 %v5525_v24, %v4979_v17  ;;  %v1043_v2 = vld [vmem:[#allocation2 + $0x9c] sm:$0xf]  ;;  %v1385_v33 = vrot.slane %v1383_v28, 5  ;;  %v1389_v23 = vrot.slane %v1387_v50, 4 }
 0x12b   : > { %7112 = vst [vmem:[#allocation8_spill] sm:$0xff] %v6842_v45  ;;  %2642 = vmatmul.bf16.gmra.mxu1 %v4696_v15  ;;  %v1374_v37 = vshrl.u32 %v1043_v2, 16  ;;  %v1377_v63 = vshll.u32 %v1043_v2, 16  ;;  %v4708_v41 = vor.u32 %v5599_v19, %v4705_v9  ;;  %v1604_v43 = vld [vmem:[#allocation2 + $0x9c] sm:$0xe] }
 0x12c   : > { %v3270_v60 = vpop.f32.mrf.mxu0  ;;  %v4711_v24 = vld [vmem:[#allocation3 + $0x110] sm:$0xf] }
 0x12d   : > { %2731 = vmatmul.bf16.gmra.mxu2 %v4700_v29  ;;  %v1376_v29 = vrot.slane %v1374_v37, 4  ;;  %v1379_v62 = vrot.slane %v1377_v63, 5 }
 0x12e   : > { %v3178_v12 = vpop.f32.mrf.mxu3 }
 0x12f   : > { %v3179_v38 = vadd.f32 %v3178_v12, %v2690_v20  ;;  %3309 = vmatmul.bf16.gmra.mxu0 %v4984_v21  ;;  %v731_v20 = vrot.slane %v6296_v52, 4  ;;  %v1045_v18 = vld [vmem:[#allocation2 + $0xa4] sm:$0x1]  ;;  %v5601_v21 = vld [vmem:[#allocation3 + $0x118] sm:$0xf0]  ;;  %v1380_v12 = vor.u32 %v1379_v62, %v1376_v29  ;;  %v1769_v52 = vrot.slane %v1605_v55, 5 }
 0x130   : > { %v2692_v5 = vpop.f32.mrf.mxu2  ;;  %v2605_v15 = vpop.f32.mrf.mxu1  ;;  %v1606_v54 = vld [vmem:[#allocation2 + $0xa4] sm:$0x1]  ;;  %v4712_v50 = vor.u32 %v5601_v21, %v4711_v24  ;;  %v4993_v62 = vld [vmem:[#allocation3 + $0xfc] sm:$0xf0]  ;;  %v1046_v21 = vld [vmem:[#allocation2 + $0xa8] sm:$0xf] }
 0x131   : > { %v2693_v13 = vadd.f32 %v2692_v5, %v2604_v48  ;;  %v6853_v58 = vadd.f32 %v3267_v34, %v3179_v38  ;;  %v1390_v48 = vor.u32 %v1389_v23, %v1385_v33  ;;  %v1393_v34 = vshll.u32 %v1045_v18, 16 }
 0x132   : > { %v4528_v38 = vrot.slane %v1604_v43, 9  ;;  %v2606_v2 = vadd.f32 %v2605_v15, %v6734_v49  ;;  %v1772_v5 = vrot.slane %v1606_v54, 5  ;;  %v1381_v63 = vrot.slane %v1380_v12, 4  ;;  %v915_v15 = vld [vmem:[#allocation2 + $0xb0] sm:$0x1] }
 0x133   : > { %7113 = vst [vmem:[#allocation9_spill] sm:$0xff] %v6853_v58  ;;  %3220 = vmatmul.bf16.gmra.mxu3 %v4980_v6  ;;  %v1391_v19 = vrot.slane %v1390_v48, 4  ;;  %v1395_v9 = vrot.slane %v1393_v34, 5  ;;  %v5527_v58 = vld [vmem:[#allocation3 + $0xf4] sm:$0xf]  ;;  %v1771_v29 = vrot.slane %v1769_v52, 4  ;;  %v916_v18 = vsel %vm6551_vm8, %v731_v20, %v915_v15 }
 0x134   : > { %v3272_v17 = vpop.f32.mrf.mxu0  ;;  %v1770_v45 = vsel %vm6566_vm12, %v4528_v38, %v1769_v52  ;;  %v4991_v43 = vld [vmem:[#allocation3 + $0xf0] sm:$0xf]  ;;  %v5528_v54 = vld [vmem:[#allocation3 + $0xf8] sm:$0xf0]  ;;  %917 = vst [vmem:[#allocation2 + $0xb0] sm:$0x1] %v916_v18 }
 0x135   : > { %v1396_v49 = vsel %vm6572_vm13, %v1391_v19, %v1395_v9  ;;  %1864 = vst [vmem:[#allocation3 + $0x140] sm:$0xf] %v1770_v45  ;;  %v1773_v55 = vsel %vm6566_vm12, %v1771_v29, %v1772_v5  ;;  %v1047_v34 = vld [vmem:[#allocation2 + $0xac] sm:$0xf]  ;;  %v4723_v19 = vld [vmem:[#allocation3 + $0x128] sm:$0xf] }
 0x136   : > { %v3181_v36 = vpop.f32.mrf.mxu3  ;;  %1556 = vst [vmem:[#allocation3 + $0x148] sm:$0xf] %v1396_v49  ;;  %v1407_v52 = vshll.u32 %v1047_v34, 16  ;;  %v1411_v5 = vshrl.u32 %v1047_v34, 16  ;;  %v1608_v49 = vld [vmem:[#allocation2 + $0xac] sm:$0xf] }
 0x137   : > { %v3182_v6 = vadd.f32 %v3181_v36, %v2693_v13  ;;  %v1386_v13 = vsel %vm6572_vm13, %v1381_v63, %v1385_v33  ;;  %v4996_v33 = vor.u32 %v5527_v58, %v4993_v62  ;;  %1865 = vst [vmem:[#allocation3 + $0x14c] sm:$0xf] %v1773_v55  ;;  %v1401_v58 = vshll.u32 %v1046_v21, 16  ;;  %v4717_v63 = vld [vmem:[#allocation3 + $0x12c] sm:$0xf0] }
 0x138   : > { %v2694_v0 = vpop.f32.mrf.mxu2  ;;  %v2608_v37 = vpop.f32.mrf.mxu1  ;;  %1555 = vst [vmem:[#allocation3 + $0x13c] sm:$0xf] %v1386_v13  ;;  %v1409_v29 = vrot.slane %v1407_v52, 5  ;;  %v1413_v62 = vrot.slane %v1411_v5, 4  ;;  %v1607_v13 = vld [vmem:[#allocation2 + $0xa8] sm:$0xe] }
 0x139   : > { %v2695_v28 = vadd.f32 %v2694_v0, %v2606_v2  ;;  %v6863_v23 = vadd.f32 %v3270_v60, %v3182_v6  ;;  %v2609_v60 = vadd.f32 %v2608_v37, %v6745_v11  ;;  %v1398_v6 = vshrl.u32 %v1046_v21, 16  ;;  %v5602_v2 = vld [vmem:[#allocation3 + $0x124] sm:$0xf]  ;;  %v5690_v11 = vld [vmem:[%s7095_s3 + $0x188] sm:$0xff] }
 0x13a   : > { %v5698_v37 = vld [vmem:[%s7095_s3 + $0x1c8] sm:$0xff]  ;;  %3954 = vmatpush.bf16.msra.mxu2 %v5690_v11  ;;  %v1776_v21 = vrot.slane %v1608_v49, 5 }
 0x13b   : > { %2647 = vmatmul.bf16.gmra.mxu1 %v4708_v41  ;;  %v4992_v41 = vor.u32 %v5528_v54, %v4991_v43  ;;  %v1400_v9 = vrot.slane %v1398_v6, 4  ;;  %4043 = vmatpush.bf16.msra.mxu3 %v5698_v37  ;;  %v1414_v43 = vor.u32 %v1413_v62, %v1409_v29 }
 0x13c   : > { %v6869_v24 = vpop.f32.mrf.mxu0  ;;  %v1778_v37 = vrot.slane %v1776_v21, 4 }
 0x13d   : > { %2736 = vmatmul.bf16.gmra.mxu2 %v4712_v50  ;;  %v1403_v50 = vrot.slane %v1401_v58, 5  ;;  %v1415_v52 = vrot.slane %v1414_v43, 4  ;;  %v1049_v43 = vld [vmem:[#allocation2 + $0xb4] sm:$0xf] }
 0x13e   : > { %v3183_v36 = vpop.f32.mrf.mxu3 }
 0x13f   : > { %v3184_v45 = vadd.f32 %v3183_v36, %v2695_v28  ;;  %3314 = vmatmul.bf16.gmra.mxu0 %v4996_v33  ;;  %v5604_v28 = vld [vmem:[#allocation3 + $0x130] sm:$0xf0]  ;;  %v1404_v18 = vor.u32 %v1403_v50, %v1400_v9  ;;  %v1609_v33 = vld [vmem:[#allocation2 + $0xb0] sm:$0x1]  ;;  %v4529_v36 = vrot.slane %v1607_v13, 9 }
 0x140   : > { %v2697_v12 = vpop.f32.mrf.mxu2  ;;  %v2610_v48 = vpop.f32.mrf.mxu1  ;;  %v4724_v6 = vor.u32 %v5604_v28, %v4723_v19  ;;  %v5005_v9 = vld [vmem:[#allocation3 + $0x114] sm:$0xf0]  ;;  %v922_v28 = vld [vmem:[#allocation2 + $0xbc] sm:$0x1]  ;;  %v5531_v13 = vld [vmem:[#allocation3 + $0x110] sm:$0xf0] }
 0x141   : > { %v2698_v20 = vadd.f32 %v2697_v12, %v2609_v60  ;;  %v2611_v38 = vadd.f32 %v2610_v48, %v6767_v39  ;;  %v6873_v0 = vadd.f32 %v3272_v17, %v3184_v45  ;;  %v748_v39 = vrot.slane %v6436_v10, 4  ;;  %v1048_v17 = vld [vmem:[#allocation2 + $0xb0] sm:$0x1]  ;;  %v5562_v10 = vld [vmem:[%s7095_s3 + $0x88] sm:$0xff] }
 0x142   : > { %v1417_v54 = vshll.u32 %v1048_v17, 16  ;;  %v4720_v60 = vor.u32 %v5602_v2, %v4717_v63  ;;  %v1779_v12 = vrot.slane %v1609_v33, 5  ;;  %v1405_v58 = vrot.slane %v1404_v18, 4  ;;  %v5530_v2 = vld [vmem:[#allocation3 + $0x10c] sm:$0xf]  ;;  %3351 = vmatpush.bf16.msra.mxu1 %v5562_v10 }
 0x143   : > { %3225 = vmatmul.bf16.gmra.mxu3 %v4992_v41  ;;  %v5706_v41 = vld [vmem:[%s7095_s3 + $0x208] sm:$0xff]  ;;  %v1777_v63 = vsel %vm6566_vm12, %v4529_v36, %v1776_v21  ;;  %v923_v62 = vsel %vm6551_vm8, %v748_v39, %v922_v28  ;;  %v5003_v17 = vld [vmem:[#allocation3 + $0x108] sm:$0xf]  ;;  %v1050_v36 = vld [vmem:[#allocation2 + $0xb8] sm:$0xf]  ;;  %v1422_v39 = vshrl.u32 %v1049_v43, 16 }
 0x144   : > { %v3277_v55 = vpop.f32.mrf.mxu0  ;;  %v1419_v5 = vrot.slane %v1417_v54, 5  ;;  %4132 = vmatpush.bf16.msra.mxu0 %v5706_v41  ;;  %v1410_v50 = vsel %vm6572_vm13, %v1405_v58, %v1409_v29  ;;  %1866 = vst [vmem:[#allocation3 + $0x158] sm:$0xf] %v1777_v63  ;;  %v5008_v29 = vor.u32 %v5530_v2, %v5005_v9  ;;  %v1425_v10 = vshll.u32 %v1049_v43, 16  ;;  %v1611_v2 = vld [vmem:[#allocation2 + $0xb8] sm:$0xf] }
 0x145   : > { %1557 = vst [vmem:[#allocation3 + $0x154] sm:$0xf] %v1410_v50  ;;  %v1431_v41 = vshll.u32 %v1050_v36, 16  ;;  %v1435_v21 = vshrl.u32 %v1050_v36, 16  ;;  %v765_v58 = vrot.slane %v6533_v53, 4 }
 0x146   : > { %v3186_v15 = vpop.f32.mrf.mxu3  ;;  %v1420_v19 = vsel %vm6572_vm13, %v1415_v52, %v1419_v5  ;;  %924 = vst [vmem:[#allocation2 + $0xbc] sm:$0x1] %v923_v62  ;;  %v1427_v52 = vrot.slane %v1425_v10, 5  ;;  %v4735_v50 = vld [vmem:[#allocation3 + $0x140] sm:$0xf] }
 0x147   : > { %v3187_v45 = vadd.f32 %v3186_v15, %v2698_v20  ;;  %1558 = vst [vmem:[#allocation3 + $0x160] sm:$0xf] %v1420_v19  ;;  %v1433_v5 = vrot.slane %v1431_v41, 5  ;;  %v5607_v19 = vld [vmem:[#allocation3 + $0x148] sm:$0xf0] }
 0x148   : > { %v2699_v48 = vpop.f32.mrf.mxu2  ;;  %v2613_v34 = vpop.f32.mrf.mxu1  ;;  %v4736_v36 = vor.u32 %v5607_v19, %v4735_v50  ;;  %v1052_v50 = vld [vmem:[#allocation2 + $0xc0] sm:$0xf] }
 0x149   : > { %v2700_v11 = vadd.f32 %v2699_v48, %v2611_v38  ;;  %v2614_v20 = vadd.f32 %v2613_v34, %v6794_v1  ;;  %v6896_v38 = vadd.f32 %v6869_v24, %v3187_v45  ;;  %v1780_v1 = vsel %vm6566_vm12, %v1778_v37, %v1779_v12  ;;  %v5605_v48 = vld [vmem:[#allocation3 + $0x13c] sm:$0xf]  ;;  %v4729_v34 = vld [vmem:[#allocation3 + $0x144] sm:$0xf0] }
 0x14a   : > { %1867 = vst [vmem:[#allocation3 + $0x164] sm:$0xf] %v1780_v1  ;;  %v5004_v24 = vor.u32 %v5531_v13, %v5003_v17  ;;  %v4732_v13 = vor.u32 %v5605_v48, %v4729_v34  ;;  %v929_v48 = vld [vmem:[#allocation2 + $0xc8] sm:$0x1] }
 0x14b   : > { %2652 = vmatmul.bf16.gmra.mxu1 %v4720_v60 }
 0x14c   : > { %v3280_v15 = vpop.f32.mrf.mxu0 }
 0x14d   : > { %2741 = vmatmul.bf16.gmra.mxu2 %v4724_v6  ;;  %v1424_v6 = vrot.slane %v1422_v39, 4  ;;  %v1051_v63 = vld [vmem:[#allocation2 + $0xbc] sm:$0x1] }
 0x14e   : > { %v3188_v49 = vpop.f32.mrf.mxu3  ;;  %v1612_v37 = vld [vmem:[#allocation2 + $0xbc] sm:$0x1]  ;;  %v1441_v1 = vshll.u32 %v1051_v63, 16 }
 0x14f   : > { %v3189_v18 = vadd.f32 %v3188_v49, %v2700_v11  ;;  %3319 = vmatmul.bf16.gmra.mxu0 %v5008_v29  ;;  %v1437_v11 = vrot.slane %v1435_v21, 4  ;;  %v1428_v28 = vor.u32 %v1427_v52, %v1424_v6  ;;  %v1783_v29 = vrot.slane %v1611_v2, 5  ;;  %v5533_v39 = vld [vmem:[#allocation3 + $0x124] sm:$0xf]  ;;  %v5017_v21 = vld [vmem:[#allocation3 + $0x12c] sm:$0xf0] }
 0x150   : > { %v2702_v54 = vpop.f32.mrf.mxu2  ;;  %v2615_v33 = vpop.f32.mrf.mxu1  ;;  %v1786_v49 = vrot.slane %v1612_v37, 5  ;;  %v930_v52 = vsel %vm6551_vm8, %v765_v58, %v929_v48  ;;  %v5534_v2 = vld [vmem:[#allocation3 + $0x128] sm:$0xf0]  ;;  %v5608_v58 = vld [vmem:[#allocation3 + $0x154] sm:$0xf] }
 0x151   : > { %v2703_v45 = vadd.f32 %v2702_v54, %v2614_v20  ;;  %v2616_v60 = vadd.f32 %v2615_v33, %v6806_v26  ;;  %v6903_v12 = vadd.f32 %v3277_v55, %v3189_v18  ;;  %v1610_v20 = vld [vmem:[#allocation2 + $0xb4] sm:$0xe]  ;;  %v1438_v55 = vor.u32 %v1437_v11, %v1433_v5  ;;  %v5015_v11 = vld [vmem:[#allocation3 + $0x120] sm:$0xf]  ;;  %931 = vst [vmem:[#allocation2 + $0xc8] sm:$0x1] %v930_v52 }
 0x152   : > { %v4530_v62 = vrot.slane %v1610_v20, 9  ;;  %v1443_v54 = vrot.slane %v1441_v1, 5  ;;  %v1785_v41 = vrot.slane %v1783_v29, 4  ;;  %v1446_v1 = vshrl.u32 %v1052_v50, 16 }
 0x153   : > { %3230 = vmatmul.bf16.gmra.mxu3 %v5004_v24  ;;  %v1429_v24 = vrot.slane %v1428_v28, 4  ;;  %v1439_v43 = vrot.slane %v1438_v55, 4  ;;  %v1053_v55 = vld [vmem:[#allocation2 + $0xc4] sm:$0xf] }
 0x154   : > { %v3282_v9 = vpop.f32.mrf.mxu0  ;;  %v1784_v10 = vsel %vm6566_vm12, %v4530_v62, %v1783_v29  ;;  %v4741_v62 = vld [vmem:[#allocation3 + $0x15c] sm:$0xf0]  ;;  %v1459_v29 = vshrl.u32 %v1053_v55, 16 }
 0x155   : > { %v1434_v6 = vsel %vm6572_vm13, %v1429_v24, %v1433_v5  ;;  %1868 = vst [vmem:[#allocation3 + $0x170] sm:$0xf] %v1784_v10  ;;  %v5020_v5 = vor.u32 %v5533_v39, %v5017_v21  ;;  %v4747_v24 = vld [vmem:[#allocation3 + $0x158] sm:$0xf]  ;;  %v1614_v10 = vld [vmem:[#allocation2 + $0xc4] sm:$0xf] }
 0x156   : > { %v3191_v26 = vpop.f32.mrf.mxu3  ;;  %1559 = vst [vmem:[#allocation3 + $0x16c] sm:$0xf] %v1434_v6  ;;  %v5610_v6 = vld [vmem:[#allocation3 + $0x160] sm:$0xf0] }
 0x157   : > { %v3192_v17 = vadd.f32 %v3191_v26, %v2703_v45  ;;  %v1444_v45 = vsel %vm6572_vm13, %v1439_v43, %v1443_v54  ;;  %v5016_v26 = vor.u32 %v5534_v2, %v5015_v11 }
 0x158   : > { %v2704_v53 = vpop.f32.mrf.mxu2  ;;  %v2618_v18 = vpop.f32.mrf.mxu1  ;;  %1560 = vst [vmem:[#allocation3 + $0x178] sm:$0xf] %v1444_v45  ;;  %v1054_v39 = vld [vmem:[#allocation2 + $0xc8] sm:$0x1] }
 0x159   : > { %v2705_v33 = vadd.f32 %v2704_v53, %v2616_v60  ;;  %v6912_v34 = vadd.f32 %v3280_v15, %v3192_v17  ;;  %v1787_v60 = vsel %vm6566_vm12, %v1785_v41, %v1786_v49  ;;  %v2619_v15 = vadd.f32 %v2618_v18, %v6685_v35  ;;  %v5689_v35 = vld [vmem:[%s7095_s3 + $0x180] sm:$0xff]  ;;  %v1615_v52 = vld [vmem:[#allocation2 + $0xc8] sm:$0x1] }
 0x15a   : > { %1869 = vst [vmem:[#allocation3 + $0x17c] sm:$0xf] %v1787_v60  ;;  %v1449_v17 = vshll.u32 %v1052_v50, 16  ;;  %v5697_v53 = vld [vmem:[%s7095_s3 + $0x1c0] sm:$0xff]  ;;  %v1448_v18 = vrot.slane %v1446_v1, 4  ;;  %3955 = vmatpush.bf16.msra.mxu2 %v5689_v35  ;;  %v1465_v60 = vshll.u32 %v1054_v39, 16 }
 0x15b   : > { %2657 = vmatmul.bf16.gmra.mxu1 %v4732_v13  ;;  %v1455_v13 = vshll.u32 %v1053_v55, 16  ;;  %4044 = vmatpush.bf16.msra.mxu3 %v5697_v53 }
 0x15c   : > { %v3285_v20 = vpop.f32.mrf.mxu0  ;;  %v1451_v43 = vrot.slane %v1449_v17, 5  ;;  %v1467_v1 = vrot.slane %v1465_v60, 5  ;;  %v4748_v17 = vor.u32 %v5610_v6, %v4747_v24  ;;  %v5027_v24 = vld [vmem:[#allocation3 + $0x138] sm:$0xf] }
 0x15d   : > { %2746 = vmatmul.bf16.gmra.mxu2 %v4736_v36  ;;  %v1457_v54 = vrot.slane %v1455_v13, 5  ;;  %v4744_v36 = vor.u32 %v5608_v58, %v4741_v62  ;;  %v5029_v13 = vld [vmem:[#allocation3 + $0x144] sm:$0xf0]  ;;  %v5611_v60 = vld [vmem:[#allocation3 + $0x16c] sm:$0xf] }
 0x15e   : > { %v3193_v63 = vpop.f32.mrf.mxu3  ;;  %v1452_v45 = vor.u32 %v1451_v43, %v1448_v18  ;;  %v5537_v43 = vld [vmem:[#allocation3 + $0x140] sm:$0xf0] }
 0x15f   : > { %v3194_v37 = vadd.f32 %v3193_v63, %v2705_v33  ;;  %3324 = vmatmul.bf16.gmra.mxu0 %v5020_v5  ;;  %v1461_v33 = vrot.slane %v1459_v29, 4  ;;  %v5561_v63 = vld [vmem:[%s7095_s3 + $0x80] sm:$0xff] }
 0x160   : > { %v2707_v19 = vpop.f32.mrf.mxu2  ;;  %v2620_v28 = vpop.f32.mrf.mxu1  ;;  %v1453_v55 = vrot.slane %v1452_v45, 4  ;;  %3352 = vmatpush.bf16.msra.mxu1 %v5561_v63  ;;  %v1567_v63 = vld [vmem:[#allocation2 + $0x8] sm:$0x1] }
 0x161   : > { %v2708_v3 = vadd.f32 %v2707_v19, %v2619_v15  ;;  %v6919_v49 = vadd.f32 %v3282_v9, %v3194_v37  ;;  %v1613_v9 = vld [vmem:[#allocation2 + $0xc0] sm:$0xe]  ;;  %v1462_v48 = vor.u32 %v1461_v33, %v1457_v54  ;;  %v2621_v5 = vadd.f32 %v2620_v28, %v6701_v59 }
 0x162   : > { %v4531_v11 = vrot.slane %v1613_v9, 9  ;;  %v5705_v37 = vld [vmem:[%s7095_s3 + $0x200] sm:$0xff]  ;;  %v1790_v15 = vrot.slane %v1614_v10, 5  ;;  %v1458_v29 = vsel %vm6572_vm13, %v1453_v55, %v1457_v54 }
 0x163   : > { %3235 = vmatmul.bf16.gmra.mxu3 %v5016_v26  ;;  %v1793_v26 = vrot.slane %v1615_v52, 5  ;;  %v1463_v58 = vrot.slane %v1462_v48, 4  ;;  %4133 = vmatpush.bf16.msra.mxu0 %v5705_v37  ;;  %1561 = vst [vmem:[#allocation3 + $0x184] sm:$0xf] %v1458_v29  ;;  %v1566_v48 = vld [vmem:[#allocation2 + $0x4] sm:$0xf] }
 0x164   : > { %v3287_v21 = vpop.f32.mrf.mxu0  ;;  %v1791_v59 = vsel %vm6566_vm12, %v4531_v11, %v1790_v15  ;;  %v1792_v28 = vrot.slane %v1790_v15, 4  ;;  %v4753_v52 = vld [vmem:[#allocation3 + $0x174] sm:$0xf0]  ;;  %v1678_v11 = vrot.slane %v1566_v48, 5  ;;  %v5539_v29 = vld [vmem:[#allocation3 + $0x154] sm:$0xf] }
 0x165   : > { %v1468_v35 = vsel %vm6572_vm13, %v1463_v58, %v1467_v1  ;;  %1870 = vst [vmem:[#allocation3 + $0x188] sm:$0xf] %v1791_v59  ;;  %v4756_v1 = vor.u32 %v5611_v60, %v4753_v52 }
 0x166   : > { %v3196_v41 = vpop.f32.mrf.mxu3  ;;  %v1794_v18 = vsel %vm6566_vm12, %v1792_v28, %v1793_v26  ;;  %1562 = vst [vmem:[#allocation3 + $0x190] sm:$0xf] %v1468_v35  ;;  %v5613_v26 = vld [vmem:[#allocation3 + $0x178] sm:$0xf0]  ;;  %v5041_v35 = vld [vmem:[#allocation3 + $0x15c] sm:$0xf0] }
 0x167   : > { %v3197_v2 = vadd.f32 %v3196_v41, %v2708_v3  ;;  %v5536_v3 = vld [vmem:[#allocation3 + $0x13c] sm:$0xf]  ;;  %1871 = vst [vmem:[#allocation3 + $0x194] sm:$0xf] %v1794_v18  ;;  %v5028_v41 = vor.u32 %v5537_v43, %v5027_v24  ;;  %v5039_v18 = vld [vmem:[#allocation3 + $0x150] sm:$0xf]  ;;  %v5044_v24 = vor.u32 %v5539_v29, %v5041_v35 }
 0x168   : > { %v2709_v50 = vpop.f32.mrf.mxu2  ;;  %v2623_v19 = vpop.f32.mrf.mxu1  ;;  %v5032_v33 = vor.u32 %v5536_v3, %v5029_v13 }
 0x169   : > { %v2710_v62 = vadd.f32 %v2709_v50, %v2621_v5  ;;  %v6940_v53 = vadd.f32 %v3285_v20, %v3197_v2  ;;  %v2624_v10 = vadd.f32 %v2623_v19, %v6722_v27  ;;  %v4759_v2 = vld [vmem:[#allocation3 + $0x170] sm:$0xf]  ;;  %v1565_v5 = vld [vmem:[#allocation2] sm:$0xe]  ;;  %v1680_v27 = vrot.slane %v1678_v11, 4 }
 0x16a   : > { %v4515_v50 = vrot.slane %v1565_v5, 9  ;;  %v1681_v19 = vrot.slane %v1567_v63, 5  ;;  %v4760_v3 = vor.u32 %v5613_v26, %v4759_v2 }
 0x16b   : > { %2662 = vmatmul.bf16.gmra.mxu1 %v4744_v36 }
 0x16c   : > { %v3290_v9 = vpop.f32.mrf.mxu0  ;;  %v1682_v59 = vsel %vm6566_vm12, %v1680_v27, %v1681_v19 }
 0x16d   : > { %2751 = vmatmul.bf16.gmra.mxu2 %v4748_v17  ;;  %v1679_v17 = vsel %vm6566_vm12, %v4515_v50, %v1678_v11  ;;  %1839 = vst [vmem:[#allocation3 + $0x14] sm:$0xf] %v1682_v59  ;;  %v4765_v48 = vld [vmem:[#allocation3 + $0x18c] sm:$0xf0]  ;;  %v4771_v11 = vld [vmem:[#allocation3 + $0x188] sm:$0xf] }
 0x16e   : > { %v3198_v39 = vpop.f32.mrf.mxu3  ;;  %1838 = vst [vmem:[#allocation3 + $0x8] sm:$0xf] %v1679_v17  ;;  %v5616_v2 = vld [vmem:[#allocation3 + $0x190] sm:$0xf0] }
 0x16f   : > { %v3199_v54 = vadd.f32 %v3198_v39, %v2710_v62  ;;  %3329 = vmatmul.bf16.gmra.mxu0 %v5032_v33  ;;  %v4772_v27 = vor.u32 %v5616_v2, %v4771_v11  ;;  %v5215_v11 = vld [vmem:[#allocation3 + $0x38] sm:$0xf]  ;;  %v5641_v2 = vld [vmem:[#allocation3 + $0x34] sm:$0xf] }
 0x170   : > { %v2712_v6 = vpop.f32.mrf.mxu2  ;;  %v2625_v20 = vpop.f32.mrf.mxu1 }
 0x171   : > { %v2713_v36 = vadd.f32 %v2712_v6, %v2624_v10  ;;  %v6945_v45 = vadd.f32 %v3287_v21, %v3199_v54  ;;  %v2626_v58 = vadd.f32 %v2625_v20, %v6740_v4  ;;  %v5540_v4 = vld [vmem:[#allocation3 + $0x158] sm:$0xf0] }
 0x172   : > { %v5040_v10 = vor.u32 %v5540_v4, %v5039_v18 }
 0x173   : > { %3240 = vmatmul.bf16.gmra.mxu3 %v5028_v41 }
 0x174   : > { %v3292_v15 = vpop.f32.mrf.mxu0 }
 0x175   : > { %v4879_v4 = vld [vmem:[#allocation3 + $0x8] sm:$0xf] }
 0x176   : > { %v3201_v37 = vpop.f32.mrf.mxu3 }
 0x177   : > { %v3202_v55 = vadd.f32 %v3201_v37, %v2713_v36  ;;  %v5614_v36 = vld [vmem:[#allocation3 + $0x184] sm:$0xf] }
 0x178   : > { %v2714_v21 = vpop.f32.mrf.mxu2  ;;  %v2628_v62 = vpop.f32.mrf.mxu1  ;;  %v4768_v37 = vor.u32 %v5614_v36, %v4765_v48 }
 0x179   : > { %v2715_v28 = vadd.f32 %v2714_v21, %v2626_v58  ;;  %v6952_v13 = vadd.f32 %v3290_v9, %v3202_v55  ;;  %v2629_v54 = vadd.f32 %v2628_v62, %v6749_v56  ;;  %v5542_v55 = vld [vmem:[#allocation3 + $0x16c] sm:$0xf]  ;;  %v5051_v58 = vld [vmem:[#allocation3 + $0x168] sm:$0xf] }
 0x17b   : > { %2667 = vmatmul.bf16.gmra.mxu1 %v4756_v1  ;;  %v5543_v1 = vld [vmem:[#allocation3 + $0x170] sm:$0xf0] }
 0x17c   : > { %v3295_v33 = vpop.f32.mrf.mxu0 }
 0x17d   : > { %2756 = vmatmul.bf16.gmra.mxu2 %v4760_v3 }
 0x17e   : > { %v3203_v43 = vpop.f32.mrf.mxu3 }
 0x17f   : > { %v3204_v39 = vadd.f32 %v3203_v43, %v2715_v28  ;;  %3334 = vmatmul.bf16.gmra.mxu0 %v5044_v24  ;;  %v5499_v24 = vld [vmem:[#allocation3 + $0x10] sm:$0xf0] }
 0x180   : > { %v2717_v41 = vpop.f32.mrf.mxu2  ;;  %v2630_v6 = vpop.f32.mrf.mxu1 }
 0x181   : > { %v2718_v20 = vadd.f32 %v2717_v41, %v2629_v54  ;;  %v6955_v9 = vadd.f32 %v3292_v15, %v3204_v39  ;;  %v2631_v63 = vadd.f32 %v2630_v6, %v6765_v14  ;;  %v5053_v15 = vld [vmem:[#allocation3 + $0x174] sm:$0xf0]  ;;  %v5052_v14 = vor.u32 %v5543_v1, %v5051_v58  ;;  %v5207_v39 = vld [vmem:[#allocation3 + $0x30] sm:$0xf]  ;;  %v5642_v54 = vld [vmem:[#allocation3 + $0x38] sm:$0xf0] }
 0x182   : > { %v5056_v21 = vor.u32 %v5542_v55, %v5053_v15  ;;  %v4880_v6 = vor.u32 %v5499_v24, %v4879_v4  ;;  %v5208_v48 = vor.u32 %v5642_v54, %v5207_v39  ;;  %v4891_v1 = vld [vmem:[#allocation3 + $0x20] sm:$0xf]  ;;  %v5227_v39 = vld [vmem:[#allocation3 + $0x50] sm:$0xf]  ;;  %v5644_v54 = vld [vmem:[#allocation3 + $0x4c] sm:$0xf] }
 0x183   : > { %3245 = vmatmul.bf16.gmra.mxu3 %v5040_v10 }
 0x184   : > { %v3297_v52 = vpop.f32.mrf.mxu0 }
 0x186   : > { %v3206_v60 = vpop.f32.mrf.mxu3 }
 0x187   : > { %v3207_v5 = vadd.f32 %v3206_v60, %v2718_v20 }
 0x188   : > { %v2719_v26 = vpop.f32.mrf.mxu2  ;;  %v2633_v56 = vpop.f32.mrf.mxu1 }
 0x189   : > { %v2720_v50 = vadd.f32 %v2719_v26, %v2631_v63  ;;  %v6958_v19 = vadd.f32 %v3295_v33, %v3207_v5  ;;  %v2634_v28 = vadd.f32 %v2633_v56, %v6780_v22  ;;  %v5209_v5 = vld [vmem:[#allocation3 + $0x3c] sm:$0xf0] }
 0x18b   : > { %2672 = vmatmul.bf16.gmra.mxu1 %v4768_v37 }
 0x18c   : > { %v3300_v17 = vpop.f32.mrf.mxu0 }
 0x18d   : > { %2761 = vmatmul.bf16.gmra.mxu2 %v4772_v27 }
 0x18e   : > { %v3208_v62 = vpop.f32.mrf.mxu3 }
 0x18f   : > { %v3209_v59 = vadd.f32 %v3208_v62, %v2720_v50  ;;  %3339 = vmatmul.bf16.gmra.mxu0 %v5056_v21  ;;  %v5502_v21 = vld [vmem:[#allocation3 + $0x28] sm:$0xf0] }
 0x190   : > { %v2722_v3 = vpop.f32.mrf.mxu2  ;;  %v2635_v29 = vpop.f32.mrf.mxu1 }
 0x191   : > { %v2723_v35 = vadd.f32 %v2722_v3, %v2634_v28  ;;  %v6961_v18 = vadd.f32 %v3297_v52, %v3209_v59  ;;  %v2636_v41 = vadd.f32 %v2635_v29, %v6802_v44  ;;  %v5643_v52 = vld [vmem:[#allocation3 + $0x40] sm:$0xf0]  ;;  %v5212_v44 = vor.u32 %v5641_v2, %v5209_v5  ;;  %v5219_v59 = vld [vmem:[#allocation3 + $0x48] sm:$0xf]  ;;  %v5645_v28 = vld [vmem:[#allocation3 + $0x50] sm:$0xf0] }
 0x192   : > { %v5216_v63 = vor.u32 %v5643_v52, %v5215_v11  ;;  %v4892_v29 = vor.u32 %v5502_v21, %v4891_v1  ;;  %v5220_v24 = vor.u32 %v5645_v28, %v5219_v59  ;;  %v4903_v5 = vld [vmem:[#allocation3 + $0x38] sm:$0xf]  ;;  %v5239_v59 = vld [vmem:[#allocation3 + $0x68] sm:$0xf]  ;;  %v5647_v28 = vld [vmem:[#allocation3 + $0x64] sm:$0xf] }
 0x193   : > { %3250 = vmatmul.bf16.gmra.mxu3 %v5052_v14 }
 0x194   : > { %v3302_v33 = vpop.f32.mrf.mxu0 }
 0x196   : > { %v3211_v43 = vpop.f32.mrf.mxu3 }
 0x197   : > { %v3212_v10 = vadd.f32 %v3211_v43, %v2723_v35 }
 0x198   : > { %v2724_v20 = vpop.f32.mrf.mxu2  ;;  %v2638_v22 = vpop.f32.mrf.mxu1 }
 0x199   : > { %v2725_v36 = vadd.f32 %v2724_v20, %v2636_v41  ;;  %v6964_v60 = vadd.f32 %v3300_v17, %v3212_v10  ;;  %v2639_v50 = vadd.f32 %v2638_v22, %v6699_v47  ;;  %v5221_v10 = vld [vmem:[#allocation3 + $0x54] sm:$0xf0] }
 0x19b   : > { %3353 = vmatmul.bf16.vlgmr.msra.gmra.mxu1 %v4880_v6 }
 0x19c   : > { %v3305_v26 = vpop.f32.mrf.mxu0 }
 0x19d   : > { %3956 = vmatmul.bf16.vlgmr.msra.gmra.mxu2 %v5208_v48 }
 0x19e   : > { %v3213_v37 = vpop.f32.mrf.mxu3 }
 0x19f   : > { %v3214_v56 = vadd.f32 %v3213_v37, %v2725_v36  ;;  %4134 = vmatmul.bf16.vlgmr.msra.gmra.mxu0 %v5216_v63  ;;  %v5505_v63 = vld [vmem:[#allocation3 + $0x40] sm:$0xf0] }
 0x1a0   : > { %v2727_v27 = vpop.f32.mrf.mxu2  ;;  %v2640_v55 = vpop.f32.mrf.mxu1 }
 0x1a1   : > { %v2728_v15 = vadd.f32 %v2727_v27, %v2639_v50  ;;  %v6967_v58 = vadd.f32 %v3302_v33, %v3214_v56  ;;  %v2641_v3 = vadd.f32 %v2640_v55, %v6720_v25  ;;  %v5646_v33 = vld [vmem:[#allocation3 + $0x58] sm:$0xf0]  ;;  %v5224_v25 = vor.u32 %v5644_v54, %v5221_v10  ;;  %v5231_v56 = vld [vmem:[#allocation3 + $0x60] sm:$0xf]  ;;  %v5648_v50 = vld [vmem:[#allocation3 + $0x68] sm:$0xf0] }
 0x1a2   : > { %v5228_v41 = vor.u32 %v5646_v33, %v5227_v39  ;;  %v4904_v55 = vor.u32 %v5505_v63, %v4903_v5  ;;  %v5232_v21 = vor.u32 %v5648_v50, %v5231_v56  ;;  %v4915_v10 = vld [vmem:[#allocation3 + $0x50] sm:$0xf]  ;;  %v5251_v56 = vld [vmem:[#allocation3 + $0x80] sm:$0xf]  ;;  %v5650_v50 = vld [vmem:[#allocation3 + $0x7c] sm:$0xf] }
 0x1a3   : > { %4045 = vmatmul.bf16.vlgmr.msra.gmra.mxu3 %v5212_v44 }
 0x1a4   : > { %v3307_v17 = vpop.f32.mrf.mxu0 }
 0x1a6   : > { %v3216_v62 = vpop.f32.mrf.mxu3 }
 0x1a7   : > { %v3217_v14 = vadd.f32 %v3216_v62, %v2728_v15 }
 0x1a8   : > { %v2729_v35 = vpop.f32.mrf.mxu2  ;;  %v2643_v47 = vpop.f32.mrf.mxu1 }
 0x1a9   : > { %v2730_v4 = vadd.f32 %v2729_v35, %v2641_v3  ;;  %v6970_v43 = vadd.f32 %v3305_v26, %v3217_v14  ;;  %v2644_v36 = vadd.f32 %v2643_v47, %v6738_v57  ;;  %v5233_v14 = vld [vmem:[#allocation3 + $0x6c] sm:$0xf0] }
 0x1ab   : > { %3358 = vmatmul.bf16.gmra.mxu1 %v4892_v29 }
 0x1ac   : > { %v3310_v20 = vpop.f32.mrf.mxu0 }
 0x1ad   : > { %3961 = vmatmul.bf16.gmra.mxu2 %v5220_v24 }
 0x1ae   : > { %v3218_v6 = vpop.f32.mrf.mxu3 }
 0x1af   : > { %v3219_v22 = vadd.f32 %v3218_v6, %v2730_v4  ;;  %4139 = vmatmul.bf16.gmra.mxu0 %v5228_v41  ;;  %v5508_v41 = vld [vmem:[#allocation3 + $0x58] sm:$0xf0] }
 0x1b0   : > { %v2732_v48 = vpop.f32.mrf.mxu2  ;;  %v2645_v11 = vpop.f32.mrf.mxu1 }
 0x1b1   : > { %v2733_v52 = vadd.f32 %v2732_v48, %v2644_v36  ;;  %v6973_v2 = vadd.f32 %v3307_v17, %v3219_v22  ;;  %v2646_v27 = vadd.f32 %v2645_v11, %v6747_v42  ;;  %v5649_v17 = vld [vmem:[#allocation3 + $0x70] sm:$0xf0]  ;;  %v5236_v42 = vor.u32 %v5647_v28, %v5233_v14  ;;  %v5243_v22 = vld [vmem:[#allocation3 + $0x78] sm:$0xf]  ;;  %v5651_v36 = vld [vmem:[#allocation3 + $0x80] sm:$0xf0] }
 0x1b2   : > { %v5240_v3 = vor.u32 %v5649_v17, %v5239_v59  ;;  %v4916_v11 = vor.u32 %v5508_v41, %v4915_v10  ;;  %v5244_v63 = vor.u32 %v5651_v36, %v5243_v22  ;;  %v4927_v14 = vld [vmem:[#allocation3 + $0x68] sm:$0xf]  ;;  %v5263_v22 = vld [vmem:[#allocation3 + $0x98] sm:$0xf]  ;;  %v5653_v36 = vld [vmem:[#allocation3 + $0x94] sm:$0xf] }
 0x1b3   : > { %4050 = vmatmul.bf16.gmra.mxu3 %v5224_v25 }
 0x1b4   : > { %v3312_v26 = vpop.f32.mrf.mxu0 }
 0x1b6   : > { %v3221_v37 = vpop.f32.mrf.mxu3 }
 0x1b7   : > { %v3222_v44 = vadd.f32 %v3221_v37, %v2733_v52 }
 0x1b8   : > { %v2734_v15 = vpop.f32.mrf.mxu2  ;;  %v2648_v57 = vpop.f32.mrf.mxu1 }
 0x1b9   : > { %v2735_v1 = vadd.f32 %v2734_v15, %v2646_v27  ;;  %v6976_v62 = vadd.f32 %v3310_v20, %v3222_v44  ;;  %v2649_v4 = vadd.f32 %v2648_v57, %v6763_v16  ;;  %v5245_v44 = vld [vmem:[#allocation3 + $0x84] sm:$0xf0] }
 0x1bb   : > { %3363 = vmatmul.bf16.gmra.mxu1 %v4904_v55 }
 0x1bc   : > { %v3315_v35 = vpop.f32.mrf.mxu0 }
 0x1bd   : > { %3966 = vmatmul.bf16.gmra.mxu2 %v5232_v21 }
 0x1be   : > { %v3223_v29 = vpop.f32.mrf.mxu3 }
 0x1bf   : > { %v3224_v47 = vadd.f32 %v3223_v29, %v2735_v1  ;;  %4144 = vmatmul.bf16.gmra.mxu0 %v5240_v3  ;;  %v5511_v3 = vld [vmem:[#allocation3 + $0x70] sm:$0xf0] }
 0x1c0   : > { %v2737_v24 = vpop.f32.mrf.mxu2  ;;  %v2650_v39 = vpop.f32.mrf.mxu1 }
 0x1c1   : > { %v2738_v33 = vadd.f32 %v2737_v24, %v2649_v4  ;;  %v6979_v54 = vadd.f32 %v3312_v26, %v3224_v47  ;;  %v2651_v48 = vadd.f32 %v2650_v39, %v6778_v8  ;;  %v5652_v26 = vld [vmem:[#allocation3 + $0x88] sm:$0xf0]  ;;  %v5248_v8 = vor.u32 %v5650_v50, %v5245_v44  ;;  %v5255_v47 = vld [vmem:[#allocation3 + $0x90] sm:$0xf]  ;;  %v5654_v4 = vld [vmem:[#allocation3 + $0x98] sm:$0xf0] }
 0x1c2   : > { %v5252_v27 = vor.u32 %v5652_v26, %v5251_v56  ;;  %v4928_v39 = vor.u32 %v5511_v3, %v4927_v14  ;;  %v5256_v41 = vor.u32 %v5654_v4, %v5255_v47  ;;  %v4939_v44 = vld [vmem:[#allocation3 + $0x80] sm:$0xf]  ;;  %v5275_v47 = vld [vmem:[#allocation3 + $0xb0] sm:$0xf]  ;;  %v5656_v4 = vld [vmem:[#allocation3 + $0xac] sm:$0xf] }
 0x1c3   : > { %4055 = vmatmul.bf16.gmra.mxu3 %v5236_v42 }
 0x1c4   : > { %v3317_v20 = vpop.f32.mrf.mxu0 }
 0x1c6   : > { %v3226_v6 = vpop.f32.mrf.mxu3 }
 0x1c7   : > { %v3227_v25 = vadd.f32 %v3226_v6, %v2738_v33 }
 0x1c8   : > { %v2739_v52 = vpop.f32.mrf.mxu2  ;;  %v2653_v16 = vpop.f32.mrf.mxu1 }
 0x1c9   : > { %v2740_v5 = vadd.f32 %v2739_v52, %v2651_v48  ;;  %v6982_v37 = vadd.f32 %v3315_v35, %v3227_v25  ;;  %v2654_v1 = vadd.f32 %v2653_v16, %v6804_v46  ;;  %v5257_v25 = vld [vmem:[#allocation3 + $0x9c] sm:$0xf0] }
 0x1cb   : > { %3368 = vmatmul.bf16.gmra.mxu1 %v4916_v11 }
 0x1cc   : > { %v3320_v15 = vpop.f32.mrf.mxu0 }
 0x1cd   : > { %3971 = vmatmul.bf16.gmra.mxu2 %v5244_v63 }
 0x1ce   : > { %v3228_v55 = vpop.f32.mrf.mxu3 }
 0x1cf   : > { %v3229_v57 = vadd.f32 %v3228_v55, %v2740_v5  ;;  %4149 = vmatmul.bf16.gmra.mxu0 %v5252_v27  ;;  %v5514_v27 = vld [vmem:[#allocation3 + $0x88] sm:$0xf0] }
 0x1d0   : > { %v2742_v21 = vpop.f32.mrf.mxu2  ;;  %v2655_v59 = vpop.f32.mrf.mxu1 }
 0x1d1   : > { %v2743_v17 = vadd.f32 %v2742_v21, %v2654_v1  ;;  %v6985_v28 = vadd.f32 %v3317_v20, %v3229_v57  ;;  %v2656_v24 = vadd.f32 %v2655_v59, %v6811_v51  ;;  %v5655_v20 = vld [vmem:[#allocation3 + $0xa0] sm:$0xf0]  ;;  %v5260_v51 = vor.u32 %v5653_v36, %v5257_v25  ;;  %v5267_v57 = vld [vmem:[#allocation3 + $0xa8] sm:$0xf]  ;;  %v5657_v1 = vld [vmem:[#allocation3 + $0xb0] sm:$0xf0] }
 0x1d2   : > { %v5264_v48 = vor.u32 %v5655_v20, %v5263_v22  ;;  %v4940_v59 = vor.u32 %v5514_v27, %v4939_v44  ;;  %v5268_v3 = vor.u32 %v5657_v1, %v5267_v57  ;;  %v4951_v25 = vld [vmem:[#allocation3 + $0x98] sm:$0xf]  ;;  %v5287_v57 = vld [vmem:[#allocation3 + $0xc8] sm:$0xf]  ;;  %v5659_v1 = vld [vmem:[#allocation3 + $0xc4] sm:$0xf] }
 0x1d3   : > { %4060 = vmatmul.bf16.gmra.mxu3 %v5248_v8 }
 0x1d4   : > { %v3322_v35 = vpop.f32.mrf.mxu0 }
 0x1d6   : > { %v3231_v29 = vpop.f32.mrf.mxu3 }
 0x1d7   : > { %v3232_v42 = vadd.f32 %v3231_v29, %v2743_v17 }
 0x1d8   : > { %v2744_v33 = vpop.f32.mrf.mxu2  ;;  %v2658_v46 = vpop.f32.mrf.mxu1 }
 0x1d9   : > { %v2745_v10 = vadd.f32 %v2744_v33, %v2656_v24  ;;  %v6988_v6 = vadd.f32 %v3320_v15, %v3232_v42  ;;  %v2659_v5 = vadd.f32 %v2658_v46, %v6703_v61  ;;  %v5269_v42 = vld [vmem:[#allocation3 + $0xb4] sm:$0xf0] }
 0x1db   : > { %3373 = vmatmul.bf16.gmra.mxu1 %v4928_v39 }
 0x1dc   : > { %v3325_v52 = vpop.f32.mrf.mxu0 }
 0x1dd   : > { %3976 = vmatmul.bf16.gmra.mxu2 %v5256_v41 }
 0x1de   : > { %v3233_v11 = vpop.f32.mrf.mxu3 }
 0x1df   : > { %v3234_v16 = vadd.f32 %v3233_v11, %v2745_v10  ;;  %4154 = vmatmul.bf16.gmra.mxu0 %v5264_v48  ;;  %v5517_v48 = vld [vmem:[#allocation3 + $0xa0] sm:$0xf0] }
 0x1e0   : > { %v2747_v63 = vpop.f32.mrf.mxu2  ;;  %v2660_v56 = vpop.f32.mrf.mxu1 }
 0x1e1   : > { %v2748_v26 = vadd.f32 %v2747_v63, %v2659_v5  ;;  %v6991_v50 = vadd.f32 %v3322_v35, %v3234_v16  ;;  %v2661_v21 = vadd.f32 %v2660_v56, %v6724_v7  ;;  %v5658_v35 = vld [vmem:[#allocation3 + $0xb8] sm:$0xf0]  ;;  %v5272_v7 = vor.u32 %v5656_v4, %v5269_v42  ;;  %v5279_v16 = vld [vmem:[#allocation3 + $0xc0] sm:$0xf]  ;;  %v5660_v5 = vld [vmem:[#allocation3 + $0xc8] sm:$0xf0] }
 0x1e2   : > { %v5276_v24 = vor.u32 %v5658_v35, %v5275_v47  ;;  %v4952_v56 = vor.u32 %v5517_v48, %v4951_v25  ;;  %v5280_v27 = vor.u32 %v5660_v5, %v5279_v16 }
 0x1e3   : > { %4065 = vmatmul.bf16.gmra.mxu3 %v5260_v51 }
 0x1e4   : > { %v3327_v15 = vpop.f32.mrf.mxu0 }
 0x1e6   : > { %v3236_v55 = vpop.f32.mrf.mxu3 }
 0x1e7   : > { %v3237_v8 = vadd.f32 %v3236_v55, %v2748_v26 }
 0x1e8   : > { %v2749_v17 = vpop.f32.mrf.mxu2  ;;  %v2663_v61 = vpop.f32.mrf.mxu1 }
 0x1e9   : > { %v2750_v14 = vadd.f32 %v2749_v17, %v2661_v21  ;;  %v6994_v29 = vadd.f32 %v3325_v52, %v3237_v8  ;;  %v2664_v10 = vadd.f32 %v2663_v61, %v6742_v40  ;;  %v5281_v8 = vld [vmem:[#allocation3 + $0xcc] sm:$0xf0] }
 0x1eb   : > { %3378 = vmatmul.bf16.gmra.mxu1 %v4940_v59 }
 0x1ec   : > { %v3330_v33 = vpop.f32.mrf.mxu0 }
 0x1ed   : > { %3981 = vmatmul.bf16.gmra.mxu2 %v5268_v3 }
 0x1ee   : > { %v3238_v39 = vpop.f32.mrf.mxu3 }
 0x1ef   : > { %v3239_v46 = vadd.f32 %v3238_v39, %v2750_v14  ;;  %4159 = vmatmul.bf16.gmra.mxu0 %v5276_v24  ;;  %v7114_v14 = vld [vmem:[#allocation4_spill] sm:$0xff]  ;;  %v5520_v39 = vld [vmem:[#allocation3 + $0xb8] sm:$0xf0] }
 0x1f0   : > { %v2752_v41 = vpop.f32.mrf.mxu2  ;;  %v2665_v22 = vpop.f32.mrf.mxu1  ;;  %v4963_v24 = vld [vmem:[#allocation3 + $0xb0] sm:$0xf] }
 0x1f1   : > { %v2753_v20 = vadd.f32 %v2752_v41, %v2664_v10  ;;  %v6997_v36 = vadd.f32 %v3327_v15, %v3239_v46  ;;  %v2666_v63 = vadd.f32 %v2665_v22, %v6751_v30  ;;  %v5661_v15 = vld [vmem:[#allocation3 + $0xd0] sm:$0xf0]  ;;  %v5284_v30 = vor.u32 %v5659_v1, %v5281_v8  ;;  %v5291_v10 = vld [vmem:[#allocation3 + $0xd8] sm:$0xf] }
 0x1f2   : > { %v5288_v21 = vor.u32 %v5661_v15, %v5287_v57  ;;  %v7115_v22 = vld [vmem:[#allocation5_spill] sm:$0xff]  ;;  %v4964_v25 = vor.u32 %v5520_v39, %v4963_v24  ;;  %v7116_v15 = vld [vmem:[#allocation6_spill] sm:$0xff]  ;;  %v7117_v39 = vld [vmem:[#allocation7_spill] sm:$0xff] }
 0x1f3   : > { %4070 = vmatmul.bf16.gmra.mxu3 %v5272_v7  ;;  %v5663_v7 = vld [vmem:[#allocation3 + $0xe0] sm:$0xf0] }
 0x1f4   : > { %v3332_v52 = vpop.f32.mrf.mxu0  ;;  %v5292_v5 = vor.u32 %v5663_v7, %v5291_v10 }
 0x1f6   : > { %v3241_v11 = vpop.f32.mrf.mxu3 }
 0x1f7   : > { %v3242_v51 = vadd.f32 %v3241_v11, %v2753_v20 }
 0x1f8   : > { %v2754_v26 = vpop.f32.mrf.mxu2  ;;  %v2668_v40 = vpop.f32.mrf.mxu1 }
 0x1f9   : > { %v2755_v44 = vadd.f32 %v2754_v26, %v2666_v63  ;;  %v7000_v55 = vadd.f32 %v3330_v33, %v3242_v51  ;;  %v2669_v3 = vadd.f32 %v2668_v40, %v7114_v14  ;;  %v5299_v63 = vld [vmem:[#allocation3 + $0xe0] sm:$0xf]  ;;  %v5293_v26 = vld [vmem:[#allocation3 + $0xe4] sm:$0xf0] }
 0x1fb   : > { %3383 = vmatmul.bf16.gmra.mxu1 %v4952_v56  ;;  %v5662_v56 = vld [vmem:[#allocation3 + $0xdc] sm:$0xf] }
 0x1fc   : > { %v3335_v17 = vpop.f32.mrf.mxu0  ;;  %v5296_v8 = vor.u32 %v5662_v56, %v5293_v26 }
 0x1fd   : > { %3986 = vmatmul.bf16.gmra.mxu2 %v5280_v27 }
 0x1fe   : > { %v3243_v59 = vpop.f32.mrf.mxu3 }
 0x1ff   : > { %v3244_v61 = vadd.f32 %v3243_v59, %v2755_v44  ;;  %4164 = vmatmul.bf16.gmra.mxu0 %v5288_v21 }
 0x200   : > { %v2757_v47 = vpop.f32.mrf.mxu2  ;;  %v2670_v35 = vpop.f32.mrf.mxu1 }
 0x201   : > { %v2758_v4 = vadd.f32 %v2757_v47, %v2669_v3  ;;  %v7003_v42 = vadd.f32 %v3332_v52, %v3244_v61  ;;  %v2671_v20 = vadd.f32 %v2670_v35, %v7115_v22  ;;  %v5664_v52 = vld [vmem:[#allocation3 + $0xe8] sm:$0xf0]  ;;  %v5523_v3 = vld [vmem:[#allocation3 + $0xd0] sm:$0xf0]  ;;  %v5303_v35 = vld [vmem:[#allocation3 + $0xf0] sm:$0xf] }
 0x202   : > { %v5300_v40 = vor.u32 %v5664_v52, %v5299_v63 }
 0x203   : > { %4075 = vmatmul.bf16.gmra.mxu3 %v5284_v30 }
 0x204   : > { %v3337_v46 = vpop.f32.mrf.mxu0 }
 0x206   : > { %v3246_v33 = vpop.f32.mrf.mxu3 }
 0x207   : > { %v3247_v41 = vadd.f32 %v3246_v33, %v2758_v4  ;;  %v5666_v4 = vld [vmem:[#allocation3 + $0xf8] sm:$0xf0] }
 0x208   : > { %v2759_v48 = vpop.f32.mrf.mxu2  ;;  %v2673_v11 = vpop.f32.mrf.mxu1 }
 0x209   : > { %v2760_v16 = vadd.f32 %v2759_v48, %v2671_v20  ;;  %v7006_v51 = vadd.f32 %v3335_v17, %v3247_v41  ;;  %v2674_v1 = vadd.f32 %v2673_v11, %v7116_v15  ;;  %v4975_v17 = vld [vmem:[#allocation3 + $0xc8] sm:$0xf]  ;;  %v5304_v20 = vor.u32 %v5666_v4, %v5303_v35  ;;  %v5311_v48 = vld [vmem:[#allocation3 + $0xf8] sm:$0xf]  ;;  %v5665_v11 = vld [vmem:[#allocation3 + $0xf4] sm:$0xf] }
 0x20a   : > { %v4976_v10 = vor.u32 %v5523_v3, %v4975_v17  ;;  %v4987_v15 = vld [vmem:[#allocation3 + $0xe0] sm:$0xf]  ;;  %v5323_v4 = vld [vmem:[#allocation3 + $0x110] sm:$0xf] }
 0x20b   : > { %3388 = vmatmul.bf16.gmra.mxu1 %v4964_v25 }
 0x20c   : > { %v3340_v27 = vpop.f32.mrf.mxu0 }
 0x20d   : > { %3991 = vmatmul.bf16.gmra.mxu2 %v5292_v5 }
 0x20e   : > { %v3248_v44 = vpop.f32.mrf.mxu3 }
 0x20f   : > { %v3249_v57 = vadd.f32 %v3248_v44, %v2760_v16  ;;  %4169 = vmatmul.bf16.gmra.mxu0 %v5300_v40  ;;  %v5305_v16 = vld [vmem:[#allocation3 + $0xfc] sm:$0xf0] }
 0x210   : > { %v2762_v21 = vpop.f32.mrf.mxu2  ;;  %v2675_v59 = vpop.f32.mrf.mxu1  ;;  %v5308_v26 = vor.u32 %v5665_v11, %v5305_v16 }
 0x211   : > { %v2763_v61 = vadd.f32 %v2762_v21, %v2674_v1  ;;  %v7009_v14 = vadd.f32 %v3337_v46, %v3249_v57  ;;  %v2676_v33 = vadd.f32 %v2675_v59, %v7117_v39  ;;  %v5667_v46 = vld [vmem:[#allocation3 + $0x100] sm:$0xf0]  ;;  %v5315_v21 = vld [vmem:[#allocation3 + $0x108] sm:$0xf]  ;;  %v5669_v59 = vld [vmem:[#allocation3 + $0x110] sm:$0xf0] }
 0x212   : > { %v5312_v5 = vor.u32 %v5667_v46, %v5311_v48  ;;  %v5316_v35 = vor.u32 %v5669_v59, %v5315_v21  ;;  %v5668_v39 = vld [vmem:[#allocation3 + $0x10c] sm:$0xf] }
 0x213   : > { %4080 = vmatmul.bf16.gmra.mxu3 %v5296_v8 }
 0x214   : > { %v3342_v47 = vpop.f32.mrf.mxu0 }
 0x216   : > { %v3251_v30 = vpop.f32.mrf.mxu3 }
 0x217   : > { %v3252_v24 = vadd.f32 %v3251_v30, %v2763_v61 }
 0x218   : > { %v2764_v7 = vpop.f32.mrf.mxu2  ;;  %v3354_v41 = vpop.f32.mrf.mxu1 }
 0x219   : > { %v2765_v22 = vadd.f32 %v2764_v7, %v2676_v33  ;;  %v7012_v25 = vadd.f32 %v3340_v27, %v3252_v24  ;;  %v5526_v27 = vld [vmem:[#allocation3 + $0xe8] sm:$0xf0]  ;;  %v5670_v24 = vld [vmem:[#allocation3 + $0x118] sm:$0xf0]  ;;  %v5317_v33 = vld [vmem:[#allocation3 + $0x114] sm:$0xf0] }
 0x21a   : > { %v4988_v61 = vor.u32 %v5526_v27, %v4987_v15  ;;  %v5320_v11 = vor.u32 %v5668_v39, %v5317_v33 }
 0x21b   : > { %3393 = vmatmul.bf16.gmra.mxu1 %v4976_v10 }
 0x21c   : > { %v4135_v52 = vpop.f32.mrf.mxu0 }
 0x21d   : > { %3996 = vmatmul.bf16.gmra.mxu2 %v5304_v20  ;;  %v7118_v20 = vld [vmem:[#allocation8_spill] sm:$0xff] }
 0x21e   : > { %v3253_v63 = vpop.f32.mrf.mxu3  ;;  %v3355_v48 = vadd.f32 %v3354_v41, %v7118_v20  ;;  %v5529_v41 = vld [vmem:[#allocation3 + $0x100] sm:$0xf0]  ;;  %v5673_v20 = vld [vmem:[#allocation3 + $0x130] sm:$0xf0] }
 0x21f   : > { %v3254_v56 = vadd.f32 %v3253_v63, %v2765_v22  ;;  %4174 = vmatmul.bf16.gmra.mxu0 %v5312_v5 }
 0x220   : > { %v3957_v40 = vpop.f32.mrf.mxu2  ;;  %v3356_v44 = vpop.f32.mrf.mxu1 }
 0x221   : > { %v7014_v57 = vadd.f32 %v3342_v47, %v3254_v56  ;;  %v5324_v47 = vor.u32 %v5670_v24, %v5323_v4  ;;  %v7119_v56 = vld [vmem:[#allocation9_spill] sm:$0xff] }
 0x223   : > { %4085 = vmatmul.bf16.gmra.mxu3 %v5308_v26  ;;  %v3357_v26 = vadd.f32 %v3356_v44, %v7119_v56  ;;  %v5327_v44 = vld [vmem:[#allocation3 + $0x120] sm:$0xf] }
 0x224   : > { %v4137_v8 = vpop.f32.mrf.mxu0 }
 0x226   : > { %v4046_v1 = vpop.f32.mrf.mxu3 }
 0x227   : > { %v4047_v30 = vadd.f32 %v4046_v1, %v3957_v40 }
 0x228   : > { %v3959_v17 = vpop.f32.mrf.mxu2  ;;  %v3359_v3 = vpop.f32.mrf.mxu1 }
 0x229   : > { %v4136_v10 = vadd.f32 %v4135_v52, %v4047_v30  ;;  %v4999_v52 = vld [vmem:[#allocation3 + $0xf8] sm:$0xf]  ;;  %v3360_v33 = vadd.f32 %v3359_v3, %v6863_v23 }
 0x22a   : > { %v5000_v4 = vor.u32 %v5529_v41, %v4999_v52 }
 0x22b   : > { %3398 = vmatmul.bf16.gmra.mxu1 %v4988_v61  ;;  %v4215_v63 = vadd.f32 %v4136_v10, %v3355_v48 }
 0x22c   : > { %v4140_v22 = vpop.f32.mrf.mxu0 }
 0x22d   : > { %4001 = vmatmul.bf16.gmra.mxu2 %v5316_v35  ;;  %v4285_v27 = vmul.f32 %v4215_v63, %v4215_v63 }
 0x22e   : > { %v4048_v7 = vpop.f32.mrf.mxu3 }
 0x22f   : > { %v4049_v46 = vadd.f32 %v4048_v7, %v3959_v17  ;;  %4179 = vmatmul.bf16.gmra.mxu0 %v5324_v47  ;;  %v5335_v7 = vld [vmem:[#allocation3 + $0x128] sm:$0xf] }
 0x230   : > { %v3962_v16 = vpop.f32.mrf.mxu2  ;;  %v3361_v5 = vpop.f32.mrf.mxu1 }
 0x231   : > { %v4138_v40 = vadd.f32 %v4137_v8, %v4049_v46  ;;  %v5672_v8 = vld [vmem:[#allocation3 + $0x128] sm:$0xf0]  ;;  %v5671_v46 = vld [vmem:[#allocation3 + $0x124] sm:$0xf]  ;;  %v3362_v23 = vadd.f32 %v3361_v5, %v6873_v0 }
 0x232   : > { %v5328_v47 = vor.u32 %v5672_v8, %v5327_v44 }
 0x233   : > { %v4216_v15 = vadd.f32 %v4138_v40, %v3357_v26  ;;  %4090 = vmatmul.bf16.gmra.mxu3 %v5320_v11  ;;  %v5329_v11 = vld [vmem:[#allocation3 + $0x12c] sm:$0xf0]  ;;  %v5336_v26 = vor.u32 %v5673_v20, %v5335_v7 }
 0x234   : > { %v4142_v17 = vpop.f32.mrf.mxu0  ;;  %v5332_v41 = vor.u32 %v5671_v46, %v5329_v11  ;;  %v5347_v46 = vld [vmem:[#allocation3 + $0x140] sm:$0xf]  ;;  %v5676_v11 = vld [vmem:[#allocation3 + $0x148] sm:$0xf0] }
 0x235   : > { %v4247_v1 = vadd.f32 %v4216_v15, %v4215_v63  ;;  %v4286_v21 = vmul.f32 %v4216_v15, %v4216_v15  ;;  %v5780_v59 = vpack.c.bf16 %v4216_v15, %v4215_v63 }
 0x236   : > { %v4051_v61 = vpop.f32.mrf.mxu3 }
 0x237   : > { %v4317_v30 = vadd.f32 %v4286_v21, %v4285_v27  ;;  %5781 = vst [vmem:[%s7023_s27] sm:$0xff] %v5780_v59   ;;  %v4052_v35 = vadd.f32 %v4051_v61, %v3962_v16  ;;  %v5011_v59 = vld [vmem:[#allocation3 + $0x110] sm:$0xf]  ;;  %v5532_v61 = vld [vmem:[#allocation3 + $0x118] sm:$0xf0] }
 0x238   : > { %v3964_v24 = vpop.f32.mrf.mxu2  ;;  %v3364_v39 = vpop.f32.mrf.mxu1 }
 0x239   : > { %v4141_v10 = vadd.f32 %v4140_v22, %v4052_v35  ;;  %v3365_v0 = vadd.f32 %v3364_v39, %v6896_v38 }
 0x23b   : > { %v4217_v48 = vadd.f32 %v4141_v10, %v3360_v33  ;;  %3403 = vmatmul.bf16.gmra.mxu1 %v5000_v4  ;;  %v5339_v33 = vld [vmem:[#allocation3 + $0x138] sm:$0xf] }
 0x23c   : > { %v4145_v15 = vpop.f32.mrf.mxu0 }
 0x23d   : > { %v4248_v63 = vadd.f32 %v4247_v1, %v4217_v48  ;;  %v4287_v56 = vmul.f32 %v4217_v48, %v4217_v48  ;;  %4006 = vmatmul.bf16.gmra.mxu2 %v5328_v47  ;;  %v5012_v47 = vor.u32 %v5532_v61, %v5011_v59  ;;  %v5023_v61 = vld [vmem:[#allocation3 + $0x128] sm:$0xf] }
 0x23e   : > { %v4053_v40 = vpop.f32.mrf.mxu3 }
 0x23f   : > { %v4318_v16 = vadd.f32 %v4317_v30, %v4287_v56  ;;  %v4054_v52 = vadd.f32 %v4053_v40, %v3964_v24  ;;  %4184 = vmatmul.bf16.gmra.mxu0 %v5336_v26  ;;  %v5675_v30 = vld [vmem:[#allocation3 + $0x140] sm:$0xf0] }
 0x240   : > { %v3967_v27 = vpop.f32.mrf.mxu2  ;;  %v3366_v21 = vpop.f32.mrf.mxu1 }
 0x241   : > { %v4143_v3 = vadd.f32 %v4142_v17, %v4054_v52  ;;  %v5340_v17 = vor.u32 %v5675_v30, %v5339_v33  ;;  %v5348_v52 = vor.u32 %v5676_v11, %v5347_v46  ;;  %v3367_v38 = vadd.f32 %v3366_v21, %v6903_v12  ;;  %v5359_v46 = vld [vmem:[#allocation3 + $0x158] sm:$0xf]  ;;  %v5679_v11 = vld [vmem:[#allocation3 + $0x160] sm:$0xf0] }
 0x243   : > { %v4218_v22 = vadd.f32 %v4143_v3, %v3362_v23  ;;  %4095 = vmatmul.bf16.gmra.mxu3 %v5332_v41 }
 0x244   : > { %v4147_v4 = vpop.f32.mrf.mxu0 }
 0x245   : > { %v4249_v1 = vadd.f32 %v4248_v63, %v4218_v22  ;;  %v4288_v44 = vmul.f32 %v4218_v22, %v4218_v22  ;;  %v5785_v8 = vpack.c.bf16 %v4218_v22, %v4217_v48  ;;  %v5674_v63 = vld [vmem:[#allocation3 + $0x13c] sm:$0xf]  ;;  %v5341_v48 = vld [vmem:[#allocation3 + $0x144] sm:$0xf0] }
 0x246   : > { %v4056_v35 = vpop.f32.mrf.mxu3  ;;  %v5344_v3 = vor.u32 %v5674_v63, %v5341_v48  ;;  %v5353_v48 = vld [vmem:[#allocation3 + $0x15c] sm:$0xf0] }
 0x247   : > { %v4319_v24 = vadd.f32 %v4318_v16, %v4288_v44  ;;  %5872 = vst [vmem:[%s7023_s27 + $0x8] sm:$0xff] %v5785_v8   ;;  %v4057_v10 = vadd.f32 %v4056_v35, %v3967_v27  ;;  %v5535_v44 = vld [vmem:[#allocation3 + $0x130] sm:$0xf0] }
 0x248   : > { %v3969_v7 = vpop.f32.mrf.mxu2  ;;  %v3369_v20 = vpop.f32.mrf.mxu1 }
 0x249   : > { %v4146_v5 = vadd.f32 %v4145_v15, %v4057_v10  ;;  %v5351_v10 = vld [vmem:[#allocation3 + $0x150] sm:$0xf]  ;;  %v3370_v12 = vadd.f32 %v3369_v20, %v6912_v34  ;;  %v1056_v20 = vld [vmem:[#allocation2 + $0xd0] sm:$0xf] }
 0x24b   : > { %v4219_v56 = vadd.f32 %v4146_v5, %v3365_v0  ;;  %3408 = vmatmul.bf16.gmra.mxu1 %v5012_v47  ;;  %v5024_v0 = vor.u32 %v5535_v44, %v5023_v61  ;;  %v5035_v61 = vld [vmem:[#allocation3 + $0x140] sm:$0xf]  ;;  %v5538_v44 = vld [vmem:[#allocation3 + $0x148] sm:$0xf0] }
 0x24c   : > { %v4150_v41 = vpop.f32.mrf.mxu0 }
 0x24d   : > { %v4250_v26 = vadd.f32 %v4249_v1, %v4219_v56  ;;  %v4289_v40 = vmul.f32 %v4219_v56, %v4219_v56  ;;  %4011 = vmatmul.bf16.gmra.mxu2 %v5340_v17 }
 0x24e   : > { %v4058_v16 = vpop.f32.mrf.mxu3 }
 0x24f   : > { %v4320_v27 = vadd.f32 %v4319_v24, %v4289_v40  ;;  %v4059_v23 = vadd.f32 %v4058_v16, %v3969_v7  ;;  %4189 = vmatmul.bf16.gmra.mxu0 %v5348_v52  ;;  %v5678_v24 = vld [vmem:[#allocation3 + $0x158] sm:$0xf0]  ;;  %v5360_v52 = vor.u32 %v5679_v11, %v5359_v46 }
 0x250   : > { %v3972_v22 = vpop.f32.mrf.mxu2  ;;  %v3371_v59 = vpop.f32.mrf.mxu1  ;;  %v1618_v46 = vld [vmem:[#allocation2 + $0xd4] sm:$0x1] }
 0x251   : > { %v4148_v39 = vadd.f32 %v4147_v4, %v4059_v23  ;;  %v5352_v4 = vor.u32 %v5678_v24, %v5351_v10  ;;  %v1479_v10 = vshll.u32 %v1056_v20, 16  ;;  %v1483_v24 = vshrl.u32 %v1056_v20, 16 }
 0x253   : > { %v4220_v15 = vadd.f32 %v4148_v39, %v3367_v38  ;;  %4100 = vmatmul.bf16.gmra.mxu3 %v5344_v3  ;;  %v1055_v38 = vld [vmem:[#allocation2 + $0xcc] sm:$0xf] }
 0x254   : > { %v4152_v30 = vpop.f32.mrf.mxu0 }
 0x255   : > { %v4251_v1 = vadd.f32 %v4250_v26, %v4220_v15  ;;  %v4290_v8 = vmul.f32 %v4220_v15, %v4220_v15  ;;  %v5790_v35 = vpack.c.bf16 %v4220_v15, %v4219_v56  ;;  %v5677_v56 = vld [vmem:[#allocation3 + $0x154] sm:$0xf] }
 0x256   : > { %v4061_v33 = vpop.f32.mrf.mxu3 }
 0x257   : > { %v4321_v47 = vadd.f32 %v4320_v27, %v4290_v8  ;;  %5873 = vst [vmem:[%s7023_s27 + $0x10] sm:$0xff] %v5790_v35   ;;  %v4062_v7 = vadd.f32 %v4061_v33, %v3972_v22  ;;  %v5356_v22 = vor.u32 %v5677_v56, %v5353_v48  ;;  %v1473_v8 = vshll.u32 %v1055_v38, 16  ;;  %v1057_v33 = vld [vmem:[#allocation2 + $0xd4] sm:$0x1] }
 0x258   : > { %v3974_v5 = vpop.f32.mrf.mxu2  ;;  %v7032_v17 = vpop.f32.mrf.mxu1  ;;  %v5036_v48 = vor.u32 %v5538_v44, %v5035_v61 }
 0x259   : > { %v4151_v21 = vadd.f32 %v4150_v41, %v4062_v7  ;;  %v3372_v41 = vadd.f32 %v3371_v59, %v6919_v49  ;;  %v1481_v59 = vrot.slane %v1479_v10, 5  ;;  %v3375_v61 = vadd.f32 %v7032_v17, %v6940_v53  ;;  %v5680_v53 = vld [vmem:[#allocation3 + $0x16c] sm:$0xf]  ;;  %v5365_v17 = vld [vmem:[#allocation3 + $0x174] sm:$0xf0] }
 0x25b   : > { %v4221_v63 = vadd.f32 %v4151_v21, %v3370_v12  ;;  %3413 = vmatmul.bf16.gmra.mxu1 %v5024_v0  ;;  %v1475_v0 = vrot.slane %v1473_v8, 5  ;;  %v966_v8 = vld [vmem:[#allocation2 + $0xcc] sm:$0xf] }
 0x25c   : > { %v4155_v27 = vpop.f32.mrf.mxu0  ;;  %1002 = vst [vmem:[#allocation3 + $0x198] sm:$0xf] %v966_v8 }
 0x25d   : > { %v4252_v26 = vadd.f32 %v4251_v1, %v4221_v63  ;;  %v4291_v40 = vmul.f32 %v4221_v63, %v4221_v63  ;;  %4016 = vmatmul.bf16.gmra.mxu2 %v5352_v4  ;;  %v1470_v1 = vshrl.u32 %v1055_v38, 16 }
 0x25e   : > { %v4063_v16 = vpop.f32.mrf.mxu3 }
 0x25f   : > { %v4322_v23 = vadd.f32 %v4321_v47, %v4291_v40  ;;  %v4064_v3 = vadd.f32 %v4063_v16, %v3974_v5  ;;  %4194 = vmatmul.bf16.gmra.mxu0 %v5360_v52  ;;  %v1617_v47 = vld [vmem:[#allocation2 + $0xd0] sm:$0xf]  ;;  %v1472_v7 = vrot.slane %v1470_v1, 4  ;;  %v1489_v5 = vshll.u32 %v1057_v33, 16  ;;  %v5363_v40 = vld [vmem:[#allocation3 + $0x168] sm:$0xf] }
 0x260   : > { %v3977_v39 = vpop.f32.mrf.mxu2  ;;  %v7035_v34 = vpop.f32.mrf.mxu1  ;;  %v1797_v12 = vrot.slane %v1617_v47, 5  ;;  %v5681_v52 = vld [vmem:[#allocation3 + $0x170] sm:$0xf0] }
 0x261   : > { %v4153_v15 = vadd.f32 %v4152_v30, %v4064_v3  ;;  %v1616_v30 = vld [vmem:[#allocation2 + $0xcc] sm:$0xe]  ;;  %v1476_v16 = vor.u32 %v1475_v0, %v1472_v7  ;;  %v1485_v3 = vrot.slane %v1483_v24, 4  ;;  %v1491_v10 = vrot.slane %v1489_v5, 5  ;;  %v5371_v7 = vld [vmem:[#allocation3 + $0x170] sm:$0xf] }
 0x262   : > { %v5364_v47 = vor.u32 %v5681_v52, %v5363_v40  ;;  %v5368_v40 = vor.u32 %v5680_v53, %v5365_v17 }
 0x263   : > { %v4222_v35 = vadd.f32 %v4153_v15, %v3372_v41  ;;  %4105 = vmatmul.bf16.gmra.mxu3 %v5356_v22  ;;  %v4532_v22 = vrot.slane %v1616_v30, 9  ;;  %v1799_v41 = vrot.slane %v1797_v12, 4  ;;  %v1800_v15 = vrot.slane %v1618_v46, 5 }
 0x264   : > { %v4157_v56 = vpop.f32.mrf.mxu0  ;;  %v1486_v33 = vor.u32 %v1485_v3, %v1481_v59 }
 0x265   : > { %v4253_v21 = vadd.f32 %v4252_v26, %v4222_v35  ;;  %v4292_v4 = vmul.f32 %v4222_v35, %v4222_v35  ;;  %v5795_v49 = vpack.c.bf16 %v4222_v35, %v4221_v63  ;;  %v967_v63 = vld [vmem:[#allocation2 + $0xd0] sm:$0xf]  ;;  %v1477_v35 = vrot.slane %v1476_v16, 4 }
 0x266   : > { %v4066_v11 = vpop.f32.mrf.mxu3  ;;  %1003 = vst [vmem:[#allocation3 + $0x1a4] sm:$0xf] %v967_v63  ;;  %v1487_v0 = vrot.slane %v1486_v33, 4  ;;  %v1801_v5 = vsel %vm6566_vm12, %v1799_v41, %v1800_v15  ;;  %v3377_v16 = vadd.f32 %v7035_v34, %v6945_v45 }
 0x267   : > { %v4323_v38 = vadd.f32 %v4322_v23, %v4292_v4  ;;  %5874 = vst [vmem:[%s7023_s27 + $0x18] sm:$0xff] %v5795_v49   ;;  %v4067_v20 = vadd.f32 %v4066_v11, %v3977_v39  ;;  %v1798_v23 = vsel %vm6566_vm12, %v4532_v22, %v1797_v12  ;;  %v5682_v39 = vld [vmem:[#allocation3 + $0x178] sm:$0xf0]  ;;  %v1482_v24 = vsel %vm6572_vm13, %v1477_v35, %v1481_v59  ;;  %v5541_v22 = vld [vmem:[#allocation3 + $0x160] sm:$0xf0] }
 0x268   : > { %v3979_v1 = vpop.f32.mrf.mxu2  ;;  %v3379_v26 = vpop.f32.mrf.mxu1  ;;  %1563 = vst [vmem:[#allocation3 + $0x19c] sm:$0xf] %v1482_v24  ;;  %v5372_v30 = vor.u32 %v5682_v39, %v5371_v7  ;;  %v5685_v7 = vld [vmem:[#allocation3 + $0x190] sm:$0xf0]  ;;  %v5683_v39 = vld [vmem:[#allocation3 + $0x184] sm:$0xf] }
 0x269   : > { %v4156_v44 = vadd.f32 %v4155_v27, %v4067_v20  ;;  %v1492_v27 = vsel %vm6572_vm13, %v1487_v0, %v1491_v10  ;;  %1872 = vst [vmem:[#allocation3 + $0x1a0] sm:$0xf] %v1798_v23  ;;  %v3380_v45 = vadd.f32 %v3379_v26, %v6952_v13  ;;  %v5377_v24 = vld [vmem:[#allocation3 + $0x18c] sm:$0xf0] }
 0x26a   : > { %1564 = vst [vmem:[#allocation3 + $0x1a8] sm:$0xf] %v1492_v27 }
 0x26b   : > { %v4223_v4 = vadd.f32 %v4156_v44, %v3375_v61  ;;  %3418 = vmatmul.bf16.gmra.mxu1 %v5036_v48  ;;  %1873 = vst [vmem:[#allocation3 + $0x1ac] sm:$0xf] %v1801_v5 }
 0x26c   : > { %v4160_v59 = vpop.f32.mrf.mxu0 }
 0x26d   : > { %v4254_v49 = vadd.f32 %v4253_v21, %v4223_v4  ;;  %v4293_v12 = vmul.f32 %v4223_v4, %v4223_v4  ;;  %4021 = vmatmul.bf16.gmra.mxu2 %v5364_v47  ;;  %v5047_v21 = vld [vmem:[#allocation3 + $0x158] sm:$0xf]  ;;  %v5383_v47 = vld [vmem:[#allocation3 + $0x188] sm:$0xf] }
 0x26e   : > { %v4068_v46 = vpop.f32.mrf.mxu3  ;;  %v5048_v10 = vor.u32 %v5541_v22, %v5047_v21  ;;  %v5384_v5 = vor.u32 %v5685_v7, %v5383_v47  ;;  %v5387_v21 = vld [vmem:[#allocation3 + $0x198] sm:$0xf]  ;;  %v5687_v22 = vld [vmem:[#allocation3 + $0x1a0] sm:$0xf0] }
 0x26f   : > { %v4324_v11 = vadd.f32 %v4323_v38, %v4293_v12  ;;  %v4069_v48 = vadd.f32 %v4068_v46, %v3979_v1  ;;  %4199 = vmatmul.bf16.gmra.mxu0 %v5372_v30  ;;  %v5375_v38 = vld [vmem:[#allocation3 + $0x180] sm:$0xf]  ;;  %v5684_v1 = vld [vmem:[#allocation3 + $0x188] sm:$0xf0]  ;;  %v5380_v12 = vor.u32 %v5683_v39, %v5377_v24 }
 0x270   : > { %v3982_v52 = vpop.f32.mrf.mxu2  ;;  %v3381_v31 = vpop.f32.mrf.mxu1 }
 0x271   : > { %v4158_v32 = vadd.f32 %v4157_v56, %v4069_v48  ;;  %v5376_v56 = vor.u32 %v5684_v1, %v5375_v38  ;;  %v3382_v13 = vadd.f32 %v3381_v31, %v6955_v9  ;;  %v5544_v48 = vld [vmem:[#allocation3 + $0x178] sm:$0xf0]  ;;  %v5395_v1 = vld [vmem:[#allocation3 + $0x1a0] sm:$0xf] }
 0x273   : > { %v4224_v3 = vadd.f32 %v4158_v32, %v3377_v16  ;;  %4110 = vmatmul.bf16.gmra.mxu3 %v5368_v40 }
 0x274   : > { %v4162_v63 = vpop.f32.mrf.mxu0 }
 0x275   : > { %v4255_v20 = vadd.f32 %v4254_v49, %v4224_v3  ;;  %v4294_v41 = vmul.f32 %v4224_v3, %v4224_v3  ;;  %v5800_v15 = vpack.c.bf16 %v4224_v3, %v4223_v4 }
 0x276   : > { %v4071_v8 = vpop.f32.mrf.mxu3 }
 0x277   : > { %v4325_v35 = vadd.f32 %v4324_v11, %v4294_v41  ;;  %5875 = vst [vmem:[%s7023_s27 + $0x20] sm:$0xff] %v5800_v15   ;;  %v4072_v33 = vadd.f32 %v4071_v8, %v3982_v52  ;;  %v5059_v11 = vld [vmem:[#allocation3 + $0x170] sm:$0xf] }
 0x278   : > { %v3984_v61 = vpop.f32.mrf.mxu2  ;;  %v3384_v44 = vpop.f32.mrf.mxu1  ;;  %v5060_v15 = vor.u32 %v5544_v48, %v5059_v11 }
 0x279   : > { %v4161_v34 = vadd.f32 %v4160_v59, %v4072_v33  ;;  %v3385_v9 = vadd.f32 %v3384_v44, %v6958_v19 }
 0x27b   : > { %v4225_v23 = vadd.f32 %v4161_v34, %v3380_v45  ;;  %3423 = vmatmul.bf16.gmra.mxu1 %v5048_v10  ;;  %v5686_v10 = vld [vmem:[#allocation3 + $0x19c] sm:$0xf] }
 0x27c   : > { %v4165_v17 = vpop.f32.mrf.mxu0 }
 0x27d   : > { %v4256_v0 = vadd.f32 %v4255_v20, %v4225_v23  ;;  %v4295_v4 = vmul.f32 %v4225_v23, %v4225_v23  ;;  %4026 = vmatmul.bf16.gmra.mxu2 %v5376_v56 }
 0x27e   : > { %v4073_v53 = vpop.f32.mrf.mxu3 }
 0x27f   : > { %v4326_v27 = vadd.f32 %v4325_v35, %v4295_v4  ;;  %v4074_v49 = vadd.f32 %v4073_v53, %v3984_v61  ;;  %4204 = vmatmul.bf16.gmra.mxu0 %v5384_v5  ;;  %v5688_v35 = vld [vmem:[#allocation3 + $0x1a8] sm:$0xf0]  ;;  %v5389_v61 = vld [vmem:[#allocation3 + $0x1a4] sm:$0xf0] }
 0x280   : > { %v3987_v30 = vpop.f32.mrf.mxu2  ;;  %v3386_v46 = vpop.f32.mrf.mxu1  ;;  %v5396_v56 = vor.u32 %v5688_v35, %v5395_v1  ;;  %v5392_v24 = vor.u32 %v5686_v10, %v5389_v61 }
 0x281   : > { %v4163_v26 = vadd.f32 %v4162_v63, %v4074_v49  ;;  %v5388_v63 = vor.u32 %v5687_v22, %v5387_v21  ;;  %v3387_v44 = vadd.f32 %v3386_v46, %v6961_v18 }
 0x283   : > { %v4226_v59 = vadd.f32 %v4163_v26, %v3382_v13  ;;  %4115 = vmatmul.bf16.gmra.mxu3 %v5380_v12 }
 0x284   : > { %v4167_v3 = vpop.f32.mrf.mxu0 }
 0x285   : > { %v4257_v40 = vadd.f32 %v4256_v0, %v4226_v59  ;;  %v4296_v52 = vmul.f32 %v4226_v59, %v4226_v59  ;;  %v5805_v16 = vpack.c.bf16 %v4226_v59, %v4225_v23 }
 0x286   : > { %v4076_v32 = vpop.f32.mrf.mxu3 }
 0x287   : > { %v4327_v20 = vadd.f32 %v4326_v27, %v4296_v52  ;;  %5876 = vst [vmem:[%s7023_s27 + $0x28] sm:$0xff] %v5805_v16   ;;  %v4077_v41 = vadd.f32 %v4076_v32, %v3987_v30 }
 0x288   : > { %v3989_v8 = vpop.f32.mrf.mxu2  ;;  %v3389_v38 = vpop.f32.mrf.mxu1 }
 0x289   : > { %v4166_v31 = vadd.f32 %v4165_v17, %v4077_v41  ;;  %v3390_v11 = vadd.f32 %v3389_v38, %v6964_v60 }
 0x28b   : > { %v4227_v33 = vadd.f32 %v4166_v31, %v3385_v9  ;;  %3428 = vmatmul.bf16.gmra.mxu1 %v5060_v15 }
 0x28c   : > { %v4170_v7 = vpop.f32.mrf.mxu0 }
 0x28d   : > { %v4258_v45 = vadd.f32 %v4257_v40, %v4227_v33  ;;  %v4297_v34 = vmul.f32 %v4227_v33, %v4227_v33  ;;  %4031 = vmatmul.bf16.gmra.mxu2 %v5388_v63 }
 0x28e   : > { %v4078_v47 = vpop.f32.mrf.mxu3 }
 0x28f   : > { %v4328_v23 = vadd.f32 %v4327_v20, %v4297_v34  ;;  %v4079_v39 = vadd.f32 %v4078_v47, %v3989_v8  ;;  %4209 = vmatmul.bf16.gmra.mxu0 %v5396_v56 }
 0x290   : > { %v3992_v0 = vpop.f32.mrf.mxu2  ;;  %v3391_v19 = vpop.f32.mrf.mxu1 }
 0x291   : > { %v4168_v4 = vadd.f32 %v4167_v3, %v4079_v39  ;;  %v3392_v20 = vadd.f32 %v3391_v19, %v6967_v58 }
 0x293   : > { %v4228_v5 = vadd.f32 %v4168_v4, %v3387_v44  ;;  %4120 = vmatmul.bf16.gmra.mxu3 %v5392_v24 }
 0x294   : > { %v4172_v12 = vpop.f32.mrf.mxu0 }
 0x295   : > { %v4259_v53 = vadd.f32 %v4258_v45, %v4228_v5  ;;  %v4298_v17 = vmul.f32 %v4228_v5, %v4228_v5  ;;  %v5810_v27 = vpack.c.bf16 %v4228_v5, %v4227_v33 }
 0x296   : > { %v4081_v49 = vpop.f32.mrf.mxu3 }
 0x297   : > { %v4329_v30 = vadd.f32 %v4328_v23, %v4298_v17  ;;  %5877 = vst [vmem:[%s7023_s27 + $0x30] sm:$0xff] %v5810_v27   ;;  %v4082_v13 = vadd.f32 %v4081_v49, %v3992_v0 }
 0x298   : > { %v3994_v26 = vpop.f32.mrf.mxu2  ;;  %v3394_v59 = vpop.f32.mrf.mxu1 }
 0x299   : > { %v4171_v48 = vadd.f32 %v4170_v7, %v4082_v13  ;;  %v3395_v10 = vadd.f32 %v3394_v59, %v6970_v43 }
 0x29b   : > { %v4229_v40 = vadd.f32 %v4171_v48, %v3390_v11 }
 0x29c   : > { %v4175_v16 = vpop.f32.mrf.mxu0 }
 0x29d   : > { %v4260_v52 = vadd.f32 %v4259_v53, %v4229_v40  ;;  %v4299_v18 = vmul.f32 %v4229_v40, %v4229_v40 }
 0x29e   : > { %v4083_v46 = vpop.f32.mrf.mxu3 }
 0x29f   : > { %v4330_v32 = vadd.f32 %v4329_v30, %v4299_v18  ;;  %v4084_v3 = vadd.f32 %v4083_v46, %v3994_v26 }
 0x2a0   : > { %v3997_v21 = vpop.f32.mrf.mxu2  ;;  %v3396_v22 = vpop.f32.mrf.mxu1 }
 0x2a1   : > { %v4173_v41 = vadd.f32 %v4172_v12, %v4084_v3  ;;  %v3397_v0 = vadd.f32 %v3396_v22, %v6973_v2 }
 0x2a3   : > { %v4230_v15 = vadd.f32 %v4173_v41, %v3392_v20 }
 0x2a4   : > { %v4177_v60 = vpop.f32.mrf.mxu0 }
 0x2a5   : > { %v4261_v8 = vadd.f32 %v4260_v52, %v4230_v15  ;;  %v4300_v9 = vmul.f32 %v4230_v15, %v4230_v15  ;;  %v5815_v31 = vpack.c.bf16 %v4230_v15, %v4229_v40 }
 0x2a6   : > { %v4086_v63 = vpop.f32.mrf.mxu3 }
 0x2a7   : > { %v4331_v38 = vadd.f32 %v4330_v32, %v4300_v9  ;;  %5878 = vst [vmem:[%s7023_s27 + $0x38] sm:$0xff] %v5815_v31   ;;  %v4087_v1 = vadd.f32 %v4086_v63, %v3997_v21 }
 0x2a8   : > { %v3999_v35 = vpop.f32.mrf.mxu2  ;;  %v3399_v33 = vpop.f32.mrf.mxu1 }
 0x2a9   : > { %v4176_v61 = vadd.f32 %v4175_v16, %v4087_v1  ;;  %v3400_v13 = vadd.f32 %v3399_v33, %v6976_v62 }
 0x2ab   : > { %v4231_v45 = vadd.f32 %v4176_v61, %v3395_v10 }
 0x2ac   : > { %v4180_v47 = vpop.f32.mrf.mxu0 }
 0x2ad   : > { %v4262_v34 = vadd.f32 %v4261_v8, %v4231_v45  ;;  %v4301_v56 = vmul.f32 %v4231_v45, %v4231_v45 }
 0x2ae   : > { %v4088_v58 = vpop.f32.mrf.mxu3 }
 0x2af   : > { %v4332_v7 = vadd.f32 %v4331_v38, %v4301_v56  ;;  %v4089_v23 = vadd.f32 %v4088_v58, %v3999_v35 }
 0x2b0   : > { %v4002_v39 = vpop.f32.mrf.mxu2  ;;  %v3401_v24 = vpop.f32.mrf.mxu1 }
 0x2b1   : > { %v4178_v19 = vadd.f32 %v4177_v60, %v4089_v23  ;;  %v3402_v32 = vadd.f32 %v3401_v24, %v6979_v54 }
 0x2b3   : > { %v4232_v44 = vadd.f32 %v4178_v19, %v3397_v0 }
 0x2b4   : > { %v4182_v43 = vpop.f32.mrf.mxu0 }
 0x2b5   : > { %v4263_v4 = vadd.f32 %v4262_v34, %v4232_v44  ;;  %v4302_v5 = vmul.f32 %v4232_v44, %v4232_v44  ;;  %v5820_v53 = vpack.c.bf16 %v4232_v44, %v4231_v45 }
 0x2b6   : > { %v4091_v17 = vpop.f32.mrf.mxu3 }
 0x2b7   : > { %v4333_v27 = vadd.f32 %v4332_v7, %v4302_v5  ;;  %5879 = vst [vmem:[%s7023_s27 + $0x40] sm:$0xff] %v5820_v53   ;;  %v4092_v49 = vadd.f32 %v4091_v17, %v4002_v39 }
 0x2b8   : > { %v4004_v12 = vpop.f32.mrf.mxu2  ;;  %v3404_v30 = vpop.f32.mrf.mxu1 }
 0x2b9   : > { %v4181_v26 = vadd.f32 %v4180_v47, %v4092_v49  ;;  %v3405_v60 = vadd.f32 %v3404_v30, %v6982_v37 }
 0x2bb   : > { %v4233_v59 = vadd.f32 %v4181_v26, %v3400_v13 }
 0x2bc   : > { %v4185_v40 = vpop.f32.mrf.mxu0 }
 0x2bd   : > { %v4264_v11 = vadd.f32 %v4263_v4, %v4233_v59  ;;  %v4303_v48 = vmul.f32 %v4233_v59, %v4233_v59 }
 0x2be   : > { %v4093_v2 = vpop.f32.mrf.mxu3 }
 0x2bf   : > { %v4334_v52 = vadd.f32 %v4333_v27, %v4303_v48  ;;  %v4094_v18 = vadd.f32 %v4093_v2, %v4004_v12 }
 0x2c0   : > { %v4007_v46 = vpop.f32.mrf.mxu2  ;;  %v3406_v16 = vpop.f32.mrf.mxu1 }
 0x2c1   : > { %v4183_v3 = vadd.f32 %v4182_v43, %v4094_v18  ;;  %v3407_v58 = vadd.f32 %v3406_v16, %v6985_v28 }
 0x2c3   : > { %v4234_v21 = vadd.f32 %v4183_v3, %v3402_v32 }
 0x2c4   : > { %v4187_v62 = vpop.f32.mrf.mxu0 }
 0x2c5   : > { %v4265_v22 = vadd.f32 %v4264_v11, %v4234_v21  ;;  %v4304_v20 = vmul.f32 %v4234_v21, %v4234_v21  ;;  %v5825_v41 = vpack.c.bf16 %v4234_v21, %v4233_v59 }
 0x2c6   : > { %v4096_v15 = vpop.f32.mrf.mxu3 }
 0x2c7   : > { %v4335_v8 = vadd.f32 %v4334_v52, %v4304_v20  ;;  %5880 = vst [vmem:[%s7023_s27 + $0x48] sm:$0xff] %v5825_v41   ;;  %v4097_v9 = vadd.f32 %v4096_v15, %v4007_v46 }
 0x2c8   : > { %v4009_v31 = vpop.f32.mrf.mxu2  ;;  %v3409_v63 = vpop.f32.mrf.mxu1 }
 0x2c9   : > { %v4186_v38 = vadd.f32 %v4185_v40, %v4097_v9  ;;  %v3410_v53 = vadd.f32 %v3409_v63, %v6988_v6 }
 0x2cb   : > { %v4235_v1 = vadd.f32 %v4186_v38, %v3405_v60 }
 0x2cc   : > { %v4190_v10 = vpop.f32.mrf.mxu0 }
 0x2cd   : > { %v4266_v35 = vadd.f32 %v4265_v22, %v4235_v1  ;;  %v4305_v33 = vmul.f32 %v4235_v1, %v4235_v1 }
 0x2ce   : > { %v4098_v54 = vpop.f32.mrf.mxu3 }
 0x2cf   : > { %v4336_v61 = vadd.f32 %v4335_v8, %v4305_v33  ;;  %v4099_v45 = vadd.f32 %v4098_v54, %v4009_v31 }
 0x2d0   : > { %v4012_v34 = vpop.f32.mrf.mxu2  ;;  %v3411_v56 = vpop.f32.mrf.mxu1 }
 0x2d1   : > { %v4188_v47 = vadd.f32 %v4187_v62, %v4099_v45  ;;  %v3412_v59 = vadd.f32 %v3411_v56, %v6991_v50 }
 0x2d3   : > { %v4236_v7 = vadd.f32 %v4188_v47, %v3407_v58 }
 0x2d4   : > { %v4192_v37 = vpop.f32.mrf.mxu0 }
 0x2d5   : > { %v4267_v23 = vadd.f32 %v4266_v35, %v4236_v7  ;;  %v4306_v39 = vmul.f32 %v4236_v7, %v4236_v7  ;;  %v5830_v24 = vpack.c.bf16 %v4236_v7, %v4235_v1 }
 0x2d6   : > { %v4101_v0 = vpop.f32.mrf.mxu3 }
 0x2d7   : > { %v4337_v19 = vadd.f32 %v4336_v61, %v4306_v39  ;;  %5881 = vst [vmem:[%s7023_s27 + $0x50] sm:$0xff] %v5830_v24   ;;  %v4102_v44 = vadd.f32 %v4101_v0, %v4012_v34 }
 0x2d8   : > { %v4014_v4 = vpop.f32.mrf.mxu2  ;;  %v3414_v5 = vpop.f32.mrf.mxu1 }
 0x2d9   : > { %v4191_v17 = vadd.f32 %v4190_v10, %v4102_v44  ;;  %v3415_v21 = vadd.f32 %v3414_v5, %v6994_v29 }
 0x2db   : > { %v4237_v43 = vadd.f32 %v4191_v17, %v3410_v53 }
 0x2dc   : > { %v4195_v12 = vpop.f32.mrf.mxu0 }
 0x2dd   : > { %v4268_v27 = vadd.f32 %v4267_v23, %v4237_v43  ;;  %v4307_v49 = vmul.f32 %v4237_v43, %v4237_v43 }
 0x2de   : > { %v4103_v28 = vpop.f32.mrf.mxu3 }
 0x2df   : > { %v4338_v30 = vadd.f32 %v4337_v19, %v4307_v49  ;;  %v4104_v13 = vadd.f32 %v4103_v28, %v4014_v4 }
 0x2e0   : > { %v4017_v26 = vpop.f32.mrf.mxu2  ;;  %v3416_v48 = vpop.f32.mrf.mxu1 }
 0x2e1   : > { %v4193_v11 = vadd.f32 %v4192_v37, %v4104_v13  ;;  %v3417_v60 = vadd.f32 %v3416_v48, %v6997_v36 }
 0x2e3   : > { %v4238_v2 = vadd.f32 %v4193_v11, %v3412_v59 }
 0x2e4   : > { %v4197_v6 = vpop.f32.mrf.mxu0 }
 0x2e5   : > { %v4269_v40 = vadd.f32 %v4268_v27, %v4238_v2  ;;  %v4308_v52 = vmul.f32 %v4238_v2, %v4238_v2  ;;  %v5835_v18 = vpack.c.bf16 %v4238_v2, %v4237_v43 }
 0x2e6   : > { %v4106_v46 = vpop.f32.mrf.mxu3 }
 0x2e7   : > { %v4339_v16 = vadd.f32 %v4338_v30, %v4308_v52  ;;  %5882 = vst [vmem:[%s7023_s27 + $0x58] sm:$0xff] %v5835_v18   ;;  %v4107_v32 = vadd.f32 %v4106_v46, %v4017_v26 }
 0x2e8   : > { %v4019_v3 = vpop.f32.mrf.mxu2  ;;  %v3419_v41 = vpop.f32.mrf.mxu1 }
 0x2e9   : > { %v4196_v22 = vadd.f32 %v4195_v12, %v4107_v32  ;;  %v3420_v58 = vadd.f32 %v3419_v41, %v7000_v55 }
 0x2eb   : > { %v4239_v20 = vadd.f32 %v4196_v22, %v3415_v21 }
 0x2ec   : > { %v4200_v8 = vpop.f32.mrf.mxu0 }
 0x2ed   : > { %v4270_v15 = vadd.f32 %v4269_v40, %v4239_v20  ;;  %v4309_v50 = vmul.f32 %v4239_v20, %v4239_v20 }
 0x2ee   : > { %v4108_v62 = vpop.f32.mrf.mxu3 }
 0x2ef   : > { %v4340_v9 = vadd.f32 %v4339_v16, %v4309_v50  ;;  %v4109_v31 = vadd.f32 %v4108_v62, %v4019_v3 }
 0x2f0   : > { %v4022_v63 = vpop.f32.mrf.mxu2  ;;  %v3421_v29 = vpop.f32.mrf.mxu1 }
 0x2f1   : > { %v4198_v38 = vadd.f32 %v4197_v6, %v4109_v31  ;;  %v3422_v44 = vadd.f32 %v3421_v29, %v7003_v42 }
 0x2f3   : > { %v4240_v1 = vadd.f32 %v4198_v38, %v3417_v60 }
 0x2f4   : > { %v4202_v34 = vpop.f32.mrf.mxu0 }
 0x2f5   : > { %v4271_v35 = vadd.f32 %v4270_v15, %v4240_v1  ;;  %v4310_v33 = vmul.f32 %v4240_v1, %v4240_v1  ;;  %v5840_v54 = vpack.c.bf16 %v4240_v1, %v4239_v20 }
 0x2f6   : > { %v4111_v10 = vpop.f32.mrf.mxu3 }
 0x2f7   : > { %v4341_v61 = vadd.f32 %v4340_v9, %v4310_v33  ;;  %5883 = vst [vmem:[%s7023_s27 + $0x60] sm:$0xff] %v5840_v54   ;;  %v4112_v45 = vadd.f32 %v4111_v10, %v4022_v63 }
 0x2f8   : > { %v4024_v56 = vpop.f32.mrf.mxu2  ;;  %v3424_v37 = vpop.f32.mrf.mxu1 }
 0x2f9   : > { %v4201_v47 = vadd.f32 %v4200_v8, %v4112_v45  ;;  %v3425_v30 = vadd.f32 %v3424_v37, %v7006_v51 }
 0x2fb   : > { %v4241_v7 = vadd.f32 %v4201_v47, %v3420_v58 }
 0x2fc   : > { %v4205_v5 = vpop.f32.mrf.mxu0 }
 0x2fd   : > { %v4272_v23 = vadd.f32 %v4271_v35, %v4241_v7  ;;  %v4311_v39 = vmul.f32 %v4241_v7, %v4241_v7 }
 0x2fe   : > { %v4113_v36 = vpop.f32.mrf.mxu3 }
 0x2ff   : > { %v4342_v24 = vadd.f32 %v4341_v61, %v4311_v39  ;;  %v4114_v0 = vadd.f32 %v4113_v36, %v4024_v56 }
 0x300   : > { %v4027_v19 = vpop.f32.mrf.mxu2  ;;  %v3426_v26 = vpop.f32.mrf.mxu1 }
 0x301   : > { %v4203_v4 = vadd.f32 %v4202_v34, %v4114_v0  ;;  %v3427_v18 = vadd.f32 %v3426_v26, %v7009_v14 }
 0x303   : > { %v4242_v53 = vadd.f32 %v4203_v4, %v3422_v44 }
 0x304   : > { %v4207_v11 = vpop.f32.mrf.mxu0 }
 0x305   : > { %v4273_v17 = vadd.f32 %v4272_v23, %v4242_v53  ;;  %v4312_v43 = vmul.f32 %v4242_v53, %v4242_v53  ;;  %v5845_v27 = vpack.c.bf16 %v4242_v53, %v4241_v7 }
 0x306   : > { %v4116_v49 = vpop.f32.mrf.mxu3 }
 0x307   : > { %v4343_v55 = vadd.f32 %v4342_v24, %v4312_v43  ;;  %5884 = vst [vmem:[%s7023_s27 + $0x68] sm:$0xff] %v5845_v27   ;;  %v4117_v28 = vadd.f32 %v4116_v49, %v4027_v19 }
 0x308   : > { %v4029_v12 = vpop.f32.mrf.mxu2  ;;  %v3429_v32 = vpop.f32.mrf.mxu1 }
 0x309   : > { %v4206_v13 = vadd.f32 %v4205_v5, %v4117_v28  ;;  %v3430_v50 = vadd.f32 %v3429_v32, %v7012_v25 }
 0x30b   : > { %v4243_v59 = vadd.f32 %v4206_v13, %v3425_v30 }
 0x30c   : > { %v4210_v51 = vpop.f32.mrf.mxu0 }
 0x30d   : > { %v4274_v48 = vadd.f32 %v4273_v17, %v4243_v59  ;;  %v4313_v42 = vmul.f32 %v4243_v59, %v4243_v59 }
 0x30e   : > { %v4118_v2 = vpop.f32.mrf.mxu3 }
 0x30f   : > { %v4344_v40 = vadd.f32 %v4343_v55, %v4313_v42  ;;  %v4119_v52 = vadd.f32 %v4118_v2, %v4029_v12 }
 0x310   : > { %v4032_v6 = vpop.f32.mrf.mxu2  ;;  %v3431_v63 = vpop.f32.mrf.mxu1 }
 0x311   : > { %v4208_v46 = vadd.f32 %v4207_v11, %v4119_v52  ;;  %v3432_v33 = vadd.f32 %v3431_v63, %v7014_v57 }
 0x313   : > { %v4244_v16 = vadd.f32 %v4208_v46, %v3427_v18 }
 0x314   : > { %v4212_v35 = vpop.f32.mrf.mxu0 }
 0x315   : > { %v4275_v3 = vadd.f32 %v4274_v48, %v4244_v16  ;;  %v4314_v21 = vmul.f32 %v4244_v16, %v4244_v16  ;;  %v5850_v22 = vpack.c.bf16 %v4244_v16, %v4243_v59 }
 0x316   : > { %v4121_v20 = vpop.f32.mrf.mxu3 }
 0x317   : > { %v4345_v41 = vadd.f32 %v4344_v40, %v4314_v21  ;;  %5885 = vst [vmem:[%s7023_s27 + $0x70] sm:$0xff] %v5850_v22   ;;  %v4122_v15 = vadd.f32 %v4121_v20, %v4032_v6 }
 0x318   : > { %v4034_v9 = vpop.f32.mrf.mxu2 }
 0x319   : > { %v4211_v62 = vadd.f32 %v4210_v51, %v4122_v15 }
 0x31b   : > { %v4245_v8 = vadd.f32 %v4211_v62, %v3430_v50 }
 0x31d   : > { %v4276_v31 = vadd.f32 %v4275_v3, %v4245_v8  ;;  %v4315_v14 = vmul.f32 %v4245_v8, %v4245_v8 }
 0x31e   : > { %v4123_v60 = vpop.f32.mrf.mxu3 }
 0x31f   : > { %v4346_v38 = vadd.f32 %v4345_v41, %v4315_v14  ;;  %v4124_v1 = vadd.f32 %v4123_v60, %v4034_v9 }
 0x321   : > { %v4213_v54 = vadd.f32 %v4212_v35, %v4124_v1 }
 0x323   : > { %v4246_v10 = vadd.f32 %v4213_v54, %v3432_v33 }
 0x325   : > { %v4277_v29 = vadd.f32 %v4276_v31, %v4246_v10  ;;  %v4316_v61 = vmul.f32 %v4246_v10, %v4246_v10  ;;  %v5855_v45 = vpack.c.bf16 %v4246_v10, %v4245_v8 }
 0x327   : > { %v4278_v25 = vrot.slane %v4277_v29, 4  ;;  %v4347_v34 = vadd.f32 %v4346_v38, %v4316_v61  ;;  %5886 = vst [vmem:[%s7023_s27 + $0x78] sm:$0xff] %v5855_v45  }
 0x329   : > { %v4279_v56 = vadd.f32 %v4278_v25, %v4277_v29  ;;  %v4348_v58 = vrot.slane %v4347_v34, 4 }
 0x32b   : > { %v4280_v47 = vrot.slane %v4279_v56, 2  ;;  %v4349_v7 = vadd.f32 %v4348_v58, %v4347_v34 }
 0x32d   : > { %v4281_v23 = vadd.f32 %v4280_v47, %v4279_v56  ;;  %v4350_v39 = vrot.slane %v4349_v7, 2 }
 0x32f   : > { %v4282_v36 = vrot.slane %v4281_v23, 1  ;;  %v4351_v24 = vadd.f32 %v4350_v39, %v4349_v7 }
 0x331   : > { %v4283_v57 = vadd.f32 %v4282_v36, %v4281_v23  ;;  %v4352_v0 = vrot.slane %v4351_v24, 1 }
 0x333   : > { %4284 = vst [vmem:[%s235_s29] sm:$0x1] %v4283_v57  ;;  %v4353_v37 = vadd.f32 %v4352_v0, %v4351_v24 }
 0x335   : > { %4354 = vst [vmem:[%s235_s29 + $0x1] sm:$0x1] %v4353_v37 }
 0x336 PF: > { %s16_s18 = sadd.s32 1, %s5930_s18  }
 0x337   : > { %p13_p4 = scmp.ge.s32.totalorder %s16_s18, 4  }
 0x339   :  { %15 = sbr.rel (!%p13_p4) target bundleno = 1 (0x1), region = 83 }

// kernel: residual_block_forward.3
= control target key start
LH: loop header
LB: loop body
LE: loop exit
PB: predicated region body
PF: predicated region fallthrough
CT: control target
= control target key end

     0   :  { %s5963_s21 = smov 0   ;;  %s6808_s0 = inlined_call_operand.vmem [shape: bf16[2,18,18,128], index: 0, kind: input, shape index: {}]   ;;  %s6809_s1 = inlined_call_operand.vmem [shape: bf16[3,384,128], index: 1, kind: input, shape index: {}]   ;;  %s6810_s2 = inlined_call_operand.vmem [shape: bf16[128,128], index: 2, kind: input, shape index: {}]   ;;  %s6811_s3 = inlined_call_operand.vmem [shape: bf16[2,16,16,128], index: 3, kind: output, shape index: {0}]   ;;  %s6812_s4 = inlined_call_operand.vmem [shape: bf16[2,256,128], index: 4, kind: output, shape index: {1}]   ;;  %s6813_s5 = inlined_call_operand.vmem [shape: f32[2,2,128], index: 5, kind: output, shape index: {2}]   ;;  %s6814_s6 = inlined_call_operand.vmem [shape: f32[2,2,128], index: 6, kind: output, shape index: {3}]  }
   0x1 LB: > { %s4375_s22 = sadd.s32 4294967295, %s5926_s21   ;;  %p4379_p0 = scmp.ge.s32.totalorder %s5926_s21, 1  ;;  %s5926_s21 = sphi %s5963_s21, %s17_s21  }
   0x2   : > { %p219_p1 = scmp.lt.s32.totalorder %s5926_s21, 3 }
   0x4   : > { %p220_p2 = pnand %p4379_p0, %p219_p1 }
   0x5   : > { %p262_p3 = scmp.lt.s32.totalorder (!%p220_p2), %s4375_s22, 1 }
   0x6   : > { %223 = sbr.rel (%p220_p2) target bundleno = 833 (0x341), region = 32 }
   0xb   : > { %v5592_v0 = vld [vmem:[%s6809_s1 + $0xf8] sm:$0xff]  ;;  %v5591_v2 = vld [vmem:[%s6809_s1 + $0xf0] sm:$0xff]  ;;  %s6820_s22 = smov (!%p262_p3, %s4375_s22), 1  ;;  %v5590_v4 = vld [vmem:[%s6809_s1 + $0xe8] sm:$0xff]  ;;  %vm411_vm0 = vsmask.f32 3328 }
   0xc   : > { %v5600_v1 = vld [vmem:[%s6809_s1 + $0x138] sm:$0xff]  ;;  %1853 = vmatpush.bf16.msra.mxu0 %v5592_v0  ;;  %5895 = vmatpush.bf16.msra.mxu2 %v5592_v0  ;;  %v5599_v3 = vld [vmem:[%s6809_s1 + $0x130] sm:$0xff]  ;;  %s5911_s7 = smul.u32 216, %s6820_s22  ;;  %v5598_v5 = vld [vmem:[%s6809_s1 + $0x128] sm:$0xff]  ;;  %vm412_vm1 = vsmask.f32 7440 }
   0xd   : > { %1942 = vmatpush.bf16.msra.mxu1 %v5600_v1  ;;  %5903 = vmatpush.bf16.msra.mxu3 %v5600_v1  ;;  %v5589_v9 = vld [vmem:[%s6809_s1 + $0xe0] sm:$0xff]  ;;  %v5588_v31 = vld [vmem:[%s6809_s1 + $0xd8] sm:$0xff]  ;;  %vm6022_vm2 = vmor %vm411_vm0, %vm412_vm1  ;;  %vm1026_vm3 = vcmask 1042432   ;;  %vm1027_vm4 = vcmask 1046532   ;;  %s5463_s16 = sshll.u32 %s6820_s22, 7 }
   0xe   : > { %s5995_s14 = scalar_lea.vmem %s6808_s0, %s5911_s7  ;;  %v5597_v18 = vld [vmem:[%s6809_s1 + $0x120] sm:$0xff]  ;;  %v5596_v37 = vld [vmem:[%s6809_s1 + $0x118] sm:$0xff]  ;;  %v5587_v48 = vld [vmem:[%s6809_s1 + $0xd0] sm:$0xff]  ;;  %s6673_s19 = scalar_lea.vmem %s6812_s4, %s5463_s16 }
   0xf   : > { %v287_v6 = vld [vmem:[%s5995_s14 + $0xc] sm:$0xf]  ;;  %v288_v7 = vld [vmem:[%s5995_s14 + $0x10] sm:$0xf]  ;;  %v362_v13 = vld [vmem:[%s5995_s14 + $0x14] sm:$0x1]  ;;  %s6683_s24 = scalar_lea.vmem %s6811_s3, %s5463_s16 }
  0x10   : > { %1854 = vmatpush.bf16.msra.mxu0 %v5591_v2  ;;  %5896 = vmatpush.bf16.msra.mxu2 %v5591_v2  ;;  %v303_v8 = vld [vmem:[%s5995_s14 + $0x6c] sm:$0xf]  ;;  %323 = vst [vmem:[#allocation2 + $0x18] sm:$0xf] %v287_v6  ;;  %v304_v10 = vld [vmem:[%s5995_s14 + $0x70] sm:$0xf]  ;;  %vm6278_vm5 = vmor %vm1026_vm3, %vm1027_vm4 }
  0x11   : > { %1943 = vmatpush.bf16.msra.mxu1 %v5599_v3  ;;  %5904 = vmatpush.bf16.msra.mxu3 %v5599_v3  ;;  %v360_v11 = vld [vmem:[%s5995_s14 + $0xc] sm:$0xf]  ;;  %324 = vst [vmem:[#allocation2 + $0x24] sm:$0xf] %v288_v7  ;;  %v361_v12 = vld [vmem:[%s5995_s14 + $0x10] sm:$0xf] }
  0x12   : > { %339 = vst [vmem:[#allocation2 + $0xd8] sm:$0xf] %v303_v8  ;;  %v439_v14 = vshrl.u32 %v360_v11, 16  ;;  %v442_v15 = vshll.u32 %v360_v11, 16  ;;  %v448_v16 = vshll.u32 %v361_v12, 16  ;;  %v452_v17 = vshrl.u32 %v361_v12, 16 }
  0x13   : > { %340 = vst [vmem:[#allocation2 + $0xe4] sm:$0xf] %v304_v10  ;;  %v458_v19 = vshll.u32 %v362_v13, 16  ;;  %v384_v20 = vld [vmem:[%s5995_s14 + $0x6c] sm:$0xf]  ;;  %v5595_v53 = vld [vmem:[%s6809_s1 + $0x110] sm:$0xff] }
  0x14   : > { %1855 = vmatpush.bf16.msra.mxu0 %v5590_v4  ;;  %5897 = vmatpush.bf16.msra.mxu2 %v5590_v4  ;;  %v441_v21 = vrot.slane %v439_v14, 4  ;;  %v444_v22 = vrot.slane %v442_v15, 5  ;;  %v450_v23 = vrot.slane %v448_v16, 5  ;;  %v454_v24 = vrot.slane %v452_v17, 4  ;;  %v385_v25 = vld [vmem:[%s5995_s14 + $0x70] sm:$0xf] }
  0x15   : > { %1944 = vmatpush.bf16.msra.mxu1 %v5598_v5  ;;  %5905 = vmatpush.bf16.msra.mxu3 %v5598_v5  ;;  %v460_v26 = vrot.slane %v458_v19, 5  ;;  %v386_v27 = vld [vmem:[%s5995_s14 + $0x74] sm:$0x1]  ;;  %v631_v28 = vshrl.u32 %v384_v20, 16  ;;  %v634_v29 = vshll.u32 %v384_v20, 16  ;;  %v640_v30 = vshll.u32 %v385_v25, 16 }
  0x16   : > { %v445_v32 = vor.u32 %v444_v22, %v441_v21  ;;  %v455_v33 = vor.u32 %v454_v24, %v450_v23  ;;  %v644_v34 = vshrl.u32 %v385_v25, 16  ;;  %v650_v35 = vshll.u32 %v386_v27, 16  ;;  %v289_v36 = vld [vmem:[%s5995_s14 + $0x18] sm:$0xf]  ;;  %v290_v42 = vld [vmem:[%s5995_s14 + $0x1c] sm:$0xf] }
  0x17   : > { %v633_v39 = vrot.slane %v631_v28, 4  ;;  %v636_v40 = vrot.slane %v634_v29, 5  ;;  %v642_v41 = vrot.slane %v640_v30, 5  ;;  %325 = vst [vmem:[#allocation2 + $0x30] sm:$0xf] %v289_v36  ;;  %v5586_v57 = vld [vmem:[%s6809_s1 + $0xc8] sm:$0xff] }
  0x18   : > { %1856 = vmatpush.bf16.msra.mxu0 %v5589_v9  ;;  %5898 = vmatpush.bf16.msra.mxu2 %v5589_v9  ;;  %v446_v43 = vrot.slane %v445_v32, 4  ;;  %v456_v44 = vrot.slane %v455_v33, 4  ;;  %v646_v45 = vrot.slane %v644_v34, 4  ;;  %v652_v47 = vrot.slane %v650_v35, 5  ;;  %326 = vst [vmem:[#allocation2 + $0x3c] sm:$0xf] %v290_v42 }
  0x19   : > { %1945 = vmatpush.bf16.msra.mxu1 %v5597_v18  ;;  %5906 = vmatpush.bf16.msra.mxu3 %v5597_v18  ;;  %v637_v46 = vor.u32 %v636_v40, %v633_v39  ;;  %v305_v52 = vld [vmem:[%s5995_s14 + $0x78] sm:$0xf]  ;;  %v306_v55 = vld [vmem:[%s5995_s14 + $0x7c] sm:$0xf]  ;;  %v365_v62 = vld [vmem:[%s5995_s14 + $0x20] sm:$0x1] }
  0x1a   : > { %v451_v49 = vsel %vm6022_vm2, %v446_v43, %v450_v23  ;;  %v461_v50 = vsel %vm6022_vm2, %v456_v44, %v460_v26  ;;  %v647_v51 = vor.u32 %v646_v45, %v642_v41  ;;  %v363_v56 = vld [vmem:[%s5995_s14 + $0x18] sm:$0xf]  ;;  %v364_v59 = vld [vmem:[%s5995_s14 + $0x1c] sm:$0xf]  ;;  %341 = vst [vmem:[#allocation2 + $0xf0] sm:$0xf] %v305_v52 }
  0x1b   : > { %884 = vst [vmem:[#allocation2 + $0x1c] sm:$0xf] %v451_v49  ;;  %v638_v54 = vrot.slane %v637_v46, 4  ;;  %v463_v60 = vshrl.u32 %v363_v56, 16  ;;  %v466_v63 = vshll.u32 %v363_v56, 16  ;;  %v472_v0 = vshll.u32 %v364_v59, 16 }
  0x1c   : > { %1857 = vmatpush.bf16.msra.mxu0 %v5588_v31  ;;  %5899 = vmatpush.bf16.msra.mxu2 %v5588_v31  ;;  %885 = vst [vmem:[#allocation2 + $0x28] sm:$0xf] %v461_v50  ;;  %v648_v58 = vrot.slane %v647_v51, 4  ;;  %v5594_v1 = vld [vmem:[%s6809_s1 + $0x108] sm:$0xff]  ;;  %v476_v4 = vshrl.u32 %v364_v59, 16  ;;  %v482_v5 = vshll.u32 %v365_v62, 16 }
  0x1d   : > { %1946 = vmatpush.bf16.msra.mxu1 %v5596_v37  ;;  %5907 = vmatpush.bf16.msra.mxu3 %v5596_v37  ;;  %v643_v61 = vsel %vm6022_vm2, %v638_v54, %v642_v41  ;;  %v465_v3 = vrot.slane %v463_v60, 4  ;;  %v6052_v6 = vld [vmem:[#allocation2 + $0x18] sm:$0xf]  ;;  %v6054_v7 = vld [vmem:[#allocation2 + $0x20] sm:$0xf0]  ;;  %v468_v8 = vrot.slane %v466_v63, 5 }
  0x1e   : > { %v653_v2 = vsel %vm6022_vm2, %v648_v58, %v652_v47  ;;  %900 = vst [vmem:[#allocation2 + $0xdc] sm:$0xf] %v643_v61  ;;  %v474_v9 = vrot.slane %v472_v0, 5  ;;  %v387_v10 = vld [vmem:[%s5995_s14 + $0x78] sm:$0xf]  ;;  %v5585_v11 = vld [vmem:[%s6809_s1 + $0xc0] sm:$0xff]  ;;  %v4456_v29 = vor.u32 %v6054_v7, %v6052_v6 }
  0x1f   : > { %901 = vst [vmem:[#allocation2 + $0xe8] sm:$0xf] %v653_v2  ;;  %v4551_v12 = vld [vmem:[#allocation2 + $0xd8] sm:$0xf]  ;;  %v478_v13 = vrot.slane %v476_v4, 4  ;;  %v469_v15 = vor.u32 %v468_v8, %v465_v3  ;;  %v5593_v18 = vld [vmem:[%s6809_s1 + $0x100] sm:$0xff] }
  0x20   : > { %1858 = vmatpush.bf16.msra.mxu0 %v5587_v48  ;;  %5900 = vmatpush.bf16.msra.mxu2 %v5587_v48  ;;  %342 = vst [vmem:[#allocation2 + $0xfc] sm:$0xf] %v306_v55  ;;  %v5562_v14 = vld [vmem:[#allocation2 + $0xe0] sm:$0xf0]  ;;  %v388_v16 = vld [vmem:[%s5995_s14 + $0x7c] sm:$0xf] }
  0x21   : > { %1947 = vmatpush.bf16.msra.mxu1 %v5595_v53  ;;  %5908 = vmatpush.bf16.msra.mxu3 %v5595_v53  ;;  %v389_v17 = vld [vmem:[%s5995_s14 + $0x80] sm:$0x1]  ;;  %v479_v20 = vor.u32 %v478_v13, %v474_v9  ;;  %v484_v21 = vrot.slane %v482_v5, 5  ;;  %v655_v22 = vshrl.u32 %v387_v10, 16  ;;  %v658_v23 = vshll.u32 %v387_v10, 16  ;;  %v5608_v30 = vld [vmem:[%s6809_s1 + $0x178] sm:$0xff] }
  0x22   : > { %v5537_v19 = vld [vmem:[#allocation2 + $0x1c] sm:$0xf]  ;;  %v470_v25 = vrot.slane %v469_v15, 4  ;;  %v664_v26 = vshll.u32 %v388_v16, 16  ;;  %v668_v27 = vshrl.u32 %v388_v16, 16  ;;  %v674_v28 = vshll.u32 %v389_v17, 16 }
  0x23   : > { %v4457_v24 = vld [vmem:[#allocation2 + $0x24] sm:$0xf0]  ;;  %v5520_v31 = vld [vmem:[%s6809_s1 + $0x38] sm:$0xff]  ;;  %v480_v32 = vrot.slane %v479_v20, 4  ;;  %v657_v33 = vrot.slane %v655_v22, 4  ;;  %v660_v34 = vrot.slane %v658_v23, 5  ;;  %v4552_v35 = vor.u32 %v5562_v14, %v4551_v12 }
  0x24   : > { %1859 = vmatpush.bf16.msra.mxu0 %v5586_v57  ;;  %5901 = vmatpush.bf16.msra.mxu2 %v5586_v57  ;;  %v5528_v37 = vld [vmem:[%s6809_s1 + $0x78] sm:$0xff]  ;;  %v475_v40 = vsel %vm6022_vm2, %v470_v25, %v474_v9  ;;  %v666_v41 = vrot.slane %v664_v26, 5  ;;  %v670_v42 = vrot.slane %v668_v27, 4  ;;  %v4460_v43 = vor.u32 %v5537_v19, %v4457_v24  ;;  %v291_v47 = vld [vmem:[%s5995_s14 + $0x24] sm:$0xf]  ;;  %v5607_v51 = vld [vmem:[%s6809_s1 + $0x170] sm:$0xff] }
  0x25   : > { %1948 = vmatpush.bf16.msra.mxu1 %v5594_v1  ;;  %5909 = vmatpush.bf16.msra.mxu3 %v5594_v1  ;;  %v5561_v36 = vld [vmem:[#allocation2 + $0xdc] sm:$0xf]  ;;  %v485_v45 = vsel %vm6022_vm2, %v480_v32, %v484_v21  ;;  %886 = vst [vmem:[#allocation2 + $0x34] sm:$0xf] %v475_v40  ;;  %v661_v46 = vor.u32 %v660_v34, %v657_v33  ;;  %v676_v50 = vrot.slane %v674_v28, 5  ;;  %v5519_v54 = vld [vmem:[%s6809_s1 + $0x30] sm:$0xff] }
  0x26   : > { %v5536_v39 = vld [vmem:[%s6809_s1 + $0xb8] sm:$0xff]  ;;  %v4553_v44 = vld [vmem:[#allocation2 + $0xe4] sm:$0xf0]  ;;  %887 = vst [vmem:[#allocation2 + $0x40] sm:$0xf] %v485_v45  ;;  %v671_v49 = vor.u32 %v670_v42, %v666_v41  ;;  %v5527_v57 = vld [vmem:[%s6809_s1 + $0x70] sm:$0xff] }
  0x27   : > { %v4556_v48 = vor.u32 %v5561_v36, %v4553_v44  ;;  %v292_v52 = vld [vmem:[%s5995_s14 + $0x28] sm:$0xf]  ;;  %v662_v53 = vrot.slane %v661_v46, 4  ;;  %327 = vst [vmem:[#allocation2 + $0x48] sm:$0xf] %v291_v47  ;;  %v5535_v58 = vld [vmem:[%s6809_s1 + $0xb0] sm:$0xff] }
  0x28   : > { %1860 = vmatpush.bf16.msra.mxu0 %v5585_v11  ;;  %5902 = vmatpush.bf16.msra.mxu2 %v5585_v11  ;;  %v307_v55 = vld [vmem:[%s5995_s14 + $0x84] sm:$0xf]  ;;  %v672_v56 = vrot.slane %v671_v49, 4  ;;  %328 = vst [vmem:[#allocation2 + $0x54] sm:$0xf] %v292_v52  ;;  %v5606_v6 = vld [vmem:[%s6809_s1 + $0x168] sm:$0xff] }
  0x29   : > { %1949 = vmatpush.bf16.msra.mxu1 %v5593_v18  ;;  %5910 = vmatpush.bf16.msra.mxu3 %v5593_v18  ;;  %v308_v59 = vld [vmem:[%s5995_s14 + $0x88] sm:$0xf]  ;;  %v667_v60 = vsel %vm6022_vm2, %v662_v53, %v666_v41  ;;  %343 = vst [vmem:[#allocation2 + $0x108] sm:$0xf] %v307_v55  ;;  %v366_v61 = vld [vmem:[%s5995_s14 + $0x24] sm:$0xf] }
  0x2a   : > { %v367_v62 = vld [vmem:[%s5995_s14 + $0x28] sm:$0xf]  ;;  %v677_v63 = vsel %vm6022_vm2, %v672_v56, %v676_v50  ;;  %902 = vst [vmem:[#allocation2 + $0xf4] sm:$0xf] %v667_v60  ;;  %v368_v0 = vld [vmem:[%s5995_s14 + $0x2c] sm:$0x1] }
  0x2b   : > { %1861 = vmatmul.bf16.vlgmr.msra.gmra.mxu0 %v4456_v29  ;;  %1901 = vmatmul.bf16.vlgmr.msra.gmra.mxu2 %v4552_v35  ;;  %v487_v1 = vshrl.u32 %v366_v61, 16  ;;  %v490_v2 = vshll.u32 %v366_v61, 16  ;;  %903 = vst [vmem:[#allocation2 + $0x100] sm:$0xf] %v677_v63  ;;  %v496_v3 = vshll.u32 %v367_v62, 16  ;;  %v500_v4 = vshrl.u32 %v367_v62, 16 }
  0x2c   : > { %2031 = vmatpush.bf16.msrb.mxu2 %v5608_v30  ;;  %1950 = vmatmul.bf16.vlgmr.msra.gmra.mxu1 %v4460_v43  ;;  %v506_v5 = vshll.u32 %v368_v0, 16  ;;  %344 = vst [vmem:[#allocation2 + $0x114] sm:$0xf] %v308_v59  ;;  %v5518_v11 = vld [vmem:[%s6809_s1 + $0x28] sm:$0xff]  ;;  %v390_v13 = vld [vmem:[%s5995_s14 + $0x84] sm:$0xf] }
  0x2d   : > { %2520 = vmatpush.bf16.msrb.mxu3 %v5520_v31  ;;  %2609 = vmatpush.bf16.msrb.mxu0 %v5528_v37  ;;  %v489_v7 = vrot.slane %v487_v1, 4  ;;  %v492_v8 = vrot.slane %v490_v2, 5  ;;  %v498_v9 = vrot.slane %v496_v3, 5  ;;  %v502_v10 = vrot.slane %v500_v4, 4  ;;  %v391_v14 = vld [vmem:[%s5995_s14 + $0x88] sm:$0xf] }
  0x2e   : > { %1990 = vmatmul.bf16.vlgmr.msra.gmra.mxu3 %v4556_v48  ;;  %2698 = vmatpush.bf16.msrb.mxu1 %v5536_v39  ;;  %v4467_v15 = vld [vmem:[#allocation2 + $0x30] sm:$0xf]  ;;  %v5541_v16 = vld [vmem:[#allocation2 + $0x38] sm:$0xf0]  ;;  %v508_v20 = vrot.slane %v506_v5, 5  ;;  %v679_v22 = vshrl.u32 %v390_v13, 16 }
  0x2f   : > { %v493_v12 = vor.u32 %v492_v8, %v489_v7  ;;  %v4563_v17 = vld [vmem:[#allocation2 + $0xf0] sm:$0xf]  ;;  %v5565_v18 = vld [vmem:[#allocation2 + $0xf8] sm:$0xf0]  ;;  %v503_v19 = vor.u32 %v502_v10, %v498_v9  ;;  %v392_v21 = vld [vmem:[%s5995_s14 + $0x8c] sm:$0x1]  ;;  %v4468_v44 = vor.u32 %v5541_v16, %v4467_v15 }
  0x30   : > { %2032 = vmatpush.bf16.msrb.mxu2 %v5607_v51  ;;  %v682_v23 = vshll.u32 %v390_v13, 16  ;;  %v5540_v24 = vld [vmem:[#allocation2 + $0x34] sm:$0xf]  ;;  %v4469_v25 = vld [vmem:[#allocation2 + $0x3c] sm:$0xf0]  ;;  %v688_v27 = vshll.u32 %v391_v14, 16  ;;  %v4564_v45 = vor.u32 %v5565_v18, %v4563_v17 }
  0x31   : > { %2521 = vmatpush.bf16.msrb.mxu3 %v5519_v54  ;;  %2610 = vmatpush.bf16.msrb.mxu0 %v5527_v57  ;;  %v494_v26 = vrot.slane %v493_v12, 4  ;;  %v692_v28 = vshrl.u32 %v391_v14, 16  ;;  %v5526_v29 = vld [vmem:[%s6809_s1 + $0x68] sm:$0xff]  ;;  %v5564_v30 = vld [vmem:[#allocation2 + $0xf4] sm:$0xf]  ;;  %v504_v31 = vrot.slane %v503_v19, 4  ;;  %v4472_v49 = vor.u32 %v5540_v24, %v4469_v25 }
  0x32   : > { %2699 = vmatpush.bf16.msrb.mxu1 %v5535_v58  ;;  %v681_v32 = vrot.slane %v679_v22, 4  ;;  %v684_v33 = vrot.slane %v682_v23, 5  ;;  %v698_v34 = vshll.u32 %v392_v21, 16  ;;  %v4565_v35 = vld [vmem:[#allocation2 + $0xfc] sm:$0xf0]  ;;  %v690_v37 = vrot.slane %v688_v27, 5 }
  0x33   : > { %v499_v36 = vsel %vm6022_vm2, %v494_v26, %v498_v9  ;;  %v694_v39 = vrot.slane %v692_v28, 4  ;;  %v5534_v40 = vld [vmem:[%s6809_s1 + $0xa8] sm:$0xff]  ;;  %v509_v41 = vsel %vm6022_vm2, %v504_v31, %v508_v20  ;;  %v293_v47 = vld [vmem:[%s5995_s14 + $0x30] sm:$0xf]  ;;  %v294_v48 = vld [vmem:[%s5995_s14 + $0x34] sm:$0xf]  ;;  %v4568_v50 = vor.u32 %v5564_v30, %v4565_v35 }
  0x34   : > { %2033 = vmatpush.bf16.msrb.mxu2 %v5606_v6  ;;  %888 = vst [vmem:[#allocation2 + $0x4c] sm:$0xf] %v499_v36  ;;  %v685_v42 = vor.u32 %v684_v33, %v681_v32  ;;  %v700_v43 = vrot.slane %v698_v34, 5  ;;  %v309_v52 = vld [vmem:[%s5995_s14 + $0x90] sm:$0xf]  ;;  %v5605_v1 = vld [vmem:[%s6809_s1 + $0x160] sm:$0xff] }
  0x35   : > { %2522 = vmatpush.bf16.msrb.mxu3 %v5518_v11  ;;  %2611 = vmatpush.bf16.msrb.mxu0 %v5526_v29  ;;  %889 = vst [vmem:[#allocation2 + $0x58] sm:$0xf] %v509_v41  ;;  %v695_v46 = vor.u32 %v694_v39, %v690_v37  ;;  %v310_v54 = vld [vmem:[%s5995_s14 + $0x94] sm:$0xf]  ;;  %v369_v56 = vld [vmem:[%s5995_s14 + $0x30] sm:$0xf] }
  0x36   : > { %2700 = vmatpush.bf16.msrb.mxu1 %v5534_v40  ;;  %v686_v51 = vrot.slane %v685_v42, 4  ;;  %329 = vst [vmem:[#allocation2 + $0x60] sm:$0xf] %v293_v47  ;;  %v370_v57 = vld [vmem:[%s5995_s14 + $0x34] sm:$0xf]  ;;  %v511_v60 = vshrl.u32 %v369_v56, 16 }
  0x37   : > { %v696_v53 = vrot.slane %v695_v46, 4  ;;  %330 = vst [vmem:[#allocation2 + $0x6c] sm:$0xf] %v294_v48  ;;  %v371_v59 = vld [vmem:[%s5995_s14 + $0x38] sm:$0x1]  ;;  %v514_v61 = vshll.u32 %v369_v56, 16 }
  0x38   : > { %v691_v55 = vsel %vm6022_vm2, %v686_v51, %v690_v37  ;;  %345 = vst [vmem:[#allocation2 + $0x120] sm:$0xf] %v309_v52  ;;  %v520_v62 = vshll.u32 %v370_v57, 16  ;;  %v524_v63 = vshrl.u32 %v370_v57, 16  ;;  %v530_v0 = vshll.u32 %v371_v59, 16  ;;  %2034 = vmatpush.bf16.msrb.mxu2 %v5605_v1  ;;  %v5517_v6 = vld [vmem:[%s6809_s1 + $0x20] sm:$0xff] }
  0x39   : > { %v701_v58 = vsel %vm6022_vm2, %v696_v53, %v700_v43  ;;  %904 = vst [vmem:[#allocation2 + $0x10c] sm:$0xf] %v691_v55  ;;  %v513_v2 = vrot.slane %v511_v60, 4  ;;  %v516_v3 = vrot.slane %v514_v61, 5  ;;  %v393_v8 = vld [vmem:[%s5995_s14 + $0x90] sm:$0xf]  ;;  %2523 = vmatpush.bf16.msrb.mxu3 %v5517_v6 }
  0x3a   : > { %905 = vst [vmem:[#allocation2 + $0x118] sm:$0xf] %v701_v58  ;;  %v522_v4 = vrot.slane %v520_v62, 5  ;;  %v526_v5 = vrot.slane %v524_v63, 4  ;;  %v394_v9 = vld [vmem:[%s5995_s14 + $0x94] sm:$0xf] }
  0x3b   : > { %1866 = vmatmul.bf16.gmra.mxu0 %v4468_v44  ;;  %1906 = vmatmul.bf16.gmra.mxu2 %v4564_v45  ;;  %346 = vst [vmem:[#allocation2 + $0x12c] sm:$0xf] %v310_v54  ;;  %v517_v7 = vor.u32 %v516_v3, %v513_v2  ;;  %v532_v11 = vrot.slane %v530_v0, 5  ;;  %v395_v12 = vld [vmem:[%s5995_s14 + $0x98] sm:$0x1]  ;;  %v703_v13 = vshrl.u32 %v393_v8, 16 }
  0x3c   : > { %1955 = vmatmul.bf16.gmra.mxu1 %v4472_v49  ;;  %v527_v10 = vor.u32 %v526_v5, %v522_v4  ;;  %v706_v14 = vshll.u32 %v393_v8, 16  ;;  %v712_v16 = vshll.u32 %v394_v9, 16  ;;  %v716_v17 = vshrl.u32 %v394_v9, 16  ;;  %v5525_v18 = vld [vmem:[%s6809_s1 + $0x60] sm:$0xff]  ;;  %v4479_v19 = vld [vmem:[#allocation2 + $0x48] sm:$0xf] }
  0x3d   : > { %v518_v15 = vrot.slane %v517_v7, 4  ;;  %v5544_v20 = vld [vmem:[#allocation2 + $0x50] sm:$0xf0]  ;;  %v4575_v21 = vld [vmem:[#allocation2 + $0x108] sm:$0xf]  ;;  %v705_v24 = vrot.slane %v703_v13, 4  ;;  %2612 = vmatpush.bf16.msrb.mxu0 %v5525_v18 }
  0x3e   : > { %1995 = vmatmul.bf16.gmra.mxu3 %v4568_v50  ;;  %v5568_v22 = vld [vmem:[#allocation2 + $0x110] sm:$0xf0]  ;;  %v528_v23 = vrot.slane %v527_v10, 4  ;;  %v708_v25 = vrot.slane %v706_v14, 5  ;;  %v722_v26 = vshll.u32 %v395_v12, 16  ;;  %v714_v31 = vrot.slane %v712_v16, 5 }
  0x3f   : > { %v5543_v27 = vld [vmem:[#allocation2 + $0x4c] sm:$0xf]  ;;  %v4481_v28 = vld [vmem:[#allocation2 + $0x54] sm:$0xf0]  ;;  %v523_v30 = vsel %vm6022_vm2, %v518_v15, %v522_v4  ;;  %v718_v32 = vrot.slane %v716_v17, 4  ;;  %v5533_v33 = vld [vmem:[%s6809_s1 + $0xa0] sm:$0xff]  ;;  %v4480_v44 = vor.u32 %v5544_v20, %v4479_v19  ;;  %v4576_v45 = vor.u32 %v5568_v22, %v4575_v21 }
  0x40   : > { %v5567_v29 = vld [vmem:[#allocation2 + $0x10c] sm:$0xf]  ;;  %v533_v35 = vsel %vm6022_vm2, %v528_v23, %v532_v11  ;;  %890 = vst [vmem:[#allocation2 + $0x64] sm:$0xf] %v523_v30  ;;  %v709_v36 = vor.u32 %v708_v25, %v705_v24  ;;  %v724_v37 = vrot.slane %v722_v26, 5  ;;  %2701 = vmatpush.bf16.msrb.mxu1 %v5533_v33  ;;  %v4484_v48 = vor.u32 %v5543_v27, %v4481_v28  ;;  %v5604_v0 = vld [vmem:[%s6809_s1 + $0x158] sm:$0xff] }
  0x41   : > { %v4577_v34 = vld [vmem:[#allocation2 + $0x114] sm:$0xf0]  ;;  %891 = vst [vmem:[#allocation2 + $0x70] sm:$0xf] %v533_v35  ;;  %v719_v39 = vor.u32 %v718_v32, %v714_v31  ;;  %v295_v40 = vld [vmem:[%s5995_s14 + $0x3c] sm:$0xf]  ;;  %2035 = vmatpush.bf16.msrb.mxu2 %v5604_v0 }
  0x42   : > { %v296_v41 = vld [vmem:[%s5995_s14 + $0x40] sm:$0xf]  ;;  %v710_v42 = vrot.slane %v709_v36, 4  ;;  %331 = vst [vmem:[#allocation2 + $0x78] sm:$0xf] %v295_v40  ;;  %v4580_v49 = vor.u32 %v5567_v29, %v4577_v34  ;;  %v5516_v12 = vld [vmem:[%s6809_s1 + $0x18] sm:$0xff] }
  0x43   : > { %v311_v43 = vld [vmem:[%s5995_s14 + $0x9c] sm:$0xf]  ;;  %v720_v46 = vrot.slane %v719_v39, 4  ;;  %332 = vst [vmem:[#allocation2 + $0x84] sm:$0xf] %v296_v41  ;;  %2524 = vmatpush.bf16.msrb.mxu3 %v5516_v12 }
  0x44   : > { %v312_v47 = vld [vmem:[%s5995_s14 + $0xa0] sm:$0xf]  ;;  %v715_v50 = vsel %vm6022_vm2, %v710_v42, %v714_v31  ;;  %347 = vst [vmem:[#allocation2 + $0x138] sm:$0xf] %v311_v43  ;;  %v372_v51 = vld [vmem:[%s5995_s14 + $0x3c] sm:$0xf] }
  0x45   : > { %v373_v52 = vld [vmem:[%s5995_s14 + $0x40] sm:$0xf]  ;;  %v725_v53 = vsel %vm6022_vm2, %v720_v46, %v724_v37  ;;  %906 = vst [vmem:[#allocation2 + $0x124] sm:$0xf] %v715_v50  ;;  %v374_v54 = vld [vmem:[%s5995_s14 + $0x44] sm:$0x1] }
  0x46   : > { %v535_v55 = vshrl.u32 %v372_v51, 16  ;;  %v538_v56 = vshll.u32 %v372_v51, 16  ;;  %907 = vst [vmem:[#allocation2 + $0x130] sm:$0xf] %v725_v53  ;;  %v544_v57 = vshll.u32 %v373_v52, 16  ;;  %v548_v58 = vshrl.u32 %v373_v52, 16 }
  0x47   : > { %v554_v59 = vshll.u32 %v374_v54, 16  ;;  %348 = vst [vmem:[#allocation2 + $0x144] sm:$0xf] %v312_v47  ;;  %v396_v2 = vld [vmem:[%s5995_s14 + $0x9c] sm:$0xf] }
  0x48   : > { %v537_v60 = vrot.slane %v535_v55, 4  ;;  %v540_v61 = vrot.slane %v538_v56, 5  ;;  %v546_v62 = vrot.slane %v544_v57, 5  ;;  %v550_v63 = vrot.slane %v548_v58, 4  ;;  %v397_v3 = vld [vmem:[%s5995_s14 + $0xa0] sm:$0xf] }
  0x49   : > { %v556_v5 = vrot.slane %v554_v59, 5  ;;  %v398_v6 = vld [vmem:[%s5995_s14 + $0xa4] sm:$0x1]  ;;  %v727_v7 = vshrl.u32 %v396_v2, 16  ;;  %v730_v8 = vshll.u32 %v396_v2, 16  ;;  %v736_v10 = vshll.u32 %v397_v3, 16 }
  0x4a   : > { %v541_v1 = vor.u32 %v540_v61, %v537_v60  ;;  %v551_v4 = vor.u32 %v550_v63, %v546_v62  ;;  %v740_v11 = vshrl.u32 %v397_v3, 16  ;;  %v746_v16 = vshll.u32 %v398_v6, 16  ;;  %v4491_v17 = vld [vmem:[#allocation2 + $0x60] sm:$0xf]  ;;  %v5547_v18 = vld [vmem:[#allocation2 + $0x68] sm:$0xf0] }
  0x4b   : > { %1871 = vmatmul.bf16.gmra.mxu0 %v4480_v44  ;;  %1911 = vmatmul.bf16.gmra.mxu2 %v4576_v45  ;;  %v729_v14 = vrot.slane %v727_v7, 4  ;;  %v732_v15 = vrot.slane %v730_v8, 5  ;;  %v4587_v19 = vld [vmem:[#allocation2 + $0x120] sm:$0xf]  ;;  %v5571_v20 = vld [vmem:[#allocation2 + $0x128] sm:$0xf0]  ;;  %v4492_v41 = vor.u32 %v5547_v18, %v4491_v17 }
  0x4c   : > { %1960 = vmatmul.bf16.gmra.mxu1 %v4484_v48  ;;  %v542_v9 = vrot.slane %v541_v1, 4  ;;  %v552_v13 = vrot.slane %v551_v4, 4  ;;  %v738_v22 = vrot.slane %v736_v10, 5  ;;  %v742_v23 = vrot.slane %v740_v11, 4  ;;  %v5524_v24 = vld [vmem:[%s6809_s1 + $0x58] sm:$0xff]  ;;  %v5603_v6 = vld [vmem:[%s6809_s1 + $0x150] sm:$0xff] }
  0x4d   : > { %v5532_v25 = vld [vmem:[%s6809_s1 + $0x98] sm:$0xff]  ;;  %v5546_v26 = vld [vmem:[#allocation2 + $0x64] sm:$0xf]  ;;  %v4493_v27 = vld [vmem:[#allocation2 + $0x6c] sm:$0xf0]  ;;  %v733_v29 = vor.u32 %v732_v15, %v729_v14  ;;  %v748_v30 = vrot.slane %v746_v16, 5  ;;  %2613 = vmatpush.bf16.msrb.mxu0 %v5524_v24  ;;  %v4588_v42 = vor.u32 %v5571_v20, %v4587_v19  ;;  %2036 = vmatpush.bf16.msrb.mxu2 %v5603_v6 }
  0x4e   : > { %2000 = vmatmul.bf16.gmra.mxu3 %v4580_v49  ;;  %v547_v21 = vsel %vm6022_vm2, %v542_v9, %v546_v62  ;;  %v557_v28 = vsel %vm6022_vm2, %v552_v13, %v556_v5  ;;  %v5570_v31 = vld [vmem:[#allocation2 + $0x124] sm:$0xf]  ;;  %v4589_v32 = vld [vmem:[#allocation2 + $0x12c] sm:$0xf0]  ;;  %v743_v33 = vor.u32 %v742_v23, %v738_v22  ;;  %2702 = vmatpush.bf16.msrb.mxu1 %v5532_v25  ;;  %v297_v34 = vld [vmem:[%s5995_s14 + $0x48] sm:$0xf] }
  0x4f   : > { %892 = vst [vmem:[#allocation2 + $0x7c] sm:$0xf] %v547_v21  ;;  %v298_v35 = vld [vmem:[%s5995_s14 + $0x4c] sm:$0xf]  ;;  %v734_v36 = vrot.slane %v733_v29, 4  ;;  %v4496_v46 = vor.u32 %v5546_v26, %v4493_v27  ;;  %v4592_v51 = vor.u32 %v5570_v31, %v4589_v32  ;;  %v5515_v14 = vld [vmem:[%s6809_s1 + $0x10] sm:$0xff] }
  0x50   : > { %893 = vst [vmem:[#allocation2 + $0x88] sm:$0xf] %v557_v28  ;;  %v313_v37 = vld [vmem:[%s5995_s14 + $0xa8] sm:$0xf]  ;;  %v744_v39 = vrot.slane %v743_v33, 4  ;;  %v5523_v15 = vld [vmem:[%s6809_s1 + $0x50] sm:$0xff]  ;;  %2525 = vmatpush.bf16.msrb.mxu3 %v5515_v14 }
  0x51   : > { %333 = vst [vmem:[#allocation2 + $0x90] sm:$0xf] %v297_v34  ;;  %v314_v40 = vld [vmem:[%s5995_s14 + $0xac] sm:$0xf]  ;;  %v739_v43 = vsel %vm6022_vm2, %v734_v36, %v738_v22  ;;  %v375_v44 = vld [vmem:[%s5995_s14 + $0x48] sm:$0xf]  ;;  %2614 = vmatpush.bf16.msrb.mxu0 %v5523_v15 }
  0x52   : > { %334 = vst [vmem:[#allocation2 + $0x9c] sm:$0xf] %v298_v35  ;;  %v376_v45 = vld [vmem:[%s5995_s14 + $0x4c] sm:$0xf]  ;;  %v749_v47 = vsel %vm6022_vm2, %v744_v39, %v748_v30  ;;  %v377_v48 = vld [vmem:[%s5995_s14 + $0x50] sm:$0x1] }
  0x53   : > { %349 = vst [vmem:[#allocation2 + $0x150] sm:$0xf] %v313_v37  ;;  %v559_v49 = vshrl.u32 %v375_v44, 16  ;;  %v562_v50 = vshll.u32 %v375_v44, 16  ;;  %v568_v52 = vshll.u32 %v376_v45, 16  ;;  %v572_v53 = vshrl.u32 %v376_v45, 16 }
  0x54   : > { %908 = vst [vmem:[#allocation2 + $0x13c] sm:$0xf] %v739_v43  ;;  %v578_v54 = vshll.u32 %v377_v48, 16  ;;  %v399_v60 = vld [vmem:[%s5995_s14 + $0xa8] sm:$0xf]  ;;  %v5531_v19 = vld [vmem:[%s6809_s1 + $0x90] sm:$0xff] }
  0x55   : > { %909 = vst [vmem:[#allocation2 + $0x148] sm:$0xf] %v749_v47  ;;  %v561_v55 = vrot.slane %v559_v49, 4  ;;  %v564_v56 = vrot.slane %v562_v50, 5  ;;  %v570_v57 = vrot.slane %v568_v52, 5  ;;  %v574_v58 = vrot.slane %v572_v53, 4  ;;  %2703 = vmatpush.bf16.msrb.mxu1 %v5531_v19 }
  0x56   : > { %350 = vst [vmem:[#allocation2 + $0x15c] sm:$0xf] %v314_v40  ;;  %v400_v61 = vld [vmem:[%s5995_s14 + $0xac] sm:$0xf]  ;;  %v580_v63 = vrot.slane %v578_v54, 5  ;;  %v751_v1 = vshrl.u32 %v399_v60, 16 }
  0x57   : > { %v565_v59 = vor.u32 %v564_v56, %v561_v55  ;;  %v575_v62 = vor.u32 %v574_v58, %v570_v57  ;;  %v401_v0 = vld [vmem:[%s5995_s14 + $0xb0] sm:$0x1]  ;;  %v754_v2 = vshll.u32 %v399_v60, 16  ;;  %v760_v4 = vshll.u32 %v400_v61, 16  ;;  %v299_v21 = vld [vmem:[%s5995_s14 + $0x54] sm:$0xf] }
  0x58   : > { %v764_v5 = vshrl.u32 %v400_v61, 16  ;;  %v753_v8 = vrot.slane %v751_v1, 4  ;;  %v770_v10 = vshll.u32 %v401_v0, 16  ;;  %v300_v22 = vld [vmem:[%s5995_s14 + $0x58] sm:$0xf]  ;;  %v5530_v15 = vld [vmem:[%s6809_s1 + $0x88] sm:$0xff] }
  0x59   : > { %v566_v3 = vrot.slane %v565_v59, 4  ;;  %v576_v7 = vrot.slane %v575_v62, 4  ;;  %v756_v9 = vrot.slane %v754_v2, 5  ;;  %v762_v12 = vrot.slane %v760_v4, 5  ;;  %v4503_v23 = vld [vmem:[#allocation2 + $0x78] sm:$0xf]  ;;  %2704 = vmatpush.bf16.msrb.mxu1 %v5530_v15 }
  0x5a   : > { %v766_v13 = vrot.slane %v764_v5, 4  ;;  %v772_v18 = vrot.slane %v770_v10, 5  ;;  %v5550_v24 = vld [vmem:[#allocation2 + $0x80] sm:$0xf0]  ;;  %v4599_v25 = vld [vmem:[#allocation2 + $0x138] sm:$0xf] }
  0x5b   : > { %1876 = vmatmul.bf16.gmra.mxu0 %v4492_v41  ;;  %1916 = vmatmul.bf16.gmra.mxu2 %v4588_v42  ;;  %v571_v11 = vsel %vm6022_vm2, %v566_v3, %v570_v57  ;;  %v581_v16 = vsel %vm6022_vm2, %v576_v7, %v580_v63  ;;  %v757_v17 = vor.u32 %v756_v9, %v753_v8  ;;  %v5574_v26 = vld [vmem:[#allocation2 + $0x140] sm:$0xf0]  ;;  %v315_v28 = vld [vmem:[%s5995_s14 + $0xb4] sm:$0xf]  ;;  %v5549_v29 = vld [vmem:[#allocation2 + $0x7c] sm:$0xf] }
  0x5c   : > { %1965 = vmatmul.bf16.gmra.mxu1 %v4496_v46  ;;  %894 = vst [vmem:[#allocation2 + $0x94] sm:$0xf] %v571_v11  ;;  %v767_v20 = vor.u32 %v766_v13, %v762_v12  ;;  %v4505_v30 = vld [vmem:[#allocation2 + $0x84] sm:$0xf0]  ;;  %v5573_v31 = vld [vmem:[#allocation2 + $0x13c] sm:$0xf]  ;;  %v4504_v46 = vor.u32 %v5550_v24, %v4503_v23  ;;  %v4600_v47 = vor.u32 %v5574_v26, %v4599_v25 }
  0x5d   : > { %895 = vst [vmem:[#allocation2 + $0xa0] sm:$0xf] %v581_v16  ;;  %v758_v27 = vrot.slane %v757_v17, 4  ;;  %v4601_v32 = vld [vmem:[#allocation2 + $0x144] sm:$0xf0]  ;;  %v4508_v50 = vor.u32 %v5549_v29, %v4505_v30 }
  0x5e   : > { %2005 = vmatmul.bf16.gmra.mxu3 %v4592_v51  ;;  %335 = vst [vmem:[#allocation2 + $0xa8] sm:$0xf] %v299_v21  ;;  %v768_v33 = vrot.slane %v767_v20, 4  ;;  %v316_v34 = vld [vmem:[%s5995_s14 + $0xb8] sm:$0xf]  ;;  %v4604_v51 = vor.u32 %v5573_v31, %v4601_v32  ;;  %v5602_v8 = vld [vmem:[%s6809_s1 + $0x148] sm:$0xff] }
  0x5f   : > { %336 = vst [vmem:[#allocation2 + $0xb4] sm:$0xf] %v300_v22  ;;  %v763_v35 = vsel %vm6022_vm2, %v758_v27, %v762_v12  ;;  %v378_v36 = vld [vmem:[%s5995_s14 + $0x54] sm:$0xf]  ;;  %v379_v37 = vld [vmem:[%s5995_s14 + $0x58] sm:$0xf]  ;;  %2037 = vmatpush.bf16.msrb.mxu2 %v5602_v8 }
  0x60   : > { %351 = vst [vmem:[#allocation2 + $0x168] sm:$0xf] %v315_v28  ;;  %v773_v39 = vsel %vm6022_vm2, %v768_v33, %v772_v18  ;;  %v380_v40 = vld [vmem:[%s5995_s14 + $0x5c] sm:$0x1]  ;;  %v583_v41 = vshrl.u32 %v378_v36, 16  ;;  %v586_v42 = vshll.u32 %v378_v36, 16 }
  0x61   : > { %910 = vst [vmem:[#allocation2 + $0x154] sm:$0xf] %v763_v35  ;;  %v592_v43 = vshll.u32 %v379_v37, 16  ;;  %v596_v44 = vshrl.u32 %v379_v37, 16  ;;  %v602_v45 = vshll.u32 %v380_v40, 16  ;;  %v5514_v9 = vld [vmem:[%s6809_s1 + $0x8] sm:$0xff] }
  0x62   : > { %911 = vst [vmem:[#allocation2 + $0x160] sm:$0xf] %v773_v39  ;;  %v585_v48 = vrot.slane %v583_v41, 4  ;;  %v588_v49 = vrot.slane %v586_v42, 5  ;;  %v402_v55 = vld [vmem:[%s5995_s14 + $0xb4] sm:$0xf]  ;;  %2526 = vmatpush.bf16.msrb.mxu3 %v5514_v9 }
  0x63   : > { %352 = vst [vmem:[#allocation2 + $0x174] sm:$0xf] %v316_v34  ;;  %v594_v52 = vrot.slane %v592_v43, 5  ;;  %v598_v53 = vrot.slane %v596_v44, 4  ;;  %v403_v56 = vld [vmem:[%s5995_s14 + $0xb8] sm:$0xf] }
  0x64   : > { %v589_v54 = vor.u32 %v588_v49, %v585_v48  ;;  %v604_v58 = vrot.slane %v602_v45, 5  ;;  %v404_v59 = vld [vmem:[%s5995_s14 + $0xbc] sm:$0x1]  ;;  %v775_v60 = vshrl.u32 %v402_v55, 16  ;;  %v778_v61 = vshll.u32 %v402_v55, 16  ;;  %v5522_v12 = vld [vmem:[%s6809_s1 + $0x48] sm:$0xff] }
  0x65   : > { %v599_v57 = vor.u32 %v598_v53, %v594_v52  ;;  %v784_v63 = vshll.u32 %v403_v56, 16  ;;  %v788_v0 = vshrl.u32 %v403_v56, 16  ;;  %v794_v4 = vshll.u32 %v404_v59, 16  ;;  %v301_v16 = vld [vmem:[%s5995_s14 + $0x60] sm:$0xf]  ;;  %2615 = vmatpush.bf16.msrb.mxu0 %v5522_v12 }
  0x66   : > { %v590_v62 = vrot.slane %v589_v54, 4  ;;  %v777_v2 = vrot.slane %v775_v60, 4  ;;  %v780_v3 = vrot.slane %v778_v61, 5  ;;  %v302_v18 = vld [vmem:[%s5995_s14 + $0x64] sm:$0xf] }
  0x67   : > { %v600_v1 = vrot.slane %v599_v57, 4  ;;  %v786_v6 = vrot.slane %v784_v63, 5  ;;  %v790_v7 = vrot.slane %v788_v0, 4  ;;  %v796_v14 = vrot.slane %v794_v4, 5  ;;  %337 = vst [vmem:[#allocation2 + $0xc0] sm:$0xf] %v301_v16 }
  0x68   : > { %v595_v5 = vsel %vm6022_vm2, %v590_v62, %v594_v52  ;;  %v781_v11 = vor.u32 %v780_v3, %v777_v2  ;;  %338 = vst [vmem:[#allocation2 + $0xcc] sm:$0xf] %v302_v18  ;;  %v317_v20 = vld [vmem:[%s5995_s14 + $0xc0] sm:$0xf]  ;;  %v4515_v21 = vld [vmem:[#allocation2 + $0x90] sm:$0xf] }
  0x69   : > { %v605_v10 = vsel %vm6022_vm2, %v600_v1, %v604_v58  ;;  %896 = vst [vmem:[#allocation2 + $0xac] sm:$0xf] %v595_v5  ;;  %v791_v13 = vor.u32 %v790_v7, %v786_v6  ;;  %v5553_v22 = vld [vmem:[#allocation2 + $0x98] sm:$0xf0]  ;;  %v4611_v23 = vld [vmem:[#allocation2 + $0x150] sm:$0xf] }
  0x6a   : > { %897 = vst [vmem:[#allocation2 + $0xb8] sm:$0xf] %v605_v10  ;;  %v782_v17 = vrot.slane %v781_v11, 4  ;;  %v5577_v24 = vld [vmem:[#allocation2 + $0x158] sm:$0xf0]  ;;  %v4516_v45 = vor.u32 %v5553_v22, %v4515_v21  ;;  %v5601_v4 = vld [vmem:[%s6809_s1 + $0x140] sm:$0xff] }
  0x6b   : > { %1881 = vmatmul.bf16.gmra.mxu0 %v4504_v46  ;;  %1921 = vmatmul.bf16.gmra.mxu2 %v4600_v47  ;;  %v792_v19 = vrot.slane %v791_v13, 4  ;;  %v5552_v25 = vld [vmem:[#allocation2 + $0x94] sm:$0xf]  ;;  %v4517_v26 = vld [vmem:[#allocation2 + $0x9c] sm:$0xf0]  ;;  %v4612_v46 = vor.u32 %v5577_v24, %v4611_v23 }
  0x6c   : > { %1970 = vmatmul.bf16.gmra.mxu1 %v4508_v50  ;;  %v787_v27 = vsel %vm6022_vm2, %v782_v17, %v786_v6  ;;  %v318_v28 = vld [vmem:[%s5995_s14 + $0xc4] sm:$0xf]  ;;  %353 = vst [vmem:[#allocation2 + $0x180] sm:$0xf] %v317_v20  ;;  %v381_v29 = vld [vmem:[%s5995_s14 + $0x60] sm:$0xf]  ;;  %v4520_v47 = vor.u32 %v5552_v25, %v4517_v26  ;;  %2038 = vmatpush.bf16.msrb.mxu2 %v5601_v4 }
  0x6d   : > { %v5576_v30 = vld [vmem:[#allocation2 + $0x154] sm:$0xf]  ;;  %v797_v31 = vsel %vm6022_vm2, %v792_v19, %v796_v14  ;;  %912 = vst [vmem:[#allocation2 + $0x16c] sm:$0xf] %v787_v27  ;;  %v382_v32 = vld [vmem:[%s5995_s14 + $0x64] sm:$0xf] }
  0x6e   : > { %2010 = vmatmul.bf16.gmra.mxu3 %v4604_v51  ;;  %v383_v33 = vld [vmem:[%s5995_s14 + $0x68] sm:$0x1]  ;;  %913 = vst [vmem:[#allocation2 + $0x178] sm:$0xf] %v797_v31  ;;  %v607_v34 = vshrl.u32 %v381_v29, 16  ;;  %v610_v35 = vshll.u32 %v381_v29, 16 }
  0x6f   : > { %v616_v36 = vshll.u32 %v382_v32, 16  ;;  %v620_v37 = vshrl.u32 %v382_v32, 16  ;;  %v4613_v39 = vld [vmem:[#allocation2 + $0x15c] sm:$0xf0]  ;;  %354 = vst [vmem:[#allocation2 + $0x18c] sm:$0xf] %v318_v28 }
  0x70   : > { %v626_v40 = vshll.u32 %v383_v33, 16  ;;  %v609_v41 = vrot.slane %v607_v34, 4  ;;  %v612_v42 = vrot.slane %v610_v35, 5  ;;  %v405_v48 = vld [vmem:[%s5995_s14 + $0xc0] sm:$0xf]  ;;  %v4616_v49 = vor.u32 %v5576_v30, %v4613_v39  ;;  %v5664_v4 = vld [vmem:[%s6809_s1 + $0x1b8] sm:$0xff] }
  0x71   : > { %v618_v43 = vrot.slane %v616_v36, 5  ;;  %v622_v44 = vrot.slane %v620_v37, 4  ;;  %v406_v53 = vld [vmem:[%s5995_s14 + $0xc4] sm:$0xf]  ;;  %v407_v54 = vld [vmem:[%s5995_s14 + $0xc8] sm:$0x1]  ;;  %3301 = vmatpush.bf16.msra.mxu2 %v5664_v4 }
  0x72   : > { %v613_v50 = vor.u32 %v612_v42, %v609_v41  ;;  %v628_v52 = vrot.slane %v626_v40, 5  ;;  %v799_v55 = vshrl.u32 %v405_v48, 16  ;;  %v802_v56 = vshll.u32 %v405_v48, 16  ;;  %v5513_v5 = vld [vmem:[%s6809_s1] sm:$0xff]  ;;  %v921_v11 = vld [vmem:[%s5995_s14 + $0xc] sm:$0xe] }
  0x73   : > { %v623_v51 = vor.u32 %v622_v44, %v618_v43  ;;  %v808_v57 = vshll.u32 %v406_v53, 16  ;;  %v812_v60 = vshrl.u32 %v406_v53, 16  ;;  %v818_v61 = vshll.u32 %v407_v54, 16  ;;  %v5521_v8 = vld [vmem:[%s6809_s1 + $0x40] sm:$0xff]  ;;  %2527 = vmatpush.bf16.msrb.mxu3 %v5513_v5  ;;  %v922_v12 = vld [vmem:[%s5995_s14 + $0x10] sm:$0xf] }
  0x74   : > { %v614_v58 = vrot.slane %v613_v50, 4  ;;  %v801_v62 = vrot.slane %v799_v55, 4  ;;  %v804_v63 = vrot.slane %v802_v56, 5  ;;  %v5529_v9 = vld [vmem:[%s6809_s1 + $0x80] sm:$0xff]  ;;  %2616 = vmatpush.bf16.msrb.mxu0 %v5521_v8  ;;  %v923_v14 = vld [vmem:[%s5995_s14 + $0x14] sm:$0x1] }
  0x75   : > { %v624_v59 = vrot.slane %v623_v51, 4  ;;  %v810_v0 = vrot.slane %v808_v57, 5  ;;  %v814_v3 = vrot.slane %v812_v60, 4  ;;  %v820_v7 = vrot.slane %v818_v61, 5  ;;  %2705 = vmatpush.bf16.msrb.mxu1 %v5529_v9  ;;  %v357_v20 = vld [vmem:[%s5995_s14] sm:$0xf] }
  0x76   : > { %v619_v1 = vsel %vm6022_vm2, %v614_v58, %v618_v43  ;;  %v805_v6 = vor.u32 %v804_v63, %v801_v62  ;;  %v4388_v15 = vrot.slane %v921_v11, 9  ;;  %v1038_v18 = vrot.slane %v922_v12, 5  ;;  %v4527_v21 = vld [vmem:[#allocation2 + $0xa8] sm:$0xf]  ;;  %v5556_v22 = vld [vmem:[#allocation2 + $0xb0] sm:$0xf0] }
  0x77   : > { %v629_v2 = vsel %vm6022_vm2, %v624_v59, %v628_v52  ;;  %898 = vst [vmem:[#allocation2 + $0xc4] sm:$0xf] %v619_v1  ;;  %v815_v10 = vor.u32 %v814_v3, %v810_v0  ;;  %v1041_v19 = vrot.slane %v923_v14, 5  ;;  %v285_v24 = vld [vmem:[%s5995_s14] sm:$0xf]  ;;  %v415_v36 = vshrl.u32 %v357_v20, 16 }
  0x78   : > { %899 = vst [vmem:[#allocation2 + $0xd0] sm:$0xf] %v629_v2  ;;  %v806_v13 = vrot.slane %v805_v6, 4  ;;  %v358_v25 = vld [vmem:[%s5995_s14 + $0x4] sm:$0xf]  ;;  %v1039_v33 = vsel %vm6278_vm5, %v4388_v15, %v1038_v18  ;;  %v1040_v34 = vrot.slane %v1038_v18, 4 }
  0x79   : > { %v816_v16 = vrot.slane %v815_v10, 4  ;;  %v4623_v26 = vld [vmem:[#allocation2 + $0x168] sm:$0xf]  ;;  %v5580_v27 = vld [vmem:[#allocation2 + $0x170] sm:$0xf0]  ;;  %v418_v37 = vshll.u32 %v357_v20, 16 }
  0x7a   : > { %v811_v23 = vsel %vm6022_vm2, %v806_v13, %v810_v0  ;;  %v5555_v28 = vld [vmem:[#allocation2 + $0xac] sm:$0xf]  ;;  %v4529_v29 = vld [vmem:[#allocation2 + $0xb4] sm:$0xf0]  ;;  %v359_v35 = vld [vmem:[%s5995_s14 + $0x8] sm:$0x1]  ;;  %v1042_v42 = vsel %vm6278_vm5, %v1040_v34, %v1041_v19  ;;  %v4624_v51 = vor.u32 %v5580_v27, %v4623_v26 }
  0x7b   : > { %1886 = vmatmul.bf16.gmra.mxu0 %v4516_v45  ;;  %1926 = vmatmul.bf16.gmra.mxu2 %v4612_v46  ;;  %v5579_v30 = vld [vmem:[#allocation2 + $0x16c] sm:$0xf]  ;;  %v4625_v31 = vld [vmem:[#allocation2 + $0x174] sm:$0xf0]  ;;  %v821_v32 = vsel %vm6022_vm2, %v816_v16, %v820_v7  ;;  %914 = vst [vmem:[#allocation2 + $0x184] sm:$0xf] %v811_v23  ;;  %v4532_v52 = vor.u32 %v5555_v28, %v4529_v29 }
  0x7c   : > { %1975 = vmatmul.bf16.gmra.mxu1 %v4520_v47  ;;  %915 = vst [vmem:[#allocation2 + $0x190] sm:$0xf] %v821_v32  ;;  %v424_v39 = vshll.u32 %v358_v25, 16  ;;  %v428_v40 = vshrl.u32 %v358_v25, 16  ;;  %v434_v41 = vshll.u32 %v359_v35, 16  ;;  %v417_v44 = vrot.slane %v415_v36, 4 }
  0x7d   : > { %1193 = vst [vmem:[#allocation2 + $0x20] sm:$0xf] %v1039_v33  ;;  %v286_v43 = vld [vmem:[%s5995_s14 + $0x4] sm:$0xf]  ;;  %v420_v45 = vrot.slane %v418_v37, 5  ;;  %v4528_v47 = vor.u32 %v5556_v22, %v4527_v21  ;;  %v4628_v53 = vor.u32 %v5579_v30, %v4625_v31  ;;  %v5672_v5 = vld [vmem:[%s6809_s1 + $0x1f8] sm:$0xff] }
  0x7e   : > { %2015 = vmatmul.bf16.gmra.mxu3 %v4616_v49  ;;  %1194 = vst [vmem:[#allocation2 + $0x2c] sm:$0xf] %v1042_v42  ;;  %v426_v46 = vrot.slane %v424_v39, 5  ;;  %v430_v48 = vrot.slane %v428_v40, 4  ;;  %v436_v49 = vrot.slane %v434_v41, 5  ;;  %v5680_v14 = vld [vmem:[%s6809_s1 + $0x238] sm:$0xff] }
  0x7f   : > { %321 = vst [vmem:[#allocation2] sm:$0xf] %v285_v24  ;;  %v918_v50 = vld [vmem:[%s5995_s14] sm:$0xe]  ;;  %v421_v54 = vor.u32 %v420_v45, %v417_v44  ;;  %v919_v55 = vld [vmem:[%s5995_s14 + $0x4] sm:$0xf]  ;;  %3390 = vmatpush.bf16.msra.mxu3 %v5672_v5  ;;  %3479 = vmatpush.bf16.msra.mxu0 %v5680_v14 }
  0x80   : > { %322 = vst [vmem:[#allocation2 + $0xc] sm:$0xf] %v286_v43  ;;  %v920_v56 = vld [vmem:[%s5995_s14 + $0x8] sm:$0x1]  ;;  %v431_v57 = vor.u32 %v430_v48, %v426_v46  ;;  %v4387_v58 = vrot.slane %v918_v50, 9  ;;  %v1031_v59 = vrot.slane %v919_v55, 5 }
  0x81   : > { %v1034_v60 = vrot.slane %v920_v56, 5  ;;  %v422_v61 = vrot.slane %v421_v54, 4  ;;  %v925_v6 = vld [vmem:[%s5995_s14 + $0x1c] sm:$0xf]  ;;  %v924_v7 = vld [vmem:[%s5995_s14 + $0x18] sm:$0xe] }
  0x82   : > { %v432_v62 = vrot.slane %v431_v57, 4  ;;  %v1032_v63 = vsel %vm6278_vm5, %v4387_v58, %v1031_v59  ;;  %v1033_v0 = vrot.slane %v1031_v59, 4  ;;  %v926_v8 = vld [vmem:[%s5995_s14 + $0x20] sm:$0x1]  ;;  %v4389_v9 = vrot.slane %v924_v7, 9  ;;  %v5704_v29 = vld [vmem:[%s6810_s2 + $0x38] sm:$0xff] }
  0x83   : > { %v427_v1 = vsel %vm6022_vm2, %v422_v61, %v426_v46  ;;  %1191 = vst [vmem:[#allocation2 + $0x8] sm:$0xf] %v1032_v63  ;;  %v1045_v10 = vrot.slane %v925_v6, 5  ;;  %v1048_v11 = vrot.slane %v926_v8, 5  ;;  %v4539_v15 = vld [vmem:[#allocation2 + $0xc0] sm:$0xf]  ;;  %3964 = vmatpush.bf16.msra.mxu1 %v5704_v29 }
  0x84   : > { %v437_v2 = vsel %vm6022_vm2, %v432_v62, %v436_v49  ;;  %882 = vst [vmem:[#allocation2 + $0x4] sm:$0xf] %v427_v1  ;;  %v1035_v3 = vsel %vm6278_vm5, %v1033_v0, %v1034_v60  ;;  %v5559_v16 = vld [vmem:[#allocation2 + $0xc8] sm:$0xf0]  ;;  %v4635_v18 = vld [vmem:[#allocation2 + $0x180] sm:$0xf] }
  0x85   : > { %883 = vst [vmem:[#allocation2 + $0x10] sm:$0xf] %v437_v2  ;;  %v1046_v12 = vsel %vm6278_vm5, %v4389_v9, %v1045_v10  ;;  %v1047_v13 = vrot.slane %v1045_v10, 4  ;;  %v5583_v20 = vld [vmem:[#allocation2 + $0x188] sm:$0xf0]  ;;  %v4540_v25 = vor.u32 %v5559_v16, %v4539_v15  ;;  %v5663_v55 = vld [vmem:[%s6809_s1 + $0x1b0] sm:$0xff] }
  0x86   : > { %1192 = vst [vmem:[#allocation2 + $0x14] sm:$0xf] %v1035_v3  ;;  %v5558_v21 = vld [vmem:[#allocation2 + $0xc4] sm:$0xf]  ;;  %v4541_v22 = vld [vmem:[#allocation2 + $0xcc] sm:$0xf0]  ;;  %v4636_v26 = vor.u32 %v5583_v20, %v4635_v18  ;;  %3302 = vmatpush.bf16.msra.mxu2 %v5663_v55 }
  0x87   : > { %1195 = vst [vmem:[#allocation2 + $0x38] sm:$0xf] %v1046_v12  ;;  %v1049_v19 = vsel %vm6278_vm5, %v1047_v13, %v1048_v11  ;;  %v5582_v23 = vld [vmem:[#allocation2 + $0x184] sm:$0xf]  ;;  %v4637_v24 = vld [vmem:[#allocation2 + $0x18c] sm:$0xf0]  ;;  %v4544_v27 = vor.u32 %v5558_v21, %v4541_v22 }
  0x88   : > { %1196 = vst [vmem:[#allocation2 + $0x44] sm:$0xf] %v1049_v19  ;;  %v4640_v28 = vor.u32 %v5582_v23, %v4637_v24  ;;  %v928_v30 = vld [vmem:[%s5995_s14 + $0x28] sm:$0xf]  ;;  %v927_v32 = vld [vmem:[%s5995_s14 + $0x24] sm:$0xe] }
  0x89   : > { %v1052_v31 = vrot.slane %v928_v30, 5  ;;  %v929_v33 = vld [vmem:[%s5995_s14 + $0x2c] sm:$0x1]  ;;  %v4390_v34 = vrot.slane %v927_v32, 9  ;;  %v4463_v40 = vld [vmem:[#allocation2 + $0x20] sm:$0xf] }
  0x8a   : > { %v1055_v36 = vrot.slane %v929_v33, 5  ;;  %v5539_v41 = vld [vmem:[#allocation2 + $0x28] sm:$0xf0]  ;;  %v4743_v42 = vld [vmem:[#allocation2] sm:$0xf]  ;;  %v5671_v56 = vld [vmem:[%s6809_s1 + $0x1f0] sm:$0xff] }
  0x8b   : > { %1891 = vmatmul.bf16.gmra.mxu0 %v4528_v47  ;;  %1931 = vmatmul.bf16.gmra.mxu2 %v4624_v51  ;;  %v1054_v35 = vrot.slane %v1052_v31, 4  ;;  %v1053_v37 = vsel %vm6278_vm5, %v4390_v34, %v1052_v31  ;;  %v5465_v43 = vld [vmem:[#allocation2 + $0x4] sm:$0xf]  ;;  %v5466_v45 = vld [vmem:[#allocation2 + $0x8] sm:$0xf0]  ;;  %v4464_v48 = vor.u32 %v5539_v41, %v4463_v40  ;;  %v5679_v8 = vld [vmem:[%s6809_s1 + $0x230] sm:$0xff] }
  0x8c   : > { %1980 = vmatmul.bf16.gmra.mxu1 %v4532_v52  ;;  %1197 = vst [vmem:[#allocation2 + $0x50] sm:$0xf] %v1053_v37  ;;  %v4745_v44 = vld [vmem:[#allocation2 + $0xc] sm:$0xf0]  ;;  %v4751_v46 = vld [vmem:[#allocation2 + $0x8] sm:$0xf]  ;;  %v4744_v51 = vor.u32 %v5466_v45, %v4743_v42  ;;  %3391 = vmatpush.bf16.msra.mxu3 %v5671_v56 }
  0x8d   : > { %v1056_v39 = vsel %vm6278_vm5, %v1054_v35, %v1055_v36  ;;  %v5467_v47 = vld [vmem:[#allocation2 + $0x10] sm:$0xf0]  ;;  %v4748_v49 = vor.u32 %v5465_v43, %v4745_v44  ;;  %v930_v60 = vld [vmem:[%s5995_s14 + $0x30] sm:$0xe]  ;;  %v932_v61 = vld [vmem:[%s5995_s14 + $0x38] sm:$0x1]  ;;  %3480 = vmatpush.bf16.msra.mxu0 %v5679_v8 }
  0x8e   : > { %2020 = vmatmul.bf16.gmra.mxu3 %v4628_v53  ;;  %1198 = vst [vmem:[#allocation2 + $0x5c] sm:$0xf] %v1056_v39  ;;  %v4752_v52 = vor.u32 %v5467_v47, %v4751_v46  ;;  %v931_v57 = vld [vmem:[%s5995_s14 + $0x34] sm:$0xf]  ;;  %v4391_v63 = vrot.slane %v930_v60, 9  ;;  %v1062_v1 = vrot.slane %v932_v61, 5 }
  0x8f   : > { %v1059_v58 = vrot.slane %v931_v57, 5  ;;  %v4475_v9 = vld [vmem:[#allocation2 + $0x38] sm:$0xf]  ;;  %v5542_v11 = vld [vmem:[#allocation2 + $0x40] sm:$0xf0] }
  0x90   : > { %v4755_v10 = vld [vmem:[#allocation2 + $0x18] sm:$0xf]  ;;  %v5468_v12 = vld [vmem:[#allocation2 + $0x1c] sm:$0xf]  ;;  %v4757_v13 = vld [vmem:[#allocation2 + $0x24] sm:$0xf0]  ;;  %v4476_v20 = vor.u32 %v5542_v11, %v4475_v9 }
  0x91   : > { %v1061_v0 = vrot.slane %v1059_v58, 4  ;;  %v1060_v5 = vsel %vm6278_vm5, %v4391_v63, %v1059_v58  ;;  %v5469_v14 = vld [vmem:[#allocation2 + $0x20] sm:$0xf0]  ;;  %v4763_v15 = vld [vmem:[#allocation2 + $0x20] sm:$0xf]  ;;  %v4760_v21 = vor.u32 %v5468_v12, %v4757_v13 }
  0x92   : > { %1199 = vst [vmem:[#allocation2 + $0x68] sm:$0xf] %v1060_v5  ;;  %v5470_v16 = vld [vmem:[#allocation2 + $0x28] sm:$0xf0]  ;;  %v4756_v24 = vor.u32 %v5469_v14, %v4755_v10  ;;  %v934_v29 = vld [vmem:[%s5995_s14 + $0x40] sm:$0xf] }
  0x93   : > { %v1063_v6 = vsel %vm6278_vm5, %v1061_v0, %v1062_v1  ;;  %v1066_v30 = vrot.slane %v934_v29, 5  ;;  %v933_v32 = vld [vmem:[%s5995_s14 + $0x3c] sm:$0xe]  ;;  %v935_v33 = vld [vmem:[%s5995_s14 + $0x44] sm:$0x1]  ;;  %v5662_v0 = vld [vmem:[%s6809_s1 + $0x1a8] sm:$0xff] }
  0x94   : > { %1200 = vst [vmem:[#allocation2 + $0x74] sm:$0xf] %v1063_v6  ;;  %v4392_v35 = vrot.slane %v933_v32, 9  ;;  %v1069_v37 = vrot.slane %v935_v33, 5  ;;  %v4487_v45 = vld [vmem:[#allocation2 + $0x50] sm:$0xf]  ;;  %3303 = vmatpush.bf16.msra.mxu2 %v5662_v0 }
  0x95   : > { %v1068_v36 = vrot.slane %v1066_v30, 4  ;;  %v4767_v46 = vld [vmem:[#allocation2 + $0x30] sm:$0xf]  ;;  %v5545_v47 = vld [vmem:[#allocation2 + $0x58] sm:$0xf0]  ;;  %v5670_v1 = vld [vmem:[%s6809_s1 + $0x1e8] sm:$0xff] }
  0x96   : > { %v1067_v42 = vsel %vm6278_vm5, %v4392_v35, %v1066_v30  ;;  %v4488_v56 = vor.u32 %v5545_v47, %v4487_v45  ;;  %3392 = vmatpush.bf16.msra.mxu3 %v5670_v1  ;;  %v936_v6 = vld [vmem:[%s5995_s14 + $0x48] sm:$0xe]  ;;  %v938_v8 = vld [vmem:[%s5995_s14 + $0x50] sm:$0x1]  ;;  %v5476_v30 = vld [vmem:[#allocation2 + $0x58] sm:$0xf0] }
  0x97   : > { %v1070_v43 = vsel %vm6278_vm5, %v1068_v36, %v1069_v37  ;;  %1201 = vst [vmem:[#allocation2 + $0x80] sm:$0xf] %v1067_v42  ;;  %v4393_v10 = vrot.slane %v936_v6, 9  ;;  %v1076_v12 = vrot.slane %v938_v8, 5  ;;  %v4787_v29 = vld [vmem:[#allocation2 + $0x50] sm:$0xf] }
  0x98   : > { %1202 = vst [vmem:[#allocation2 + $0x8c] sm:$0xf] %v1070_v43  ;;  %v940_v45 = vld [vmem:[%s5995_s14 + $0x58] sm:$0xf]  ;;  %v4791_v0 = vld [vmem:[#allocation2 + $0x60] sm:$0xf] }
  0x99   : > { %v4799_v6 = vld [vmem:[#allocation2 + $0x68] sm:$0xf] }
  0x9b   : > { %1896 = vmatmul.bf16.gmra.mxu0 %v4540_v25  ;;  %1936 = vmatmul.bf16.gmra.mxu2 %v4636_v26  ;;  %v4764_v25 = vor.u32 %v5470_v16, %v4763_v15  ;;  %v5703_v26 = vld [vmem:[%s6810_s2 + $0x30] sm:$0xff] }
  0x9c   : > { %1985 = vmatmul.bf16.gmra.mxu1 %v4544_v27  ;;  %v5479_v8 = vld [vmem:[#allocation2 + $0x70] sm:$0xf0] }
  0x9d   : > { %3965 = vmatpush.bf16.msra.mxu1 %v5703_v26  ;;  %v4781_v26 = vld [vmem:[#allocation2 + $0x54] sm:$0xf0] }
  0x9e   : > { %2025 = vmatmul.bf16.gmra.mxu3 %v4640_v28 }
  0x9f   : > { %v5551_v1 = vld [vmem:[#allocation2 + $0x88] sm:$0xf0] }
  0xa8   : > { %v1862_v50 = vpop.f32.mrf.mxu0 }
  0xa9   : > { %v1951_v53 = vpop.f32.mrf.mxu1 }
  0xaa   : > { %v6332_v54 = vadd.f32 %v1951_v53, %v1862_v50  ;;  %v5472_v50 = vld [vmem:[#allocation2 + $0x38] sm:$0xf0] }
  0xab   : > { %2039 = vmatmul.bf16.vlgmr.msrb.gmra.mxu2 %v4464_v48  ;;  %2617 = vmatmul.bf16.vlgmr.msrb.gmra.mxu0 %v4748_v49  ;;  %v5471_v48 = vld [vmem:[#allocation2 + $0x34] sm:$0xf]  ;;  %v4769_v49 = vld [vmem:[#allocation2 + $0x3c] sm:$0xf0]  ;;  %v4768_v60 = vor.u32 %v5472_v50, %v4767_v46  ;;  %v1080_v46 = vrot.slane %v940_v45, 5 }
  0xac   : > { %2706 = vmatmul.bf16.vlgmr.msrb.gmra.mxu1 %v4752_v52  ;;  %v5473_v52 = vld [vmem:[#allocation2 + $0x40] sm:$0xf0]  ;;  %v4772_v57 = vor.u32 %v5471_v48, %v4769_v49  ;;  %v939_v48 = vld [vmem:[%s5995_s14 + $0x54] sm:$0xe]  ;;  %v941_v49 = vld [vmem:[%s5995_s14 + $0x5c] sm:$0x1] }
  0xae   : > { %2528 = vmatmul.bf16.vlgmr.msrb.gmra.mxu3 %v4744_v51  ;;  %v1902_v59 = vpop.f32.mrf.mxu2  ;;  %v4775_v51 = vld [vmem:[#allocation2 + $0x38] sm:$0xf] }
  0xaf   : > { %v4776_v61 = vor.u32 %v5473_v52, %v4775_v51  ;;  %v4394_v51 = vrot.slane %v939_v48, 9  ;;  %v1082_v52 = vrot.slane %v1080_v46, 4  ;;  %v4803_v48 = vld [vmem:[#allocation2 + $0x78] sm:$0xf] }
  0xb0   : > { %v1864_v3 = vpop.f32.mrf.mxu0 }
  0xb1   : > { %v1991_v62 = vpop.f32.mrf.mxu3  ;;  %v1953_v4 = vpop.f32.mrf.mxu1 }
  0xb2   : > { %v6343_v2 = vadd.f32 %v1991_v62, %v1902_v59  ;;  %v6349_v7 = vadd.f32 %v1953_v4, %v1864_v3  ;;  %v937_v3 = vld [vmem:[%s5995_s14 + $0x4c] sm:$0xf] }
  0xb3   : > { %v1073_v4 = vrot.slane %v937_v3, 5  ;;  %v5477_v3 = vld [vmem:[#allocation2 + $0x64] sm:$0xf] }
  0xb5   : > { %v1075_v11 = vrot.slane %v1073_v4, 4  ;;  %v1074_v16 = vsel %vm6278_vm5, %v4393_v10, %v1073_v4  ;;  %v4793_v4 = vld [vmem:[#allocation2 + $0x6c] sm:$0xf0] }
  0xb6   : > { %v1904_v18 = vpop.f32.mrf.mxu2  ;;  %1203 = vst [vmem:[#allocation2 + $0x98] sm:$0xf] %v1074_v16 }
  0xb8   : > { %v1867_v23 = vpop.f32.mrf.mxu0 }
  0xb9   : > { %v1993_v19 = vpop.f32.mrf.mxu3  ;;  %v1956_v27 = vpop.f32.mrf.mxu1 }
  0xba   : > { %v6354_v22 = vadd.f32 %v1993_v19, %v1904_v18  ;;  %v6359_v28 = vadd.f32 %v1956_v27, %v1867_v23  ;;  %v1077_v18 = vsel %vm6278_vm5, %v1075_v11, %v1076_v12  ;;  %v4779_v23 = vld [vmem:[#allocation2 + $0x48] sm:$0xf]  ;;  %v5475_v27 = vld [vmem:[#allocation2 + $0x50] sm:$0xf0]  ;;  %v4796_v12 = vor.u32 %v5477_v3, %v4793_v4 }
  0xbb   : > { %2044 = vmatmul.bf16.gmra.mxu2 %v4476_v20  ;;  %2622 = vmatmul.bf16.gmra.mxu0 %v4760_v21  ;;  %v5678_v20 = vld [vmem:[%s6809_s1 + $0x228] sm:$0xff]  ;;  %1204 = vst [vmem:[#allocation2 + $0xa4] sm:$0xf] %v1077_v18  ;;  %v4780_v37 = vor.u32 %v5475_v27, %v4779_v23  ;;  %v4800_v18 = vor.u32 %v5479_v8, %v4799_v6  ;;  %v5661_v23 = vld [vmem:[%s6809_s1 + $0x1a0] sm:$0xff] }
  0xbc   : > { %2711 = vmatmul.bf16.gmra.mxu1 %v4764_v25  ;;  %v4499_v21 = vld [vmem:[#allocation2 + $0x68] sm:$0xf]  ;;  %v5474_v25 = vld [vmem:[#allocation2 + $0x4c] sm:$0xf]  ;;  %3481 = vmatpush.bf16.msra.mxu0 %v5678_v20 }
  0xbd   : > { %3304 = vmatpush.bf16.msra.mxu2 %v5661_v23 }
  0xbe   : > { %2533 = vmatmul.bf16.gmra.mxu3 %v4756_v24  ;;  %v1907_v31 = vpop.f32.mrf.mxu2  ;;  %v5548_v24 = vld [vmem:[#allocation2 + $0x70] sm:$0xf0] }
  0xbf   : > { %v4500_v33 = vor.u32 %v5548_v24, %v4499_v21  ;;  %v5669_v24 = vld [vmem:[%s6809_s1 + $0x1e0] sm:$0xff] }
  0xc0   : > { %v1869_v40 = vpop.f32.mrf.mxu0  ;;  %3393 = vmatpush.bf16.msra.mxu3 %v5669_v24 }
  0xc1   : > { %v1996_v34 = vpop.f32.mrf.mxu3  ;;  %v1958_v41 = vpop.f32.mrf.mxu1 }
  0xc2   : > { %v6364_v39 = vadd.f32 %v1996_v34, %v1907_v31  ;;  %v6370_v44 = vadd.f32 %v1958_v41, %v1869_v40  ;;  %v4784_v34 = vor.u32 %v5474_v25, %v4781_v26  ;;  %v4788_v40 = vor.u32 %v5476_v30, %v4787_v29  ;;  %v5702_v41 = vld [vmem:[%s6810_s2 + $0x28] sm:$0xff]  ;;  %v943_v25 = vld [vmem:[%s5995_s14 + $0x64] sm:$0xf]  ;;  %v942_v29 = vld [vmem:[%s5995_s14 + $0x60] sm:$0xe] }
  0xc3   : > { %3966 = vmatpush.bf16.msra.mxu1 %v5702_v41  ;;  %v1087_v26 = vrot.slane %v943_v25, 5  ;;  %v944_v30 = vld [vmem:[%s5995_s14 + $0x68] sm:$0x1] }
  0xc6   : > { %v1909_v53 = vpop.f32.mrf.mxu2 }
  0xc8   : > { %v1872_v59 = vpop.f32.mrf.mxu0 }
  0xc9   : > { %v1998_v55 = vpop.f32.mrf.mxu3  ;;  %v1961_v62 = vpop.f32.mrf.mxu1 }
  0xca   : > { %v6372_v58 = vadd.f32 %v1998_v55, %v1909_v53  ;;  %v6374_v63 = vadd.f32 %v1961_v62, %v1872_v59  ;;  %v1083_v53 = vrot.slane %v941_v49, 5  ;;  %v1081_v59 = vsel %vm6278_vm5, %v4394_v51, %v1080_v46  ;;  %v4511_v62 = vld [vmem:[#allocation2 + $0x80] sm:$0xf]  ;;  %v5554_v49 = vld [vmem:[#allocation2 + $0xa0] sm:$0xf0] }
  0xcb   : > { %2049 = vmatmul.bf16.gmra.mxu2 %v4488_v56  ;;  %2627 = vmatmul.bf16.gmra.mxu0 %v4772_v57  ;;  %1205 = vst [vmem:[#allocation2 + $0xb0] sm:$0xf] %v1081_v59  ;;  %v4512_v11 = vor.u32 %v5551_v1, %v4511_v62  ;;  %v5677_v46 = vld [vmem:[%s6809_s1 + $0x220] sm:$0xff]  ;;  %v4805_v51 = vld [vmem:[#allocation2 + $0x84] sm:$0xf0] }
  0xcc   : > { %2716 = vmatmul.bf16.gmra.mxu1 %v4776_v61  ;;  %3482 = vmatpush.bf16.msra.mxu0 %v5677_v46 }
  0xce   : > { %2538 = vmatmul.bf16.gmra.mxu3 %v4768_v60  ;;  %v1912_v5 = vpop.f32.mrf.mxu2  ;;  %v1084_v60 = vsel %vm6278_vm5, %v1082_v52, %v1083_v53  ;;  %v5481_v52 = vld [vmem:[#allocation2 + $0x80] sm:$0xf0]  ;;  %v4811_v53 = vld [vmem:[#allocation2 + $0x80] sm:$0xf] }
  0xcf   : > { %1206 = vst [vmem:[#allocation2 + $0xbc] sm:$0xf] %v1084_v60  ;;  %v4804_v3 = vor.u32 %v5481_v52, %v4803_v48 }
  0xd0   : > { %v1874_v14 = vpop.f32.mrf.mxu0 }
  0xd1   : > { %v2001_v9 = vpop.f32.mrf.mxu3  ;;  %v1963_v15 = vpop.f32.mrf.mxu1 }
  0xd2   : > { %v6385_v13 = vadd.f32 %v2001_v9, %v1912_v5  ;;  %v6391_v19 = vadd.f32 %v1963_v15, %v1874_v14  ;;  %v5478_v5 = vld [vmem:[#allocation2 + $0x68] sm:$0xf0] }
  0xd3   : > { %v4792_v16 = vor.u32 %v5478_v5, %v4791_v0  ;;  %v5701_v5 = vld [vmem:[%s6810_s2 + $0x20] sm:$0xff] }
  0xd4   : > { %3967 = vmatpush.bf16.msra.mxu1 %v5701_v5  ;;  %v950_v5 = vld [vmem:[%s5995_s14 + $0x80] sm:$0x1] }
  0xd6   : > { %v1914_v31 = vpop.f32.mrf.mxu2 }
  0xd8   : > { %v1877_v36 = vpop.f32.mrf.mxu0 }
  0xd9   : > { %v2003_v32 = vpop.f32.mrf.mxu3  ;;  %v1966_v42 = vpop.f32.mrf.mxu1 }
  0xda   : > { %v6396_v35 = vadd.f32 %v2003_v32, %v1914_v31  ;;  %v6401_v43 = vadd.f32 %v1966_v42, %v1877_v36  ;;  %v4395_v32 = vrot.slane %v942_v29, 9 }
  0xdb   : > { %2054 = vmatmul.bf16.gmra.mxu2 %v4500_v33  ;;  %2632 = vmatmul.bf16.gmra.mxu0 %v4784_v34  ;;  %v1089_v33 = vrot.slane %v1087_v26, 4  ;;  %v1090_v34 = vrot.slane %v944_v30, 5 }
  0xdc   : > { %2721 = vmatmul.bf16.gmra.mxu1 %v4788_v40  ;;  %v1088_v41 = vsel %vm6278_vm5, %v4395_v32, %v1087_v26  ;;  %v4815_v32 = vld [vmem:[#allocation2 + $0x90] sm:$0xf] }
  0xdd   : > { %v1091_v42 = vsel %vm6278_vm5, %v1089_v33, %v1090_v34  ;;  %1207 = vst [vmem:[#allocation2 + $0xc8] sm:$0xf] %v1088_v41  ;;  %v5557_v33 = vld [vmem:[#allocation2 + $0xb8] sm:$0xf0]  ;;  %v5483_v34 = vld [vmem:[#allocation2 + $0x94] sm:$0xf] }
  0xde   : > { %2543 = vmatmul.bf16.gmra.mxu3 %v4780_v37  ;;  %v1917_v47 = vpop.f32.mrf.mxu2  ;;  %1208 = vst [vmem:[#allocation2 + $0xd4] sm:$0xf] %v1091_v42  ;;  %v4823_v41 = vld [vmem:[#allocation2 + $0x98] sm:$0xf]  ;;  %v5485_v42 = vld [vmem:[#allocation2 + $0xa0] sm:$0xf0] }
  0xe0   : > { %v1879_v56 = vpop.f32.mrf.mxu0 }
  0xe1   : > { %v2006_v50 = vpop.f32.mrf.mxu3  ;;  %v1968_v57 = vpop.f32.mrf.mxu1 }
  0xe2   : > { %v6406_v55 = vadd.f32 %v2006_v50, %v1917_v47  ;;  %v6412_v61 = vadd.f32 %v1968_v57, %v1879_v56  ;;  %v4523_v47 = vld [vmem:[#allocation2 + $0x98] sm:$0xf]  ;;  %v5480_v50 = vld [vmem:[#allocation2 + $0x7c] sm:$0xf]  ;;  %v5482_v56 = vld [vmem:[#allocation2 + $0x88] sm:$0xf0] }
  0xe3   : > { %v4524_v60 = vor.u32 %v5554_v49, %v4523_v47  ;;  %v4808_v62 = vor.u32 %v5480_v50, %v4805_v51  ;;  %v4812_v4 = vor.u32 %v5482_v56, %v4811_v53  ;;  %v4824_v53 = vor.u32 %v5485_v42, %v4823_v41 }
  0xe6   : > { %v1919_v9 = vpop.f32.mrf.mxu2 }
  0xe8   : > { %v1882_v15 = vpop.f32.mrf.mxu0 }
  0xe9   : > { %v2008_v10 = vpop.f32.mrf.mxu3  ;;  %v1971_v20 = vpop.f32.mrf.mxu1 }
  0xea   : > { %v6414_v14 = vadd.f32 %v2008_v10, %v1919_v9  ;;  %v6416_v21 = vadd.f32 %v1971_v20, %v1882_v15  ;;  %v946_v9 = vld [vmem:[%s5995_s14 + $0x70] sm:$0xf]  ;;  %v947_v15 = vld [vmem:[%s5995_s14 + $0x74] sm:$0x1] }
  0xeb   : > { %2059 = vmatmul.bf16.gmra.mxu2 %v4512_v11  ;;  %2637 = vmatmul.bf16.gmra.mxu0 %v4796_v12  ;;  %v1094_v10 = vrot.slane %v946_v9, 5  ;;  %v945_v12 = vld [vmem:[%s5995_s14 + $0x6c] sm:$0xe]  ;;  %v1097_v23 = vrot.slane %v947_v15, 5 }
  0xec   : > { %2726 = vmatmul.bf16.gmra.mxu1 %v4800_v18  ;;  %v4396_v18 = vrot.slane %v945_v12, 9 }
  0xed   : > { %v1096_v20 = vrot.slane %v1094_v10, 4 }
  0xee   : > { %2548 = vmatmul.bf16.gmra.mxu3 %v4792_v16  ;;  %v1922_v27 = vpop.f32.mrf.mxu2 }
  0xef   : > { %v1098_v29 = vsel %vm6278_vm5, %v1096_v20, %v1097_v23 }
  0xf0   : > { %v1884_v37 = vpop.f32.mrf.mxu0  ;;  %1210 = vst [vmem:[#allocation2 + $0xec] sm:$0xf] %v1098_v29  ;;  %v5560_v29 = vld [vmem:[#allocation2 + $0xd0] sm:$0xf0] }
  0xf1   : > { %v2011_v31 = vpop.f32.mrf.mxu3  ;;  %v1973_v40 = vpop.f32.mrf.mxu1 }
  0xf2   : > { %v6427_v36 = vadd.f32 %v2011_v31, %v1922_v27  ;;  %v6433_v45 = vadd.f32 %v1973_v40, %v1884_v37  ;;  %v1095_v27 = vsel %vm6278_vm5, %v4396_v18, %v1094_v10  ;;  %v4535_v31 = vld [vmem:[#allocation2 + $0xb0] sm:$0xf]  ;;  %v4817_v37 = vld [vmem:[#allocation2 + $0x9c] sm:$0xf0]  ;;  %v5484_v40 = vld [vmem:[#allocation2 + $0x98] sm:$0xf0] }
  0xf3   : > { %1209 = vst [vmem:[#allocation2 + $0xe0] sm:$0xf] %v1095_v27  ;;  %v4536_v48 = vor.u32 %v5557_v33, %v4535_v31  ;;  %v4820_v49 = vor.u32 %v5483_v34, %v4817_v37  ;;  %v4816_v52 = vor.u32 %v5484_v40, %v4815_v32  ;;  %v5487_v27 = vld [vmem:[#allocation2 + $0xb0] sm:$0xf0]  ;;  %v5486_v31 = vld [vmem:[#allocation2 + $0xac] sm:$0xf] }
  0xf4   : > { %v4829_v32 = vld [vmem:[#allocation2 + $0xb4] sm:$0xf0]  ;;  %v4835_v33 = vld [vmem:[#allocation2 + $0xb0] sm:$0xf]  ;;  %v5488_v34 = vld [vmem:[#allocation2 + $0xb8] sm:$0xf0] }
  0xf5   : > { %v5676_v37 = vld [vmem:[%s6809_s1 + $0x218] sm:$0xff] }
  0xf6   : > { %v1924_v57 = vpop.f32.mrf.mxu2  ;;  %3483 = vmatpush.bf16.msra.mxu0 %v5676_v37 }
  0xf8   : > { %v1887_v1 = vpop.f32.mrf.mxu0 }
  0xf9   : > { %v2013_v59 = vpop.f32.mrf.mxu3  ;;  %v1976_v6 = vpop.f32.mrf.mxu1 }
  0xfa   : > { %v6438_v0 = vadd.f32 %v2013_v59, %v1924_v57  ;;  %v6443_v8 = vadd.f32 %v1976_v6, %v1887_v1  ;;  %v5660_v59 = vld [vmem:[%s6809_s1 + $0x198] sm:$0xff] }
  0xfb   : > { %2064 = vmatmul.bf16.gmra.mxu2 %v4524_v60  ;;  %2642 = vmatmul.bf16.gmra.mxu0 %v4808_v62  ;;  %v5668_v60 = vld [vmem:[%s6809_s1 + $0x1d8] sm:$0xff] }
  0xfc   : > { %2731 = vmatmul.bf16.gmra.mxu1 %v4812_v4  ;;  %v949_v62 = vld [vmem:[%s5995_s14 + $0x7c] sm:$0xf]  ;;  %3305 = vmatpush.bf16.msra.mxu2 %v5660_v59  ;;  %v948_v4 = vld [vmem:[%s5995_s14 + $0x78] sm:$0xe] }
  0xfd   : > { %v1101_v1 = vrot.slane %v949_v62, 5  ;;  %3394 = vmatpush.bf16.msra.mxu3 %v5668_v60  ;;  %v4397_v9 = vrot.slane %v948_v4, 9  ;;  %v5700_v59 = vld [vmem:[%s6810_s2 + $0x18] sm:$0xff] }
  0xfe   : > { %2553 = vmatmul.bf16.gmra.mxu3 %v4804_v3  ;;  %v1927_v11 = vpop.f32.mrf.mxu2  ;;  %3968 = vmatpush.bf16.msra.mxu1 %v5700_v59  ;;  %v5659_v59 = vld [vmem:[%s6809_s1 + $0x190] sm:$0xff] }
  0xff   : > { %v1103_v10 = vrot.slane %v1101_v1, 4  ;;  %v1102_v18 = vsel %vm6278_vm5, %v4397_v9, %v1101_v1  ;;  %v951_v1 = vld [vmem:[%s5995_s14 + $0x84] sm:$0xe] }
 0x100   : > { %v1889_v25 = vpop.f32.mrf.mxu0  ;;  %1211 = vst [vmem:[#allocation2 + $0xf8] sm:$0xf] %v1102_v18  ;;  %3306 = vmatpush.bf16.msra.mxu2 %v5659_v59 }
 0x101   : > { %v2016_v16 = vpop.f32.mrf.mxu3  ;;  %v1978_v26 = vpop.f32.mrf.mxu1 }
 0x102   : > { %v6448_v24 = vadd.f32 %v2016_v16, %v1927_v11  ;;  %v6454_v30 = vadd.f32 %v1978_v26, %v1889_v25  ;;  %v1104_v11 = vrot.slane %v950_v5, 5  ;;  %v4547_v25 = vld [vmem:[#allocation2 + $0xc8] sm:$0xf]  ;;  %v4398_v5 = vrot.slane %v951_v1, 9 }
 0x103   : > { %v4827_v26 = vld [vmem:[#allocation2 + $0xa8] sm:$0xf]  ;;  %v4548_v42 = vor.u32 %v5560_v29, %v4547_v25  ;;  %v4559_v25 = vld [vmem:[#allocation2 + $0xe0] sm:$0xf]  ;;  %v5489_v29 = vld [vmem:[#allocation2 + $0xc4] sm:$0xf] }
 0x104   : > { %v1105_v20 = vsel %vm6278_vm5, %v1103_v10, %v1104_v11 }
 0x105   : > { %1212 = vst [vmem:[#allocation2 + $0x104] sm:$0xf] %v1105_v20 }
 0x106   : > { %v1929_v46 = vpop.f32.mrf.mxu2 }
 0x108   : > { %v1892_v51 = vpop.f32.mrf.mxu0 }
 0x109   : > { %v2018_v47 = vpop.f32.mrf.mxu3  ;;  %v1981_v56 = vpop.f32.mrf.mxu1 }
 0x10a   : > { %v6456_v50 = vadd.f32 %v2018_v47, %v1929_v46  ;;  %v6458_v57 = vadd.f32 %v1981_v56, %v1892_v51  ;;  %v4832_v46 = vor.u32 %v5486_v31, %v4829_v32  ;;  %v4836_v51 = vor.u32 %v5488_v34, %v4835_v33  ;;  %v952_v56 = vld [vmem:[%s5995_s14 + $0x88] sm:$0xf]  ;;  %v4841_v31 = vld [vmem:[#allocation2 + $0xcc] sm:$0xf0]  ;;  %v5490_v32 = vld [vmem:[#allocation2 + $0xc8] sm:$0xf0] }
 0x10b   : > { %2069 = vmatmul.bf16.gmra.mxu2 %v4536_v48  ;;  %2647 = vmatmul.bf16.gmra.mxu0 %v4820_v49  ;;  %v4828_v49 = vor.u32 %v5487_v27, %v4827_v26  ;;  %v1108_v60 = vrot.slane %v952_v56, 5  ;;  %v4839_v26 = vld [vmem:[#allocation2 + $0xc0] sm:$0xf]  ;;  %v5563_v27 = vld [vmem:[#allocation2 + $0xe8] sm:$0xf0] }
 0x10c   : > { %2736 = vmatmul.bf16.gmra.mxu1 %v4824_v53  ;;  %v4847_v33 = vld [vmem:[#allocation2 + $0xc8] sm:$0xf]  ;;  %v5491_v34 = vld [vmem:[#allocation2 + $0xd0] sm:$0xf0] }
 0x10d   : > { %v955_v56 = vld [vmem:[%s5995_s14 + $0x94] sm:$0xf] }
 0x10e   : > { %2558 = vmatmul.bf16.gmra.mxu3 %v4816_v52  ;;  %v1932_v3 = vpop.f32.mrf.mxu2 }
 0x110   : > { %v1894_v15 = vpop.f32.mrf.mxu0 }
 0x111   : > { %v2021_v6 = vpop.f32.mrf.mxu3  ;;  %v1983_v16 = vpop.f32.mrf.mxu1 }
 0x112   : > { %v6469_v12 = vadd.f32 %v2021_v6, %v1932_v3  ;;  %v6475_v23 = vadd.f32 %v1983_v16, %v1894_v15  ;;  %v953_v3 = vld [vmem:[%s5995_s14 + $0x8c] sm:$0x1]  ;;  %v1110_v6 = vrot.slane %v1108_v60, 4  ;;  %v1109_v16 = vsel %vm6278_vm5, %v4398_v5, %v1108_v60  ;;  %v5667_v60 = vld [vmem:[%s6809_s1 + $0x1d0] sm:$0xff] }
 0x113   : > { %v1111_v9 = vrot.slane %v953_v3, 5  ;;  %1213 = vst [vmem:[#allocation2 + $0x110] sm:$0xf] %v1109_v16  ;;  %v954_v3 = vld [vmem:[%s5995_s14 + $0x90] sm:$0xe]  ;;  %3395 = vmatpush.bf16.msra.mxu3 %v5667_v60 }
 0x115   : > { %v1112_v18 = vsel %vm6278_vm5, %v1110_v6, %v1111_v9  ;;  %v4399_v9 = vrot.slane %v954_v3, 9 }
 0x116   : > { %v1934_v40 = vpop.f32.mrf.mxu2  ;;  %1214 = vst [vmem:[#allocation2 + $0x11c] sm:$0xf] %v1112_v18 }
 0x118   : > { %v1897_v48 = vpop.f32.mrf.mxu0 }
 0x119   : > { %v2023_v41 = vpop.f32.mrf.mxu3  ;;  %v1986_v52 = vpop.f32.mrf.mxu1 }
 0x11a   : > { %v6480_v47 = vadd.f32 %v2023_v41, %v1934_v40  ;;  %v6482_v53 = vadd.f32 %v1986_v52, %v1897_v48  ;;  %v4560_v41 = vor.u32 %v5563_v27, %v4559_v25 }
 0x11b   : > { %2074 = vmatmul.bf16.gmra.mxu2 %v4548_v42  ;;  %2652 = vmatmul.bf16.gmra.mxu0 %v4832_v46  ;;  %v4844_v42 = vor.u32 %v5489_v29, %v4841_v31  ;;  %v4571_v29 = vld [vmem:[#allocation2 + $0xf8] sm:$0xf] }
 0x11c   : > { %2741 = vmatmul.bf16.gmra.mxu1 %v4836_v51  ;;  %v4848_v51 = vor.u32 %v5491_v34, %v4847_v33  ;;  %v5566_v33 = vld [vmem:[#allocation2 + $0x100] sm:$0xf0]  ;;  %v5492_v34 = vld [vmem:[#allocation2 + $0xdc] sm:$0xf] }
 0x11e   : > { %2563 = vmatmul.bf16.gmra.mxu3 %v4828_v49  ;;  %v1937_v62 = vpop.f32.mrf.mxu2  ;;  %v4840_v49 = vor.u32 %v5490_v32, %v4839_v26  ;;  %v4851_v32 = vld [vmem:[#allocation2 + $0xd8] sm:$0xf] }
 0x120   : > { %v1899_v11 = vpop.f32.mrf.mxu0 }
 0x121   : > { %v2026_v4 = vpop.f32.mrf.mxu3  ;;  %v1988_v15 = vpop.f32.mrf.mxu1 }
 0x122   : > { %v6490_v10 = vadd.f32 %v2026_v4, %v1937_v62  ;;  %v6496_v20 = vadd.f32 %v1988_v15, %v1899_v11  ;;  %v1115_v62 = vrot.slane %v955_v56, 5  ;;  %v956_v4 = vld [vmem:[%s5995_s14 + $0x98] sm:$0x1] }
 0x123   : > { %v1118_v15 = vrot.slane %v956_v4, 5 }
 0x124   : > { %v1117_v11 = vrot.slane %v1115_v62, 4  ;;  %v1116_v26 = vsel %vm6278_vm5, %v4399_v9, %v1115_v62 }
 0x125   : > { %1215 = vst [vmem:[#allocation2 + $0x128] sm:$0xf] %v1116_v26  ;;  %v959_v26 = vld [vmem:[%s5995_s14 + $0xa4] sm:$0x1] }
 0x126   : > { %v1939_v37 = vpop.f32.mrf.mxu2  ;;  %v1119_v27 = vsel %vm6278_vm5, %v1117_v11, %v1118_v15 }
 0x127   : > { %1216 = vst [vmem:[#allocation2 + $0x134] sm:$0xf] %v1119_v27 }
 0x128   : > { %v2618_v48 = vpop.f32.mrf.mxu0 }
 0x129   : > { %v2028_v40 = vpop.f32.mrf.mxu3  ;;  %v2707_v52 = vpop.f32.mrf.mxu1 }
 0x12a   : > { %v6498_v46 = vadd.f32 %v2028_v40, %v1939_v37  ;;  %v4853_v37 = vld [vmem:[#allocation2 + $0xe4] sm:$0xf0] }
 0x12b   : > { %2079 = vmatmul.bf16.gmra.mxu2 %v4560_v41  ;;  %2657 = vmatmul.bf16.gmra.mxu0 %v4844_v42  ;;  %v4859_v41 = vld [vmem:[#allocation2 + $0xe0] sm:$0xf]  ;;  %v5494_v42 = vld [vmem:[#allocation2 + $0xe8] sm:$0xf0]  ;;  %v4856_v60 = vor.u32 %v5492_v34, %v4853_v37 }
 0x12c   : > { %2746 = vmatmul.bf16.gmra.mxu1 %v4848_v51 }
 0x12e   : > { %2568 = vmatmul.bf16.gmra.mxu3 %v4840_v49  ;;  %v2040_v1 = vpop.f32.mrf.mxu2  ;;  %v5675_v49 = vld [vmem:[%s6809_s1 + $0x210] sm:$0xff] }
 0x12f   : > { %v2041_v5 = vadd.f32 %v2040_v1, %v6332_v54  ;;  %v5493_v54 = vld [vmem:[#allocation2 + $0xe0] sm:$0xf0]  ;;  %3484 = vmatpush.bf16.msra.mxu0 %v5675_v49  ;;  %v4863_v49 = vld [vmem:[#allocation2 + $0xf0] sm:$0xf] }
 0x130   : > { %v2620_v16 = vpop.f32.mrf.mxu0  ;;  %v4852_v1 = vor.u32 %v5493_v54, %v4851_v32  ;;  %v1125_v32 = vrot.slane %v959_v26, 5 }
 0x131   : > { %v2529_v6 = vpop.f32.mrf.mxu3  ;;  %v2709_v25 = vpop.f32.mrf.mxu1 }
 0x132   : > { %v2530_v18 = vadd.f32 %v2529_v6, %v2041_v5  ;;  %v958_v6 = vld [vmem:[%s5995_s14 + $0xa0] sm:$0xf] }
 0x133   : > { %v1122_v11 = vrot.slane %v958_v6, 5 }
 0x134   : > { %v2619_v31 = vadd.f32 %v2618_v48, %v2530_v18  ;;  %v4572_v48 = vor.u32 %v5566_v33, %v4571_v29  ;;  %v957_v18 = vld [vmem:[%s5995_s14 + $0x9c] sm:$0xe] }
 0x136   : > { %v6514_v40 = vadd.f32 %v2707_v52, %v2619_v31  ;;  %v2042_v51 = vpop.f32.mrf.mxu2  ;;  %v4860_v52 = vor.u32 %v5494_v42, %v4859_v41  ;;  %v1124_v31 = vrot.slane %v1122_v11, 4  ;;  %v4583_v42 = vld [vmem:[#allocation2 + $0x110] sm:$0xf] }
 0x137   : > { %v2043_v56 = vadd.f32 %v2042_v51, %v6349_v7  ;;  %v5699_v7 = vld [vmem:[%s6810_s2 + $0x10] sm:$0xff] }
 0x138   : > { %v2623_v62 = vpop.f32.mrf.mxu0  ;;  %3969 = vmatpush.bf16.msra.mxu1 %v5699_v7  ;;  %v1126_v37 = vsel %vm6278_vm5, %v1124_v31, %v1125_v32  ;;  %v5495_v51 = vld [vmem:[#allocation2 + $0xf4] sm:$0xf] }
 0x139   : > { %v2531_v59 = vpop.f32.mrf.mxu3  ;;  %v2712_v4 = vpop.f32.mrf.mxu1  ;;  %1218 = vst [vmem:[#allocation2 + $0x14c] sm:$0xf] %v1126_v37 }
 0x13a   : > { %v2532_v3 = vadd.f32 %v2531_v59, %v2043_v56  ;;  %v4865_v56 = vld [vmem:[#allocation2 + $0xfc] sm:$0xf0] }
 0x13b   : > { %2084 = vmatmul.bf16.gmra.mxu2 %v4572_v48  ;;  %2662 = vmatmul.bf16.gmra.mxu0 %v4856_v60  ;;  %v5496_v48 = vld [vmem:[#allocation2 + $0xf8] sm:$0xf0]  ;;  %v4871_v60 = vld [vmem:[#allocation2 + $0xf8] sm:$0xf]  ;;  %v4868_v7 = vor.u32 %v5495_v51, %v4865_v56 }
 0x13c   : > { %v2621_v5 = vadd.f32 %v2620_v16, %v2532_v3  ;;  %2751 = vmatmul.bf16.gmra.mxu1 %v4860_v52  ;;  %v4400_v16 = vrot.slane %v957_v18, 9 }
 0x13e   : > { %2573 = vmatmul.bf16.gmra.mxu3 %v4852_v1  ;;  %v6521_v9 = vadd.f32 %v2709_v25, %v2621_v5  ;;  %v2045_v15 = vpop.f32.mrf.mxu2  ;;  %v1123_v25 = vsel %vm6278_vm5, %v4400_v16, %v1122_v11  ;;  %v5497_v1 = vld [vmem:[#allocation2 + $0x100] sm:$0xf0]  ;;  %v5666_v16 = vld [vmem:[%s6809_s1 + $0x1c8] sm:$0xff] }
 0x13f   : > { %v2046_v27 = vadd.f32 %v2045_v15, %v6359_v28  ;;  %1217 = vst [vmem:[#allocation2 + $0x140] sm:$0xf] %v1123_v25  ;;  %v5569_v28 = vld [vmem:[#allocation2 + $0x118] sm:$0xf0]  ;;  %v4872_v15 = vor.u32 %v5497_v1, %v4871_v60  ;;  %v962_v25 = vld [vmem:[%s5995_s14 + $0xb0] sm:$0x1]  ;;  %3396 = vmatpush.bf16.msra.mxu3 %v5666_v16 }
 0x140   : > { %v2625_v54 = vpop.f32.mrf.mxu0  ;;  %v4584_v6 = vor.u32 %v5569_v28, %v4583_v42  ;;  %v1132_v42 = vrot.slane %v962_v25, 5  ;;  %v4595_v60 = vld [vmem:[#allocation2 + $0x128] sm:$0xf] }
 0x141   : > { %v2534_v29 = vpop.f32.mrf.mxu3  ;;  %v2714_v34 = vpop.f32.mrf.mxu1 }
 0x142   : > { %v2535_v33 = vadd.f32 %v2534_v29, %v2046_v27 }
 0x144   : > { %v2624_v41 = vadd.f32 %v2623_v62, %v2535_v33  ;;  %v4864_v62 = vor.u32 %v5496_v48, %v4863_v49  ;;  %v960_v33 = vld [vmem:[%s5995_s14 + $0xa8] sm:$0xe] }
 0x146   : > { %v6533_v59 = vadd.f32 %v2712_v4, %v2624_v41  ;;  %v2047_v52 = vpop.f32.mrf.mxu2  ;;  %v961_v4 = vld [vmem:[%s5995_s14 + $0xac] sm:$0xf]  ;;  %v4401_v41 = vrot.slane %v960_v33, 9 }
 0x147   : > { %v2048_v3 = vadd.f32 %v2047_v52, %v6370_v44  ;;  %v5658_v44 = vld [vmem:[%s6809_s1 + $0x188] sm:$0xff]  ;;  %v1129_v31 = vrot.slane %v961_v4, 5 }
 0x148   : > { %v2628_v11 = vpop.f32.mrf.mxu0  ;;  %3307 = vmatpush.bf16.msra.mxu2 %v5658_v44  ;;  %v4875_v52 = vld [vmem:[#allocation2 + $0x108] sm:$0xf] }
 0x149   : > { %v2536_v5 = vpop.f32.mrf.mxu3  ;;  %v2717_v26 = vpop.f32.mrf.mxu1  ;;  %v1130_v56 = vsel %vm6278_vm5, %v4401_v41, %v1129_v31 }
 0x14a   : > { %v2537_v18 = vadd.f32 %v2536_v5, %v2048_v3  ;;  %1219 = vst [vmem:[#allocation2 + $0x158] sm:$0xf] %v1130_v56  ;;  %v5572_v3 = vld [vmem:[#allocation2 + $0x130] sm:$0xf0]  ;;  %v5498_v5 = vld [vmem:[#allocation2 + $0x10c] sm:$0xf] }
 0x14b   : > { %2089 = vmatmul.bf16.gmra.mxu2 %v4584_v6  ;;  %2667 = vmatmul.bf16.gmra.mxu0 %v4868_v7  ;;  %v4877_v6 = vld [vmem:[#allocation2 + $0x114] sm:$0xf0]  ;;  %v965_v56 = vld [vmem:[%s5995_s14 + $0xbc] sm:$0x1] }
 0x14c   : > { %v2626_v27 = vadd.f32 %v2625_v54, %v2537_v18  ;;  %2756 = vmatmul.bf16.gmra.mxu1 %v4872_v15  ;;  %v5500_v15 = vld [vmem:[#allocation2 + $0x118] sm:$0xf0]  ;;  %v5674_v18 = vld [vmem:[%s6809_s1 + $0x208] sm:$0xff]  ;;  %v4880_v16 = vor.u32 %v5498_v5, %v4877_v6 }
 0x14d   : > { %3485 = vmatpush.bf16.msra.mxu0 %v5674_v18  ;;  %v4887_v18 = vld [vmem:[#allocation2 + $0x120] sm:$0xf] }
 0x14e   : > { %2578 = vmatmul.bf16.gmra.mxu3 %v4864_v62  ;;  %v6537_v29 = vadd.f32 %v2714_v34, %v2626_v27  ;;  %v2050_v32 = vpop.f32.mrf.mxu2  ;;  %v1131_v34 = vrot.slane %v1129_v31, 4  ;;  %v4883_v62 = vld [vmem:[#allocation2 + $0x110] sm:$0xf] }
 0x14f   : > { %v2051_v54 = vadd.f32 %v2050_v32, %v6374_v63  ;;  %v5499_v63 = vld [vmem:[#allocation2 + $0x110] sm:$0xf0] }
 0x150   : > { %v2630_v49 = vpop.f32.mrf.mxu0  ;;  %v1133_v48 = vsel %vm6278_vm5, %v1131_v34, %v1132_v42  ;;  %v4876_v32 = vor.u32 %v5499_v63, %v4875_v52  ;;  %v1139_v52 = vrot.slane %v965_v56, 5 }
 0x151   : > { %v2539_v37 = vpop.f32.mrf.mxu3  ;;  %v2719_v51 = vpop.f32.mrf.mxu1  ;;  %1220 = vst [vmem:[#allocation2 + $0x164] sm:$0xf] %v1133_v48 }
 0x152   : > { %v2540_v28 = vadd.f32 %v2539_v37, %v2051_v54  ;;  %v964_v37 = vld [vmem:[%s5995_s14 + $0xb8] sm:$0xf] }
 0x153   : > { %v1136_v34 = vrot.slane %v964_v37, 5 }
 0x154   : > { %v2629_v1 = vadd.f32 %v2628_v11, %v2540_v28  ;;  %v4596_v11 = vor.u32 %v5572_v3, %v4595_v60  ;;  %v963_v28 = vld [vmem:[%s5995_s14 + $0xb4] sm:$0xe] }
 0x156   : > { %v6552_v7 = vadd.f32 %v2717_v26, %v2629_v1  ;;  %v2052_v27 = vpop.f32.mrf.mxu2  ;;  %v4884_v26 = vor.u32 %v5500_v15, %v4883_v62  ;;  %v1138_v1 = vrot.slane %v1136_v34, 4  ;;  %v4607_v15 = vld [vmem:[#allocation2 + $0x140] sm:$0xf] }
 0x157   : > { %v2053_v4 = vadd.f32 %v2052_v27, %v6391_v19  ;;  %v5698_v19 = vld [vmem:[%s6810_s2 + $0x8] sm:$0xff]  ;;  %v5501_v27 = vld [vmem:[#allocation2 + $0x124] sm:$0xf] }
 0x158   : > { %v2633_v31 = vpop.f32.mrf.mxu0  ;;  %3970 = vmatpush.bf16.msra.mxu1 %v5698_v19  ;;  %v1140_v6 = vsel %vm6278_vm5, %v1138_v1, %v1139_v52 }
 0x159   : > { %v2541_v44 = vpop.f32.mrf.mxu3  ;;  %v2722_v25 = vpop.f32.mrf.mxu1  ;;  %1222 = vst [vmem:[#allocation2 + $0x17c] sm:$0xf] %v1140_v6 }
 0x15a   : > { %v2542_v33 = vadd.f32 %v2541_v44, %v2053_v4  ;;  %v4889_v4 = vld [vmem:[#allocation2 + $0x12c] sm:$0xf0] }
 0x15b   : > { %2094 = vmatmul.bf16.gmra.mxu2 %v4596_v11  ;;  %2672 = vmatmul.bf16.gmra.mxu0 %v4880_v16  ;;  %v5502_v11 = vld [vmem:[#allocation2 + $0x128] sm:$0xf0]  ;;  %v4895_v16 = vld [vmem:[#allocation2 + $0x128] sm:$0xf]  ;;  %v4892_v19 = vor.u32 %v5501_v27, %v4889_v4 }
 0x15c   : > { %v2631_v54 = vadd.f32 %v2630_v49, %v2542_v33  ;;  %2761 = vmatmul.bf16.gmra.mxu1 %v4884_v26  ;;  %v4402_v49 = vrot.slane %v963_v28, 9 }
 0x15e   : > { %2583 = vmatmul.bf16.gmra.mxu3 %v4876_v32  ;;  %v6559_v41 = vadd.f32 %v2719_v51, %v2631_v54  ;;  %v2055_v42 = vpop.f32.mrf.mxu2  ;;  %v1137_v51 = vsel %vm6278_vm5, %v4402_v49, %v1136_v34  ;;  %v5503_v32 = vld [vmem:[#allocation2 + $0x130] sm:$0xf0]  ;;  %v5665_v49 = vld [vmem:[%s6809_s1 + $0x1c0] sm:$0xff] }
 0x15f   : > { %v2056_v48 = vadd.f32 %v2055_v42, %v6401_v43  ;;  %1221 = vst [vmem:[#allocation2 + $0x170] sm:$0xf] %v1137_v51  ;;  %v5575_v43 = vld [vmem:[#allocation2 + $0x148] sm:$0xf0]  ;;  %v4896_v42 = vor.u32 %v5503_v32, %v4895_v16  ;;  %v968_v51 = vld [vmem:[%s5995_s14 + $0xc8] sm:$0x1]  ;;  %3397 = vmatpush.bf16.msra.mxu3 %v5665_v49 }
 0x160   : > { %v2635_v63 = vpop.f32.mrf.mxu0  ;;  %v4608_v37 = vor.u32 %v5575_v43, %v4607_v15  ;;  %v1146_v15 = vrot.slane %v968_v51, 5  ;;  %v4619_v16 = vld [vmem:[#allocation2 + $0x158] sm:$0xf] }
 0x161   : > { %v2544_v60 = vpop.f32.mrf.mxu3  ;;  %v2724_v5 = vpop.f32.mrf.mxu1 }
 0x162   : > { %v2545_v3 = vadd.f32 %v2544_v60, %v2056_v48 }
 0x164   : > { %v2634_v62 = vadd.f32 %v2633_v31, %v2545_v3  ;;  %v4888_v31 = vor.u32 %v5502_v11, %v4887_v18  ;;  %v966_v3 = vld [vmem:[%s5995_s14 + $0xc0] sm:$0xe] }
 0x166   : > { %v6571_v44 = vadd.f32 %v2722_v25, %v2634_v62  ;;  %v2057_v26 = vpop.f32.mrf.mxu2  ;;  %v967_v25 = vld [vmem:[%s5995_s14 + $0xc4] sm:$0xf]  ;;  %v4403_v62 = vrot.slane %v966_v3, 9 }
 0x167   : > { %v2058_v33 = vadd.f32 %v2057_v26, %v6412_v61  ;;  %v5657_v61 = vld [vmem:[%s6809_s1 + $0x180] sm:$0xff]  ;;  %v1143_v1 = vrot.slane %v967_v25, 5  ;;  %v4899_v26 = vld [vmem:[#allocation2 + $0x138] sm:$0xf] }
 0x168   : > { %v2638_v34 = vpop.f32.mrf.mxu0  ;;  %3308 = vmatpush.bf16.msra.mxu2 %v5657_v61 }
 0x169   : > { %v2546_v54 = vpop.f32.mrf.mxu3  ;;  %v2727_v56 = vpop.f32.mrf.mxu1  ;;  %v1144_v4 = vsel %vm6278_vm5, %v4403_v62, %v1143_v1 }
 0x16a   : > { %v2547_v28 = vadd.f32 %v2546_v54, %v2058_v33  ;;  %1223 = vst [vmem:[#allocation2 + $0x188] sm:$0xf] %v1144_v4  ;;  %v5578_v33 = vld [vmem:[#allocation2 + $0x160] sm:$0xf0]  ;;  %v5504_v54 = vld [vmem:[#allocation2 + $0x13c] sm:$0xf] }
 0x16b   : > { %2099 = vmatmul.bf16.gmra.mxu2 %v4608_v37  ;;  %2677 = vmatmul.bf16.gmra.mxu0 %v4892_v19  ;;  %v4901_v37 = vld [vmem:[#allocation2 + $0x144] sm:$0xf0]  ;;  %v4620_v49 = vor.u32 %v5578_v33, %v4619_v16  ;;  %v4913_v33 = vld [vmem:[#allocation2 + $0x15c] sm:$0xf0] }
 0x16c   : > { %v2636_v48 = vadd.f32 %v2635_v63, %v2547_v28  ;;  %2766 = vmatmul.bf16.gmra.mxu1 %v4896_v42  ;;  %v5506_v42 = vld [vmem:[#allocation2 + $0x148] sm:$0xf0]  ;;  %v5673_v28 = vld [vmem:[%s6809_s1 + $0x200] sm:$0xff] }
 0x16d   : > { %3486 = vmatpush.bf16.msra.mxu0 %v5673_v28 }
 0x16e   : > { %2588 = vmatmul.bf16.gmra.mxu3 %v4888_v31  ;;  %v6575_v60 = vadd.f32 %v2724_v5, %v2636_v48  ;;  %v2060_v52 = vpop.f32.mrf.mxu2  ;;  %v1145_v5 = vrot.slane %v1143_v1, 4  ;;  %v4907_v31 = vld [vmem:[#allocation2 + $0x140] sm:$0xf] }
 0x16f   : > { %v2061_v63 = vadd.f32 %v2060_v52, %v6416_v21  ;;  %v5505_v21 = vld [vmem:[#allocation2 + $0x140] sm:$0xf0]  ;;  %v4908_v3 = vor.u32 %v5506_v42, %v4907_v31 }
 0x170   : > { %v2640_v18 = vpop.f32.mrf.mxu0  ;;  %v1147_v11 = vsel %vm6278_vm5, %v1145_v5, %v1146_v15  ;;  %v4900_v52 = vor.u32 %v5505_v21, %v4899_v26  ;;  %v5581_v26 = vld [vmem:[#allocation2 + $0x178] sm:$0xf0]  ;;  %v5507_v21 = vld [vmem:[#allocation2 + $0x154] sm:$0xf]  ;;  %v5509_v31 = vld [vmem:[#allocation2 + $0x160] sm:$0xf0] }
 0x171   : > { %v2549_v6 = vpop.f32.mrf.mxu3  ;;  %v2729_v27 = vpop.f32.mrf.mxu1  ;;  %1224 = vst [vmem:[#allocation2 + $0x194] sm:$0xf] %v1147_v11 }
 0x172   : > { %v2550_v43 = vadd.f32 %v2549_v6, %v2061_v63 }
 0x174   : > { %v2639_v32 = vadd.f32 %v2638_v34, %v2550_v43  ;;  %v4904_v34 = vor.u32 %v5504_v54, %v4901_v37  ;;  %v5508_v54 = vld [vmem:[#allocation2 + $0x158] sm:$0xf0]  ;;  %v4919_v37 = vld [vmem:[#allocation2 + $0x158] sm:$0xf] }
 0x176   : > { %v6590_v19 = vadd.f32 %v2727_v56, %v2639_v32  ;;  %v2062_v48 = vpop.f32.mrf.mxu2  ;;  %v4911_v32 = vld [vmem:[#allocation2 + $0x150] sm:$0xf] }
 0x177   : > { %v2063_v25 = vadd.f32 %v2062_v48, %v6433_v45  ;;  %v5697_v45 = vld [vmem:[%s6810_s2] sm:$0xff] }
 0x178   : > { %v2643_v1 = vpop.f32.mrf.mxu0  ;;  %3971 = vmatpush.bf16.msra.mxu1 %v5697_v45 }
 0x179   : > { %v2551_v61 = vpop.f32.mrf.mxu3  ;;  %v2732_v63 = vpop.f32.mrf.mxu1 }
 0x17a   : > { %v2552_v51 = vadd.f32 %v2551_v61, %v2063_v25  ;;  %v4916_v25 = vor.u32 %v5507_v21, %v4913_v33  ;;  %v5511_v21 = vld [vmem:[#allocation2 + $0x170] sm:$0xf0]  ;;  %v4931_v33 = vld [vmem:[#allocation2 + $0x170] sm:$0xf] }
 0x17b   : > { %2104 = vmatmul.bf16.gmra.mxu2 %v4620_v49  ;;  %2682 = vmatmul.bf16.gmra.mxu0 %v4904_v34  ;;  %v4912_v49 = vor.u32 %v5508_v54, %v4911_v32  ;;  %v4920_v34 = vor.u32 %v5509_v31, %v4919_v37  ;;  %v5510_v32 = vld [vmem:[#allocation2 + $0x16c] sm:$0xf]  ;;  %v5512_v54 = vld [vmem:[#allocation2 + $0x178] sm:$0xf0] }
 0x17c   : > { %v2641_v56 = vadd.f32 %v2640_v18, %v2552_v51  ;;  %2771 = vmatmul.bf16.gmra.mxu1 %v4908_v3  ;;  %v4631_v18 = vld [vmem:[#allocation2 + $0x170] sm:$0xf] }
 0x17d   : > { %v4632_v48 = vor.u32 %v5581_v26, %v4631_v18  ;;  %v5584_v18 = vld [vmem:[#allocation2 + $0x190] sm:$0xf0]  ;;  %v4925_v26 = vld [vmem:[#allocation2 + $0x174] sm:$0xf0] }
 0x17e   : > { %2593 = vmatmul.bf16.gmra.mxu3 %v4900_v52  ;;  %v6596_v6 = vadd.f32 %v2729_v27, %v2641_v56  ;;  %v2065_v62 = vpop.f32.mrf.mxu2 }
 0x17f   : > { %v2066_v5 = vadd.f32 %v2065_v62, %v6443_v8 }
 0x180   : > { %v2645_v43 = vpop.f32.mrf.mxu0 }
 0x181   : > { %v2554_v15 = vpop.f32.mrf.mxu3  ;;  %v2734_v11 = vpop.f32.mrf.mxu1 }
 0x182   : > { %v2555_v4 = vadd.f32 %v2554_v15, %v2066_v5 }
 0x184   : > { %v2644_v16 = vadd.f32 %v2643_v1, %v2555_v4  ;;  %v4643_v4 = vld [vmem:[#allocation2 + $0x188] sm:$0xf] }
 0x186   : > { %v6602_v27 = vadd.f32 %v2732_v63, %v2644_v16  ;;  %v2067_v42 = vpop.f32.mrf.mxu2  ;;  %v4923_v16 = vld [vmem:[#allocation2 + $0x168] sm:$0xf] }
 0x187   : > { %v2068_v28 = vadd.f32 %v2067_v42, %v6454_v30  ;;  %v4928_v42 = vor.u32 %v5510_v32, %v4925_v26  ;;  %v5081_v32 = vld [vmem:[#allocation2 + $0x3c] sm:$0xf0]  ;;  %v5367_v26 = vld [vmem:[#allocation2 + $0x1c] sm:$0xf] }
 0x188   : > { %v2648_v61 = vpop.f32.mrf.mxu0 }
 0x189   : > { %v2556_v8 = vpop.f32.mrf.mxu3  ;;  %v2737_v52 = vpop.f32.mrf.mxu1 }
 0x18a   : > { %v2557_v1 = vadd.f32 %v2556_v8, %v2068_v28  ;;  %v4924_v8 = vor.u32 %v5511_v21, %v4923_v16  ;;  %v5087_v16 = vld [vmem:[#allocation2 + $0x38] sm:$0xf]  ;;  %v5681_v21 = vld [vmem:[#allocation2 + $0x24] sm:$0xf0] }
 0x18b   : > { %2109 = vmatmul.bf16.gmra.mxu2 %v4632_v48  ;;  %2687 = vmatmul.bf16.gmra.mxu0 %v4916_v25  ;;  %v4932_v48 = vor.u32 %v5512_v54, %v4931_v33 }
 0x18c   : > { %v2646_v3 = vadd.f32 %v2645_v43, %v2557_v1  ;;  %2776 = vmatmul.bf16.gmra.mxu1 %v4920_v34 }
 0x18e   : > { %2598 = vmatmul.bf16.gmra.mxu3 %v4912_v49  ;;  %v6605_v51 = vadd.f32 %v2734_v11, %v2646_v3  ;;  %v2070_v63 = vpop.f32.mrf.mxu2 }
 0x18f   : > { %v2071_v56 = vadd.f32 %v2070_v63, %v6458_v57  ;;  %v4644_v57 = vor.u32 %v5584_v18, %v4643_v4  ;;  %v5609_v4 = vld [vmem:[#allocation2 + $0x34] sm:$0xf]  ;;  %v5611_v18 = vld [vmem:[#allocation2 + $0x40] sm:$0xf0] }
 0x190   : > { %v2650_v30 = vpop.f32.mrf.mxu0 }
 0x191   : > { %v2559_v45 = vpop.f32.mrf.mxu3  ;;  %v2739_v5 = vpop.f32.mrf.mxu1 }
 0x192   : > { %v2560_v62 = vadd.f32 %v2559_v45, %v2071_v56 }
 0x194   : > { %v2649_v15 = vadd.f32 %v2648_v61, %v2560_v62  ;;  %v5079_v62 = vld [vmem:[#allocation2 + $0x30] sm:$0xf] }
 0x196   : > { %v6608_v43 = vadd.f32 %v2737_v52, %v2649_v15  ;;  %v2072_v11 = vpop.f32.mrf.mxu2  ;;  %v5610_v15 = vld [vmem:[#allocation2 + $0x38] sm:$0xf0] }
 0x197   : > { %v2073_v37 = vadd.f32 %v2072_v11, %v6475_v23  ;;  %v5088_v11 = vor.u32 %v5611_v18, %v5087_v16  ;;  %v5093_v16 = vld [vmem:[#allocation2 + $0x54] sm:$0xf0]  ;;  %v5371_v18 = vld [vmem:[#allocation2 + $0x34] sm:$0xf] }
 0x198   : > { %v2653_v28 = vpop.f32.mrf.mxu0 }
 0x199   : > { %v2561_v31 = vpop.f32.mrf.mxu3  ;;  %v2742_v61 = vpop.f32.mrf.mxu1 }
 0x19a   : > { %v2562_v25 = vadd.f32 %v2561_v31, %v2073_v37  ;;  %v5084_v31 = vor.u32 %v5609_v4, %v5081_v32  ;;  %v5614_v4 = vld [vmem:[#allocation2 + $0x58] sm:$0xf0]  ;;  %v5682_v32 = vld [vmem:[#allocation2 + $0x3c] sm:$0xf0] }
 0x19b   : > { %2114 = vmatmul.bf16.gmra.mxu2 %v4644_v57  ;;  %2692 = vmatmul.bf16.gmra.mxu0 %v4928_v42  ;;  %v5368_v57 = vor.u32 %v5681_v21, %v5367_v26 }
 0x19c   : > { %v2651_v49 = vadd.f32 %v2650_v30, %v2562_v25  ;;  %2781 = vmatmul.bf16.gmra.mxu1 %v4932_v48 }
 0x19e   : > { %2603 = vmatmul.bf16.gmra.mxu3 %v4924_v8  ;;  %v6611_v34 = vadd.f32 %v2739_v5, %v2651_v49  ;;  %v2075_v1 = vpop.f32.mrf.mxu2 }
 0x19f   : > { %v2076_v52 = vadd.f32 %v2075_v1, %v6482_v53  ;;  %v5080_v53 = vor.u32 %v5610_v15, %v5079_v62  ;;  %v5612_v62 = vld [vmem:[#allocation2 + $0x4c] sm:$0xf]  ;;  %v5099_v15 = vld [vmem:[#allocation2 + $0x50] sm:$0xf] }
 0x1a0   : > { %v2655_v23 = vpop.f32.mrf.mxu0 }
 0x1a1   : > { %v2564_v3 = vpop.f32.mrf.mxu3  ;;  %v2744_v56 = vpop.f32.mrf.mxu1 }
 0x1a2   : > { %v2565_v63 = vadd.f32 %v2564_v3, %v2076_v52 }
 0x1a4   : > { %v2654_v45 = vadd.f32 %v2653_v28, %v2565_v63  ;;  %v5091_v63 = vld [vmem:[#allocation2 + $0x48] sm:$0xf] }
 0x1a6   : > { %v6614_v30 = vadd.f32 %v2742_v61, %v2654_v45  ;;  %v2077_v5 = vpop.f32.mrf.mxu2  ;;  %v5613_v45 = vld [vmem:[#allocation2 + $0x50] sm:$0xf0] }
 0x1a7   : > { %v2078_v33 = vadd.f32 %v2077_v5, %v6496_v20  ;;  %v5100_v5 = vor.u32 %v5614_v4, %v5099_v15  ;;  %v5105_v15 = vld [vmem:[#allocation2 + $0x6c] sm:$0xf0]  ;;  %v5375_v4 = vld [vmem:[#allocation2 + $0x4c] sm:$0xf] }
 0x1a8   : > { %v2658_v37 = vpop.f32.mrf.mxu0 }
 0x1a9   : > { %v2566_v54 = vpop.f32.mrf.mxu3  ;;  %v2747_v28 = vpop.f32.mrf.mxu1 }
 0x1aa   : > { %v2567_v42 = vadd.f32 %v2566_v54, %v2078_v33  ;;  %v5096_v54 = vor.u32 %v5612_v62, %v5093_v16  ;;  %v5617_v62 = vld [vmem:[#allocation2 + $0x70] sm:$0xf0]  ;;  %v5683_v16 = vld [vmem:[#allocation2 + $0x54] sm:$0xf0] }
 0x1ab   : > { %3309 = vmatmul.bf16.vlgmr.msra.gmra.mxu2 %v5080_v53  ;;  %3487 = vmatmul.bf16.vlgmr.msra.gmra.mxu0 %v5088_v11  ;;  %v5372_v53 = vor.u32 %v5682_v32, %v5371_v18 }
 0x1ac   : > { %v2656_v8 = vadd.f32 %v2655_v23, %v2567_v42  ;;  %3972 = vmatmul.bf16.vlgmr.msra.gmra.mxu1 %v5368_v57 }
 0x1ae   : > { %3398 = vmatmul.bf16.vlgmr.msra.gmra.mxu3 %v5084_v31  ;;  %v6617_v48 = vadd.f32 %v2744_v56, %v2656_v8  ;;  %v2080_v25 = vpop.f32.mrf.mxu2 }
 0x1af   : > { %v2081_v61 = vadd.f32 %v2080_v25, %v6343_v2  ;;  %v5092_v2 = vor.u32 %v5613_v45, %v5091_v63  ;;  %v5615_v63 = vld [vmem:[#allocation2 + $0x64] sm:$0xf]  ;;  %v5111_v45 = vld [vmem:[#allocation2 + $0x68] sm:$0xf] }
 0x1b0   : > { %v2660_v20 = vpop.f32.mrf.mxu0 }
 0x1b1   : > { %v2569_v49 = vpop.f32.mrf.mxu3  ;;  %v2749_v52 = vpop.f32.mrf.mxu1 }
 0x1b2   : > { %v2570_v1 = vadd.f32 %v2569_v49, %v2081_v61 }
 0x1b4   : > { %v2659_v3 = vadd.f32 %v2658_v37, %v2570_v1  ;;  %v5103_v1 = vld [vmem:[#allocation2 + $0x60] sm:$0xf] }
 0x1b6   : > { %v6620_v23 = vadd.f32 %v2747_v28, %v2659_v3  ;;  %v2082_v56 = vpop.f32.mrf.mxu2  ;;  %v5616_v3 = vld [vmem:[#allocation2 + $0x68] sm:$0xf0] }
 0x1b7   : > { %v2083_v26 = vadd.f32 %v2082_v56, %v6354_v22  ;;  %v5112_v56 = vor.u32 %v5617_v62, %v5111_v45  ;;  %v5117_v45 = vld [vmem:[#allocation2 + $0x84] sm:$0xf0]  ;;  %v5379_v62 = vld [vmem:[#allocation2 + $0x64] sm:$0xf] }
 0x1b8   : > { %v2663_v33 = vpop.f32.mrf.mxu0 }
 0x1b9   : > { %v2571_v21 = vpop.f32.mrf.mxu3  ;;  %v2752_v37 = vpop.f32.mrf.mxu1 }
 0x1ba   : > { %v2572_v11 = vadd.f32 %v2571_v21, %v2083_v26  ;;  %v5108_v21 = vor.u32 %v5615_v63, %v5105_v15  ;;  %v5620_v63 = vld [vmem:[#allocation2 + $0x88] sm:$0xf0]  ;;  %v5684_v15 = vld [vmem:[#allocation2 + $0x6c] sm:$0xf0] }
 0x1bb   : > { %3314 = vmatmul.bf16.gmra.mxu2 %v5092_v2  ;;  %3492 = vmatmul.bf16.gmra.mxu0 %v5100_v5  ;;  %v5376_v2 = vor.u32 %v5683_v16, %v5375_v4 }
 0x1bc   : > { %v2661_v31 = vadd.f32 %v2660_v20, %v2572_v11  ;;  %3977 = vmatmul.bf16.gmra.mxu1 %v5372_v53 }
 0x1be   : > { %3403 = vmatmul.bf16.gmra.mxu3 %v5096_v54  ;;  %v6623_v57 = vadd.f32 %v2749_v52, %v2661_v31  ;;  %v2085_v42 = vpop.f32.mrf.mxu2 }
 0x1bf   : > { %v2086_v28 = vadd.f32 %v2085_v42, %v6364_v39  ;;  %v5104_v39 = vor.u32 %v5616_v3, %v5103_v1  ;;  %v5618_v1 = vld [vmem:[#allocation2 + $0x7c] sm:$0xf]  ;;  %v5123_v3 = vld [vmem:[#allocation2 + $0x80] sm:$0xf] }
 0x1c0   : > { %v2665_v22 = vpop.f32.mrf.mxu0 }
 0x1c1   : > { %v2574_v8 = vpop.f32.mrf.mxu3  ;;  %v2754_v61 = vpop.f32.mrf.mxu1 }
 0x1c2   : > { %v2575_v25 = vadd.f32 %v2574_v8, %v2086_v28 }
 0x1c4   : > { %v2664_v49 = vadd.f32 %v2663_v33, %v2575_v25  ;;  %v5115_v25 = vld [vmem:[#allocation2 + $0x78] sm:$0xf] }
 0x1c6   : > { %v6626_v20 = vadd.f32 %v2752_v37, %v2664_v49  ;;  %v2087_v52 = vpop.f32.mrf.mxu2  ;;  %v5619_v49 = vld [vmem:[#allocation2 + $0x80] sm:$0xf0] }
 0x1c7   : > { %v2088_v18 = vadd.f32 %v2087_v52, %v6372_v58  ;;  %v5124_v52 = vor.u32 %v5620_v63, %v5123_v3  ;;  %v5129_v3 = vld [vmem:[#allocation2 + $0x9c] sm:$0xf0]  ;;  %v5383_v63 = vld [vmem:[#allocation2 + $0x7c] sm:$0xf] }
 0x1c8   : > { %v2668_v26 = vpop.f32.mrf.mxu0 }
 0x1c9   : > { %v2576_v32 = vpop.f32.mrf.mxu3  ;;  %v2757_v33 = vpop.f32.mrf.mxu1 }
 0x1ca   : > { %v2577_v5 = vadd.f32 %v2576_v32, %v2088_v18  ;;  %v5120_v32 = vor.u32 %v5618_v1, %v5117_v45  ;;  %v5623_v1 = vld [vmem:[#allocation2 + $0xa0] sm:$0xf0]  ;;  %v5685_v45 = vld [vmem:[#allocation2 + $0x84] sm:$0xf0] }
 0x1cb   : > { %3319 = vmatmul.bf16.gmra.mxu2 %v5104_v39  ;;  %3497 = vmatmul.bf16.gmra.mxu0 %v5112_v56  ;;  %v5380_v39 = vor.u32 %v5684_v15, %v5379_v62 }
 0x1cc   : > { %v2666_v54 = vadd.f32 %v2665_v22, %v2577_v5  ;;  %3982 = vmatmul.bf16.gmra.mxu1 %v5376_v2 }
 0x1ce   : > { %3408 = vmatmul.bf16.gmra.mxu3 %v5108_v21  ;;  %v6629_v53 = vadd.f32 %v2754_v61, %v2666_v54  ;;  %v2090_v11 = vpop.f32.mrf.mxu2 }
 0x1cf   : > { %v2091_v37 = vadd.f32 %v2090_v11, %v6385_v13  ;;  %v5116_v13 = vor.u32 %v5619_v49, %v5115_v25  ;;  %v5621_v25 = vld [vmem:[#allocation2 + $0x94] sm:$0xf]  ;;  %v5135_v49 = vld [vmem:[#allocation2 + $0x98] sm:$0xf] }
 0x1d0   : > { %v2670_v58 = vpop.f32.mrf.mxu0 }
 0x1d1   : > { %v2579_v31 = vpop.f32.mrf.mxu3  ;;  %v2759_v28 = vpop.f32.mrf.mxu1 }
 0x1d2   : > { %v2580_v42 = vadd.f32 %v2579_v31, %v2091_v37 }
 0x1d4   : > { %v2669_v8 = vadd.f32 %v2668_v26, %v2580_v42  ;;  %v5127_v42 = vld [vmem:[#allocation2 + $0x90] sm:$0xf] }
 0x1d6   : > { %v6632_v22 = vadd.f32 %v2757_v33, %v2669_v8  ;;  %v2092_v61 = vpop.f32.mrf.mxu2  ;;  %v5622_v8 = vld [vmem:[#allocation2 + $0x98] sm:$0xf0] }
 0x1d7   : > { %v2093_v4 = vadd.f32 %v2092_v61, %v6396_v35  ;;  %v5136_v61 = vor.u32 %v5623_v1, %v5135_v49  ;;  %v5141_v49 = vld [vmem:[#allocation2 + $0xb4] sm:$0xf0]  ;;  %v5387_v1 = vld [vmem:[#allocation2 + $0x94] sm:$0xf] }
 0x1d8   : > { %v2673_v18 = vpop.f32.mrf.mxu0 }
 0x1d9   : > { %v2581_v16 = vpop.f32.mrf.mxu3  ;;  %v2762_v26 = vpop.f32.mrf.mxu1 }
 0x1da   : > { %v2582_v56 = vadd.f32 %v2581_v16, %v2093_v4  ;;  %v5132_v16 = vor.u32 %v5621_v25, %v5129_v3  ;;  %v5626_v25 = vld [vmem:[#allocation2 + $0xb8] sm:$0xf0]  ;;  %v5686_v3 = vld [vmem:[#allocation2 + $0x9c] sm:$0xf0] }
 0x1db   : > { %3324 = vmatmul.bf16.gmra.mxu2 %v5116_v13  ;;  %3502 = vmatmul.bf16.gmra.mxu0 %v5124_v52  ;;  %v5384_v13 = vor.u32 %v5685_v45, %v5383_v63 }
 0x1dc   : > { %v2671_v21 = vadd.f32 %v2670_v58, %v2582_v56  ;;  %3987 = vmatmul.bf16.gmra.mxu1 %v5380_v39 }
 0x1de   : > { %3413 = vmatmul.bf16.gmra.mxu3 %v5120_v32  ;;  %v6635_v2 = vadd.f32 %v2759_v28, %v2671_v21  ;;  %v2095_v5 = vpop.f32.mrf.mxu2 }
 0x1df   : > { %v2096_v33 = vadd.f32 %v2095_v5, %v6406_v55  ;;  %v5128_v55 = vor.u32 %v5622_v8, %v5127_v42  ;;  %v5624_v42 = vld [vmem:[#allocation2 + $0xac] sm:$0xf]  ;;  %v5147_v8 = vld [vmem:[#allocation2 + $0xb0] sm:$0xf] }
 0x1e0   : > { %v2675_v35 = vpop.f32.mrf.mxu0 }
 0x1e1   : > { %v2584_v54 = vpop.f32.mrf.mxu3  ;;  %v2764_v37 = vpop.f32.mrf.mxu1 }
 0x1e2   : > { %v2585_v11 = vadd.f32 %v2584_v54, %v2096_v33 }
 0x1e4   : > { %v2674_v31 = vadd.f32 %v2673_v18, %v2585_v11  ;;  %v5139_v11 = vld [vmem:[#allocation2 + $0xa8] sm:$0xf] }
 0x1e6   : > { %v6638_v58 = vadd.f32 %v2762_v26, %v2674_v31  ;;  %v2097_v28 = vpop.f32.mrf.mxu2  ;;  %v5625_v31 = vld [vmem:[#allocation2 + $0xb0] sm:$0xf0] }
 0x1e7   : > { %v2098_v62 = vadd.f32 %v2097_v28, %v6414_v14  ;;  %v5148_v28 = vor.u32 %v5626_v25, %v5147_v8  ;;  %v5153_v8 = vld [vmem:[#allocation2 + $0xcc] sm:$0xf0]  ;;  %v5391_v25 = vld [vmem:[#allocation2 + $0xac] sm:$0xf] }
 0x1e8   : > { %v2678_v4 = vpop.f32.mrf.mxu0 }
 0x1e9   : > { %v2586_v15 = vpop.f32.mrf.mxu3  ;;  %v2767_v18 = vpop.f32.mrf.mxu1 }
 0x1ea   : > { %v2587_v52 = vadd.f32 %v2586_v15, %v2098_v62  ;;  %v5144_v15 = vor.u32 %v5624_v42, %v5141_v49  ;;  %v5629_v42 = vld [vmem:[#allocation2 + $0xd0] sm:$0xf0]  ;;  %v5687_v49 = vld [vmem:[#allocation2 + $0xb4] sm:$0xf0] }
 0x1eb   : > { %3329 = vmatmul.bf16.gmra.mxu2 %v5128_v55  ;;  %3507 = vmatmul.bf16.gmra.mxu0 %v5136_v61  ;;  %v5388_v55 = vor.u32 %v5686_v3, %v5387_v1 }
 0x1ec   : > { %v2676_v32 = vadd.f32 %v2675_v35, %v2587_v52  ;;  %3992 = vmatmul.bf16.gmra.mxu1 %v5384_v13 }
 0x1ee   : > { %3418 = vmatmul.bf16.gmra.mxu3 %v5132_v16  ;;  %v6641_v39 = vadd.f32 %v2764_v37, %v2676_v32  ;;  %v2100_v56 = vpop.f32.mrf.mxu2 }
 0x1ef   : > { %v2101_v26 = vadd.f32 %v2100_v56, %v6427_v36  ;;  %v5140_v36 = vor.u32 %v5625_v31, %v5139_v11  ;;  %v5627_v11 = vld [vmem:[#allocation2 + $0xc4] sm:$0xf]  ;;  %v5159_v31 = vld [vmem:[#allocation2 + $0xc8] sm:$0xf] }
 0x1f0   : > { %v2680_v14 = vpop.f32.mrf.mxu0 }
 0x1f1   : > { %v2589_v21 = vpop.f32.mrf.mxu3  ;;  %v2769_v33 = vpop.f32.mrf.mxu1 }
 0x1f2   : > { %v2590_v5 = vadd.f32 %v2589_v21, %v2101_v26 }
 0x1f4   : > { %v2679_v54 = vadd.f32 %v2678_v4, %v2590_v5  ;;  %v5151_v5 = vld [vmem:[#allocation2 + $0xc0] sm:$0xf] }
 0x1f6   : > { %v6644_v35 = vadd.f32 %v2767_v18, %v2679_v54  ;;  %v2102_v37 = vpop.f32.mrf.mxu2  ;;  %v5628_v54 = vld [vmem:[#allocation2 + $0xc8] sm:$0xf0] }
 0x1f7   : > { %v2103_v63 = vadd.f32 %v2102_v37, %v6438_v0  ;;  %v5160_v37 = vor.u32 %v5629_v42, %v5159_v31  ;;  %v5165_v31 = vld [vmem:[#allocation2 + $0xe4] sm:$0xf0]  ;;  %v5395_v42 = vld [vmem:[#allocation2 + $0xc4] sm:$0xf] }
 0x1f8   : > { %v2683_v62 = vpop.f32.mrf.mxu0 }
 0x1f9   : > { %v2591_v45 = vpop.f32.mrf.mxu3  ;;  %v2772_v4 = vpop.f32.mrf.mxu1 }
 0x1fa   : > { %v2592_v61 = vadd.f32 %v2591_v45, %v2103_v63  ;;  %v5156_v45 = vor.u32 %v5627_v11, %v5153_v8  ;;  %v5632_v11 = vld [vmem:[#allocation2 + $0xe8] sm:$0xf0]  ;;  %v5688_v8 = vld [vmem:[#allocation2 + $0xcc] sm:$0xf0] }
 0x1fb   : > { %3334 = vmatmul.bf16.gmra.mxu2 %v5140_v36  ;;  %3512 = vmatmul.bf16.gmra.mxu0 %v5148_v28  ;;  %v5392_v36 = vor.u32 %v5687_v49, %v5391_v25 }
 0x1fc   : > { %v2681_v16 = vadd.f32 %v2680_v14, %v2592_v61  ;;  %3997 = vmatmul.bf16.gmra.mxu1 %v5388_v55 }
 0x1fe   : > { %3423 = vmatmul.bf16.gmra.mxu3 %v5144_v15  ;;  %v6647_v13 = vadd.f32 %v2769_v33, %v2681_v16  ;;  %v2105_v52 = vpop.f32.mrf.mxu2 }
 0x1ff   : > { %v2106_v18 = vadd.f32 %v2105_v52, %v6448_v24  ;;  %v5152_v24 = vor.u32 %v5628_v54, %v5151_v5  ;;  %v5630_v5 = vld [vmem:[#allocation2 + $0xdc] sm:$0xf]  ;;  %v5171_v54 = vld [vmem:[#allocation2 + $0xe0] sm:$0xf] }
 0x200   : > { %v2685_v0 = vpop.f32.mrf.mxu0 }
 0x201   : > { %v2594_v32 = vpop.f32.mrf.mxu3  ;;  %v2774_v26 = vpop.f32.mrf.mxu1 }
 0x202   : > { %v2595_v56 = vadd.f32 %v2594_v32, %v2106_v18 }
 0x204   : > { %v2684_v21 = vadd.f32 %v2683_v62, %v2595_v56  ;;  %v5163_v56 = vld [vmem:[#allocation2 + $0xd8] sm:$0xf] }
 0x206   : > { %v6650_v14 = vadd.f32 %v2772_v4, %v2684_v21  ;;  %v2107_v33 = vpop.f32.mrf.mxu2  ;;  %v5631_v21 = vld [vmem:[#allocation2 + $0xe0] sm:$0xf0] }
 0x207   : > { %v2108_v1 = vadd.f32 %v2107_v33, %v6456_v50  ;;  %v5172_v33 = vor.u32 %v5632_v11, %v5171_v54  ;;  %v5177_v54 = vld [vmem:[#allocation2 + $0xfc] sm:$0xf0]  ;;  %v5399_v11 = vld [vmem:[#allocation2 + $0xdc] sm:$0xf] }
 0x208   : > { %v2688_v63 = vpop.f32.mrf.mxu0 }
 0x209   : > { %v2596_v3 = vpop.f32.mrf.mxu3  ;;  %v2777_v62 = vpop.f32.mrf.mxu1 }
 0x20a   : > { %v2597_v28 = vadd.f32 %v2596_v3, %v2108_v1  ;;  %v5168_v3 = vor.u32 %v5630_v5, %v5165_v31  ;;  %v5635_v5 = vld [vmem:[#allocation2 + $0x100] sm:$0xf0]  ;;  %v5689_v31 = vld [vmem:[#allocation2 + $0xe4] sm:$0xf0] }
 0x20b   : > { %3339 = vmatmul.bf16.gmra.mxu2 %v5152_v24  ;;  %3517 = vmatmul.bf16.gmra.mxu0 %v5160_v37  ;;  %v5396_v24 = vor.u32 %v5688_v8, %v5395_v42 }
 0x20c   : > { %v2686_v15 = vadd.f32 %v2685_v0, %v2597_v28  ;;  %4002 = vmatmul.bf16.gmra.mxu1 %v5392_v36 }
 0x20e   : > { %3428 = vmatmul.bf16.gmra.mxu3 %v5156_v45  ;;  %v6653_v55 = vadd.f32 %v2774_v26, %v2686_v15  ;;  %v2110_v61 = vpop.f32.mrf.mxu2 }
 0x20f   : > { %v2111_v4 = vadd.f32 %v2110_v61, %v6469_v12  ;;  %v5164_v12 = vor.u32 %v5631_v21, %v5163_v56  ;;  %v5633_v56 = vld [vmem:[#allocation2 + $0xf4] sm:$0xf]  ;;  %v5183_v21 = vld [vmem:[#allocation2 + $0xf8] sm:$0xf] }
 0x210   : > { %v2690_v50 = vpop.f32.mrf.mxu0 }
 0x211   : > { %v2599_v16 = vpop.f32.mrf.mxu3  ;;  %v2779_v18 = vpop.f32.mrf.mxu1 }
 0x212   : > { %v2600_v52 = vadd.f32 %v2599_v16, %v2111_v4 }
 0x214   : > { %v2689_v32 = vadd.f32 %v2688_v63, %v2600_v52  ;;  %v5175_v52 = vld [vmem:[#allocation2 + $0xf0] sm:$0xf] }
 0x216   : > { %v6656_v0 = vadd.f32 %v2777_v62, %v2689_v32  ;;  %v2112_v26 = vpop.f32.mrf.mxu2  ;;  %v5634_v32 = vld [vmem:[#allocation2 + $0xf8] sm:$0xf0] }
 0x217   : > { %v2113_v25 = vadd.f32 %v2112_v26, %v6480_v47  ;;  %v5176_v8 = vor.u32 %v5634_v32, %v5175_v52  ;;  %v5184_v26 = vor.u32 %v5635_v5, %v5183_v21  ;;  %v5636_v32 = vld [vmem:[#allocation2 + $0x10c] sm:$0xf]  ;;  %v5638_v21 = vld [vmem:[#allocation2 + $0x118] sm:$0xf0]  ;;  %v5189_v5 = vld [vmem:[#allocation2 + $0x114] sm:$0xf0] }
 0x218   : > { %v2693_v1 = vpop.f32.mrf.mxu0 }
 0x219   : > { %v2601_v49 = vpop.f32.mrf.mxu3  ;;  %v2782_v63 = vpop.f32.mrf.mxu1 }
 0x21a   : > { %v2602_v37 = vadd.f32 %v2601_v49, %v2113_v25  ;;  %v5180_v49 = vor.u32 %v5633_v56, %v5177_v54  ;;  %v5195_v56 = vld [vmem:[#allocation2 + $0x110] sm:$0xf]  ;;  %v5403_v54 = vld [vmem:[#allocation2 + $0xf4] sm:$0xf] }
 0x21b   : > { %3344 = vmatmul.bf16.gmra.mxu2 %v5164_v12  ;;  %3522 = vmatmul.bf16.gmra.mxu0 %v5172_v33  ;;  %v5400_v12 = vor.u32 %v5689_v31, %v5399_v11  ;;  %v5690_v11 = vld [vmem:[#allocation2 + $0xfc] sm:$0xf0] }
 0x21c   : > { %v2691_v45 = vadd.f32 %v2690_v50, %v2602_v37  ;;  %4007 = vmatmul.bf16.gmra.mxu1 %v5396_v24 }
 0x21e   : > { %3433 = vmatmul.bf16.gmra.mxu3 %v5168_v3  ;;  %v6659_v36 = vadd.f32 %v2779_v18, %v2691_v45  ;;  %v2115_v28 = vpop.f32.mrf.mxu2 }
 0x21f   : > { %v2116_v62 = vadd.f32 %v2115_v28, %v6490_v10 }
 0x220   : > { %v2695_v47 = vpop.f32.mrf.mxu0 }
 0x221   : > { %v2604_v15 = vpop.f32.mrf.mxu3  ;;  %v2784_v4 = vpop.f32.mrf.mxu1 }
 0x222   : > { %v2605_v61 = vadd.f32 %v2604_v15, %v2116_v62 }
 0x224   : > { %v2694_v16 = vadd.f32 %v2693_v1, %v2605_v61 }
 0x226   : > { %v6662_v50 = vadd.f32 %v2782_v63, %v2694_v16  ;;  %v2117_v18 = vpop.f32.mrf.mxu2  ;;  %v5187_v16 = vld [vmem:[#allocation2 + $0x108] sm:$0xf] }
 0x227   : > { %v2118_v42 = vadd.f32 %v2117_v18, %v6498_v46 }
 0x228   : > { %v3488_v25 = vpop.f32.mrf.mxu0 }
 0x229   : > { %v2606_v10 = vpop.f32.mrf.mxu3  ;;  %v3973_v1 = vpop.f32.mrf.mxu1 }
 0x22a   : > { %v2607_v33 = vadd.f32 %v2606_v10, %v2118_v42  ;;  %v4091_v63 = vmul.f32 %v3973_v1, %v3973_v1 }
 0x22b   : > { %3349 = vmatmul.bf16.gmra.mxu2 %v5176_v8  ;;  %3527 = vmatmul.bf16.gmra.mxu0 %v5184_v26  ;;  %v5196_v8 = vor.u32 %v5638_v21, %v5195_v56 }
 0x22c   : > { %v2696_v3 = vadd.f32 %v2695_v47, %v2607_v33  ;;  %4012 = vmatmul.bf16.gmra.mxu1 %v5400_v12  ;;  %v5192_v12 = vor.u32 %v5636_v32, %v5189_v5  ;;  %v5404_v33 = vor.u32 %v5690_v11, %v5403_v54  ;;  %v5199_v54 = vld [vmem:[#allocation2 + $0x120] sm:$0xf]  ;;  %v5640_v11 = vld [vmem:[#allocation2 + $0x128] sm:$0xf0] }
 0x22e   : > { %3438 = vmatmul.bf16.gmra.mxu3 %v5180_v49  ;;  %v6665_v24 = vadd.f32 %v2784_v4, %v2696_v3  ;;  %v3310_v37 = vpop.f32.mrf.mxu2  ;;  %v5637_v4 = vld [vmem:[#allocation2 + $0x110] sm:$0xf0] }
 0x22f   : > { %v5188_v10 = vor.u32 %v5637_v4, %v5187_v16 }
 0x230   : > { %v3490_v45 = vpop.f32.mrf.mxu0 }
 0x231   : > { %v3399_v46 = vpop.f32.mrf.mxu3  ;;  %v3975_v28 = vpop.f32.mrf.mxu1 }
 0x232   : > { %v3400_v62 = vadd.f32 %v3399_v46, %v3310_v37  ;;  %v4092_v15 = vmul.f32 %v3975_v28, %v3975_v28  ;;  %v5788_v47 = vpack.c.bf16 %v3975_v28, %v3973_v1  ;;  %v4053_v61 = vadd.f32 %v3975_v28, %v3973_v1 }
 0x234   : > { %5789 = vst [vmem:[%s6673_s19] sm:$0xff] %v5788_v47   ;;  %v4123_v52 = vadd.f32 %v4092_v15, %v4091_v63  ;;  %v3489_v31 = vadd.f32 %v3488_v25, %v3400_v62 }
 0x236   : > { %v3312_v18 = vpop.f32.mrf.mxu2  ;;  %v3568_v3 = vadd.f32 %v3489_v31, %v6514_v40  ;;  %v5639_v31 = vld [vmem:[#allocation2 + $0x124] sm:$0xf] }
 0x238   : > { %v3493_v49 = vpop.f32.mrf.mxu0  ;;  %v3638_v62 = vmul.f32 %v3568_v3, %v3568_v3 }
 0x239   : > { %v3401_v42 = vpop.f32.mrf.mxu3  ;;  %v3978_v1 = vpop.f32.mrf.mxu1 }
 0x23a   : > { %v3402_v26 = vadd.f32 %v3401_v42, %v3312_v18  ;;  %v4054_v46 = vadd.f32 %v4053_v61, %v3978_v1  ;;  %v4093_v63 = vmul.f32 %v3978_v1, %v3978_v1 }
 0x23b   : > { %3354 = vmatmul.bf16.gmra.mxu2 %v5188_v10  ;;  %3532 = vmatmul.bf16.gmra.mxu0 %v5196_v8  ;;  %v5207_v10 = vld [vmem:[#allocation2 + $0x128] sm:$0xf]  ;;  %v5641_v8 = vld [vmem:[#allocation2 + $0x130] sm:$0xf0] }
 0x23c   : > { %v3491_v37 = vadd.f32 %v3490_v45, %v3402_v26  ;;  %v4124_v25 = vadd.f32 %v4123_v52, %v4093_v63  ;;  %4017 = vmatmul.bf16.gmra.mxu1 %v5404_v33  ;;  %v5201_v26 = vld [vmem:[#allocation2 + $0x12c] sm:$0xf0]  ;;  %v5691_v33 = vld [vmem:[#allocation2 + $0x114] sm:$0xf0] }
 0x23e   : > { %v3569_v28 = vadd.f32 %v3491_v37, %v6521_v9  ;;  %3443 = vmatmul.bf16.gmra.mxu3 %v5192_v12  ;;  %v3315_v47 = vpop.f32.mrf.mxu2  ;;  %v5407_v12 = vld [vmem:[#allocation2 + $0x10c] sm:$0xf] }
 0x240   : > { %v3600_v15 = vadd.f32 %v3569_v28, %v3568_v3  ;;  %v3639_v40 = vmul.f32 %v3569_v28, %v3569_v28  ;;  %v5708_v45 = vpack.c.bf16 %v3569_v28, %v3568_v3  ;;  %v3495_v4 = vpop.f32.mrf.mxu0 }
 0x241   : > { %v3404_v61 = vpop.f32.mrf.mxu3  ;;  %v3980_v52 = vpop.f32.mrf.mxu1 }
 0x242   : > { %v3670_v16 = vadd.f32 %v3639_v40, %v3638_v62  ;;  %5709 = vst [vmem:[%s6683_s24] sm:$0xff] %v5708_v45   ;;  %v3405_v9 = vadd.f32 %v3404_v61, %v3315_v47  ;;  %v4094_v56 = vmul.f32 %v3980_v52, %v3980_v52  ;;  %v5793_v21 = vpack.c.bf16 %v3980_v52, %v3978_v1 }
 0x243   : > { %v4055_v5 = vadd.f32 %v4054_v46, %v3980_v52  ;;  %v5208_v62 = vor.u32 %v5641_v8, %v5207_v10  ;;  %v5204_v45 = vor.u32 %v5639_v31, %v5201_v26  ;;  %v5408_v47 = vor.u32 %v5691_v33, %v5407_v12  ;;  %v5211_v33 = vld [vmem:[#allocation2 + $0x138] sm:$0xf] }
 0x244   : > { %v3494_v32 = vadd.f32 %v3493_v49, %v3405_v9  ;;  %5880 = vst [vmem:[%s6673_s19 + $0x8] sm:$0xff] %v5793_v21   ;;  %v4125_v42 = vadd.f32 %v4124_v25, %v4094_v56  ;;  %v5200_v49 = vor.u32 %v5640_v11, %v5199_v54 }
 0x246   : > { %v3570_v18 = vadd.f32 %v3494_v32, %v6533_v59  ;;  %v3317_v63 = vpop.f32.mrf.mxu2 }
 0x248   : > { %v3601_v3 = vadd.f32 %v3600_v15, %v3570_v18  ;;  %v3640_v37 = vmul.f32 %v3570_v18, %v3570_v18  ;;  %v3498_v40 = vpop.f32.mrf.mxu0 }
 0x249   : > { %v3406_v28 = vpop.f32.mrf.mxu3  ;;  %v3983_v61 = vpop.f32.mrf.mxu1 }
 0x24a   : > { %v3671_v1 = vadd.f32 %v3670_v16, %v3640_v37  ;;  %v3407_v46 = vadd.f32 %v3406_v28, %v3317_v63  ;;  %v4056_v25 = vadd.f32 %v4055_v5, %v3983_v61  ;;  %v4095_v9 = vmul.f32 %v3983_v61, %v3983_v61  ;;  %v5644_v63 = vld [vmem:[#allocation2 + $0x148] sm:$0xf0]  ;;  %v5213_v28 = vld [vmem:[#allocation2 + $0x144] sm:$0xf0] }
 0x24b   : > { %3359 = vmatmul.bf16.gmra.mxu2 %v5200_v49  ;;  %3537 = vmatmul.bf16.gmra.mxu0 %v5208_v62  ;;  %v5411_v49 = vld [vmem:[#allocation2 + $0x124] sm:$0xf]  ;;  %v5692_v62 = vld [vmem:[#allocation2 + $0x12c] sm:$0xf0] }
 0x24c   : > { %v3496_v59 = vadd.f32 %v3495_v4, %v3407_v46  ;;  %v4126_v15 = vadd.f32 %v4125_v42, %v4095_v9  ;;  %4022 = vmatmul.bf16.gmra.mxu1 %v5408_v47  ;;  %v5642_v42 = vld [vmem:[#allocation2 + $0x13c] sm:$0xf] }
 0x24e   : > { %v3571_v52 = vadd.f32 %v3496_v59, %v6537_v29  ;;  %3448 = vmatmul.bf16.gmra.mxu3 %v5204_v45  ;;  %v3320_v16 = vpop.f32.mrf.mxu2  ;;  %v5643_v29 = vld [vmem:[#allocation2 + $0x140] sm:$0xf0] }
 0x250   : > { %v3602_v32 = vadd.f32 %v3601_v3, %v3571_v52  ;;  %v3641_v56 = vmul.f32 %v3571_v52, %v3571_v52  ;;  %v5713_v21 = vpack.c.bf16 %v3571_v52, %v3570_v18  ;;  %v3500_v10 = vpop.f32.mrf.mxu0  ;;  %v5219_v18 = vld [vmem:[#allocation2 + $0x140] sm:$0xf]  ;;  %v5216_v52 = vor.u32 %v5642_v42, %v5213_v28  ;;  %v5223_v28 = vld [vmem:[#allocation2 + $0x150] sm:$0xf] }
 0x251   : > { %v3409_v54 = vpop.f32.mrf.mxu3  ;;  %v3985_v4 = vpop.f32.mrf.mxu1  ;;  %v5220_v59 = vor.u32 %v5644_v63, %v5219_v18 }
 0x252   : > { %v3672_v11 = vadd.f32 %v3671_v1, %v3641_v56  ;;  %5865 = vst [vmem:[%s6683_s24 + $0x8] sm:$0xff] %v5713_v21   ;;  %v3410_v31 = vadd.f32 %v3409_v54, %v3320_v16  ;;  %v4096_v8 = vmul.f32 %v3985_v4, %v3985_v4  ;;  %v5798_v26 = vpack.c.bf16 %v3985_v4, %v3983_v61 }
 0x253   : > { %v4057_v12 = vadd.f32 %v4056_v25, %v3985_v4  ;;  %v5412_v56 = vor.u32 %v5692_v62, %v5411_v49 }
 0x254   : > { %v3499_v5 = vadd.f32 %v3498_v40, %v3410_v31  ;;  %5881 = vst [vmem:[%s6673_s19 + $0x10] sm:$0xff] %v5798_v26   ;;  %v4127_v3 = vadd.f32 %v4126_v15, %v4096_v8  ;;  %v5212_v40 = vor.u32 %v5643_v29, %v5211_v33 }
 0x256   : > { %v3572_v37 = vadd.f32 %v3499_v5, %v6552_v7  ;;  %v3322_v45 = vpop.f32.mrf.mxu2 }
 0x258   : > { %v3603_v1 = vadd.f32 %v3602_v32, %v3572_v37  ;;  %v3642_v46 = vmul.f32 %v3572_v37, %v3572_v37  ;;  %v3503_v9 = vpop.f32.mrf.mxu0 }
 0x259   : > { %v3411_v47 = vpop.f32.mrf.mxu3  ;;  %v3988_v21 = vpop.f32.mrf.mxu1 }
 0x25a   : > { %v3673_v61 = vadd.f32 %v3672_v11, %v3642_v46  ;;  %v3412_v25 = vadd.f32 %v3411_v47, %v3322_v45  ;;  %v4058_v15 = vadd.f32 %v4057_v12, %v3988_v21  ;;  %v4097_v16 = vmul.f32 %v3988_v21, %v3988_v21  ;;  %v5225_v46 = vld [vmem:[#allocation2 + $0x15c] sm:$0xf0]  ;;  %v5415_v45 = vld [vmem:[#allocation2 + $0x13c] sm:$0xf]  ;;  %v5693_v47 = vld [vmem:[#allocation2 + $0x144] sm:$0xf0] }
 0x25b   : > { %3364 = vmatmul.bf16.gmra.mxu2 %v5212_v40  ;;  %3542 = vmatmul.bf16.gmra.mxu0 %v5220_v59 }
 0x25c   : > { %v3501_v7 = vadd.f32 %v3500_v10, %v3412_v25  ;;  %v4128_v32 = vadd.f32 %v4127_v3, %v4097_v16  ;;  %4027 = vmatmul.bf16.gmra.mxu1 %v5412_v56  ;;  %v5645_v3 = vld [vmem:[#allocation2 + $0x154] sm:$0xf]  ;;  %v408_v16 = vld [vmem:[%s5995_s14 + $0xcc] sm:$0xf] }
 0x25e   : > { %v3573_v54 = vadd.f32 %v3501_v7, %v6559_v41  ;;  %3453 = vmatmul.bf16.gmra.mxu3 %v5216_v52  ;;  %v3325_v11 = vpop.f32.mrf.mxu2  ;;  %v5646_v41 = vld [vmem:[#allocation2 + $0x158] sm:$0xf0] }
 0x260   : > { %v3604_v31 = vadd.f32 %v3603_v1, %v3573_v54  ;;  %v3643_v4 = vmul.f32 %v3573_v54, %v3573_v54  ;;  %v5718_v5 = vpack.c.bf16 %v3573_v54, %v3572_v37  ;;  %v3505_v29 = vpop.f32.mrf.mxu0  ;;  %v5231_v37 = vld [vmem:[#allocation2 + $0x158] sm:$0xf]  ;;  %v5647_v1 = vld [vmem:[#allocation2 + $0x160] sm:$0xf0] }
 0x261   : > { %v3414_v8 = vpop.f32.mrf.mxu3  ;;  %v3990_v10 = vpop.f32.mrf.mxu1  ;;  %v5232_v52 = vor.u32 %v5647_v1, %v5231_v37 }
 0x262   : > { %v3674_v26 = vadd.f32 %v3673_v61, %v3643_v4  ;;  %5866 = vst [vmem:[%s6683_s24 + $0x10] sm:$0xff] %v5718_v5   ;;  %v3415_v33 = vadd.f32 %v3414_v8, %v3325_v11  ;;  %v4098_v42 = vmul.f32 %v3990_v10, %v3990_v10  ;;  %v5803_v18 = vpack.c.bf16 %v3990_v10, %v3988_v21 }
 0x263   : > { %v4059_v63 = vadd.f32 %v4058_v15, %v3990_v10  ;;  %v5228_v15 = vor.u32 %v5645_v3, %v5225_v46  ;;  %v826_v8 = vshll.u32 %v408_v16, 16  ;;  %v410_v10 = vld [vmem:[%s5995_s14 + $0xd4] sm:$0x1]  ;;  %v969_v46 = vld [vmem:[%s5995_s14 + $0xcc] sm:$0xe] }
 0x264   : > { %v3504_v12 = vadd.f32 %v3503_v9, %v3415_v33  ;;  %5882 = vst [vmem:[%s6673_s19 + $0x18] sm:$0xff] %v5803_v18   ;;  %v4129_v62 = vadd.f32 %v4128_v32, %v4098_v42  ;;  %v5224_v9 = vor.u32 %v5646_v41, %v5223_v28  ;;  %v409_v32 = vld [vmem:[%s5995_s14 + $0xd0] sm:$0xf] }
 0x265   : > { %v828_v18 = vrot.slane %v826_v8, 5  ;;  %v970_v28 = vld [vmem:[%s5995_s14 + $0xd0] sm:$0xf] }
 0x266   : > { %v3574_v49 = vadd.f32 %v3504_v12, %v6571_v44  ;;  %v3327_v61 = vpop.f32.mrf.mxu2  ;;  %v5416_v44 = vor.u32 %v5693_v47, %v5415_v45  ;;  %v832_v12 = vshll.u32 %v409_v32, 16 }
 0x268   : > { %v3605_v40 = vadd.f32 %v3604_v31, %v3574_v49  ;;  %v3644_v59 = vmul.f32 %v3574_v49, %v3574_v49  ;;  %v3508_v7 = vpop.f32.mrf.mxu0  ;;  %v823_v31 = vshrl.u32 %v408_v16, 16  ;;  %v320_v16 = vld [vmem:[%s5995_s14 + $0xd0] sm:$0xf] }
 0x269   : > { %v3416_v25 = vpop.f32.mrf.mxu3  ;;  %v3993_v54 = vpop.f32.mrf.mxu1  ;;  %356 = vst [vmem:[#allocation2 + $0x1a4] sm:$0xf] %v320_v16 }
 0x26a   : > { %v3675_v56 = vadd.f32 %v3674_v26, %v3644_v59  ;;  %v3417_v21 = vadd.f32 %v3416_v25, %v3327_v61  ;;  %v4060_v5 = vadd.f32 %v4059_v63, %v3993_v54  ;;  %v4099_v11 = vmul.f32 %v3993_v54, %v3993_v54 }
 0x26b   : > { %3369 = vmatmul.bf16.gmra.mxu2 %v5224_v9  ;;  %3547 = vmatmul.bf16.gmra.mxu0 %v5232_v52  ;;  %v825_v42 = vrot.slane %v823_v31, 4  ;;  %v842_v63 = vshll.u32 %v410_v10, 16  ;;  %v5235_v10 = vld [vmem:[#allocation2 + $0x168] sm:$0xf] }
 0x26c   : > { %v3506_v4 = vadd.f32 %v3505_v29, %v3417_v21  ;;  %v4130_v26 = vadd.f32 %v4129_v62, %v4099_v11  ;;  %4032 = vmatmul.bf16.gmra.mxu1 %v5416_v44  ;;  %v836_v29 = vshrl.u32 %v409_v32, 16  ;;  %v971_v62 = vld [vmem:[%s5995_s14 + $0xd4] sm:$0x1]  ;;  %v4404_v21 = vrot.slane %v969_v46, 9 }
 0x26d   : > { %v829_v47 = vor.u32 %v828_v18, %v825_v42  ;;  %v844_v61 = vrot.slane %v842_v63, 5  ;;  %v5237_v42 = vld [vmem:[#allocation2 + $0x174] sm:$0xf0] }
 0x26e   : > { %v3575_v33 = vadd.f32 %v3506_v4, %v6575_v60  ;;  %3458 = vmatmul.bf16.gmra.mxu3 %v5228_v15  ;;  %v3330_v1 = vpop.f32.mrf.mxu2  ;;  %v834_v60 = vrot.slane %v832_v12, 5  ;;  %v838_v59 = vrot.slane %v836_v29, 4  ;;  %v1150_v15 = vrot.slane %v970_v28, 5  ;;  %v5649_v12 = vld [vmem:[#allocation2 + $0x170] sm:$0xf0] }
 0x26f   : > { %v1153_v4 = vrot.slane %v971_v62, 5 }
 0x270   : > { %v3606_v41 = vadd.f32 %v3605_v40, %v3575_v33  ;;  %v3645_v3 = vmul.f32 %v3575_v33, %v3575_v33  ;;  %v5723_v37 = vpack.c.bf16 %v3575_v33, %v3574_v49  ;;  %v3510_v52 = vpop.f32.mrf.mxu0  ;;  %v319_v40 = vld [vmem:[%s5995_s14 + $0xcc] sm:$0xf]  ;;  %v830_v49 = vrot.slane %v829_v47, 4  ;;  %s4385_s14 = sshll.u32 %s6820_s22, 1 }
 0x271   : > { %v3419_v45 = vpop.f32.mrf.mxu3  ;;  %v3995_v44 = vpop.f32.mrf.mxu1  ;;  %v839_v32 = vor.u32 %v838_v59, %v834_v60  ;;  %355 = vst [vmem:[#allocation2 + $0x198] sm:$0xf] %v319_v40  ;;  %v1152_v63 = vrot.slane %v1150_v15, 4  ;;  %s284_s27 = scalar_lea.vmem %s6814_s6, %s4385_s14  ;;  %s280_s29 = scalar_lea.vmem %s6813_s5, %s4385_s14 }
 0x272   : > { %v3676_v25 = vadd.f32 %v3675_v56, %v3645_v3  ;;  %5867 = vst [vmem:[%s6683_s24 + $0x18] sm:$0xff] %v5723_v37   ;;  %v3420_v9 = vadd.f32 %v3419_v45, %v3330_v1  ;;  %v4061_v31 = vadd.f32 %v4060_v5, %v3995_v44  ;;  %v4100_v8 = vmul.f32 %v3995_v44, %v3995_v44  ;;  %v5648_v56 = vld [vmem:[#allocation2 + $0x16c] sm:$0xf]  ;;  %v5243_v37 = vld [vmem:[#allocation2 + $0x170] sm:$0xf] }
 0x273   : > { %v5808_v33 = vpack.c.bf16 %v3995_v44, %v3993_v54  ;;  %v835_v18 = vsel %vm6022_vm2, %v830_v49, %v834_v60  ;;  %v840_v29 = vrot.slane %v839_v32, 4  ;;  %v1151_v54 = vsel %vm6278_vm5, %v4404_v21, %v1150_v15  ;;  %v5419_v5 = vld [vmem:[#allocation2 + $0x154] sm:$0xf]  ;;  %v5694_v1 = vld [vmem:[#allocation2 + $0x15c] sm:$0xf0] }
 0x274   : > { %v3509_v11 = vadd.f32 %v3508_v7, %v3420_v9  ;;  %v4131_v3 = vadd.f32 %v4130_v26, %v4100_v8  ;;  %v5650_v7 = vld [vmem:[#allocation2 + $0x178] sm:$0xf0]  ;;  %916 = vst [vmem:[#allocation2 + $0x19c] sm:$0xf] %v835_v18  ;;  %v1154_v60 = vsel %vm6278_vm5, %v1152_v63, %v1153_v4  ;;  %v5236_v26 = vor.u32 %v5649_v12, %v5235_v10  ;;  %v5651_v63 = vld [vmem:[#allocation2 + $0x184] sm:$0xf] }
 0x275   : > { %5883 = vst [vmem:[%s6673_s19 + $0x20] sm:$0xff] %v5808_v33   ;;  %v845_v46 = vsel %vm6022_vm2, %v840_v29, %v844_v61  ;;  %v5244_v59 = vor.u32 %v5650_v7, %v5243_v37  ;;  %v5240_v15 = vor.u32 %v5648_v56, %v5237_v42  ;;  %v5420_v40 = vor.u32 %v5694_v1, %v5419_v5  ;;  %v5247_v29 = vld [vmem:[#allocation2 + $0x180] sm:$0xf]  ;;  %v5653_v7 = vld [vmem:[#allocation2 + $0x190] sm:$0xf0] }
 0x276   : > { %v3576_v28 = vadd.f32 %v3509_v11, %v6590_v19  ;;  %v3332_v47 = vpop.f32.mrf.mxu2  ;;  %917 = vst [vmem:[#allocation2 + $0x1a8] sm:$0xf] %v845_v46  ;;  %v5423_v5 = vld [vmem:[#allocation2 + $0x16c] sm:$0xf]  ;;  %v5695_v1 = vld [vmem:[#allocation2 + $0x174] sm:$0xf0] }
 0x277   : > { %1225 = vst [vmem:[#allocation2 + $0x1a0] sm:$0xf] %v1151_v54  ;;  %v5249_v54 = vld [vmem:[#allocation2 + $0x18c] sm:$0xf0] }
 0x278   : > { %v3607_v62 = vadd.f32 %v3606_v41, %v3576_v28  ;;  %v3646_v45 = vmul.f32 %v3576_v28, %v3576_v28  ;;  %v3513_v21 = vpop.f32.mrf.mxu0  ;;  %1226 = vst [vmem:[#allocation2 + $0x1ac] sm:$0xf] %v1154_v60 }
 0x279   : > { %v3421_v19 = vpop.f32.mrf.mxu3  ;;  %v3998_v38 = vpop.f32.mrf.mxu1 }
 0x27a   : > { %v3677_v9 = vadd.f32 %v3676_v25, %v3646_v45  ;;  %v3422_v44 = vadd.f32 %v3421_v19, %v3332_v47  ;;  %v4062_v16 = vadd.f32 %v4061_v31, %v3998_v38  ;;  %v4101_v17 = vmul.f32 %v3998_v38, %v3998_v38 }
 0x27b   : > { %3374 = vmatmul.bf16.gmra.mxu2 %v5236_v26  ;;  %3552 = vmatmul.bf16.gmra.mxu0 %v5244_v59 }
 0x27c   : > { %v3511_v61 = vadd.f32 %v3510_v52, %v3422_v44  ;;  %v4132_v49 = vadd.f32 %v4131_v3, %v4101_v17  ;;  %4037 = vmatmul.bf16.gmra.mxu1 %v5420_v40  ;;  %v5252_v44 = vor.u32 %v5651_v63, %v5249_v54 }
 0x27e   : > { %v3577_v41 = vadd.f32 %v3511_v61, %v6596_v6  ;;  %3463 = vmatmul.bf16.gmra.mxu3 %v5240_v15  ;;  %v3335_v11 = vpop.f32.mrf.mxu2  ;;  %v5652_v6 = vld [vmem:[#allocation2 + $0x188] sm:$0xf0] }
 0x27f   : > { %v5248_v47 = vor.u32 %v5652_v6, %v5247_v29  ;;  %v5267_v6 = vld [vmem:[#allocation2 + $0x1a0] sm:$0xf]  ;;  %v5656_v63 = vld [vmem:[#allocation2 + $0x1a8] sm:$0xf0] }
 0x280   : > { %v3608_v32 = vadd.f32 %v3607_v62, %v3577_v41  ;;  %v3647_v4 = vmul.f32 %v3577_v41, %v3577_v41  ;;  %v5728_v25 = vpack.c.bf16 %v3577_v41, %v3576_v28  ;;  %v3515_v12 = vpop.f32.mrf.mxu0  ;;  %v5255_v28 = vld [vmem:[#allocation2 + $0x188] sm:$0xf] }
 0x281   : > { %v3424_v8 = vpop.f32.mrf.mxu3  ;;  %v4000_v52 = vpop.f32.mrf.mxu1  ;;  %v5256_v19 = vor.u32 %v5653_v7, %v5255_v28  ;;  %v5696_v28 = vld [vmem:[#allocation2 + $0x18c] sm:$0xf0] }
 0x282   : > { %v3678_v33 = vadd.f32 %v3677_v9, %v3647_v4  ;;  %5868 = vst [vmem:[%s6683_s24 + $0x20] sm:$0xff] %v5728_v25   ;;  %v3425_v10 = vadd.f32 %v3424_v8, %v3335_v11  ;;  %v4063_v56 = vadd.f32 %v4062_v16, %v4000_v52  ;;  %v4102_v42 = vmul.f32 %v4000_v52, %v4000_v52 }
 0x283   : > { %v5813_v18 = vpack.c.bf16 %v4000_v52, %v3998_v38 }
 0x284   : > { %v3514_v31 = vadd.f32 %v3513_v21, %v3425_v10  ;;  %v4133_v37 = vadd.f32 %v4132_v49, %v4102_v42  ;;  %v5424_v21 = vor.u32 %v5695_v1, %v5423_v5  ;;  %v5427_v42 = vld [vmem:[#allocation2 + $0x184] sm:$0xf] }
 0x285   : > { %5884 = vst [vmem:[%s6673_s19 + $0x28] sm:$0xff] %v5813_v18  }
 0x286   : > { %v3578_v3 = vadd.f32 %v3514_v31, %v6602_v27  ;;  %v3337_v62 = vpop.f32.mrf.mxu2 }
 0x288   : > { %v3609_v46 = vadd.f32 %v3608_v32, %v3578_v3  ;;  %v3648_v60 = vmul.f32 %v3578_v3, %v3578_v3  ;;  %v3518_v9 = vpop.f32.mrf.mxu0 }
 0x289   : > { %v3426_v45 = vpop.f32.mrf.mxu3  ;;  %v4003_v15 = vpop.f32.mrf.mxu1 }
 0x28a   : > { %v3679_v26 = vadd.f32 %v3678_v33, %v3648_v60  ;;  %v3427_v59 = vadd.f32 %v3426_v45, %v3337_v62  ;;  %v4064_v40 = vadd.f32 %v4063_v56, %v4003_v15  ;;  %v4103_v38 = vmul.f32 %v4003_v15, %v4003_v15  ;;  %v5259_v56 = vld [vmem:[#allocation2 + $0x198] sm:$0xf] }
 0x28b   : > { %3379 = vmatmul.bf16.gmra.mxu2 %v5248_v47  ;;  %3557 = vmatmul.bf16.gmra.mxu0 %v5256_v19  ;;  %v5268_v60 = vor.u32 %v5656_v63, %v5267_v6 }
 0x28c   : > { %v3516_v27 = vadd.f32 %v3515_v12, %v3427_v59  ;;  %v4134_v16 = vadd.f32 %v4133_v37, %v4103_v38  ;;  %4042 = vmatmul.bf16.gmra.mxu1 %v5424_v21  ;;  %v5261_v37 = vld [vmem:[#allocation2 + $0x1a4] sm:$0xf0] }
 0x28e   : > { %v3579_v61 = vadd.f32 %v3516_v27, %v6605_v51  ;;  %3468 = vmatmul.bf16.gmra.mxu3 %v5252_v44  ;;  %v3340_v32 = vpop.f32.mrf.mxu2  ;;  %v5655_v51 = vld [vmem:[#allocation2 + $0x1a0] sm:$0xf0] }
 0x290   : > { %v3610_v17 = vadd.f32 %v3609_v46, %v3579_v61  ;;  %v3649_v41 = vmul.f32 %v3579_v61, %v3579_v61  ;;  %v5733_v49 = vpack.c.bf16 %v3579_v61, %v3578_v3  ;;  %v3520_v8 = vpop.f32.mrf.mxu0  ;;  %v5654_v3 = vld [vmem:[#allocation2 + $0x19c] sm:$0xf]  ;;  %v5260_v46 = vor.u32 %v5655_v51, %v5259_v56 }
 0x291   : > { %v3429_v4 = vpop.f32.mrf.mxu3  ;;  %v4005_v33 = vpop.f32.mrf.mxu1  ;;  %v5264_v19 = vor.u32 %v5654_v3, %v5261_v37 }
 0x292   : > { %v3680_v25 = vadd.f32 %v3679_v26, %v3649_v41  ;;  %5869 = vst [vmem:[%s6683_s24 + $0x28] sm:$0xff] %v5733_v49   ;;  %v3430_v11 = vadd.f32 %v3429_v4, %v3340_v32  ;;  %v4065_v12 = vadd.f32 %v4064_v40, %v4005_v33  ;;  %v4104_v52 = vmul.f32 %v4005_v33, %v4005_v33 }
 0x293   : > { %v5818_v31 = vpack.c.bf16 %v4005_v33, %v4003_v15  ;;  %v5428_v26 = vor.u32 %v5696_v28, %v5427_v42 }
 0x294   : > { %v3519_v10 = vadd.f32 %v3518_v9, %v3430_v11  ;;  %v4135_v29 = vadd.f32 %v4134_v16, %v4104_v52 }
 0x295   : > { %5885 = vst [vmem:[%s6673_s19 + $0x30] sm:$0xff] %v5818_v31  }
 0x296   : > { %v3580_v18 = vadd.f32 %v3519_v10, %v6608_v43  ;;  %v3342_v5 = vpop.f32.mrf.mxu2 }
 0x298   : > { %v3611_v7 = vadd.f32 %v3610_v17, %v3580_v18  ;;  %v3650_v54 = vmul.f32 %v3580_v18, %v3580_v18  ;;  %v3523_v47 = vpop.f32.mrf.mxu0 }
 0x299   : > { %v3431_v1 = vpop.f32.mrf.mxu3  ;;  %v4008_v59 = vpop.f32.mrf.mxu1 }
 0x29a   : > { %v3681_v62 = vadd.f32 %v3680_v25, %v3650_v54  ;;  %v3432_v45 = vadd.f32 %v3431_v1, %v3342_v5  ;;  %v4066_v9 = vadd.f32 %v4065_v12, %v4008_v59  ;;  %v4105_v44 = vmul.f32 %v4008_v59, %v4008_v59 }
 0x29b   : > { %3384 = vmatmul.bf16.gmra.mxu2 %v5260_v46  ;;  %3562 = vmatmul.bf16.gmra.mxu0 %v5268_v60 }
 0x29c   : > { %v3521_v43 = vadd.f32 %v3520_v8, %v3432_v45  ;;  %v4136_v15 = vadd.f32 %v4135_v29, %v4105_v44  ;;  %4047 = vmatmul.bf16.gmra.mxu1 %v5428_v26 }
 0x29e   : > { %v3581_v21 = vadd.f32 %v3521_v43, %v6611_v34  ;;  %3473 = vmatmul.bf16.gmra.mxu3 %v5264_v19  ;;  %v3345_v61 = vpop.f32.mrf.mxu2 }
 0x2a0   : > { %v3612_v27 = vadd.f32 %v3611_v7, %v3581_v21  ;;  %v3651_v40 = vmul.f32 %v3581_v21, %v3581_v21  ;;  %v5738_v38 = vpack.c.bf16 %v3581_v21, %v3580_v18  ;;  %v3525_v49 = vpop.f32.mrf.mxu0 }
 0x2a1   : > { %v3434_v16 = vpop.f32.mrf.mxu3  ;;  %v4010_v32 = vpop.f32.mrf.mxu1 }
 0x2a2   : > { %v3682_v17 = vadd.f32 %v3681_v62, %v3651_v40  ;;  %5870 = vst [vmem:[%s6683_s24 + $0x30] sm:$0xff] %v5738_v38   ;;  %v3435_v41 = vadd.f32 %v3434_v16, %v3345_v61  ;;  %v4067_v25 = vadd.f32 %v4066_v9, %v4010_v32  ;;  %v4106_v11 = vmul.f32 %v4010_v32, %v4010_v32 }
 0x2a3   : > { %v5823_v8 = vpack.c.bf16 %v4010_v32, %v4008_v59 }
 0x2a4   : > { %v3524_v4 = vadd.f32 %v3523_v47, %v3435_v41  ;;  %v4137_v33 = vadd.f32 %v4136_v15, %v4106_v11 }
 0x2a5   : > { %5886 = vst [vmem:[%s6673_s19 + $0x38] sm:$0xff] %v5823_v8  }
 0x2a6   : > { %v3582_v34 = vadd.f32 %v3524_v4, %v6614_v30  ;;  %v3347_v52 = vpop.f32.mrf.mxu2 }
 0x2a8   : > { %v3613_v10 = vadd.f32 %v3612_v27, %v3582_v34  ;;  %v3652_v12 = vmul.f32 %v3582_v34, %v3582_v34  ;;  %v3528_v42 = vpop.f32.mrf.mxu0 }
 0x2a9   : > { %v3436_v31 = vpop.f32.mrf.mxu3  ;;  %v4013_v18 = vpop.f32.mrf.mxu1 }
 0x2aa   : > { %v3683_v56 = vadd.f32 %v3682_v17, %v3652_v12  ;;  %v3437_v51 = vadd.f32 %v3436_v31, %v3347_v52  ;;  %v4068_v6 = vadd.f32 %v4067_v25, %v4013_v18  ;;  %v4107_v63 = vmul.f32 %v4013_v18, %v4013_v18 }
 0x2ac   : > { %v3526_v29 = vadd.f32 %v3525_v49, %v3437_v51  ;;  %v4138_v37 = vadd.f32 %v4137_v33, %v4107_v63 }
 0x2ae   : > { %v3583_v3 = vadd.f32 %v3526_v29, %v6617_v48  ;;  %v3350_v54 = vpop.f32.mrf.mxu2 }
 0x2b0   : > { %v3614_v28 = vadd.f32 %v3613_v10, %v3583_v3  ;;  %v3653_v30 = vmul.f32 %v3583_v3, %v3583_v3  ;;  %v5743_v7 = vpack.c.bf16 %v3583_v3, %v3582_v34  ;;  %v3530_v60 = vpop.f32.mrf.mxu0 }
 0x2b1   : > { %v3439_v5 = vpop.f32.mrf.mxu3  ;;  %v4015_v62 = vpop.f32.mrf.mxu1 }
 0x2b2   : > { %v3684_v1 = vadd.f32 %v3683_v56, %v3653_v30  ;;  %5871 = vst [vmem:[%s6683_s24 + $0x38] sm:$0xff] %v5743_v7   ;;  %v3440_v46 = vadd.f32 %v3439_v5, %v3350_v54  ;;  %v4069_v47 = vadd.f32 %v4068_v6, %v4015_v62  ;;  %v4108_v19 = vmul.f32 %v4015_v62, %v4015_v62 }
 0x2b3   : > { %v5828_v26 = vpack.c.bf16 %v4015_v62, %v4013_v18 }
 0x2b4   : > { %v3529_v45 = vadd.f32 %v3528_v42, %v3440_v46  ;;  %v4139_v43 = vadd.f32 %v4138_v37, %v4108_v19 }
 0x2b5   : > { %5887 = vst [vmem:[%s6673_s19 + $0x40] sm:$0xff] %v5828_v26  }
 0x2b6   : > { %v3584_v59 = vadd.f32 %v3529_v45, %v6620_v23  ;;  %v3352_v44 = vpop.f32.mrf.mxu2 }
 0x2b8   : > { %v3615_v48 = vadd.f32 %v3614_v28, %v3584_v59  ;;  %v3654_v9 = vmul.f32 %v3584_v59, %v3584_v59  ;;  %v3533_v40 = vpop.f32.mrf.mxu0 }
 0x2b9   : > { %v3441_v21 = vpop.f32.mrf.mxu3  ;;  %v4018_v38 = vpop.f32.mrf.mxu1 }
 0x2ba   : > { %v3685_v15 = vadd.f32 %v3684_v1, %v3654_v9  ;;  %v3442_v27 = vadd.f32 %v3441_v21, %v3352_v44  ;;  %v4070_v16 = vadd.f32 %v4069_v47, %v4018_v38  ;;  %v4109_v17 = vmul.f32 %v4018_v38, %v4018_v38 }
 0x2bc   : > { %v3531_v61 = vadd.f32 %v3530_v60, %v3442_v27  ;;  %v4140_v49 = vadd.f32 %v4139_v43, %v4109_v17 }
 0x2be   : > { %v3585_v41 = vadd.f32 %v3531_v61, %v6623_v57  ;;  %v3355_v25 = vpop.f32.mrf.mxu2 }
 0x2c0   : > { %v3616_v32 = vadd.f32 %v3615_v48, %v3585_v41  ;;  %v3655_v23 = vmul.f32 %v3585_v41, %v3585_v41  ;;  %v5748_v4 = vpack.c.bf16 %v3585_v41, %v3584_v59  ;;  %v3535_v33 = vpop.f32.mrf.mxu0 }
 0x2c1   : > { %v3444_v11 = vpop.f32.mrf.mxu3  ;;  %v4020_v10 = vpop.f32.mrf.mxu1 }
 0x2c2   : > { %v3686_v8 = vadd.f32 %v3685_v15, %v3655_v23  ;;  %5872 = vst [vmem:[%s6683_s24 + $0x40] sm:$0xff] %v5748_v4   ;;  %v3445_v34 = vadd.f32 %v3444_v11, %v3355_v25  ;;  %v4071_v52 = vadd.f32 %v4070_v16, %v4020_v10  ;;  %v4110_v31 = vmul.f32 %v4020_v10, %v4020_v10 }
 0x2c3   : > { %v5833_v56 = vpack.c.bf16 %v4020_v10, %v4018_v38 }
 0x2c4   : > { %v3534_v12 = vadd.f32 %v3533_v40, %v3445_v34  ;;  %v4141_v42 = vadd.f32 %v4140_v49, %v4110_v31 }
 0x2c5   : > { %5888 = vst [vmem:[%s6673_s19 + $0x48] sm:$0xff] %v5833_v56  }
 0x2c6   : > { %v3586_v51 = vadd.f32 %v3534_v12, %v6626_v20  ;;  %v3357_v29 = vpop.f32.mrf.mxu2 }
 0x2c8   : > { %v3617_v57 = vadd.f32 %v3616_v32, %v3586_v51  ;;  %v3656_v18 = vmul.f32 %v3586_v51, %v3586_v51  ;;  %v3538_v37 = vpop.f32.mrf.mxu0 }
 0x2c9   : > { %v3446_v6 = vpop.f32.mrf.mxu3  ;;  %v4023_v28 = vpop.f32.mrf.mxu1 }
 0x2ca   : > { %v3687_v63 = vadd.f32 %v3686_v8, %v3656_v18  ;;  %v3447_v3 = vadd.f32 %v3446_v6, %v3357_v29  ;;  %v6736_v7 = vadd.f32 %v4071_v52, %v4023_v28  ;;  %v4111_v54 = vmul.f32 %v4023_v28, %v4023_v28 }
 0x2cc   : > { %v3536_v30 = vadd.f32 %v3535_v33, %v3447_v3  ;;  %v6739_v1 = vadd.f32 %v4141_v42, %v4111_v54 }
 0x2ce   : > { %v3587_v5 = vadd.f32 %v3536_v30, %v6629_v53  ;;  %v3360_v62 = vpop.f32.mrf.mxu2 }
 0x2d0   : > { %v3618_v20 = vadd.f32 %v3617_v57, %v3587_v5  ;;  %v3657_v46 = vmul.f32 %v3587_v5, %v3587_v5  ;;  %v5753_v60 = vpack.c.bf16 %v3587_v5, %v3586_v51  ;;  %v3540_v26 = vpop.f32.mrf.mxu0 }
 0x2d1   : > { %v3449_v45 = vpop.f32.mrf.mxu3  ;;  %v6742_v59 = vpop.f32.mrf.mxu1 }
 0x2d2   : > { %v3688_v47 = vadd.f32 %v3687_v63, %v3657_v46  ;;  %5873 = vst [vmem:[%s6683_s24 + $0x48] sm:$0xff] %v5753_v60   ;;  %v3450_v19 = vadd.f32 %v3449_v45, %v3360_v62  ;;  %v5838_v48 = vpack.c.bf16 %v6742_v59, %v4023_v28 }
 0x2d4   : > { %v3539_v43 = vadd.f32 %v3538_v37, %v3450_v19  ;;  %5889 = vst [vmem:[%s6673_s19 + $0x50] sm:$0xff] %v5838_v48  }
 0x2d6   : > { %v3588_v9 = vadd.f32 %v3539_v43, %v6632_v22  ;;  %v3362_v21 = vpop.f32.mrf.mxu2 }
 0x2d8   : > { %v3619_v53 = vadd.f32 %v3618_v20, %v3588_v9  ;;  %v3658_v44 = vmul.f32 %v3588_v9, %v3588_v9  ;;  %v3543_v38 = vpop.f32.mrf.mxu0 }
 0x2d9   : > { %v3451_v15 = vpop.f32.mrf.mxu3  ;;  %v6747_v61 = vpop.f32.mrf.mxu1 }
 0x2da   : > { %v3689_v27 = vadd.f32 %v3688_v47, %v3658_v44  ;;  %v3452_v40 = vadd.f32 %v3451_v15, %v3362_v21 }
 0x2dc   : > { %v3541_v16 = vadd.f32 %v3540_v26, %v3452_v40 }
 0x2de   : > { %v3589_v17 = vadd.f32 %v3541_v16, %v6635_v2  ;;  %v3365_v23 = vpop.f32.mrf.mxu2 }
 0x2e0   : > { %v3620_v41 = vadd.f32 %v3619_v53, %v3589_v17  ;;  %v3659_v49 = vmul.f32 %v3589_v17, %v3589_v17  ;;  %v5758_v32 = vpack.c.bf16 %v3589_v17, %v3588_v9  ;;  %v3545_v11 = vpop.f32.mrf.mxu0 }
 0x2e1   : > { %v3454_v22 = vpop.f32.mrf.mxu3  ;;  %v6751_v8 = vpop.f32.mrf.mxu1 }
 0x2e2   : > { %v3690_v4 = vadd.f32 %v3689_v27, %v3659_v49  ;;  %5874 = vst [vmem:[%s6683_s24 + $0x50] sm:$0xff] %v5758_v32   ;;  %v3455_v25 = vadd.f32 %v3454_v22, %v3365_v23  ;;  %v5843_v33 = vpack.c.bf16 %v6751_v8, %v6747_v61 }
 0x2e4   : > { %v3544_v34 = vadd.f32 %v3543_v38, %v3455_v25  ;;  %5890 = vst [vmem:[%s6673_s19 + $0x58] sm:$0xff] %v5843_v33  }
 0x2e6   : > { %v3590_v10 = vadd.f32 %v3544_v34, %v6638_v58  ;;  %v3367_v52 = vpop.f32.mrf.mxu2 }
 0x2e8   : > { %v3621_v12 = vadd.f32 %v3620_v41, %v3590_v10  ;;  %v3660_v2 = vmul.f32 %v3590_v10, %v3590_v10  ;;  %v3548_v42 = vpop.f32.mrf.mxu0 }
 0x2e9   : > { %v3456_v31 = vpop.f32.mrf.mxu3  ;;  %v6757_v57 = vpop.f32.mrf.mxu1 }
 0x2ea   : > { %v3691_v56 = vadd.f32 %v3690_v4, %v3660_v2  ;;  %v3457_v51 = vadd.f32 %v3456_v31, %v3367_v52  ;;  %v4113_v52 = vmul.f32 %v6747_v61, %v6747_v61 }
 0x2ec   : > { %v3546_v18 = vadd.f32 %v3545_v11, %v3457_v51 }
 0x2ee   : > { %v3591_v29 = vadd.f32 %v3546_v18, %v6641_v39  ;;  %v3370_v37 = vpop.f32.mrf.mxu2 }
 0x2f0   : > { %v3622_v6 = vadd.f32 %v3621_v12, %v3591_v29  ;;  %v3661_v63 = vmul.f32 %v3591_v29, %v3591_v29  ;;  %v5763_v3 = vpack.c.bf16 %v3591_v29, %v3590_v10  ;;  %v3550_v54 = vpop.f32.mrf.mxu0  ;;  %v4112_v10 = vmul.f32 %v6742_v59, %v6742_v59 }
 0x2f1   : > { %v3459_v58 = vpop.f32.mrf.mxu3  ;;  %v6761_v5 = vpop.f32.mrf.mxu1  ;;  %v4114_v29 = vmul.f32 %v6751_v8, %v6751_v8 }
 0x2f2   : > { %v3692_v28 = vadd.f32 %v3691_v56, %v3661_v63  ;;  %5875 = vst [vmem:[%s6683_s24 + $0x58] sm:$0xff] %v5763_v3   ;;  %v3460_v30 = vadd.f32 %v3459_v58, %v3370_v37  ;;  %v5848_v46 = vpack.c.bf16 %v6761_v5, %v6757_v57  ;;  %v4143_v18 = vadd.f32 %v6739_v1, %v4112_v10 }
 0x2f4   : > { %v3549_v20 = vadd.f32 %v3548_v42, %v3460_v30  ;;  %5891 = vst [vmem:[%s6673_s19 + $0x60] sm:$0xff] %v5848_v46   ;;  %v4144_v37 = vadd.f32 %v4143_v18, %v4113_v52 }
 0x2f6   : > { %v3592_v60 = vadd.f32 %v3549_v20, %v6644_v35  ;;  %v3372_v45 = vpop.f32.mrf.mxu2  ;;  %v4145_v1 = vadd.f32 %v4144_v37, %v4114_v29 }
 0x2f8   : > { %v3623_v62 = vadd.f32 %v3622_v6, %v3592_v60  ;;  %v3662_v39 = vmul.f32 %v3592_v60, %v3592_v60  ;;  %v3553_v43 = vpop.f32.mrf.mxu0 }
 0x2f9   : > { %v3461_v47 = vpop.f32.mrf.mxu3  ;;  %v4038_v48 = vpop.f32.mrf.mxu1 }
 0x2fa   : > { %v3693_v19 = vadd.f32 %v3692_v28, %v3662_v39  ;;  %v3462_v26 = vadd.f32 %v3461_v47, %v3372_v45 }
 0x2fc   : > { %v3551_v9 = vadd.f32 %v3550_v54, %v3462_v26  ;;  %v4116_v54 = vmul.f32 %v6761_v5, %v6761_v5 }
 0x2fe   : > { %v3593_v53 = vadd.f32 %v3551_v9, %v6647_v13  ;;  %v3375_v27 = vpop.f32.mrf.mxu2 }
 0x300   : > { %v3624_v44 = vadd.f32 %v3623_v62, %v3593_v53  ;;  %v3663_v21 = vmul.f32 %v3593_v53, %v3593_v53  ;;  %v5768_v15 = vpack.c.bf16 %v3593_v53, %v3592_v60  ;;  %v3555_v16 = vpop.f32.mrf.mxu0  ;;  %v4117_v60 = vmul.f32 %v4038_v48, %v4038_v48 }
 0x301   : > { %v3464_v40 = vpop.f32.mrf.mxu3  ;;  %v4040_v17 = vpop.f32.mrf.mxu1 }
 0x302   : > { %v3694_v35 = vadd.f32 %v3693_v19, %v3663_v21  ;;  %5876 = vst [vmem:[%s6683_s24 + $0x60] sm:$0xff] %v5768_v15   ;;  %v3465_v38 = vadd.f32 %v3464_v40, %v3375_v27  ;;  %v5853_v49 = vpack.c.bf16 %v4040_v17, %v4038_v48  ;;  %v4118_v26 = vmul.f32 %v4040_v17, %v4040_v17 }
 0x304   : > { %v3554_v41 = vadd.f32 %v3553_v43, %v3465_v38  ;;  %5892 = vst [vmem:[%s6673_s19 + $0x68] sm:$0xff] %v5853_v49  }
 0x306   : > { %v3594_v32 = vadd.f32 %v3554_v41, %v6650_v14  ;;  %v3377_v4 = vpop.f32.mrf.mxu2  ;;  %v4073_v14 = vadd.f32 %v6736_v7, %v6742_v59  ;;  %v4115_v7 = vmul.f32 %v6757_v57, %v6757_v57 }
 0x308   : > { %v3625_v23 = vadd.f32 %v3624_v44, %v3594_v32  ;;  %v3664_v22 = vmul.f32 %v3594_v32, %v3594_v32  ;;  %v3558_v12 = vpop.f32.mrf.mxu0  ;;  %v4074_v63 = vadd.f32 %v4073_v14, %v6747_v61  ;;  %v4146_v46 = vadd.f32 %v4145_v1, %v4115_v7 }
 0x309   : > { %v3466_v25 = vpop.f32.mrf.mxu3  ;;  %v4043_v34 = vpop.f32.mrf.mxu1 }
 0x30a   : > { %v3695_v13 = vadd.f32 %v3694_v35, %v3664_v22  ;;  %v3467_v11 = vadd.f32 %v3466_v25, %v3377_v4  ;;  %v4075_v58 = vadd.f32 %v4074_v63, %v6751_v8  ;;  %v4147_v8 = vadd.f32 %v4146_v46, %v4116_v54 }
 0x30b   : > { %v4119_v15 = vmul.f32 %v4043_v34, %v4043_v34 }
 0x30c   : > { %v3556_v33 = vadd.f32 %v3555_v16, %v3467_v11  ;;  %v4076_v20 = vadd.f32 %v4075_v58, %v6757_v57  ;;  %v4148_v21 = vadd.f32 %v4147_v8, %v4117_v60 }
 0x30e   : > { %v3595_v2 = vadd.f32 %v3556_v33, %v6653_v55  ;;  %v3380_v42 = vpop.f32.mrf.mxu2  ;;  %v4077_v39 = vadd.f32 %v4076_v20, %v6761_v5  ;;  %v4149_v40 = vadd.f32 %v4148_v21, %v4118_v26 }
 0x310   : > { %v3626_v31 = vadd.f32 %v3625_v23, %v3595_v2  ;;  %v3665_v56 = vmul.f32 %v3595_v2, %v3595_v2  ;;  %v5773_v51 = vpack.c.bf16 %v3595_v2, %v3594_v32  ;;  %v3560_v62 = vpop.f32.mrf.mxu0  ;;  %v4078_v9 = vadd.f32 %v4077_v39, %v4038_v48 }
 0x311   : > { %v3469_v6 = vpop.f32.mrf.mxu3  ;;  %v4045_v59 = vpop.f32.mrf.mxu1  ;;  %v4150_v16 = vadd.f32 %v4149_v40, %v4119_v15 }
 0x312   : > { %v3696_v55 = vadd.f32 %v3695_v13, %v3665_v56  ;;  %5877 = vst [vmem:[%s6683_s24 + $0x68] sm:$0xff] %v5773_v51   ;;  %v3470_v3 = vadd.f32 %v3469_v6, %v3380_v42  ;;  %v5858_v30 = vpack.c.bf16 %v4045_v59, %v4043_v34  ;;  %v4079_v27 = vadd.f32 %v4078_v9, %v4040_v17 }
 0x313   : > { %v4120_v35 = vmul.f32 %v4045_v59, %v4045_v59 }
 0x314   : > { %v3559_v28 = vadd.f32 %v3558_v12, %v3470_v3  ;;  %5893 = vst [vmem:[%s6673_s19 + $0x70] sm:$0xff] %v5858_v30   ;;  %v4080_v38 = vadd.f32 %v4079_v27, %v4043_v34 }
 0x315   : > { %v4151_v4 = vadd.f32 %v4150_v16, %v4120_v35 }
 0x316   : > { %v3596_v61 = vadd.f32 %v3559_v28, %v6656_v0  ;;  %v3382_v19 = vpop.f32.mrf.mxu2  ;;  %v4081_v49 = vadd.f32 %v4080_v38, %v4045_v59 }
 0x318   : > { %v3627_v45 = vadd.f32 %v3626_v31, %v3596_v61  ;;  %v3666_v47 = vmul.f32 %v3596_v61, %v3596_v61  ;;  %v3563_v25 = vpop.f32.mrf.mxu0 }
 0x319   : > { %v3471_v43 = vpop.f32.mrf.mxu3  ;;  %v4048_v57 = vpop.f32.mrf.mxu1 }
 0x31a   : > { %v3697_v53 = vadd.f32 %v3696_v55, %v3666_v47  ;;  %v3472_v44 = vadd.f32 %v3471_v43, %v3382_v19  ;;  %v4121_v41 = vmul.f32 %v4048_v57, %v4048_v57  ;;  %v4082_v17 = vadd.f32 %v4081_v49, %v4048_v57 }
 0x31c   : > { %v3561_v0 = vadd.f32 %v3560_v62, %v3472_v44  ;;  %v4152_v10 = vadd.f32 %v4151_v4, %v4121_v41 }
 0x31e   : > { %v3597_v5 = vadd.f32 %v3561_v0, %v6659_v36  ;;  %v3385_v48 = vpop.f32.mrf.mxu2 }
 0x320   : > { %v3628_v32 = vadd.f32 %v3627_v45, %v3597_v5  ;;  %v3667_v23 = vmul.f32 %v3597_v5, %v3597_v5  ;;  %v5778_v22 = vpack.c.bf16 %v3597_v5, %v3596_v61  ;;  %v3565_v59 = vpop.f32.mrf.mxu0 }
 0x321   : > { %v3474_v13 = vpop.f32.mrf.mxu3  ;;  %v4050_v12 = vpop.f32.mrf.mxu1 }
 0x322   : > { %v3698_v11 = vadd.f32 %v3697_v53, %v3667_v23  ;;  %5878 = vst [vmem:[%s6683_s24 + $0x70] sm:$0xff] %v5778_v22   ;;  %v3475_v33 = vadd.f32 %v3474_v13, %v3385_v48  ;;  %v4083_v2 = vadd.f32 %v4082_v17, %v4050_v12  ;;  %v4122_v36 = vmul.f32 %v4050_v12, %v4050_v12 }
 0x323   : > { %v5863_v52 = vpack.c.bf16 %v4050_v12, %v4048_v57 }
 0x324   : > { %v3564_v34 = vadd.f32 %v3563_v25, %v3475_v33  ;;  %v4084_v31 = vrot.slane %v4083_v2, 4  ;;  %v4153_v56 = vadd.f32 %v4152_v10, %v4122_v36 }
 0x325   : > { %5894 = vst [vmem:[%s6673_s19 + $0x78] sm:$0xff] %v5863_v52  }
 0x326   : > { %v3598_v14 = vadd.f32 %v3564_v34, %v6662_v50  ;;  %v4085_v18 = vadd.f32 %v4084_v31, %v4083_v2  ;;  %v4154_v29 = vrot.slane %v4153_v56, 4  ;;  %v3387_v6 = vpop.f32.mrf.mxu2 }
 0x328   : > { %v3629_v51 = vadd.f32 %v3628_v32, %v3598_v14  ;;  %v3668_v42 = vmul.f32 %v3598_v14, %v3598_v14  ;;  %v4086_v3 = vrot.slane %v4085_v18, 2  ;;  %v4155_v37 = vadd.f32 %v4154_v29, %v4153_v56 }
 0x329   : > { %v3476_v63 = vpop.f32.mrf.mxu3 }
 0x32a   : > { %v3699_v55 = vadd.f32 %v3698_v11, %v3668_v42  ;;  %v3477_v7 = vadd.f32 %v3476_v63, %v3387_v6  ;;  %v4087_v58 = vadd.f32 %v4086_v3, %v4085_v18  ;;  %v4156_v28 = vrot.slane %v4155_v37, 2 }
 0x32c   : > { %v3566_v30 = vadd.f32 %v3565_v59, %v3477_v7  ;;  %v4088_v50 = vrot.slane %v4087_v58, 1  ;;  %v4157_v1 = vadd.f32 %v4156_v28, %v4155_v37 }
 0x32e   : > { %v3599_v54 = vadd.f32 %v3566_v30, %v6665_v24  ;;  %v4089_v20 = vadd.f32 %v4088_v50, %v4087_v58  ;;  %v4158_v61 = vrot.slane %v4157_v1, 1 }
 0x330   : > { %v3630_v46 = vadd.f32 %v3629_v51, %v3599_v54  ;;  %v3669_v60 = vmul.f32 %v3599_v54, %v3599_v54  ;;  %v5783_v62 = vpack.c.bf16 %v3599_v54, %v3598_v14  ;;  %4090 = vst [vmem:[%s284_s27] sm:$0x1] %v4089_v20  ;;  %v4159_v39 = vadd.f32 %v4158_v61, %v4157_v1 }
 0x332   : > { %v3631_v45 = vrot.slane %v3630_v46, 4  ;;  %v3700_v47 = vadd.f32 %v3699_v55, %v3669_v60  ;;  %5879 = vst [vmem:[%s6683_s24 + $0x78] sm:$0xff] %v5783_v62  }
 0x333   : > { %4160 = vst [vmem:[%s284_s27 + $0x1] sm:$0x1] %v4159_v39 }
 0x334   : > { %v3632_v19 = vadd.f32 %v3631_v45, %v3630_v46  ;;  %v3701_v8 = vrot.slane %v3700_v47, 4 }
 0x336   : > { %v3633_v26 = vrot.slane %v3632_v19, 2  ;;  %v3702_v43 = vadd.f32 %v3701_v8, %v3700_v47 }
 0x338   : > { %v3634_v24 = vadd.f32 %v3633_v26, %v3632_v19  ;;  %v3703_v9 = vrot.slane %v3702_v43, 2 }
 0x33a   : > { %v3635_v53 = vrot.slane %v3634_v24, 1  ;;  %v3704_v44 = vadd.f32 %v3703_v9, %v3702_v43 }
 0x33c   : > { %v3636_v21 = vadd.f32 %v3635_v53, %v3634_v24  ;;  %v3705_v15 = vrot.slane %v3704_v44, 1 }
 0x33e   : > { %3637 = vst [vmem:[%s280_s29] sm:$0x1] %v3636_v21  ;;  %v3706_v57 = vadd.f32 %v3705_v15, %v3704_v44 }
 0x340   : > { %3707 = vst [vmem:[%s280_s29 + $0x1] sm:$0x1] %v3706_v57 }
 0x341 PF: > { %s17_s21 = sadd.s32 1, %s5926_s21  }
 0x342   : > { %p14_p4 = scmp.ge.s32.totalorder %s17_s21, 4  }
 0x344   :  { %16 = sbr.rel (!%p14_p4) target bundleno = 1 (0x1), region = 102 }

</bundles_post_ra>
